<compile_context>
chip_gen: v7x
topology: tpu7x:2x2x1
jax: 0.10.0
libtpu: 0.0.40
codegen_flags: <defaults>
</compile_context>

<pallas_src>
import functools

import jax
import jax.numpy as jnp
from jax.experimental import pallas as pl
from jax.experimental.pallas import tpu as pltpu

DROPOUT = 0.2
N_EMBED = 384
TM = 256  # rows per tile (multiple of 256 keeps the 2x256^2 MXU full on v6e/v7x)


def _ffn_kernel(seed_ref, x_ref, w1_ref, b1_ref, w2_ref, b2_ref, o_ref,
                *, train: bool, rate: float):
    # x_ref: (TM, C) f32    w1_ref: (C, 4C) bf16  b1_ref: (1, 4C) f32
    # w2_ref: (4C, C) bf16  b2_ref: (1, C)  f32   o_ref: (TM, C) f32
    x = x_ref[...].astype(jnp.bfloat16)

    # Linear 1 + bias + ReLU  (bf16 MXU matmul, f32 accumulation / elementwise)
    h = jnp.dot(x, w1_ref[...], preferred_element_type=jnp.float32)
    h = jnp.maximum(h + b1_ref[...], 0.0)

    # Linear 2 + bias
    y = jnp.dot(h.astype(jnp.bfloat16), w2_ref[...],
                preferred_element_type=jnp.float32)
    y = y + b2_ref[...]

    if train and rate > 0.0:
        # Inverted dropout with the hardware PRNG; fold the tile index into the
        # seed so every row-tile draws an independent mask.
        pltpu.prng_seed(seed_ref[0] + pl.program_id(0))
        bits = pltpu.bitcast(pltpu.prng_random_bits(y.shape), jnp.uint32)
        threshold = jnp.uint32(int(rate * (1 << 32)))  # P(bits >= thr) = 1 - rate
        y = jnp.where(bits >= threshold, y * (1.0 / (1.0 - rate)), 0.0)

    o_ref[...] = y.astype(o_ref.dtype)


def feed_forward(x, w1, b1, w2, b2, *, train: bool = False, seed: int = 0):
    """x: (B, T, C) float32.  Returns (B, T, C) float32."""
    B, T, C = x.shape
    M = B * T
    hidden = w1.shape[1]
    x2d = x.reshape(M, C)

    # Pad rows up to a multiple of TM so the grid tiles evenly.
    n_tiles = pl.cdiv(M, TM)
    m_pad = n_tiles * TM
    if m_pad != M:
        x2d = jnp.pad(x2d, ((0, m_pad - M), (0, 0)))

    # Weights stored / shipped as bf16 (halves weight DMA, MXU-native).
    w1_bf = w1.astype(jnp.bfloat16)
    w2_bf = w2.astype(jnp.bfloat16)

    kernel = functools.partial(_ffn_kernel, train=train, rate=DROPOUT)

    flops = 2 * m_pad * C * hidden * 2           # two matmuls
    bytes_accessed = (x2d.size * 4 + m_pad * C * 4          # x in, y out (f32)
                      + w1_bf.size * 2 + w2_bf.size * 2     # bf16 weights
                      + b1.size * 4 + b2.size * 4)

    out = pl.pallas_call(
        kernel,
        out_shape=jax.ShapeDtypeStruct((m_pad, C), x.dtype),
        grid_spec=pltpu.PrefetchScalarGridSpec(
            num_scalar_prefetch=1,                    # seed -> SMEM
            grid=(n_tiles,),
            in_specs=[
                pl.BlockSpec((TM, C), lambda i, s: (i, 0)),       # x tile
                pl.BlockSpec((C, hidden), lambda i, s: (0, 0)),   # w1 (resident)
                pl.BlockSpec((1, hidden), lambda i, s: (0, 0)),   # b1 (resident)
                pl.BlockSpec((hidden, C), lambda i, s: (0, 0)),   # w2 (resident)
                pl.BlockSpec((1, C), lambda i, s: (0, 0)),        # b2 (resident)
            ],
            out_specs=pl.BlockSpec((TM, C), lambda i, s: (i, 0)),
        ),
        compiler_params=pltpu.CompilerParams(
            dimension_semantics=("parallel",),        # shard M across TCs (v7x)
            vmem_limit_bytes=32 * 1024 * 1024,
        ),
        cost_estimate=pl.CostEstimate(
            flops=flops, bytes_accessed=bytes_accessed, transcendentals=0),
    )(jnp.array([seed], dtype=jnp.int32), x2d, w1_bf, b1, w2_bf, b2)

    return out[:M].reshape(B, T, C)


def init_params(key, n_embed):
    """Deterministic init mirroring torch.nn.Linear (U(-1/sqrt(fan_in), +))."""
    k1, k2, k3, k4 = jax.random.split(key, 4)
    hidden = 4 * n_embed
    lim1 = 1.0 / jnp.sqrt(jnp.float32(n_embed))
    lim2 = 1.0 / jnp.sqrt(jnp.float32(hidden))
    # Stored as (in, out) so the kernel does x @ W (== torch's x @ W.T).
    w1 = jax.random.uniform(k1, (n_embed, hidden), jnp.float32, -lim1, lim1)
    b1 = jax.random.uniform(k2, (1, hidden), jnp.float32, -lim1, lim1)
    w2 = jax.random.uniform(k3, (hidden, n_embed), jnp.float32, -lim2, lim2)
    b2 = jax.random.uniform(k4, (1, n_embed), jnp.float32, -lim2, lim2)
    return w1, b1, w2, b2


if __name__ == "__main__":
    key = jax.random.PRNGKey(0)
    k_x, k_p = jax.random.split(key)

    B, T, C = 2, 8, N_EMBED
    x = jax.random.normal(k_x, (B, T, C), jnp.float32)
    w1, b1, w2, b2 = init_params(k_p, C)

    # eval mode (dropout = identity), matching model.eval() in PyTorch
    y = feed_forward(x, w1, b1, w2, b2, train=False)
    jax.block_until_ready(y)

    # pure-JAX reference with the same bf16-matmul / f32-accumulate recipe
    x2d = x.reshape(-1, C)
    h_ref = jnp.dot(x2d.astype(jnp.bfloat16), w1.astype(jnp.bfloat16),
                    preferred_element_type=jnp.float32) + b1
    h_ref = jnp.maximum(h_ref, 0.0)
    ref = jnp.dot(h_ref.astype(jnp.bfloat16), w2.astype(jnp.bfloat16),
                  preferred_element_type=jnp.float32) + b2
    assert jnp.allclose(y.reshape(-1, C), ref, atol=2e-2, rtol=2e-2)

    print("KERNEL_OK")
</pallas_src>

<mosaic_0001>
module attributes {stable_mosaic.version = 11 : i64} {
  func.func @_ffn_kernel(%arg0: i32, %arg1: memref<1xi32, #tpu.memory_space<smem>>, %arg2: memref<256x384xf32, #tpu.memory_space<vmem>>, %arg3: memref<384x1536xbf16, #tpu.memory_space<vmem>>, %arg4: memref<1x1536xf32, #tpu.memory_space<vmem>>, %arg5: memref<1536x384xbf16, #tpu.memory_space<vmem>>, %arg6: memref<1x384xf32, #tpu.memory_space<vmem>>, %arg7: memref<256x384xf32, #tpu.memory_space<vmem>>) attributes {dimension_semantics = [#tpu.dimension_semantics<parallel>], iteration_bounds = array<i64: 1>, scalar_prefetch = 1 : i64, scratch_operands = 0 : i64, tpu.core_type = #tpu.core_type<tc>, window_params = [{transform_indices = @transform_0, window_bounds = array<i64: 256, 384>}, {pipeline_mode = #tpu.pipeline_mode<synchronous>, transform_indices = @transform_1, window_bounds = array<i64: 384, 1536>}, {pipeline_mode = #tpu.pipeline_mode<synchronous>, transform_indices = @transform_2, window_bounds = array<i64: 1, 1536>}, {pipeline_mode = #tpu.pipeline_mode<synchronous>, transform_indices = @transform_3, window_bounds = array<i64: 1536, 384>}, {pipeline_mode = #tpu.pipeline_mode<synchronous>, transform_indices = @transform_4, window_bounds = array<i64: 1, 384>}, {transform_indices = @transform_5, window_bounds = array<i64: 256, 384>}]} {
    %c0 = arith.constant 0 : index
    %c0_0 = arith.constant 0 : index
    %0 = vector.load %arg2[%c0, %c0_0] : memref<256x384xf32, #tpu.memory_space<vmem>>, vector<256x384xf32>
    %1 = arith.truncf %0 : vector<256x384xf32> to vector<256x384xbf16>
    %c0_1 = arith.constant 0 : index
    %c0_2 = arith.constant 0 : index
    %2 = vector.load %arg3[%c0_1, %c0_2] : memref<384x1536xbf16, #tpu.memory_space<vmem>>, vector<384x1536xbf16>
    %cst = arith.constant dense<0.000000e+00> : vector<256x1536xf32>
    %3 = tpu.matmul %1, %2, %cst {dimension_numbers = #tpu.dot_dimension_numbers<[1], [0], [0], [1], [0, 0, 1, 1], [], []>} : vector<256x384xbf16>, vector<384x1536xbf16>, vector<256x1536xf32> -> vector<256x1536xf32>
    %c0_3 = arith.constant 0 : index
    %c0_4 = arith.constant 0 : index
    %4 = vector.load %arg4[%c0_3, %c0_4] : memref<1x1536xf32, #tpu.memory_space<vmem>>, vector<1x1536xf32>
    %5 = vector.broadcast %4 : vector<1x1536xf32> to vector<256x1536xf32>
    %6 = arith.addf %3, %5 : vector<256x1536xf32>
    %cst_5 = arith.constant 0.000000e+00 : f32
    %7 = vector.broadcast %cst_5 : f32 to vector<256x1536xf32>
    %8 = arith.maximumf %6, %7 : vector<256x1536xf32>
    %9 = arith.truncf %8 : vector<256x1536xf32> to vector<256x1536xbf16>
    %c0_6 = arith.constant 0 : index
    %c0_7 = arith.constant 0 : index
    %10 = vector.load %arg5[%c0_6, %c0_7] : memref<1536x384xbf16, #tpu.memory_space<vmem>>, vector<1536x384xbf16>
    %cst_8 = arith.constant dense<0.000000e+00> : vector<256x384xf32>
    %11 = tpu.matmul %9, %10, %cst_8 {dimension_numbers = #tpu.dot_dimension_numbers<[1], [0], [0], [1], [0, 0, 1, 1], [], []>} : vector<256x1536xbf16>, vector<1536x384xbf16>, vector<256x384xf32> -> vector<256x384xf32>
    %c0_9 = arith.constant 0 : index
    %c0_10 = arith.constant 0 : index
    %12 = vector.load %arg6[%c0_9, %c0_10] : memref<1x384xf32, #tpu.memory_space<vmem>>, vector<1x384xf32>
    %13 = vector.broadcast %12 : vector<1x384xf32> to vector<256x384xf32>
    %14 = arith.addf %11, %13 : vector<256x384xf32>
    %c0_11 = arith.constant 0 : index
    %c0_12 = arith.constant 0 : index
    %15 = vector.load %arg7[%c0_11, %c0_12] : memref<256x384xf32, #tpu.memory_space<vmem>>, vector<256x384xf32>
    tpu.vector_store %arg7[%c0_11, %c0_12], %14 {strides = array<i32>} : memref<256x384xf32, #tpu.memory_space<vmem>>, vector<256x384xf32>,
    return
  }
  func.func @transform_0(%arg0: i32, %arg1: memref<1xi32, #tpu.memory_space<smem>>) -> (i32, i32) {
    %c0_i32 = arith.constant 0 : i32
    %c0_i32_0 = arith.constant 0 : i32
    return %arg0, %c0_i32 : i32, i32
  }
  func.func @transform_1(%arg0: i32, %arg1: memref<1xi32, #tpu.memory_space<smem>>) -> (i32, i32) {
    %c0_i32 = arith.constant 0 : i32
    %c0_i32_0 = arith.constant 0 : i32
    %c0_i32_1 = arith.constant 0 : i32
    return %c0_i32, %c0_i32_0 : i32, i32
  }
  func.func @transform_2(%arg0: i32, %arg1: memref<1xi32, #tpu.memory_space<smem>>) -> (i32, i32) {
    %c0_i32 = arith.constant 0 : i32
    %c0_i32_0 = arith.constant 0 : i32
    %c0_i32_1 = arith.constant 0 : i32
    return %c0_i32, %c0_i32_0 : i32, i32
  }
  func.func @transform_3(%arg0: i32, %arg1: memref<1xi32, #tpu.memory_space<smem>>) -> (i32, i32) {
    %c0_i32 = arith.constant 0 : i32
    %c0_i32_0 = arith.constant 0 : i32
    %c0_i32_1 = arith.constant 0 : i32
    return %c0_i32, %c0_i32_0 : i32, i32
  }
  func.func @transform_4(%arg0: i32, %arg1: memref<1xi32, #tpu.memory_space<smem>>) -> (i32, i32) {
    %c0_i32 = arith.constant 0 : i32
    %c0_i32_0 = arith.constant 0 : i32
    %c0_i32_1 = arith.constant 0 : i32
    return %c0_i32, %c0_i32_0 : i32, i32
  }
  func.func @transform_5(%arg0: i32, %arg1: memref<1xi32, #tpu.memory_space<smem>>) -> (i32, i32) {
    %c0_i32 = arith.constant 0 : i32
    %c0_i32_0 = arith.constant 0 : i32
    return %arg0, %c0_i32 : i32, i32
  }
}

</mosaic_0001>

<bundles_post_ra>
// kernel: tpu_custom_call.1
= control target key start
LH: loop header
LB: loop body
LE: loop exit
PB: predicated region body
PF: predicated region fallthrough
CT: control target
= control target key end

     0   :  { %12 = vsyncpa [#allocation5], 0  ;;  %s14856_s0 = inlined_call_operand.<no memory space> [shape: s32[1], index: 0, kind: input, shape index: {}]   ;;  %s14857_s1 = inlined_call_operand.hbm [shape: f32[256,384], index: 1, kind: input, shape index: {}]   ;;  %s14858_s2 = inlined_call_operand.hbm [shape: bf16[384,1536], index: 2, kind: input, shape index: {}]   ;;  %s14859_s3 = inlined_call_operand.hbm [shape: f32[1,1536], index: 3, kind: input, shape index: {}]   ;;  %s14860_s4 = inlined_call_operand.hbm [shape: bf16[1536,384], index: 4, kind: input, shape index: {}]   ;;  %s14861_s5 = inlined_call_operand.hbm [shape: f32[1,384], index: 5, kind: input, shape index: {}]   ;;  %s14862_s6 = inlined_call_operand.hbm [shape: f32[256,384], index: 6, kind: output, shape index: {}]  }
   0x1   :  { %13 = vsyncpa [#allocation8], 0 }
   0x2   :  { %14 = vsyncpa [#allocation11], 0 }
   0x3   :  { %15 = vsyncpa [#allocation6], 0  ;;  %s12463_s0 = smov [#allocation7]   ;;  %s12323_s24 = scalar_lea.hbm %s14858_s2, 36864 }
   0x4   :  { %s33_s21 = sshll.u32 %s12463_s0, 4  ;;  %p12324_p0 = scmp.ne.s32.totalorder %s14858_s2, %s12323_s24  ;;  %s34_s21 = int_to_ptr.vmem [resolvable:$true] %s33_s21 }
   0x5   :  { %p12327_p1 = scmp.lt.u32.totalorder %s12323_s24, %s14858_s2 }
   0x7   :  { %p12329_p2 = pnand %p12327_p1, %p12324_p0 }
   0x9   :  { %12332 = shalt.err (!%p12329_p2)
}
   0xa   :  { %s12333_s29 = scalar_lea.vmem %s34_s21, 36864  ;;  %p12338_p4 = scmp.lt.s32.totalorder %s34_s21, %s34_s21 }
   0xb   :  { %p12334_p3 = scmp.ne.s32.totalorder %s34_s21, %s12333_s29  ;;  %p12339_p5 = scmp.lt.s32.totalorder %s12333_s29, %s12333_s29 }
   0xd   :  { %p12340_p6 = por %p12339_p5, %p12338_p4 }
   0xf   :  { %p12341_p7 = pnand %p12340_p6, %p12334_p3 }
  0x11   :  { %12344 = shalt.err (!%p12341_p7)
}
  0x12   :  { %s12464_s30 = smov 768   ;;  %s12465_s7 = smov 48  }
  0x13   :  { %39 = dma.hbm_to_vmem [thread:$0]  %s14858_s2, 36864, %s34_s21, [#allocation8], %s12464_s30, %s12464_s30, %s12465_s7  }
  0x14   :  { %s12466_s10 = smov [#allocation10]   ;;  %s12345_s14 = scalar_lea.hbm %s14860_s4, 36864 }
  0x15   :  { %s55_s11 = sshll.u32 %s12466_s10, 4  ;;  %p12346_p8 = scmp.ne.s32.totalorder %s14860_s4, %s12345_s14  ;;  %s56_s11 = int_to_ptr.vmem [resolvable:$true] %s55_s11 }
  0x16   :  { %p12349_p9 = scmp.lt.u32.totalorder %s12345_s14, %s14860_s4 }
  0x18   :  { %p12351_p10 = pnand %p12349_p9, %p12346_p8 }
  0x1a   :  { %12354 = shalt.err (!%p12351_p10)
}
  0x1b   :  { %s12355_s19 = scalar_lea.vmem %s56_s11, 36864  ;;  %p12360_p12 = scmp.lt.s32.totalorder %s56_s11, %s56_s11 }
  0x1c   :  { %p12356_p11 = scmp.ne.s32.totalorder %s56_s11, %s12355_s19  ;;  %p12361_p13 = scmp.lt.s32.totalorder %s12355_s19, %s12355_s19 }
  0x1e   :  { %p12362_p0 = por %p12361_p13, %p12360_p12 }
  0x20   :  { %p12363_p1 = pnand %p12362_p0, %p12356_p11 }
  0x22   :  { %12366 = shalt.err (!%p12363_p1)
}
  0x23   :  { %s12467_s2 = smov 192   ;;  %s12468_s20 = smov 12  }
  0x24   :  { %61 = dma.hbm_to_vmem [thread:$0]  %s14860_s4, 36864, %s56_s11, [#allocation11], %s12467_s2, %s12467_s2, %s12468_s20  }
  0x25   :  { %s12469_s22 = smov [#allocation4]   ;;  %s12367_s26 = scalar_lea.hbm %s14857_s1, 12288 }
  0x26   :  { %s21_s23 = sshll.u32 %s12469_s22, 4  ;;  %p12368_p2 = scmp.ne.s32.totalorder %s14857_s1, %s12367_s26  ;;  %s22_s23 = int_to_ptr.vmem [resolvable:$true] %s21_s23 }
  0x27   :  { %p12371_p3 = scmp.lt.u32.totalorder %s12367_s26, %s14857_s1 }
  0x29   :  { %p12373_p4 = pnand %p12371_p3, %p12368_p2 }
  0x2b   :  { %12376 = shalt.err (!%p12373_p4)
}
  0x2c   :  { %s12377_s7 = scalar_lea.vmem %s22_s23, 12288  ;;  %p12382_p6 = scmp.lt.s32.totalorder %s22_s23, %s22_s23 }
  0x2d   :  { %p12378_p5 = scmp.ne.s32.totalorder %s22_s23, %s12377_s7  ;;  %p12383_p7 = scmp.lt.s32.totalorder %s12377_s7, %s12377_s7 }
  0x2f   :  { %p12384_p8 = por %p12383_p7, %p12382_p6 }
  0x31   :  { %p12385_p9 = pnand %p12384_p8, %p12378_p5 }
  0x33   :  { %12388 = shalt.err (!%p12385_p9)
}
  0x34   :  { %s12470_s4 = smov 384   ;;  %s12471_s8 = smov 24  }
  0x35   :  { %27 = dma.hbm_to_vmem [thread:$0]  %s14857_s1, 12288, %s22_s23, [#allocation5], %s12470_s4, %s12470_s4, %s12471_s8  }
  0x36   :  { %s12472_s11 = smov [#allocation9]   ;;  %s12473_s13 = smov [#allocation12]  }
  0x37   :  { %s46_s12 = sshll.u32 %s12472_s11, 4  ;;  %s68_s14 = sshll.u32 %s12473_s13, 4  ;;  %s47_s12 = int_to_ptr.vmem [resolvable:$true] %s46_s12  ;;  %s69_s14 = int_to_ptr.vmem [resolvable:$true] %s68_s14 }
  0x38   :  { %s12389_s17 = scalar_lea.hbm %s14859_s3, 192 }
  0x39   :  { %p12390_p10 = scmp.ne.s32.totalorder %s14859_s3, %s12389_s17  ;;  %p12393_p11 = scmp.lt.u32.totalorder %s12389_s17, %s14859_s3 }
  0x3b   :  { %p12395_p12 = pnand %p12393_p11, %p12390_p10 }
  0x3d   :  { %12398 = shalt.err (!%p12395_p12)
}
  0x3e   :  { %s12399_s1 = scalar_lea.vmem %s47_s12, 192  ;;  %p12404_p0 = scmp.lt.s32.totalorder %s47_s12, %s47_s12 }
  0x3f   :  { %p12400_p13 = scmp.ne.s32.totalorder %s47_s12, %s12399_s1  ;;  %p12405_p1 = scmp.lt.s32.totalorder %s12399_s1, %s12399_s1 }
  0x41   :  { %p12406_p2 = por %p12405_p1, %p12404_p0 }
  0x43   :  { %p12407_p3 = pnand %p12406_p2, %p12400_p13 }
  0x45   :  { %12410 = shalt.err (!%p12407_p3)
}
  0x46   :  { %49 = dma.hbm_to_vmem [thread:$0]  %s14859_s3, 192, %s47_s12, [#allocation8]  }
  0x47   :  { %s12411_s24 = scalar_lea.hbm %s14861_s5, 48 }
  0x48   :  { %p12412_p4 = scmp.ne.s32.totalorder %s14861_s5, %s12411_s24  ;;  %p12415_p5 = scmp.lt.u32.totalorder %s12411_s24, %s14861_s5 }
  0x4a   :  { %p12417_p6 = pnand %p12415_p5, %p12412_p4 }
  0x4c   :  { %12420 = shalt.err (!%p12417_p6)
}
  0x4d   :  { %s12421_s29 = scalar_lea.vmem %s69_s14, 48  ;;  %s12425_s30 = scalar_lea.vmem %s69_s14, 64 }
  0x4e   :  { %p12422_p7 = scmp.ne.s32.totalorder %s69_s14, %s12421_s29  ;;  %p12426_p8 = scmp.lt.s32.totalorder %s69_s14, %s69_s14 }
  0x4f   :  { %p12427_p9 = scmp.lt.s32.totalorder %s12425_s30, %s12421_s29 }
  0x51   :  { %p12428_p10 = por %p12427_p9, %p12426_p8 }
  0x53   :  { %p12429_p11 = pnand %p12428_p10, %p12422_p7 }
  0x55   :  { %12432 = shalt.err (!%p12429_p11)
}
  0x56   :  { %71 = dma.hbm_to_vmem [thread:$0]  %s14861_s5, 48, %s69_s14, [#allocation11]  }
  0x57   :  { %12455 = dma.done.wait [#allocation5], 12288  }
  0x58   :  { %12456 = vsyncadd [#allocation5], 4294955008 }
  0x59   :  { %12457 = dma.done.wait [#allocation8], 37056  }
  0x5a   :  { %12458 = vsyncadd [#allocation8], 4294930240 }
  0x5b   :  { %12459 = dma.done.wait [#allocation11], 36912  }
  0x5c   :  { %12460 = vsyncadd [#allocation11], 4294930384  ;;  %v11505_v0 = vld [vmem:[#allocation7 + $0x4] ss:$48 sps:$4 sm:$0xff]   ;;  %v11507_v1 = vld [vmem:[#allocation7 + $0xc] ss:$48 sps:$4 sm:$0xff]  }
  0x5d   :  { %2024 = vmatprep.subr.bf16.mxu0 %v11505_v0  ;;  %v11509_v2 = vld [vmem:[#allocation7] ss:$48 sps:$4 sm:$0xff]   ;;  %v11510_v3 = vld [vmem:[#allocation7 + $0x8] ss:$48 sps:$4 sm:$0xff]   ;;  %2410 = vmatprep.subr.bf16.mxu1 %v11507_v1  ;;  %v11511_v4 = vld [vmem:[#allocation7 + $0x64] ss:$48 sps:$4 sm:$0xff]  }
  0x5e   :  { %2025 = vmatpush1.bf16.msra.mxu0 %v11509_v2  ;;  %2411 = vmatpush1.bf16.msra.mxu1 %v11510_v3  ;;  %v11513_v5 = vld [vmem:[#allocation7 + $0x6c] ss:$48 sps:$4 sm:$0xff]   ;;  %v11515_v6 = vld [vmem:[#allocation7 + $0x60] ss:$48 sps:$4 sm:$0xff]   ;;  %v11516_v7 = vld [vmem:[#allocation7 + $0x68] ss:$48 sps:$4 sm:$0xff]  }
  0x5f   :  { %2026 = vmatprep.subr.bf16.mxu0 %v11511_v4  ;;  %2412 = vmatprep.subr.bf16.mxu1 %v11513_v5  ;;  %v11517_v8 = vld [vmem:[#allocation7 + $0xc4] ss:$48 sps:$4 sm:$0xff]   ;;  %v11519_v9 = vld [vmem:[#allocation7 + $0xcc] ss:$48 sps:$4 sm:$0xff]   ;;  %v11521_v10 = vld [vmem:[#allocation7 + $0xc0] ss:$48 sps:$4 sm:$0xff]  }
  0x60   :  { %v11522_v11 = vld [vmem:[#allocation7 + $0xc8] ss:$48 sps:$4 sm:$0xff]   ;;  %v11523_v12 = vld [vmem:[#allocation7 + $0x124] ss:$48 sps:$4 sm:$0xff]   ;;  %v11525_v13 = vld [vmem:[#allocation7 + $0x12c] ss:$48 sps:$4 sm:$0xff]  }
  0x61   :  { %v11527_v14 = vld [vmem:[#allocation7 + $0x120] ss:$48 sps:$4 sm:$0xff]   ;;  %v11528_v15 = vld [vmem:[#allocation7 + $0x128] ss:$48 sps:$4 sm:$0xff]   ;;  %v11529_v16 = vld [vmem:[#allocation7 + $0x184] ss:$48 sps:$4 sm:$0xff]  }
  0x62   :  { %2027 = vmatpush1.bf16.msra.mxu0 %v11515_v6  ;;  %2413 = vmatpush1.bf16.msra.mxu1 %v11516_v7  ;;  %v11531_v17 = vld [vmem:[#allocation7 + $0x18c] ss:$48 sps:$4 sm:$0xff]   ;;  %v11533_v18 = vld [vmem:[#allocation7 + $0x180] ss:$48 sps:$4 sm:$0xff]   ;;  %v11534_v19 = vld [vmem:[#allocation7 + $0x188] ss:$48 sps:$4 sm:$0xff]  }
  0x63   :  { %2028 = vmatprep.subr.bf16.mxu0 %v11517_v8  ;;  %2414 = vmatprep.subr.bf16.mxu1 %v11519_v9  ;;  %v11535_v20 = vld [vmem:[#allocation7 + $0x1e4] ss:$48 sps:$4 sm:$0xff]   ;;  %v11537_v21 = vld [vmem:[#allocation7 + $0x1ec] ss:$48 sps:$4 sm:$0xff]   ;;  %v11539_v22 = vld [vmem:[#allocation7 + $0x1e0] ss:$48 sps:$4 sm:$0xff]  }
  0x64   :  { %v11540_v23 = vld [vmem:[#allocation7 + $0x1e8] ss:$48 sps:$4 sm:$0xff]   ;;  %v11541_v24 = vld [vmem:[#allocation7 + $0x244] ss:$48 sps:$4 sm:$0xff]   ;;  %v11543_v25 = vld [vmem:[#allocation7 + $0x24c] ss:$48 sps:$4 sm:$0xff]  }
  0x65   :  { %v11545_v26 = vld [vmem:[#allocation7 + $0x240] ss:$48 sps:$4 sm:$0xff]   ;;  %v11546_v27 = vld [vmem:[#allocation7 + $0x248] ss:$48 sps:$4 sm:$0xff]   ;;  %v11547_v28 = vld [vmem:[#allocation7 + $0x2a4] ss:$48 sps:$4 sm:$0xff]  }
  0x66   :  { %2029 = vmatpush1.bf16.msra.mxu0 %v11521_v10  ;;  %2415 = vmatpush1.bf16.msra.mxu1 %v11522_v11  ;;  %v11549_v29 = vld [vmem:[#allocation7 + $0x2ac] ss:$48 sps:$4 sm:$0xff]   ;;  %v11551_v30 = vld [vmem:[#allocation7 + $0x2a0] ss:$48 sps:$4 sm:$0xff]   ;;  %v11552_v31 = vld [vmem:[#allocation7 + $0x2a8] ss:$48 sps:$4 sm:$0xff]  }
  0x67   :  { %2030 = vmatprep.subr.bf16.mxu0 %v11523_v12  ;;  %2416 = vmatprep.subr.bf16.mxu1 %v11525_v13  ;;  %v11553_v32 = vld [vmem:[#allocation7 + $0x304] ss:$48 sps:$4 sm:$0xff]   ;;  %v11555_v33 = vld [vmem:[#allocation7 + $0x30c] ss:$48 sps:$4 sm:$0xff]   ;;  %v11557_v34 = vld [vmem:[#allocation7 + $0x300] ss:$48 sps:$4 sm:$0xff]  }
  0x68   :  { %v11558_v35 = vld [vmem:[#allocation7 + $0x308] ss:$48 sps:$4 sm:$0xff]   ;;  %v11559_v36 = vld [vmem:[#allocation7 + $0x364] ss:$48 sps:$4 sm:$0xff]   ;;  %v11561_v37 = vld [vmem:[#allocation7 + $0x36c] ss:$48 sps:$4 sm:$0xff]  }
  0x69   :  { %v11563_v38 = vld [vmem:[#allocation7 + $0x360] ss:$48 sps:$4 sm:$0xff]   ;;  %v11564_v39 = vld [vmem:[#allocation7 + $0x368] ss:$48 sps:$4 sm:$0xff]   ;;  %v11565_v40 = vld [vmem:[#allocation7 + $0x3c4] ss:$48 sps:$4 sm:$0xff]  }
  0x6a   :  { %2031 = vmatpush1.bf16.msra.mxu0 %v11527_v14  ;;  %2417 = vmatpush1.bf16.msra.mxu1 %v11528_v15  ;;  %v11567_v41 = vld [vmem:[#allocation7 + $0x3cc] ss:$48 sps:$4 sm:$0xff]   ;;  %v11569_v42 = vld [vmem:[#allocation7 + $0x3c0] ss:$48 sps:$4 sm:$0xff]   ;;  %v11570_v43 = vld [vmem:[#allocation7 + $0x3c8] ss:$48 sps:$4 sm:$0xff]  }
  0x6b   :  { %2032 = vmatprep.subr.bf16.mxu0 %v11529_v16  ;;  %2418 = vmatprep.subr.bf16.mxu1 %v11531_v17  ;;  %v11571_v44 = vld [vmem:[#allocation7 + $0x424] ss:$48 sps:$4 sm:$0xff]   ;;  %v11573_v45 = vld [vmem:[#allocation7 + $0x42c] ss:$48 sps:$4 sm:$0xff]   ;;  %v11575_v47 = vld [vmem:[#allocation7 + $0x420] ss:$48 sps:$4 sm:$0xff]  }
  0x6c   :  { %v89_v46 = vld [vmem:[#allocation4 + $0x8] sm:$0xff]  ;;  %v92_v49 = vld [vmem:[#allocation4 + $0x20] sm:$0xff]  ;;  %v91_v4 = vld [vmem:[#allocation4 + $0x18] sm:$0xff]  ;;  %s12475_s5 = smov [#allocation13]  }
  0x6d   :  { %v11576_v48 = vld [vmem:[#allocation7 + $0x428] ss:$48 sps:$4 sm:$0xff]   ;;  %v11577_v50 = vld [vmem:[#allocation7 + $0x484] ss:$48 sps:$4 sm:$0xff]   ;;  %v12574_v51 = vpack.c.bf16 %v92_v49, %v89_v46  ;;  %v11579_v52 = vld [vmem:[#allocation7 + $0x48c] ss:$48 sps:$4 sm:$0xff]  }
  0x6e   :  { %2033 = vmatpush1.bf16.msra.mxu0 %v11533_v18  ;;  %2419 = vmatpush1.bf16.msra.mxu1 %v11534_v19  ;;  %v11581_v53 = vld [vmem:[#allocation7 + $0x480] ss:$48 sps:$4 sm:$0xff]   ;;  %v11582_v54 = vld [vmem:[#allocation7 + $0x488] ss:$48 sps:$4 sm:$0xff]   ;;  %v11583_v55 = vld [vmem:[#allocation7 + $0x4e4] ss:$48 sps:$4 sm:$0xff]  }
  0x6f   :  { %2034 = vmatprep.subr.bf16.mxu0 %v11535_v20  ;;  %2420 = vmatprep.subr.bf16.mxu1 %v11537_v21  ;;  %v11585_v56 = vld [vmem:[#allocation7 + $0x4ec] ss:$48 sps:$4 sm:$0xff]   ;;  %v11587_v57 = vld [vmem:[#allocation7 + $0x4e0] ss:$48 sps:$4 sm:$0xff]   ;;  %v11588_v58 = vld [vmem:[#allocation7 + $0x4e8] ss:$48 sps:$4 sm:$0xff]  }
  0x70   :  { %2056 = vmatprep.mubr.bf16.mxu0 %v12574_v51  ;;  %2442 = vmatprep.mubr.bf16.mxu1 %v12574_v51  ;;  %v11589_v59 = vld [vmem:[#allocation7 + $0x544] ss:$48 sps:$4 sm:$0xff]   ;;  %v11591_v60 = vld [vmem:[#allocation7 + $0x54c] ss:$48 sps:$4 sm:$0xff]   ;;  %v11593_v61 = vld [vmem:[#allocation7 + $0x540] ss:$48 sps:$4 sm:$0xff]  }
  0x71   :  { %v11594_v62 = vld [vmem:[#allocation7 + $0x548] ss:$48 sps:$4 sm:$0xff]   ;;  %v11595_v63 = vld [vmem:[#allocation7 + $0x5a4] ss:$48 sps:$4 sm:$0xff]   ;;  %v11597_v0 = vld [vmem:[#allocation7 + $0x5ac] ss:$48 sps:$4 sm:$0xff]  }
  0x72   :  { %2035 = vmatpush1.bf16.msra.mxu0 %v11539_v22  ;;  %2421 = vmatpush1.bf16.msra.mxu1 %v11540_v23  ;;  %v11599_v1 = vld [vmem:[#allocation7 + $0x5a0] ss:$48 sps:$4 sm:$0xff]   ;;  %v11600_v2 = vld [vmem:[#allocation7 + $0x5a8] ss:$48 sps:$4 sm:$0xff]   ;;  %v11603_v5 = vld [vmem:[#allocation7 + $0x60c] ss:$48 sps:$4 sm:$0xff]  }
  0x73   :  { %2036 = vmatprep.subr.bf16.mxu0 %v11541_v24  ;;  %2422 = vmatprep.subr.bf16.mxu1 %v11543_v25  ;;  %v88_v3 = vld [vmem:[#allocation4] sm:$0xff]  ;;  %v95_v7 = vld [vmem:[#allocation4 + $0x38] sm:$0xff]  ;;  %v98_v8 = vld [vmem:[#allocation4 + $0x50] sm:$0xff]  ;;  %s9078_s9 = sshll.u32 %s12475_s5, 4  ;;  %s9079_s9 = int_to_ptr.vmem [resolvable:$true] %s9078_s9 }
  0x74   :  { %v11606_v6 = vld [vmem:[#allocation7 + $0x604] ss:$48 sps:$4 sm:$0xff]   ;;  %v12578_v9 = vpack.c.bf16 %v91_v4, %v88_v3  ;;  %v11601_v10 = vld [vmem:[#allocation7 + $0x608] ss:$48 sps:$4 sm:$0xff]   ;;  %v11604_v11 = vld [vmem:[#allocation7 + $0x600] ss:$48 sps:$4 sm:$0xff]   ;;  %v12580_v12 = vpack.c.bf16 %v98_v8, %v95_v7  ;;  %p12438_p13 = scmp.lt.s32.totalorder %s9079_s9, %s9079_s9 }
  0x75   :  { %v11609_v13 = vld [vmem:[#allocation7 + $0x66c] ss:$48 sps:$4 sm:$0xff]   ;;  %v11612_v14 = vld [vmem:[#allocation7 + $0x664] ss:$48 sps:$4 sm:$0xff]   ;;  %v11607_v18 = vld [vmem:[#allocation7 + $0x668] ss:$48 sps:$4 sm:$0xff]  }
  0x76   :  { %2037 = vmatpush1.bf16.msra.mxu0 %v11545_v26  ;;  %2423 = vmatpush1.bf16.msra.mxu1 %v11546_v27  ;;  %v94_v15 = vld [vmem:[#allocation4 + $0x30] sm:$0xff]  ;;  %v97_v16 = vld [vmem:[#allocation4 + $0x48] sm:$0xff]  ;;  %v104_v20 = vld [vmem:[#allocation4 + $0x80] sm:$0xff]  ;;  %s12433_s10 = scalar_lea.vmem %s9079_s9, 12288 }
  0x77   :  { %2038 = vmatprep.subr.bf16.mxu0 %v11547_v28  ;;  %2424 = vmatprep.subr.bf16.mxu1 %v11549_v29  ;;  %v101_v17 = vld [vmem:[#allocation4 + $0x68] sm:$0xff]  ;;  %v11610_v19 = vld [vmem:[#allocation7 + $0x660] ss:$48 sps:$4 sm:$0xff]   ;;  %v11618_v22 = vld [vmem:[#allocation7 + $0x6c4] ss:$48 sps:$4 sm:$0xff]   ;;  %v12586_v23 = vpack.c.bf16 %v97_v16, %v94_v15  ;;  %p12434_p12 = scmp.ne.s32.totalorder %s9079_s9, %s12433_s10  ;;  %p12439_p0 = scmp.lt.s32.totalorder %s12433_s10, %s12433_s10 }
  0x78   :  { %v11615_v21 = vld [vmem:[#allocation7 + $0x6cc] ss:$48 sps:$4 sm:$0xff]   ;;  %v12588_v24 = vpack.c.bf16 %v104_v20, %v101_v17  ;;  %v11613_v25 = vld [vmem:[#allocation7 + $0x6c8] ss:$48 sps:$4 sm:$0xff]   ;;  %v11616_v26 = vld [vmem:[#allocation7 + $0x6c0] ss:$48 sps:$4 sm:$0xff]  }
  0x79   :  { %v100_v27 = vld [vmem:[#allocation4 + $0x60] sm:$0xff]  ;;  %v11621_v28 = vld [vmem:[#allocation7 + $0x72c] ss:$48 sps:$4 sm:$0xff]   ;;  %v118_v4 = vld [vmem:[#allocation4 + $0xf0] sm:$0xff]  ;;  %p12440_p1 = por %p12439_p0, %p12438_p13 }
  0x7a   :  { %2039 = vmatpush1.bf16.msra.mxu0 %v11551_v30  ;;  %2425 = vmatpush1.bf16.msra.mxu1 %v11552_v31  ;;  %v11624_v29 = vld [vmem:[#allocation7 + $0x724] ss:$48 sps:$4 sm:$0xff]   ;;  %v103_v30 = vld [vmem:[#allocation4 + $0x78] sm:$0xff]  ;;  %v137_v20 = vld [vmem:[#allocation4 + $0x188] sm:$0xff] }
  0x7b   :  { %2040 = vmatprep.subr.bf16.mxu0 %v11553_v32  ;;  %2426 = vmatprep.subr.bf16.mxu1 %v11555_v33  ;;  %v107_v31 = vld [vmem:[#allocation4 + $0x98] sm:$0xff]  ;;  %v110_v32 = vld [vmem:[#allocation4 + $0xb0] sm:$0xff]  ;;  %v116_v46 = vld [vmem:[#allocation4 + $0xe0] sm:$0xff]  ;;  %p12441_p2 = pnand %p12440_p1, %p12434_p12 }
  0x7c   :  { %v11619_v33 = vld [vmem:[#allocation7 + $0x728] ss:$48 sps:$4 sm:$0xff]   ;;  %v11639_v49 = vld [vmem:[#allocation7 + $0x84c] ss:$48 sps:$4 sm:$0xff]   ;;  %v128_v7 = vld [vmem:[#allocation4 + $0x140] sm:$0xff] }
  0x7d   :  { %v134_v15 = vld [vmem:[#allocation4 + $0x170] sm:$0xff] }
  0x7e   :  { %2041 = vmatpush1.bf16.msra.mxu0 %v11557_v34  ;;  %2427 = vmatpush1.bf16.msra.mxu1 %v11558_v35  ;;  %v11622_v34 = vld [vmem:[#allocation7 + $0x720] ss:$48 sps:$4 sm:$0xff]   ;;  %v11627_v35 = vld [vmem:[#allocation7 + $0x78c] ss:$48 sps:$4 sm:$0xff]  }
  0x7f   :  { %2042 = vmatprep.subr.bf16.mxu0 %v11559_v36  ;;  %2428 = vmatprep.subr.bf16.mxu1 %v11561_v37  ;;  %v11630_v36 = vld [vmem:[#allocation7 + $0x784] ss:$48 sps:$4 sm:$0xff]   ;;  %v12594_v37 = vpack.c.bf16 %v103_v30, %v100_v27  ;;  %v139_v27 = vld [vmem:[#allocation4 + $0x198] sm:$0xff] }
  0x82   :  { %2043 = vmatpush1.bf16.msra.mxu0 %v11563_v38  ;;  %2429 = vmatpush1.bf16.msra.mxu1 %v11564_v39  ;;  %v12596_v38 = vpack.c.bf16 %v110_v32, %v107_v31  ;;  %v11625_v39 = vld [vmem:[#allocation7 + $0x788] ss:$48 sps:$4 sm:$0xff]   ;;  %v142_v32 = vld [vmem:[#allocation4 + $0x1b0] sm:$0xff] }
  0x83   :  { %2044 = vmatprep.subr.bf16.mxu0 %v11565_v40  ;;  %2430 = vmatprep.subr.bf16.mxu1 %v11567_v41  ;;  %v11628_v40 = vld [vmem:[#allocation7 + $0x780] ss:$48 sps:$4 sm:$0xff]   ;;  %v11633_v41 = vld [vmem:[#allocation7 + $0x7ec] ss:$48 sps:$4 sm:$0xff]  }
  0x86   :  { %2045 = vmatpush1.bf16.msra.mxu0 %v11569_v42  ;;  %2431 = vmatpush1.bf16.msra.mxu1 %v11570_v43  ;;  %v11636_v42 = vld [vmem:[#allocation7 + $0x7e4] ss:$48 sps:$4 sm:$0xff]  }
  0x87   :  { %2046 = vmatprep.subr.bf16.mxu0 %v11571_v44  ;;  %2432 = vmatprep.subr.bf16.mxu1 %v11573_v45  ;;  %v106_v43 = vld [vmem:[#allocation4 + $0x90] sm:$0xff]  ;;  %v109_v44 = vld [vmem:[#allocation4 + $0xa8] sm:$0xff] }
  0x88   :  { %v113_v45 = vld [vmem:[#allocation4 + $0xc8] sm:$0xff] }
  0x8a   :  { %2047 = vmatpush1.bf16.msra.mxu0 %v11575_v47  ;;  %2433 = vmatpush1.bf16.msra.mxu1 %v11576_v48  ;;  %v11631_v47 = vld [vmem:[#allocation7 + $0x7e8] ss:$48 sps:$4 sm:$0xff]   ;;  %v11634_v48 = vld [vmem:[#allocation7 + $0x7e0] ss:$48 sps:$4 sm:$0xff]  }
  0x8b   :  { %2048 = vmatprep.subr.bf16.mxu0 %v11577_v50  ;;  %2434 = vmatprep.subr.bf16.mxu1 %v11579_v52  ;;  %v11642_v50 = vld [vmem:[#allocation7 + $0x844] ss:$48 sps:$4 sm:$0xff]   ;;  %v12602_v52 = vpack.c.bf16 %v109_v44, %v106_v43 }
  0x8c   :  { %v158_v43 = vld [vmem:[#allocation4 + $0x230] sm:$0xff] }
  0x8e   :  { %2049 = vmatpush1.bf16.msra.mxu0 %v11581_v53  ;;  %2435 = vmatpush1.bf16.msra.mxu1 %v11582_v54  ;;  %v12604_v53 = vpack.c.bf16 %v116_v46, %v113_v45  ;;  %v11637_v54 = vld [vmem:[#allocation7 + $0x848] ss:$48 sps:$4 sm:$0xff]   ;;  %v154_v46 = vld [vmem:[#allocation4 + $0x210] sm:$0xff] }
  0x8f   :  { %2050 = vmatprep.subr.bf16.mxu0 %v11583_v55  ;;  %2436 = vmatprep.subr.bf16.mxu1 %v11585_v56  ;;  %v11640_v55 = vld [vmem:[#allocation7 + $0x840] ss:$48 sps:$4 sm:$0xff]  }
  0x90   :  { %v112_v56 = vld [vmem:[#allocation4 + $0xc0] sm:$0xff] }
  0x92   :  { %2051 = vmatpush1.bf16.msra.mxu0 %v11587_v57  ;;  %2437 = vmatpush1.bf16.msra.mxu1 %v11588_v58  ;;  %v11645_v57 = vld [vmem:[#allocation7 + $0x8ac] ss:$48 sps:$4 sm:$0xff]   ;;  %v11648_v58 = vld [vmem:[#allocation7 + $0x8a4] ss:$48 sps:$4 sm:$0xff]  }
  0x93   :  { %2052 = vmatprep.subr.bf16.mxu0 %v11589_v59  ;;  %2438 = vmatprep.subr.bf16.mxu1 %v11591_v60  ;;  %v115_v59 = vld [vmem:[#allocation4 + $0xd8] sm:$0xff] }
  0x94   :  { %v119_v60 = vld [vmem:[#allocation4 + $0xf8] sm:$0xff] }
  0x96   :  { %2053 = vmatpush1.bf16.msra.mxu0 %v11593_v61  ;;  %2439 = vmatpush1.bf16.msra.mxu1 %v11594_v62  ;;  %v122_v61 = vld [vmem:[#allocation4 + $0x110] sm:$0xff]  ;;  %v11643_v62 = vld [vmem:[#allocation7 + $0x8a8] ss:$48 sps:$4 sm:$0xff]  }
  0x97   :  { %2054 = vmatprep.subr.bf16.mxu0 %v11595_v63  ;;  %2440 = vmatprep.subr.bf16.mxu1 %v11597_v0  ;;  %v11646_v63 = vld [vmem:[#allocation7 + $0x8a0] ss:$48 sps:$4 sm:$0xff]   ;;  %v11651_v0 = vld [vmem:[#allocation7 + $0x1c] ss:$48 sps:$4 sm:$0xff]   ;;  %v12612_v3 = vpack.c.bf16 %v122_v61, %v119_v60 }
  0x98   :  { %v166_v61 = vld [vmem:[#allocation4 + $0x270] sm:$0xff] }
  0x9a   :  { %2055 = vmatpush1.bf16.msra.mxu0 %v11599_v1  ;;  %2441 = vmatpush1.bf16.msra.mxu1 %v11600_v2  ;;  %v11654_v1 = vld [vmem:[#allocation7 + $0x14] ss:$48 sps:$4 sm:$0xff]   ;;  %v12610_v2 = vpack.c.bf16 %v115_v59, %v112_v56  ;;  %v163_v56 = vld [vmem:[#allocation4 + $0x258] sm:$0xff] }
  0x9b   :  { %2603 = vmatprep.subr.bf16.mxu1 %v11603_v5  ;;  %2217 = vmatprep.subr.bf16.mxu0 %v11606_v6  ;;  %v121_v5 = vld [vmem:[#allocation4 + $0x108] sm:$0xff] }
  0x9c   :  { %v125_v6 = vld [vmem:[#allocation4 + $0x128] sm:$0xff]  ;;  %v12618_v8 = vpack.c.bf16 %v121_v5, %v118_v4  ;;  %v172_v5 = vld [vmem:[#allocation4 + $0x2a0] sm:$0xff] }
  0x9d   :  { %2057 = vmatmul.mubr.bf16.vlgmr.msra.gmra.mrb[0].mxu0 %v12578_v9  ;;  %2443 = vmatmul.mubr.bf16.vlgmr.msra.gmra.mrb[0].mxu1 %v12578_v9 }
  0x9e   :  { %2604 = vmatpush1.bf16.msra.mxu1 %v11601_v10  ;;  %2218 = vmatpush1.bf16.msra.mxu0 %v11604_v11  ;;  %v12620_v10 = vpack.c.bf16 %v128_v7, %v125_v6  ;;  %v124_v11 = vld [vmem:[#allocation4 + $0x120] sm:$0xff]  ;;  %v175_v6 = vld [vmem:[#allocation4 + $0x2b8] sm:$0xff] }
  0x9f   :  { %2066 = vmatprep.mubr.bf16.mxu0 %v12580_v12  ;;  %2452 = vmatprep.mubr.bf16.mxu1 %v12580_v12  ;;  %v179_v7 = vld [vmem:[#allocation4 + $0x2d8] sm:$0xff] }
  0xa0   :  { %2605 = vmatprep.subr.bf16.mxu1 %v11609_v13  ;;  %2219 = vmatprep.subr.bf16.mxu0 %v11612_v14  ;;  %v127_v13 = vld [vmem:[#allocation4 + $0x138] sm:$0xff] }
  0xa1   :  { %v131_v14 = vld [vmem:[#allocation4 + $0x158] sm:$0xff]  ;;  %v12626_v16 = vpack.c.bf16 %v127_v13, %v124_v11  ;;  %v182_v11 = vld [vmem:[#allocation4 + $0x2f0] sm:$0xff]  ;;  %v12690_v13 = vpack.c.bf16 %v175_v6, %v172_v5 }
  0xa2   :  { %2606 = vmatpush1.bf16.msra.mxu1 %v11607_v18  ;;  %2220 = vmatpush1.bf16.msra.mxu0 %v11610_v19  ;;  %v12628_v17 = vpack.c.bf16 %v134_v15, %v131_v14  ;;  %v130_v18 = vld [vmem:[#allocation4 + $0x150] sm:$0xff]  ;;  %v133_v19 = vld [vmem:[#allocation4 + $0x168] sm:$0xff]  ;;  %v12692_v14 = vpack.c.bf16 %v182_v11, %v179_v7 }
  0xa3   :  { %2607 = vmatprep.subr.bf16.mxu1 %v11615_v21  ;;  %2221 = vmatprep.subr.bf16.mxu0 %v11618_v22  ;;  %v140_v21 = vld [vmem:[#allocation4 + $0x1a0] sm:$0xff]  ;;  %v12634_v22 = vpack.c.bf16 %v133_v19, %v130_v18  ;;  %15056 = vst [vmem:[#allocation28_spill] sm:$0xff] %v12690_v13  ;;  %v178_v15 = vld [vmem:[#allocation4 + $0x2d0] sm:$0xff]  ;;  %v181_v18 = vld [vmem:[#allocation4 + $0x2e8] sm:$0xff] }
  0xa4   :  { %15057 = vst [vmem:[#allocation29_spill] sm:$0xff] %v12692_v14  ;;  %v12698_v19 = vpack.c.bf16 %v181_v18, %v178_v15  ;;  %v11673_v5 = vld [vmem:[#allocation7 + $0x198] ss:$48 sps:$4 sm:$0xff]   ;;  %v11676_v6 = vld [vmem:[#allocation7 + $0x190] ss:$48 sps:$4 sm:$0xff]  }
  0xa5   :  { %2067 = vmatmul.mubr.bf16.gmra.mrb[4].mxu0 %v12586_v23  ;;  %2453 = vmatmul.mubr.bf16.gmra.mrb[4].mxu1 %v12586_v23  ;;  %v11681_v7 = vld [vmem:[#allocation7 + $0x1fc] ss:$48 sps:$4 sm:$0xff]   ;;  %v11684_v11 = vld [vmem:[#allocation7 + $0x1f4] ss:$48 sps:$4 sm:$0xff]  }
  0xa6   :  { %2076 = vmatprep.mubr.bf16.mxu0 %v12588_v24  ;;  %2462 = vmatprep.mubr.bf16.mxu1 %v12588_v24  ;;  %15058 = vst [vmem:[#allocation30_spill] sm:$0xff] %v12698_v19  ;;  %v108_v15 = vld [vmem:[#allocation4 + $0xa0] sm:$0xff]  ;;  %v111_v18 = vld [vmem:[#allocation4 + $0xb8] sm:$0xff] }
  0xa7   :  { %2608 = vmatpush1.bf16.msra.mxu1 %v11613_v25  ;;  %2222 = vmatpush1.bf16.msra.mxu0 %v11616_v26  ;;  %v12636_v25 = vpack.c.bf16 %v140_v21, %v137_v20  ;;  %v136_v26 = vld [vmem:[#allocation4 + $0x180] sm:$0xff]  ;;  %v90_v20 = vld [vmem:[#allocation4 + $0x10] sm:$0xff]  ;;  %v14863_v21 = vmov 0  }
  0xa8   :  { %2609 = vmatprep.subr.bf16.mxu1 %v11621_v28  ;;  %2223 = vmatprep.subr.bf16.mxu0 %v11624_v29  ;;  %v143_v28 = vld [vmem:[#allocation4 + $0x1b8] sm:$0xff]  ;;  %v146_v29 = vld [vmem:[#allocation4 + $0x1d0] sm:$0xff]  ;;  %v12642_v30 = vpack.c.bf16 %v139_v27, %v136_v26  ;;  %v93_v26 = vld [vmem:[#allocation4 + $0x28] sm:$0xff] }
  0xa9   :  { %15046 = vst [vmem:[#allocation18_spill] sm:$0xff] %v12636_v25  ;;  %v12644_v31 = vpack.c.bf16 %v146_v29, %v143_v28  ;;  %v11649_v27 = vld [vmem:[#allocation7 + $0x18] ss:$48 sps:$4 sm:$0xff]   ;;  %v11652_v28 = vld [vmem:[#allocation7 + $0x10] ss:$48 sps:$4 sm:$0xff]   ;;  %v12704_v29 = vpack.c.bf16 %v93_v26, %v90_v20 }
  0xaa   :  { %15047 = vst [vmem:[#allocation19_spill] sm:$0xff] %v12642_v30  ;;  %v11679_v20 = vld [vmem:[#allocation7 + $0x1f8] ss:$48 sps:$4 sm:$0xff]   ;;  %v11682_v26 = vld [vmem:[#allocation7 + $0x1f0] ss:$48 sps:$4 sm:$0xff]  }
  0xab   :  { %2610 = vmatpush1.bf16.msra.mxu1 %v11619_v33  ;;  %2224 = vmatpush1.bf16.msra.mxu0 %v11622_v34  ;;  %15048 = vst [vmem:[#allocation20_spill] sm:$0xff] %v12644_v31  ;;  %v145_v33 = vld [vmem:[#allocation4 + $0x1c8] sm:$0xff] }
  0xac   :  { %2611 = vmatprep.subr.bf16.mxu1 %v11627_v35  ;;  %2225 = vmatprep.subr.bf16.mxu0 %v11630_v36  ;;  %v149_v34 = vld [vmem:[#allocation4 + $0x1e8] sm:$0xff]  ;;  %v152_v35 = vld [vmem:[#allocation4 + $0x200] sm:$0xff]  ;;  %v12650_v36 = vpack.c.bf16 %v145_v33, %v142_v32 }
  0xad   :  { %2077 = vmatmul.mubr.bf16.gmra.mrb[8].mxu0 %v12594_v37  ;;  %2463 = vmatmul.mubr.bf16.gmra.mrb[8].mxu1 %v12594_v37  ;;  %v11657_v32 = vld [vmem:[#allocation7 + $0x7c] ss:$48 sps:$4 sm:$0xff]   ;;  %v11660_v33 = vld [vmem:[#allocation7 + $0x74] ss:$48 sps:$4 sm:$0xff]  }
  0xae   :  { %2086 = vmatprep.mubr.bf16.mxu0 %v12596_v38  ;;  %2472 = vmatprep.mubr.bf16.mxu1 %v12596_v38  ;;  %15049 = vst [vmem:[#allocation21_spill] sm:$0xff] %v12650_v36 }
  0xaf   :  { %2612 = vmatpush1.bf16.msra.mxu1 %v11625_v39  ;;  %2226 = vmatpush1.bf16.msra.mxu0 %v11628_v40  ;;  %v12652_v39 = vpack.c.bf16 %v152_v35, %v149_v34  ;;  %v148_v40 = vld [vmem:[#allocation4 + $0x1e0] sm:$0xff]  ;;  %v99_v35 = vld [vmem:[#allocation4 + $0x58] sm:$0xff] }
  0xb0   :  { %2613 = vmatprep.subr.bf16.mxu1 %v11633_v41  ;;  %2227 = vmatprep.subr.bf16.mxu0 %v11636_v42  ;;  %v151_v41 = vld [vmem:[#allocation4 + $0x1f8] sm:$0xff]  ;;  %v96_v34 = vld [vmem:[#allocation4 + $0x40] sm:$0xff] }
  0xb1   :  { %15050 = vst [vmem:[#allocation22_spill] sm:$0xff] %v12652_v39  ;;  %v155_v42 = vld [vmem:[#allocation4 + $0x218] sm:$0xff]  ;;  %v12658_v44 = vpack.c.bf16 %v151_v41, %v148_v40  ;;  %v11658_v41 = vld [vmem:[#allocation7 + $0x70] ss:$48 sps:$4 sm:$0xff]  }
  0xb2   :  { %v12660_v45 = vpack.c.bf16 %v158_v43, %v155_v42  ;;  %v11655_v40 = vld [vmem:[#allocation7 + $0x78] ss:$48 sps:$4 sm:$0xff]   ;;  %v11663_v42 = vld [vmem:[#allocation7 + $0xdc] ss:$48 sps:$4 sm:$0xff]   ;;  %v11666_v43 = vld [vmem:[#allocation7 + $0xd4] ss:$48 sps:$4 sm:$0xff]  }
  0xb3   :  { %2614 = vmatpush1.bf16.msra.mxu1 %v11631_v47  ;;  %2228 = vmatpush1.bf16.msra.mxu0 %v11634_v48  ;;  %15051 = vst [vmem:[#allocation23_spill] sm:$0xff] %v12658_v44  ;;  %v157_v47 = vld [vmem:[#allocation4 + $0x228] sm:$0xff] }
  0xb4   :  { %2615 = vmatprep.subr.bf16.mxu1 %v11639_v49  ;;  %2229 = vmatprep.subr.bf16.mxu0 %v11642_v50  ;;  %15052 = vst [vmem:[#allocation24_spill] sm:$0xff] %v12660_v45  ;;  %v161_v48 = vld [vmem:[#allocation4 + $0x248] sm:$0xff]  ;;  %v164_v49 = vld [vmem:[#allocation4 + $0x260] sm:$0xff]  ;;  %v12666_v50 = vpack.c.bf16 %v157_v47, %v154_v46  ;;  %v12710_v46 = vpack.c.bf16 %v99_v35, %v96_v34 }
  0xb5   :  { %2087 = vmatmul.mubr.bf16.gmra.mrb[12].mxu0 %v12602_v52  ;;  %2473 = vmatmul.mubr.bf16.gmra.mrb[12].mxu1 %v12602_v52  ;;  %v11661_v47 = vld [vmem:[#allocation7 + $0xd8] ss:$48 sps:$4 sm:$0xff]   ;;  %v11688_v34 = vld [vmem:[#allocation7 + $0x250] ss:$48 sps:$4 sm:$0xff]   ;;  %v11693_v35 = vld [vmem:[#allocation7 + $0x2bc] ss:$48 sps:$4 sm:$0xff]  }
  0xb6   :  { %2096 = vmatprep.mubr.bf16.mxu0 %v12604_v53  ;;  %2482 = vmatprep.mubr.bf16.mxu1 %v12604_v53 }
  0xb7   :  { %2616 = vmatpush1.bf16.msra.mxu1 %v11637_v54  ;;  %2230 = vmatpush1.bf16.msra.mxu0 %v11640_v55  ;;  %v12668_v54 = vpack.c.bf16 %v164_v49, %v161_v48  ;;  %v160_v55 = vld [vmem:[#allocation4 + $0x240] sm:$0xff]  ;;  %v11669_v49 = vld [vmem:[#allocation7 + $0x13c] ss:$48 sps:$4 sm:$0xff]  }
  0xb8   :  { %2617 = vmatprep.subr.bf16.mxu1 %v11645_v57  ;;  %2231 = vmatprep.subr.bf16.mxu0 %v11648_v58  ;;  %v167_v57 = vld [vmem:[#allocation4 + $0x278] sm:$0xff]  ;;  %v170_v58 = vld [vmem:[#allocation4 + $0x290] sm:$0xff]  ;;  %v12674_v59 = vpack.c.bf16 %v163_v56, %v160_v55 }
  0xb9   :  { %15053 = vst [vmem:[#allocation25_spill] sm:$0xff] %v12668_v54  ;;  %v12676_v60 = vpack.c.bf16 %v170_v58, %v167_v57  ;;  %v11664_v48 = vld [vmem:[#allocation7 + $0xd0] ss:$48 sps:$4 sm:$0xff]   ;;  %v11672_v55 = vld [vmem:[#allocation7 + $0x134] ss:$48 sps:$4 sm:$0xff]   ;;  %v105_v57 = vld [vmem:[#allocation4 + $0x88] sm:$0xff] }
  0xba   :  { %v102_v56 = vld [vmem:[#allocation4 + $0x70] sm:$0xff]  ;;  %v11667_v58 = vld [vmem:[#allocation7 + $0x138] ss:$48 sps:$4 sm:$0xff]  }
  0xbb   :  { %2618 = vmatpush1.bf16.msra.mxu1 %v11643_v62  ;;  %2232 = vmatpush1.bf16.msra.mxu0 %v11646_v63  ;;  %v169_v62 = vld [vmem:[#allocation4 + $0x288] sm:$0xff] }
  0xbc   :  { %3182 = vmatprep.subr.bf16.mxu1 %v11651_v0  ;;  %2796 = vmatprep.subr.bf16.mxu0 %v11654_v1  ;;  %v173_v63 = vld [vmem:[#allocation4 + $0x2a8] sm:$0xff]  ;;  %v176_v0 = vld [vmem:[#allocation4 + $0x2c0] sm:$0xff]  ;;  %v12682_v1 = vpack.c.bf16 %v169_v62, %v166_v61 }
  0xbd   :  { %2097 = vmatmul.mubr.bf16.gmra.mrb[16].mxu0 %v12610_v2  ;;  %2483 = vmatmul.mubr.bf16.gmra.mrb[16].mxu1 %v12610_v2  ;;  %v12684_v4 = vpack.c.bf16 %v176_v0, %v173_v63  ;;  %v11670_v61 = vld [vmem:[#allocation7 + $0x130] ss:$48 sps:$4 sm:$0xff]   ;;  %v11675_v62 = vld [vmem:[#allocation7 + $0x19c] ss:$48 sps:$4 sm:$0xff]   ;;  %v11678_v63 = vld [vmem:[#allocation7 + $0x194] ss:$48 sps:$4 sm:$0xff]   ;;  %v12716_v0 = vpack.c.bf16 %v105_v57, %v102_v56 }
  0xbe   :  { %2106 = vmatprep.mubr.bf16.mxu0 %v12612_v3  ;;  %2492 = vmatprep.mubr.bf16.mxu1 %v12612_v3  ;;  %15054 = vst [vmem:[#allocation26_spill] sm:$0xff] %v12682_v1  ;;  %v11697_v56 = vld [vmem:[#allocation7 + $0x318] ss:$48 sps:$4 sm:$0xff]   ;;  %v11700_v57 = vld [vmem:[#allocation7 + $0x310] ss:$48 sps:$4 sm:$0xff]  }
  0xbf   :  { %15055 = vst [vmem:[#allocation27_spill] sm:$0xff] %v12684_v4 }
  0xc5   :  { %2107 = vmatmul.mubr.bf16.gmra.mrb[20].mxu0 %v12618_v8  ;;  %2493 = vmatmul.mubr.bf16.gmra.mrb[20].mxu1 %v12618_v8 }
  0xc6   :  { %2116 = vmatprep.mubr.bf16.mxu0 %v12620_v10  ;;  %2502 = vmatprep.mubr.bf16.mxu1 %v12620_v10 }
  0xcd   :  { %2117 = vmatmul.mubr.bf16.gmra.mrb[24].mxu0 %v12626_v16  ;;  %2503 = vmatmul.mubr.bf16.gmra.mrb[24].mxu1 %v12626_v16 }
  0xce   :  { %2126 = vmatprep.mubr.bf16.mxu0 %v12628_v17  ;;  %2512 = vmatprep.mubr.bf16.mxu1 %v12628_v17 }
  0xd5   :  { %2127 = vmatmul.mubr.bf16.gmra.mrb[28].mxu0 %v12634_v22  ;;  %2513 = vmatmul.mubr.bf16.gmra.mrb[28].mxu1 %v12634_v22 }
  0xd6   :  { %2136 = vmatprep.mubr.bf16.mxu0 %v12636_v25  ;;  %2522 = vmatprep.mubr.bf16.mxu1 %v12636_v25 }
  0xdd   :  { %2137 = vmatmul.mubr.bf16.gmra.mrb[32].mxu0 %v12642_v30  ;;  %2523 = vmatmul.mubr.bf16.gmra.mrb[32].mxu1 %v12642_v30 }
  0xde   :  { %2146 = vmatprep.mubr.bf16.mxu0 %v12644_v31  ;;  %2532 = vmatprep.mubr.bf16.mxu1 %v12644_v31 }
  0xe5   :  { %2147 = vmatmul.mubr.bf16.gmra.mrb[36].mxu0 %v12650_v36  ;;  %2533 = vmatmul.mubr.bf16.gmra.mrb[36].mxu1 %v12650_v36 }
  0xe6   :  { %2156 = vmatprep.mubr.bf16.mxu0 %v12652_v39  ;;  %2542 = vmatprep.mubr.bf16.mxu1 %v12652_v39 }
  0xed   :  { %2157 = vmatmul.mubr.bf16.gmra.mrb[40].mxu0 %v12658_v44  ;;  %2543 = vmatmul.mubr.bf16.gmra.mrb[40].mxu1 %v12658_v44 }
  0xee   :  { %2166 = vmatprep.mubr.bf16.mxu0 %v12660_v45  ;;  %2552 = vmatprep.mubr.bf16.mxu1 %v12660_v45 }
  0xf5   :  { %2167 = vmatmul.mubr.bf16.gmra.mrb[44].mxu0 %v12666_v50  ;;  %2553 = vmatmul.mubr.bf16.gmra.mrb[44].mxu1 %v12666_v50 }
  0xf6   :  { %2176 = vmatprep.mubr.bf16.mxu0 %v12668_v54  ;;  %2562 = vmatprep.mubr.bf16.mxu1 %v12668_v54 }
  0xfd   :  { %2177 = vmatmul.mubr.bf16.gmra.mrb[48].mxu0 %v12674_v59  ;;  %2563 = vmatmul.mubr.bf16.gmra.mrb[48].mxu1 %v12674_v59 }
  0xfe   :  { %2186 = vmatprep.mubr.bf16.mxu0 %v12676_v60  ;;  %2572 = vmatprep.mubr.bf16.mxu1 %v12676_v60 }
 0x105   :  { %2187 = vmatmul.mubr.bf16.gmra.mrb[52].mxu0 %v12682_v1  ;;  %2573 = vmatmul.mubr.bf16.gmra.mrb[52].mxu1 %v12682_v1 }
 0x106   :  { %2196 = vmatprep.mubr.bf16.mxu0 %v12684_v4  ;;  %2582 = vmatprep.mubr.bf16.mxu1 %v12684_v4 }
 0x10d   :  { %2197 = vmatmul.mubr.bf16.gmra.mrb[56].mxu0 %v12690_v13  ;;  %2583 = vmatmul.mubr.bf16.gmra.mrb[56].mxu1 %v12690_v13 }
 0x10e   :  { %2206 = vmatprep.mubr.bf16.mxu0 %v12692_v14  ;;  %2592 = vmatprep.mubr.bf16.mxu1 %v12692_v14 }
 0x115   :  { %2207 = vmatmul.mubr.bf16.gmra.mrb[60].mxu0 %v12698_v19  ;;  %2593 = vmatmul.mubr.bf16.gmra.mrb[60].mxu1 %v12698_v19 }
 0x116   :  { %2249 = vmatprep.mubr.bf16.mxu0 %v14863_v21  ;;  %2635 = vmatprep.mubr.bf16.mxu1 %v14863_v21 }
 0x11d   :  { %2250 = vmatmul.mubr.bf16.vlgmr.msra.gmra.mrb[0].mxu0 %v12704_v29  ;;  %2636 = vmatmul.mubr.bf16.vlgmr.msra.gmra.mrb[0].mxu1 %v12704_v29 }
 0x11e   :  { %3183 = vmatpush1.bf16.msra.mxu1 %v11649_v27  ;;  %2797 = vmatpush1.bf16.msra.mxu0 %v11652_v28  ;;  %v11687_v27 = vld [vmem:[#allocation7 + $0x25c] ss:$48 sps:$4 sm:$0xff]   ;;  %v11690_v28 = vld [vmem:[#allocation7 + $0x254] ss:$48 sps:$4 sm:$0xff]  }
 0x11f   :  { %2259 = vmatprep.mubr.bf16.mxu0 %v14863_v21  ;;  %2645 = vmatprep.mubr.bf16.mxu1 %v14863_v21 }
 0x120   :  { %3184 = vmatprep.subr.bf16.mxu1 %v11657_v32  ;;  %2798 = vmatprep.subr.bf16.mxu0 %v11660_v33  ;;  %v12722_v32 = vpack.c.bf16 %v111_v18, %v108_v15  ;;  %v11685_v33 = vld [vmem:[#allocation7 + $0x258] ss:$48 sps:$4 sm:$0xff]  }
 0x121   :  { %v11709_v18 = vld [vmem:[#allocation7 + $0x3d8] ss:$48 sps:$4 sm:$0xff]  }
 0x122   :  { %3185 = vmatpush1.bf16.msra.mxu1 %v11655_v40  ;;  %2799 = vmatpush1.bf16.msra.mxu0 %v11658_v41  ;;  %v11696_v40 = vld [vmem:[#allocation7 + $0x2b4] ss:$48 sps:$4 sm:$0xff]  }
 0x123   :  { %3186 = vmatprep.subr.bf16.mxu1 %v11663_v42  ;;  %2800 = vmatprep.subr.bf16.mxu0 %v11666_v43  ;;  %v114_v41 = vld [vmem:[#allocation4 + $0xd0] sm:$0xff]  ;;  %v117_v42 = vld [vmem:[#allocation4 + $0xe8] sm:$0xff] }
 0x124   :  { %v11691_v43 = vld [vmem:[#allocation7 + $0x2b8] ss:$48 sps:$4 sm:$0xff]  }
 0x125   :  { %2260 = vmatmul.mubr.bf16.gmra.mrb[4].mxu0 %v12710_v46  ;;  %2646 = vmatmul.mubr.bf16.gmra.mrb[4].mxu1 %v12710_v46 }
 0x126   :  { %2269 = vmatprep.mubr.bf16.mxu0 %v14863_v21  ;;  %2655 = vmatprep.mubr.bf16.mxu1 %v14863_v21 }
 0x127   :  { %3187 = vmatpush1.bf16.msra.mxu1 %v11661_v47  ;;  %2801 = vmatpush1.bf16.msra.mxu0 %v11664_v48  ;;  %v11694_v47 = vld [vmem:[#allocation7 + $0x2b0] ss:$48 sps:$4 sm:$0xff]   ;;  %v11699_v48 = vld [vmem:[#allocation7 + $0x31c] ss:$48 sps:$4 sm:$0xff]  }
 0x128   :  { %3188 = vmatprep.subr.bf16.mxu1 %v11669_v49  ;;  %2802 = vmatprep.subr.bf16.mxu0 %v11672_v55  ;;  %v11702_v49 = vld [vmem:[#allocation7 + $0x314] ss:$48 sps:$4 sm:$0xff]   ;;  %v12728_v55 = vpack.c.bf16 %v117_v42, %v114_v41 }
 0x129   :  { %v11726_v41 = vld [vmem:[#allocation7 + $0x494] ss:$48 sps:$4 sm:$0xff]  }
 0x12b   :  { %3189 = vmatpush1.bf16.msra.mxu1 %v11667_v58  ;;  %2803 = vmatpush1.bf16.msra.mxu0 %v11670_v61  ;;  %v11705_v58 = vld [vmem:[#allocation7 + $0x37c] ss:$48 sps:$4 sm:$0xff]   ;;  %v11708_v61 = vld [vmem:[#allocation7 + $0x374] ss:$48 sps:$4 sm:$0xff]  }
 0x12c   :  { %3190 = vmatprep.subr.bf16.mxu1 %v11675_v62  ;;  %2804 = vmatprep.subr.bf16.mxu0 %v11678_v63  ;;  %v120_v62 = vld [vmem:[#allocation4 + $0x100] sm:$0xff]  ;;  %v123_v63 = vld [vmem:[#allocation4 + $0x118] sm:$0xff] }
 0x12d   :  { %2270 = vmatmul.mubr.bf16.gmra.mrb[8].mxu0 %v12716_v0  ;;  %2656 = vmatmul.mubr.bf16.gmra.mrb[8].mxu1 %v12716_v0  ;;  %v12734_v15 = vpack.c.bf16 %v123_v63, %v120_v62  ;;  %v11735_v62 = vld [vmem:[#allocation7 + $0x55c] ss:$48 sps:$4 sm:$0xff]   ;;  %v11738_v63 = vld [vmem:[#allocation7 + $0x554] ss:$48 sps:$4 sm:$0xff]  }
 0x12e   :  { %2279 = vmatprep.mubr.bf16.mxu0 %v14863_v21  ;;  %2665 = vmatprep.mubr.bf16.mxu1 %v14863_v21 }
 0x12f   :  { %3191 = vmatpush1.bf16.msra.mxu1 %v11673_v5  ;;  %2805 = vmatpush1.bf16.msra.mxu0 %v11676_v6  ;;  %v11703_v5 = vld [vmem:[#allocation7 + $0x378] ss:$48 sps:$4 sm:$0xff]   ;;  %v11706_v6 = vld [vmem:[#allocation7 + $0x370] ss:$48 sps:$4 sm:$0xff]  }
 0x130   :  { %3192 = vmatprep.subr.bf16.mxu1 %v11681_v7  ;;  %2806 = vmatprep.subr.bf16.mxu0 %v11684_v11  ;;  %v11711_v7 = vld [vmem:[#allocation7 + $0x3dc] ss:$48 sps:$4 sm:$0xff]   ;;  %v11714_v11 = vld [vmem:[#allocation7 + $0x3d4] ss:$48 sps:$4 sm:$0xff]  }
 0x133   :  { %3193 = vmatpush1.bf16.msra.mxu1 %v11679_v20  ;;  %2807 = vmatpush1.bf16.msra.mxu0 %v11682_v26  ;;  %v11712_v20 = vld [vmem:[#allocation7 + $0x3d0] ss:$48 sps:$4 sm:$0xff]   ;;  %v11717_v26 = vld [vmem:[#allocation7 + $0x43c] ss:$48 sps:$4 sm:$0xff]  }
 0x134   :  { %3194 = vmatprep.subr.bf16.mxu1 %v11687_v27  ;;  %2808 = vmatprep.subr.bf16.mxu0 %v11690_v28  ;;  %v11720_v27 = vld [vmem:[#allocation7 + $0x434] ss:$48 sps:$4 sm:$0xff]  }
 0x135   :  { %2280 = vmatmul.mubr.bf16.gmra.mrb[12].mxu0 %v12722_v32  ;;  %2666 = vmatmul.mubr.bf16.gmra.mrb[12].mxu1 %v12722_v32  ;;  %v126_v28 = vld [vmem:[#allocation4 + $0x130] sm:$0xff] }
 0x136   :  { %2289 = vmatprep.mubr.bf16.mxu0 %v14863_v21  ;;  %2675 = vmatprep.mubr.bf16.mxu1 %v14863_v21 }
 0x137   :  { %3195 = vmatpush1.bf16.msra.mxu1 %v11685_v33  ;;  %2809 = vmatpush1.bf16.msra.mxu0 %v11688_v34  ;;  %v129_v33 = vld [vmem:[#allocation4 + $0x148] sm:$0xff] }
 0x138   :  { %3196 = vmatprep.subr.bf16.mxu1 %v11693_v35  ;;  %2810 = vmatprep.subr.bf16.mxu0 %v11696_v40  ;;  %v11715_v34 = vld [vmem:[#allocation7 + $0x438] ss:$48 sps:$4 sm:$0xff]   ;;  %v11718_v35 = vld [vmem:[#allocation7 + $0x430] ss:$48 sps:$4 sm:$0xff]   ;;  %v11723_v40 = vld [vmem:[#allocation7 + $0x49c] ss:$48 sps:$4 sm:$0xff]   ;;  %v12740_v42 = vpack.c.bf16 %v129_v33, %v126_v28 }
 0x139   :  { %v11742_v28 = vld [vmem:[#allocation7 + $0x5b0] ss:$48 sps:$4 sm:$0xff]   ;;  %v11747_v33 = vld [vmem:[#allocation7 + $0x61c] ss:$48 sps:$4 sm:$0xff]  }
 0x13b   :  { %3197 = vmatpush1.bf16.msra.mxu1 %v11691_v43  ;;  %2811 = vmatpush1.bf16.msra.mxu0 %v11694_v47  ;;  %v11721_v43 = vld [vmem:[#allocation7 + $0x498] ss:$48 sps:$4 sm:$0xff]   ;;  %v11724_v47 = vld [vmem:[#allocation7 + $0x490] ss:$48 sps:$4 sm:$0xff]  }
 0x13c   :  { %3198 = vmatprep.subr.bf16.mxu1 %v11699_v48  ;;  %2812 = vmatprep.subr.bf16.mxu0 %v11702_v49  ;;  %v11729_v48 = vld [vmem:[#allocation7 + $0x4fc] ss:$48 sps:$4 sm:$0xff]   ;;  %v11732_v49 = vld [vmem:[#allocation7 + $0x4f4] ss:$48 sps:$4 sm:$0xff]  }
 0x13d   :  { %2290 = vmatmul.mubr.bf16.gmra.mrb[16].mxu0 %v12728_v55  ;;  %2676 = vmatmul.mubr.bf16.gmra.mrb[16].mxu1 %v12728_v55 }
 0x13e   :  { %2299 = vmatprep.mubr.bf16.mxu0 %v14863_v21  ;;  %2685 = vmatprep.mubr.bf16.mxu1 %v14863_v21 }
 0x13f   :  { %3199 = vmatpush1.bf16.msra.mxu1 %v11697_v56  ;;  %2813 = vmatpush1.bf16.msra.mxu0 %v11700_v57  ;;  %v132_v56 = vld [vmem:[#allocation4 + $0x160] sm:$0xff]  ;;  %v135_v57 = vld [vmem:[#allocation4 + $0x178] sm:$0xff] }
 0x140   :  { %3200 = vmatprep.subr.bf16.mxu1 %v11705_v58  ;;  %2814 = vmatprep.subr.bf16.mxu0 %v11708_v61  ;;  %v11727_v58 = vld [vmem:[#allocation7 + $0x4f8] ss:$48 sps:$4 sm:$0xff]   ;;  %v11730_v61 = vld [vmem:[#allocation7 + $0x4f0] ss:$48 sps:$4 sm:$0xff]  }
 0x143   :  { %3201 = vmatpush1.bf16.msra.mxu1 %v11703_v5  ;;  %2815 = vmatpush1.bf16.msra.mxu0 %v11706_v6  ;;  %v12746_v5 = vpack.c.bf16 %v135_v57, %v132_v56  ;;  %v11733_v6 = vld [vmem:[#allocation7 + $0x558] ss:$48 sps:$4 sm:$0xff]   ;;  %v156_v56 = vld [vmem:[#allocation4 + $0x220] sm:$0xff] }
 0x144   :  { %3202 = vmatprep.subr.bf16.mxu1 %v11711_v7  ;;  %2816 = vmatprep.subr.bf16.mxu0 %v11714_v11  ;;  %v11736_v7 = vld [vmem:[#allocation7 + $0x550] ss:$48 sps:$4 sm:$0xff]   ;;  %v11741_v11 = vld [vmem:[#allocation7 + $0x5bc] ss:$48 sps:$4 sm:$0xff]  }
 0x145   :  { %2300 = vmatmul.mubr.bf16.gmra.mrb[20].mxu0 %v12734_v15  ;;  %2686 = vmatmul.mubr.bf16.gmra.mrb[20].mxu1 %v12734_v15  ;;  %v159_v57 = vld [vmem:[#allocation4 + $0x238] sm:$0xff] }
 0x146   :  { %2309 = vmatprep.mubr.bf16.mxu0 %v14863_v21  ;;  %2695 = vmatprep.mubr.bf16.mxu1 %v14863_v21 }
 0x147   :  { %3203 = vmatpush1.bf16.msra.mxu1 %v11709_v18  ;;  %2817 = vmatpush1.bf16.msra.mxu0 %v11712_v20  ;;  %v11744_v18 = vld [vmem:[#allocation7 + $0x5b4] ss:$48 sps:$4 sm:$0xff]  }
 0x148   :  { %3204 = vmatprep.subr.bf16.mxu1 %v11717_v26  ;;  %2818 = vmatprep.subr.bf16.mxu0 %v11720_v27  ;;  %v138_v20 = vld [vmem:[#allocation4 + $0x190] sm:$0xff]  ;;  %v141_v26 = vld [vmem:[#allocation4 + $0x1a8] sm:$0xff] }
 0x149   :  { %v11739_v27 = vld [vmem:[#allocation7 + $0x5b8] ss:$48 sps:$4 sm:$0xff]  }
 0x14b   :  { %3205 = vmatpush1.bf16.msra.mxu1 %v11715_v34  ;;  %2819 = vmatpush1.bf16.msra.mxu0 %v11718_v35  ;;  %v11750_v34 = vld [vmem:[#allocation7 + $0x614] ss:$48 sps:$4 sm:$0xff]   ;;  %v12752_v35 = vpack.c.bf16 %v141_v26, %v138_v20  ;;  %v177_v20 = vld [vmem:[#allocation4 + $0x2c8] sm:$0xff] }
 0x14c   :  { %3206 = vmatprep.subr.bf16.mxu1 %v11723_v40  ;;  %2820 = vmatprep.subr.bf16.mxu0 %v11726_v41  ;;  %v144_v40 = vld [vmem:[#allocation4 + $0x1c0] sm:$0xff]  ;;  %v147_v41 = vld [vmem:[#allocation4 + $0x1d8] sm:$0xff] }
 0x14d   :  { %2310 = vmatmul.mubr.bf16.gmra.mrb[24].mxu0 %v12740_v42  ;;  %2696 = vmatmul.mubr.bf16.gmra.mrb[24].mxu1 %v12740_v42 }
 0x14e   :  { %2319 = vmatprep.mubr.bf16.mxu0 %v14863_v21  ;;  %2705 = vmatprep.mubr.bf16.mxu1 %v14863_v21 }
 0x14f   :  { %3207 = vmatpush1.bf16.msra.mxu1 %v11721_v43  ;;  %2821 = vmatpush1.bf16.msra.mxu0 %v11724_v47  ;;  %v12758_v43 = vpack.c.bf16 %v147_v41, %v144_v40  ;;  %v150_v47 = vld [vmem:[#allocation4 + $0x1f0] sm:$0xff]  ;;  %v11753_v41 = vld [vmem:[#allocation7 + $0x67c] ss:$48 sps:$4 sm:$0xff]  }
 0x150   :  { %3208 = vmatprep.subr.bf16.mxu1 %v11729_v48  ;;  %2822 = vmatprep.subr.bf16.mxu0 %v11732_v49  ;;  %v153_v48 = vld [vmem:[#allocation4 + $0x208] sm:$0xff]  ;;  %v11748_v40 = vld [vmem:[#allocation7 + $0x610] ss:$48 sps:$4 sm:$0xff]  }
 0x151   :  { %v12764_v49 = vpack.c.bf16 %v153_v48, %v150_v47  ;;  %v11756_v47 = vld [vmem:[#allocation7 + $0x674] ss:$48 sps:$4 sm:$0xff]   ;;  %v11751_v48 = vld [vmem:[#allocation7 + $0x678] ss:$48 sps:$4 sm:$0xff]  }
 0x153   :  { %3209 = vmatpush1.bf16.msra.mxu1 %v11727_v58  ;;  %2823 = vmatpush1.bf16.msra.mxu0 %v11730_v61  ;;  %v12770_v58 = vpack.c.bf16 %v159_v57, %v156_v56  ;;  %v162_v61 = vld [vmem:[#allocation4 + $0x250] sm:$0xff]  ;;  %v11759_v57 = vld [vmem:[#allocation7 + $0x6dc] ss:$48 sps:$4 sm:$0xff]  }
 0x154   :  { %3210 = vmatprep.subr.bf16.mxu1 %v11735_v62  ;;  %2824 = vmatprep.subr.bf16.mxu0 %v11738_v63  ;;  %v165_v62 = vld [vmem:[#allocation4 + $0x268] sm:$0xff]  ;;  %v11754_v56 = vld [vmem:[#allocation7 + $0x670] ss:$48 sps:$4 sm:$0xff]  }
 0x155   :  { %2320 = vmatmul.mubr.bf16.gmra.mrb[28].mxu0 %v12746_v5  ;;  %2706 = vmatmul.mubr.bf16.gmra.mrb[28].mxu1 %v12746_v5  ;;  %v12776_v63 = vpack.c.bf16 %v165_v62, %v162_v61  ;;  %v11762_v61 = vld [vmem:[#allocation7 + $0x6d4] ss:$48 sps:$4 sm:$0xff]   ;;  %v11757_v62 = vld [vmem:[#allocation7 + $0x6d8] ss:$48 sps:$4 sm:$0xff]  }
 0x156   :  { %2329 = vmatprep.mubr.bf16.mxu0 %v14863_v21  ;;  %2715 = vmatprep.mubr.bf16.mxu1 %v14863_v21 }
 0x157   :  { %3211 = vmatpush1.bf16.msra.mxu1 %v11733_v6  ;;  %2825 = vmatpush1.bf16.msra.mxu0 %v11736_v7  ;;  %v168_v6 = vld [vmem:[#allocation4 + $0x280] sm:$0xff]  ;;  %v171_v7 = vld [vmem:[#allocation4 + $0x298] sm:$0xff] }
 0x158   :  { %3212 = vmatprep.subr.bf16.mxu1 %v11741_v11  ;;  %2826 = vmatprep.subr.bf16.mxu0 %v11744_v18  ;;  %v12782_v11 = vpack.c.bf16 %v171_v7, %v168_v6  ;;  %v174_v18 = vld [vmem:[#allocation4 + $0x2b0] sm:$0xff]  ;;  %v11765_v7 = vld [vmem:[#allocation7 + $0x73c] ss:$48 sps:$4 sm:$0xff]  }
 0x159   :  { %v12788_v26 = vpack.c.bf16 %v177_v20, %v174_v18  ;;  %v11760_v6 = vld [vmem:[#allocation7 + $0x6d0] ss:$48 sps:$4 sm:$0xff]   ;;  %v11768_v18 = vld [vmem:[#allocation7 + $0x734] ss:$48 sps:$4 sm:$0xff]   ;;  %v11763_v20 = vld [vmem:[#allocation7 + $0x738] ss:$48 sps:$4 sm:$0xff]  }
 0x15b   :  { %3213 = vmatpush1.bf16.msra.mxu1 %v11739_v27  ;;  %2827 = vmatpush1.bf16.msra.mxu0 %v11742_v28  ;;  %v180_v27 = vld [vmem:[#allocation4 + $0x2e0] sm:$0xff]  ;;  %v183_v28 = vld [vmem:[#allocation4 + $0x2f8] sm:$0xff] }
 0x15c   :  { %3375 = vmatprep.subr.bf16.mxu1 %v11747_v33  ;;  %2989 = vmatprep.subr.bf16.mxu0 %v11750_v34  ;;  %v12794_v33 = vpack.c.bf16 %v183_v28, %v180_v27  ;;  %v11745_v34 = vld [vmem:[#allocation7 + $0x618] ss:$48 sps:$4 sm:$0xff]   ;;  %v11766_v27 = vld [vmem:[#allocation7 + $0x730] ss:$48 sps:$4 sm:$0xff]   ;;  %v11771_v28 = vld [vmem:[#allocation7 + $0x79c] ss:$48 sps:$4 sm:$0xff]  }
 0x15d   :  { %2330 = vmatmul.mubr.bf16.gmra.mrb[32].mxu0 %v12752_v35  ;;  %2716 = vmatmul.mubr.bf16.gmra.mrb[32].mxu1 %v12752_v35 }
 0x15e   :  { %2339 = vmatprep.mubr.bf16.mxu0 %v14863_v21  ;;  %2725 = vmatprep.mubr.bf16.mxu1 %v14863_v21 }
 0x165   :  { %2340 = vmatmul.mubr.bf16.gmra.mrb[36].mxu0 %v12758_v43  ;;  %2726 = vmatmul.mubr.bf16.gmra.mrb[36].mxu1 %v12758_v43 }
 0x166   :  { %2349 = vmatprep.mubr.bf16.mxu0 %v14863_v21  ;;  %2735 = vmatprep.mubr.bf16.mxu1 %v14863_v21 }
 0x16d   :  { %2350 = vmatmul.mubr.bf16.gmra.mrb[40].mxu0 %v12764_v49  ;;  %2736 = vmatmul.mubr.bf16.gmra.mrb[40].mxu1 %v12764_v49 }
 0x16e   :  { %2359 = vmatprep.mubr.bf16.mxu0 %v14863_v21  ;;  %2745 = vmatprep.mubr.bf16.mxu1 %v14863_v21 }
 0x175   :  { %2360 = vmatmul.mubr.bf16.gmra.mrb[44].mxu0 %v12770_v58  ;;  %2746 = vmatmul.mubr.bf16.gmra.mrb[44].mxu1 %v12770_v58 }
 0x176   :  { %2369 = vmatprep.mubr.bf16.mxu0 %v14863_v21  ;;  %2755 = vmatprep.mubr.bf16.mxu1 %v14863_v21 }
 0x17d   :  { %2370 = vmatmul.mubr.bf16.gmra.mrb[48].mxu0 %v12776_v63  ;;  %2756 = vmatmul.mubr.bf16.gmra.mrb[48].mxu1 %v12776_v63 }
 0x17e   :  { %2379 = vmatprep.mubr.bf16.mxu0 %v14863_v21  ;;  %2765 = vmatprep.mubr.bf16.mxu1 %v14863_v21 }
 0x185   :  { %2380 = vmatmul.mubr.bf16.gmra.mrb[52].mxu0 %v12782_v11  ;;  %2766 = vmatmul.mubr.bf16.gmra.mrb[52].mxu1 %v12782_v11 }
 0x186   :  { %2389 = vmatprep.mubr.bf16.mxu0 %v14863_v21  ;;  %2775 = vmatprep.mubr.bf16.mxu1 %v14863_v21 }
 0x18d   :  { %2390 = vmatmul.mubr.bf16.gmra.mrb[56].mxu0 %v12788_v26  ;;  %2776 = vmatmul.mubr.bf16.gmra.mrb[56].mxu1 %v12788_v26 }
 0x18e   :  { %2399 = vmatprep.mubr.bf16.mxu0 %v14863_v21  ;;  %2785 = vmatprep.mubr.bf16.mxu1 %v14863_v21 }
 0x195   :  { %2400 = vmatmul.mubr.bf16.gmra.mrb[60].mxu0 %v12794_v33  ;;  %2786 = vmatmul.mubr.bf16.gmra.mrb[60].mxu1 %v12794_v33 }
 0x196   :  { %2828 = vmatprep.mubr.bf16.mxu0 %v12574_v51  ;;  %3214 = vmatprep.mubr.bf16.mxu1 %v12574_v51 }
 0x19d   :  { %2829 = vmatmul.mubr.bf16.vlgmr.msra.gmra.mrb[64].mxu0 %v12578_v9  ;;  %3215 = vmatmul.mubr.bf16.vlgmr.msra.gmra.mrb[64].mxu1 %v12578_v9 }
 0x19e   :  { %3376 = vmatpush1.bf16.msra.mxu1 %v11745_v34  ;;  %2990 = vmatpush1.bf16.msra.mxu0 %v11748_v40  ;;  %v11774_v34 = vld [vmem:[#allocation7 + $0x794] ss:$48 sps:$4 sm:$0xff]   ;;  %v11769_v40 = vld [vmem:[#allocation7 + $0x798] ss:$48 sps:$4 sm:$0xff]  }
 0x19f   :  { %2838 = vmatprep.mubr.bf16.mxu0 %v12580_v12  ;;  %3224 = vmatprep.mubr.bf16.mxu1 %v12580_v12 }
 0x1a0   :  { %3377 = vmatprep.subr.bf16.mxu1 %v11753_v41  ;;  %2991 = vmatprep.subr.bf16.mxu0 %v11756_v47  ;;  %v11772_v41 = vld [vmem:[#allocation7 + $0x790] ss:$48 sps:$4 sm:$0xff]   ;;  %v11777_v47 = vld [vmem:[#allocation7 + $0x7fc] ss:$48 sps:$4 sm:$0xff]  }
 0x1a2   :  { %3378 = vmatpush1.bf16.msra.mxu1 %v11751_v48  ;;  %2992 = vmatpush1.bf16.msra.mxu0 %v11754_v56  ;;  %v11780_v48 = vld [vmem:[#allocation7 + $0x7f4] ss:$48 sps:$4 sm:$0xff]   ;;  %v11775_v56 = vld [vmem:[#allocation7 + $0x7f8] ss:$48 sps:$4 sm:$0xff]  }
 0x1a3   :  { %3379 = vmatprep.subr.bf16.mxu1 %v11759_v57  ;;  %2993 = vmatprep.subr.bf16.mxu0 %v11762_v61  ;;  %v11778_v57 = vld [vmem:[#allocation7 + $0x7f0] ss:$48 sps:$4 sm:$0xff]   ;;  %v11783_v61 = vld [vmem:[#allocation7 + $0x85c] ss:$48 sps:$4 sm:$0xff]  }
 0x1a5   :  { %2839 = vmatmul.mubr.bf16.gmra.mrb[68].mxu0 %v12586_v23  ;;  %3225 = vmatmul.mubr.bf16.gmra.mrb[68].mxu1 %v12586_v23 }
 0x1a6   :  { %2848 = vmatprep.mubr.bf16.mxu0 %v12588_v24  ;;  %3234 = vmatprep.mubr.bf16.mxu1 %v12588_v24 }
 0x1a7   :  { %3380 = vmatpush1.bf16.msra.mxu1 %v11757_v62  ;;  %2994 = vmatpush1.bf16.msra.mxu0 %v11760_v6  ;;  %v11786_v62 = vld [vmem:[#allocation7 + $0x854] ss:$48 sps:$4 sm:$0xff]   ;;  %v11781_v6 = vld [vmem:[#allocation7 + $0x858] ss:$48 sps:$4 sm:$0xff]  }
 0x1a8   :  { %3381 = vmatprep.subr.bf16.mxu1 %v11765_v7  ;;  %2995 = vmatprep.subr.bf16.mxu0 %v11768_v18  ;;  %v11784_v7 = vld [vmem:[#allocation7 + $0x850] ss:$48 sps:$4 sm:$0xff]   ;;  %v11789_v18 = vld [vmem:[#allocation7 + $0x8bc] ss:$48 sps:$4 sm:$0xff]  }
 0x1ab   :  { %3382 = vmatpush1.bf16.msra.mxu1 %v11763_v20  ;;  %2996 = vmatpush1.bf16.msra.mxu0 %v11766_v27  ;;  %v11792_v20 = vld [vmem:[#allocation7 + $0x8b4] ss:$48 sps:$4 sm:$0xff]   ;;  %v11787_v27 = vld [vmem:[#allocation7 + $0x8b8] ss:$48 sps:$4 sm:$0xff]  }
 0x1ac   :  { %3383 = vmatprep.subr.bf16.mxu1 %v11771_v28  ;;  %2997 = vmatprep.subr.bf16.mxu0 %v11774_v34  ;;  %v11790_v28 = vld [vmem:[#allocation7 + $0x8b0] ss:$48 sps:$4 sm:$0xff]   ;;  %v11795_v34 = vld [vmem:[#allocation7 + $0x2c] ss:$48 sps:$4 sm:$0xff]  }
 0x1ad   :  { %2849 = vmatmul.mubr.bf16.gmra.mrb[72].mxu0 %v12594_v37  ;;  %3235 = vmatmul.mubr.bf16.gmra.mrb[72].mxu1 %v12594_v37 }
 0x1ae   :  { %2858 = vmatprep.mubr.bf16.mxu0 %v12596_v38  ;;  %3244 = vmatprep.mubr.bf16.mxu1 %v12596_v38 }
 0x1af   :  { %3384 = vmatpush1.bf16.msra.mxu1 %v11769_v40  ;;  %2998 = vmatpush1.bf16.msra.mxu0 %v11772_v41  ;;  %v11798_v40 = vld [vmem:[#allocation7 + $0x24] ss:$48 sps:$4 sm:$0xff]   ;;  %v524_v41 = vlaneseq }
 0x1b0   :  { %3385 = vmatprep.subr.bf16.mxu1 %v11777_v47  ;;  %2999 = vmatprep.subr.bf16.mxu0 %v11780_v48 }
 0x1b1   :  { %v12838_v47 = vshrl.u32 %v524_v41, 7 }
 0x1b3   :  { %3386 = vmatpush1.bf16.msra.mxu1 %v11775_v56  ;;  %3000 = vmatpush1.bf16.msra.mxu0 %v11778_v57  ;;  %15059 = vst [vmem:[#allocation31_spill] sm:$0xff] %v12838_v47  ;;  %v12843_v48 = vsub.s32 0, %v12838_v47  ;;  %v12846_v56 = vsub.s32 2, %v12838_v47  ;;  %v520_v57 = vld [vmem:[#allocation9] sm:$0xff] }
 0x1b4   :  { %3387 = vmatprep.subr.bf16.mxu1 %v11783_v61  ;;  %3001 = vmatprep.subr.bf16.mxu0 %v11786_v62  ;;  %v12849_v61 = vsub.s32 1, %v12838_v47  ;;  %v14873_v62 = vsub.s32 3, %v12838_v47 }
 0x1b5   :  { %2859 = vmatmul.mubr.bf16.gmra.mrb[76].mxu0 %v12602_v52  ;;  %3245 = vmatmul.mubr.bf16.gmra.mrb[76].mxu1 %v12602_v52  ;;  %15060 = vst [vmem:[#allocation32_spill] sm:$0xff] %v12843_v48  ;;  %15061 = vst [vmem:[#allocation33_spill] sm:$0xff] %v12846_v56 }
 0x1b6   :  { %2868 = vmatprep.mubr.bf16.mxu0 %v12604_v53  ;;  %3254 = vmatprep.mubr.bf16.mxu1 %v12604_v53  ;;  %15062 = vst [vmem:[#allocation34_spill] sm:$0xff] %v12849_v61 }
 0x1b7   :  { %3388 = vmatpush1.bf16.msra.mxu1 %v11781_v6  ;;  %3002 = vmatpush1.bf16.msra.mxu0 %v11784_v7  ;;  %v12855_v6 = vrot.slane %v520_v57, %v12843_v48  ;;  %v12858_v7 = vrot.slane %v520_v57, %v12846_v56 }
 0x1b8   :  { %3389 = vmatprep.subr.bf16.mxu1 %v11789_v18  ;;  %3003 = vmatprep.subr.bf16.mxu0 %v11792_v20  ;;  %v12861_v18 = vrot.slane %v520_v57, %v12849_v61  ;;  %v12865_v20 = vrot.slane %v520_v57, %v14873_v62 }
 0x1bb   :  { %3390 = vmatpush1.bf16.msra.mxu1 %v11787_v27  ;;  %3004 = vmatpush1.bf16.msra.mxu0 %v11790_v28 }
 0x1bc   :  { %3954 = vmatprep.subr.bf16.mxu1 %v11795_v34  ;;  %3568 = vmatprep.subr.bf16.mxu0 %v11798_v40 }
 0x1bd   :  { %2869 = vmatmul.mubr.bf16.gmra.mrb[80].mxu0 %v12610_v2  ;;  %3255 = vmatmul.mubr.bf16.gmra.mrb[80].mxu1 %v12610_v2 }
 0x1be   :  { %2878 = vmatprep.mubr.bf16.mxu0 %v12612_v3  ;;  %3264 = vmatprep.mubr.bf16.mxu1 %v12612_v3 }
 0x1c5   :  { %2879 = vmatmul.mubr.bf16.gmra.mrb[84].mxu0 %v12618_v8  ;;  %3265 = vmatmul.mubr.bf16.gmra.mrb[84].mxu1 %v12618_v8 }
 0x1c6   :  { %2888 = vmatprep.mubr.bf16.mxu0 %v12620_v10  ;;  %3274 = vmatprep.mubr.bf16.mxu1 %v12620_v10 }
 0x1cd   :  { %2889 = vmatmul.mubr.bf16.gmra.mrb[88].mxu0 %v12626_v16  ;;  %3275 = vmatmul.mubr.bf16.gmra.mrb[88].mxu1 %v12626_v16 }
 0x1ce   :  { %2898 = vmatprep.mubr.bf16.mxu0 %v12628_v17  ;;  %3284 = vmatprep.mubr.bf16.mxu1 %v12628_v17 }
 0x1d5   :  { %2899 = vmatmul.mubr.bf16.gmra.mrb[92].mxu0 %v12634_v22  ;;  %3285 = vmatmul.mubr.bf16.gmra.mrb[92].mxu1 %v12634_v22 }
 0x1d6   :  { %2908 = vmatprep.mubr.bf16.mxu0 %v12636_v25  ;;  %3294 = vmatprep.mubr.bf16.mxu1 %v12636_v25 }
 0x1dd   :  { %2909 = vmatmul.mubr.bf16.gmra.mrb[96].mxu0 %v12642_v30  ;;  %3295 = vmatmul.mubr.bf16.gmra.mrb[96].mxu1 %v12642_v30 }
 0x1de   :  { %2918 = vmatprep.mubr.bf16.mxu0 %v12644_v31  ;;  %3304 = vmatprep.mubr.bf16.mxu1 %v12644_v31 }
 0x1e5   :  { %2919 = vmatmul.mubr.bf16.gmra.mrb[100].mxu0 %v12650_v36  ;;  %3305 = vmatmul.mubr.bf16.gmra.mrb[100].mxu1 %v12650_v36 }
 0x1e6   :  { %2928 = vmatprep.mubr.bf16.mxu0 %v12652_v39  ;;  %3314 = vmatprep.mubr.bf16.mxu1 %v12652_v39 }
 0x1ed   :  { %2929 = vmatmul.mubr.bf16.gmra.mrb[104].mxu0 %v12658_v44  ;;  %3315 = vmatmul.mubr.bf16.gmra.mrb[104].mxu1 %v12658_v44 }
 0x1ee   :  { %2938 = vmatprep.mubr.bf16.mxu0 %v12660_v45  ;;  %3324 = vmatprep.mubr.bf16.mxu1 %v12660_v45 }
 0x1f0   :  { %v2251_v27 = vpop.f32.mrb[0].mxu0  ;;  %v2637_v28 = vpop.f32.mrb[0].mxu1 }
 0x1f1   :  { %v10340_v34 = vadd.f32 %v2251_v27, %v12855_v6  ;;  %v10404_v40 = vadd.f32 %v2637_v28, %v12858_v7  ;;  %v2253_v41 = vpop.f32.mrb[1].mxu0  ;;  %v2639_v21 = vpop.f32.mrb[1].mxu1 }
 0x1f2   :  { %v10341_v56 = vadd.f32 %v2253_v41, %v12861_v18  ;;  %v10405_v61 = vadd.f32 %v2639_v21, %v12865_v20  ;;  %v2255_v48 = vpop.f32.mrb[2].mxu0  ;;  %v2641_v44 = vpop.f32.mrb[2].mxu1 }
 0x1f3   :  { %v10342_v57 = vadd.f32 %v2255_v48, %v12855_v6  ;;  %v10406_v62 = vadd.f32 %v2641_v44, %v12858_v7  ;;  %v2257_v47 = vpop.f32.mrb[3].mxu0  ;;  %v2643_v45 = vpop.f32.mrb[3].mxu1  ;;  %v4340_v36 = vmax.f32 %v10340_v34, 0.0  ;;  %v4342_v28 = vmax.f32 %v10404_v40, 0.0 }
 0x1f4   :  { %v10343_v39 = vadd.f32 %v2257_v47, %v12861_v18  ;;  %v10407_v27 = vadd.f32 %v2643_v45, %v12865_v20  ;;  %v4341_v21 = vmax.f32 %v10341_v56, 0.0  ;;  %v4343_v41 = vmax.f32 %v10405_v61, 0.0 }
 0x1f5   :  { %v4352_v31 = vmax.f32 %v10342_v57, 0.0  ;;  %v4354_v30 = vmax.f32 %v10406_v62, 0.0  ;;  %2939 = vmatmul.mubr.bf16.gmra.mrb[108].mxu0 %v12666_v50  ;;  %3325 = vmatmul.mubr.bf16.gmra.mrb[108].mxu1 %v12666_v50 }
 0x1f6   :  { %v4353_v25 = vmax.f32 %v10343_v39, 0.0  ;;  %v4355_v48 = vmax.f32 %v10407_v27, 0.0  ;;  %2948 = vmatprep.mubr.bf16.mxu0 %v12668_v54  ;;  %3334 = vmatprep.mubr.bf16.mxu1 %v12668_v54 }
 0x1f7   :  { %v12881_v44 = vpack.c.bf16 %v4352_v31, %v4340_v36  ;;  %v12883_v47 = vpack.c.bf16 %v4354_v30, %v4342_v28 }
 0x1f8   :  { %v12885_v45 = vpack.c.bf16 %v4353_v25, %v4341_v21  ;;  %v2261_v34 = vpop.f32.mrb[4].mxu0  ;;  %v2647_v62 = vpop.f32.mrb[4].mxu1  ;;  %v12887_v40 = vpack.c.bf16 %v4355_v48, %v4343_v41 }
 0x1f9   :  { %15063 = vst [vmem:[#allocation35_spill] sm:$0xff] %v12881_v44  ;;  %15064 = vst [vmem:[#allocation36_spill] sm:$0xff] %v12883_v47  ;;  %v10344_v57 = vadd.f32 %v2261_v34, %v12855_v6  ;;  %v10408_v56 = vadd.f32 %v2647_v62, %v12858_v7  ;;  %v2263_v39 = vpop.f32.mrb[5].mxu0  ;;  %v2649_v61 = vpop.f32.mrb[5].mxu1 }
 0x1fa   :  { %15065 = vst [vmem:[#allocation37_spill] sm:$0xff] %v12885_v45  ;;  %15066 = vst [vmem:[#allocation38_spill] sm:$0xff] %v12887_v40  ;;  %v10345_v27 = vadd.f32 %v2263_v39, %v12861_v18  ;;  %v10409_v54 = vadd.f32 %v2649_v61, %v12865_v20  ;;  %v2265_v31 = vpop.f32.mrb[6].mxu0  ;;  %v2651_v36 = vpop.f32.mrb[6].mxu1 }
 0x1fb   :  { %v10346_v30 = vadd.f32 %v2265_v31, %v12855_v6  ;;  %v10410_v25 = vadd.f32 %v2651_v36, %v12858_v7  ;;  %v2267_v28 = vpop.f32.mrb[7].mxu0  ;;  %v2653_v21 = vpop.f32.mrb[7].mxu1  ;;  %v4364_v34 = vmax.f32 %v10344_v57, 0.0  ;;  %v4366_v62 = vmax.f32 %v10408_v56, 0.0 }
 0x1fc   :  { %v10347_v41 = vadd.f32 %v2267_v28, %v12861_v18  ;;  %v10411_v48 = vadd.f32 %v2653_v21, %v12865_v20  ;;  %v4365_v39 = vmax.f32 %v10345_v27, 0.0  ;;  %v4367_v61 = vmax.f32 %v10409_v54, 0.0 }
 0x1fd   :  { %v4376_v47 = vmax.f32 %v10346_v30, 0.0  ;;  %v4378_v40 = vmax.f32 %v10410_v25, 0.0  ;;  %2949 = vmatmul.mubr.bf16.gmra.mrb[112].mxu0 %v12674_v59  ;;  %3335 = vmatmul.mubr.bf16.gmra.mrb[112].mxu1 %v12674_v59 }
 0x1fe   :  { %v4377_v44 = vmax.f32 %v10347_v41, 0.0  ;;  %v4379_v31 = vmax.f32 %v10411_v48, 0.0  ;;  %2958 = vmatprep.mubr.bf16.mxu0 %v12676_v60  ;;  %3344 = vmatprep.mubr.bf16.mxu1 %v12676_v60 }
 0x1ff   :  { %v12901_v36 = vpack.c.bf16 %v4376_v47, %v4364_v34  ;;  %v12903_v28 = vpack.c.bf16 %v4378_v40, %v4366_v62 }
 0x200   :  { %v12905_v57 = vpack.c.bf16 %v4377_v44, %v4365_v39  ;;  %v2271_v56 = vpop.f32.mrb[8].mxu0  ;;  %v2657_v30 = vpop.f32.mrb[8].mxu1  ;;  %v12907_v25 = vpack.c.bf16 %v4379_v31, %v4367_v61 }
 0x201   :  { %15067 = vst [vmem:[#allocation39_spill] sm:$0xff] %v12901_v36  ;;  %15068 = vst [vmem:[#allocation40_spill] sm:$0xff] %v12903_v28  ;;  %v10348_v21 = vadd.f32 %v2271_v56, %v12855_v6  ;;  %v10412_v54 = vadd.f32 %v2657_v30, %v12858_v7  ;;  %v2273_v27 = vpop.f32.mrb[9].mxu0  ;;  %v2659_v41 = vpop.f32.mrb[9].mxu1 }
 0x202   :  { %15069 = vst [vmem:[#allocation41_spill] sm:$0xff] %v12905_v57  ;;  %15070 = vst [vmem:[#allocation42_spill] sm:$0xff] %v12907_v25  ;;  %v10349_v48 = vadd.f32 %v2273_v27, %v12861_v18  ;;  %v10413_v45 = vadd.f32 %v2659_v41, %v12865_v20  ;;  %v2275_v47 = vpop.f32.mrb[10].mxu0  ;;  %v2661_v34 = vpop.f32.mrb[10].mxu1 }
 0x203   :  { %v10350_v40 = vadd.f32 %v2275_v47, %v12855_v6  ;;  %v10414_v44 = vadd.f32 %v2661_v34, %v12858_v7  ;;  %v2277_v62 = vpop.f32.mrb[11].mxu0  ;;  %v2663_v39 = vpop.f32.mrb[11].mxu1  ;;  %v4388_v56 = vmax.f32 %v10348_v21, 0.0  ;;  %v4390_v30 = vmax.f32 %v10412_v54, 0.0 }
 0x204   :  { %v10351_v61 = vadd.f32 %v2277_v62, %v12861_v18  ;;  %v10415_v31 = vadd.f32 %v2663_v39, %v12865_v20  ;;  %v4389_v27 = vmax.f32 %v10349_v48, 0.0  ;;  %v4391_v41 = vmax.f32 %v10413_v45, 0.0 }
 0x205   :  { %v4400_v28 = vmax.f32 %v10350_v40, 0.0  ;;  %v4402_v25 = vmax.f32 %v10414_v44, 0.0  ;;  %2959 = vmatmul.mubr.bf16.gmra.mrb[116].mxu0 %v12682_v1  ;;  %3345 = vmatmul.mubr.bf16.gmra.mrb[116].mxu1 %v12682_v1 }
 0x206   :  { %v4401_v36 = vmax.f32 %v10351_v61, 0.0  ;;  %v4403_v47 = vmax.f32 %v10415_v31, 0.0  ;;  %2968 = vmatprep.mubr.bf16.mxu0 %v12684_v4  ;;  %3354 = vmatprep.mubr.bf16.mxu1 %v12684_v4 }
 0x207   :  { %v12921_v34 = vpack.c.bf16 %v4400_v28, %v4388_v56  ;;  %v12923_v62 = vpack.c.bf16 %v4402_v25, %v4390_v30 }
 0x208   :  { %v12925_v21 = vpack.c.bf16 %v4401_v36, %v4389_v27  ;;  %v2281_v54 = vpop.f32.mrb[12].mxu0  ;;  %v2667_v40 = vpop.f32.mrb[12].mxu1  ;;  %v12927_v44 = vpack.c.bf16 %v4403_v47, %v4391_v41 }
 0x209   :  { %15071 = vst [vmem:[#allocation43_spill] sm:$0xff] %v12921_v34  ;;  %15072 = vst [vmem:[#allocation44_spill] sm:$0xff] %v12923_v62  ;;  %v10352_v39 = vadd.f32 %v2281_v54, %v12855_v6  ;;  %v10416_v45 = vadd.f32 %v2667_v40, %v12858_v7  ;;  %v2283_v48 = vpop.f32.mrb[13].mxu0  ;;  %v2669_v61 = vpop.f32.mrb[13].mxu1 }
 0x20a   :  { %15073 = vst [vmem:[#allocation45_spill] sm:$0xff] %v12925_v21  ;;  %15074 = vst [vmem:[#allocation46_spill] sm:$0xff] %v12927_v44  ;;  %v10353_v31 = vadd.f32 %v2283_v48, %v12861_v18  ;;  %v10417_v57 = vadd.f32 %v2669_v61, %v12865_v20  ;;  %v2285_v28 = vpop.f32.mrb[14].mxu0  ;;  %v2671_v56 = vpop.f32.mrb[14].mxu1 }
 0x20b   :  { %v10354_v25 = vadd.f32 %v2285_v28, %v12855_v6  ;;  %v10418_v36 = vadd.f32 %v2671_v56, %v12858_v7  ;;  %v2287_v30 = vpop.f32.mrb[15].mxu0  ;;  %v2673_v27 = vpop.f32.mrb[15].mxu1  ;;  %v4412_v54 = vmax.f32 %v10352_v39, 0.0  ;;  %v4414_v40 = vmax.f32 %v10416_v45, 0.0 }
 0x20c   :  { %v10355_v41 = vadd.f32 %v2287_v30, %v12861_v18  ;;  %v10419_v47 = vadd.f32 %v2673_v27, %v12865_v20  ;;  %v4413_v48 = vmax.f32 %v10353_v31, 0.0  ;;  %v4415_v61 = vmax.f32 %v10417_v57, 0.0 }
 0x20d   :  { %v4424_v62 = vmax.f32 %v10354_v25, 0.0  ;;  %v4426_v44 = vmax.f32 %v10418_v36, 0.0  ;;  %2969 = vmatmul.mubr.bf16.gmra.mrb[120].mxu0 %v12690_v13  ;;  %3355 = vmatmul.mubr.bf16.gmra.mrb[120].mxu1 %v12690_v13 }
 0x20e   :  { %v4425_v34 = vmax.f32 %v10355_v41, 0.0  ;;  %v4427_v28 = vmax.f32 %v10419_v47, 0.0  ;;  %2978 = vmatprep.mubr.bf16.mxu0 %v12692_v14  ;;  %3364 = vmatprep.mubr.bf16.mxu1 %v12692_v14  ;;  %v11799_v14 = vld [vmem:[#allocation7 + $0x88] ss:$48 sps:$4 sm:$0xff]  }
 0x20f   :  { %v12941_v56 = vpack.c.bf16 %v4424_v62, %v4412_v54  ;;  %v12943_v30 = vpack.c.bf16 %v4426_v44, %v4414_v40 }
 0x210   :  { %v12945_v39 = vpack.c.bf16 %v4425_v34, %v4413_v48  ;;  %v2291_v45 = vpop.f32.mrb[16].mxu0  ;;  %v2677_v25 = vpop.f32.mrb[16].mxu1  ;;  %v12947_v36 = vpack.c.bf16 %v4427_v28, %v4415_v61 }
 0x211   :  { %15075 = vst [vmem:[#allocation47_spill] sm:$0xff] %v12941_v56  ;;  %15076 = vst [vmem:[#allocation48_spill] sm:$0xff] %v12943_v30  ;;  %v10356_v27 = vadd.f32 %v2291_v45, %v12855_v6  ;;  %v10420_v57 = vadd.f32 %v2677_v25, %v12858_v7  ;;  %v2293_v31 = vpop.f32.mrb[17].mxu0  ;;  %v2679_v41 = vpop.f32.mrb[17].mxu1 }
 0x212   :  { %15077 = vst [vmem:[#allocation49_spill] sm:$0xff] %v12945_v39  ;;  %15078 = vst [vmem:[#allocation50_spill] sm:$0xff] %v12947_v36  ;;  %v10357_v47 = vadd.f32 %v2293_v31, %v12861_v18  ;;  %v10421_v21 = vadd.f32 %v2679_v41, %v12865_v20  ;;  %v2295_v62 = vpop.f32.mrb[18].mxu0  ;;  %v2681_v54 = vpop.f32.mrb[18].mxu1  ;;  %v15079_v39 = vmov 0  }
 0x213   :  { %v10358_v44 = vadd.f32 %v2295_v62, %v12855_v6  ;;  %v10422_v34 = vadd.f32 %v2681_v54, %v12858_v7  ;;  %v2297_v40 = vpop.f32.mrb[19].mxu0  ;;  %v2683_v48 = vpop.f32.mrb[19].mxu1  ;;  %v4436_v45 = vmax.f32 %v10356_v27, 0.0  ;;  %v4438_v25 = vmax.f32 %v10420_v57, 0.0 }
 0x214   :  { %v10359_v61 = vadd.f32 %v2297_v40, %v12861_v18  ;;  %v10423_v28 = vadd.f32 %v2683_v48, %v12865_v20  ;;  %v4437_v31 = vmax.f32 %v10357_v47, 0.0  ;;  %v4439_v41 = vmax.f32 %v10421_v21, 0.0 }
 0x215   :  { %v4448_v30 = vmax.f32 %v10358_v44, 0.0  ;;  %v4450_v36 = vmax.f32 %v10422_v34, 0.0  ;;  %2979 = vmatmul.mubr.bf16.gmra.mrb[124].mxu0 %v12698_v19  ;;  %3365 = vmatmul.mubr.bf16.gmra.mrb[124].mxu1 %v12698_v19 }
 0x216   :  { %v4449_v56 = vmax.f32 %v10359_v61, 0.0  ;;  %v4451_v62 = vmax.f32 %v10423_v28, 0.0  ;;  %3021 = vmatprep.mubr.bf16.mxu0 %v15079_v39  ;;  %3407 = vmatprep.mubr.bf16.mxu1 %v15079_v39 }
 0x217   :  { %v12961_v54 = vpack.c.bf16 %v4448_v30, %v4436_v45  ;;  %v12963_v40 = vpack.c.bf16 %v4450_v36, %v4438_v25  ;;  %v11793_v36 = vld [vmem:[#allocation7 + $0x28] ss:$48 sps:$4 sm:$0xff]   ;;  %v11796_v25 = vld [vmem:[#allocation7 + $0x20] ss:$48 sps:$4 sm:$0xff]  }
 0x218   :  { %v12965_v27 = vpack.c.bf16 %v4449_v56, %v4437_v31  ;;  %v2301_v57 = vpop.f32.mrb[20].mxu0  ;;  %v2687_v44 = vpop.f32.mrb[20].mxu1  ;;  %v12967_v34 = vpack.c.bf16 %v4451_v62, %v4439_v41 }
 0x219   :  { %15080 = vst [vmem:[#allocation51_spill] sm:$0xff] %v12961_v54  ;;  %15081 = vst [vmem:[#allocation52_spill] sm:$0xff] %v12963_v40  ;;  %v10360_v48 = vadd.f32 %v2301_v57, %v12855_v6  ;;  %v10424_v21 = vadd.f32 %v2687_v44, %v12858_v7  ;;  %v2303_v47 = vpop.f32.mrb[21].mxu0  ;;  %v2689_v61 = vpop.f32.mrb[21].mxu1  ;;  %v11801_v40 = vld [vmem:[#allocation7 + $0x8c] ss:$48 sps:$4 sm:$0xff]  }
 0x21a   :  { %15082 = vst [vmem:[#allocation53_spill] sm:$0xff] %v12965_v27  ;;  %15083 = vst [vmem:[#allocation54_spill] sm:$0xff] %v12967_v34  ;;  %v10361_v28 = vadd.f32 %v2303_v47, %v12861_v18  ;;  %v10425_v19 = vadd.f32 %v2689_v61, %v12865_v20  ;;  %v2305_v30 = vpop.f32.mrb[22].mxu0  ;;  %v2691_v45 = vpop.f32.mrb[22].mxu1  ;;  %v11804_v34 = vld [vmem:[#allocation7 + $0x84] ss:$48 sps:$4 sm:$0xff]  }
 0x21b   :  { %v10362_v56 = vadd.f32 %v2305_v30, %v12855_v6  ;;  %v10426_v31 = vadd.f32 %v2691_v45, %v12858_v7  ;;  %v2307_v41 = vpop.f32.mrb[23].mxu0  ;;  %v2693_v62 = vpop.f32.mrb[23].mxu1  ;;  %v4460_v54 = vmax.f32 %v10360_v48, 0.0  ;;  %v4462_v47 = vmax.f32 %v10424_v21, 0.0  ;;  %v11807_v48 = vld [vmem:[#allocation7 + $0xec] ss:$48 sps:$4 sm:$0xff]  }
 0x21c   :  { %v10363_v57 = vadd.f32 %v2307_v41, %v12861_v18  ;;  %v10427_v44 = vadd.f32 %v2693_v62, %v12865_v20  ;;  %v4461_v30 = vmax.f32 %v10361_v28, 0.0  ;;  %v4463_v13 = vmax.f32 %v10425_v19, 0.0  ;;  %v11802_v41 = vld [vmem:[#allocation7 + $0x80] ss:$48 sps:$4 sm:$0xff]   ;;  %v11810_v21 = vld [vmem:[#allocation7 + $0xe4] ss:$48 sps:$4 sm:$0xff]  }
 0x21d   :  { %v4472_v27 = vmax.f32 %v10362_v56, 0.0  ;;  %v4474_v61 = vmax.f32 %v10426_v31, 0.0  ;;  %3022 = vmatmul.mubr.bf16.vlgmr.msra.gmra.mrb[64].mxu0 %v12704_v29  ;;  %3408 = vmatmul.mubr.bf16.vlgmr.msra.gmra.mrb[64].mxu1 %v12704_v29 }
 0x21e   :  { %v4473_v45 = vmax.f32 %v10363_v57, 0.0  ;;  %v4475_v4 = vmax.f32 %v10427_v44, 0.0  ;;  %3955 = vmatpush1.bf16.msra.mxu1 %v11793_v36  ;;  %3569 = vmatpush1.bf16.msra.mxu0 %v11796_v25 }
 0x21f   :  { %v12979_v1 = vpack.c.bf16 %v4472_v27, %v4460_v54  ;;  %3031 = vmatprep.mubr.bf16.mxu0 %v15079_v39  ;;  %3417 = vmatprep.mubr.bf16.mxu1 %v15079_v39  ;;  %v12983_v56 = vpack.c.bf16 %v4474_v61, %v4462_v47 }
 0x220   :  { %v12985_v31 = vpack.c.bf16 %v4473_v45, %v4461_v30  ;;  %v2311_v62 = vpop.f32.mrb[24].mxu0  ;;  %v2697_v28 = vpop.f32.mrb[24].mxu1  ;;  %3956 = vmatprep.subr.bf16.mxu1 %v11801_v40  ;;  %3570 = vmatprep.subr.bf16.mxu0 %v11804_v34  ;;  %v12987_v19 = vpack.c.bf16 %v4475_v4, %v4463_v13  ;;  %v11805_v34 = vld [vmem:[#allocation7 + $0xe8] ss:$48 sps:$4 sm:$0xff]   ;;  %v11808_v45 = vld [vmem:[#allocation7 + $0xe0] ss:$48 sps:$4 sm:$0xff]  }
 0x221   :  { %15084 = vst [vmem:[#allocation55_spill] sm:$0xff] %v12979_v1  ;;  %15085 = vst [vmem:[#allocation56_spill] sm:$0xff] %v12983_v56  ;;  %v10364_v36 = vadd.f32 %v2311_v62, %v12855_v6  ;;  %v10428_v54 = vadd.f32 %v2697_v28, %v12858_v7  ;;  %v2313_v27 = vpop.f32.mrb[25].mxu0  ;;  %v2699_v25 = vpop.f32.mrb[25].mxu1 }
 0x222   :  { %15086 = vst [vmem:[#allocation57_spill] sm:$0xff] %v12985_v31  ;;  %15087 = vst [vmem:[#allocation58_spill] sm:$0xff] %v12987_v19  ;;  %v10365_v57 = vadd.f32 %v2313_v27, %v12861_v18  ;;  %v10429_v44 = vadd.f32 %v2699_v25, %v12865_v20  ;;  %v2315_v47 = vpop.f32.mrb[26].mxu0  ;;  %v2701_v61 = vpop.f32.mrb[26].mxu1  ;;  %3957 = vmatpush1.bf16.msra.mxu1 %v11799_v14  ;;  %3571 = vmatpush1.bf16.msra.mxu0 %v11802_v41  ;;  %v11813_v27 = vld [vmem:[#allocation7 + $0x14c] ss:$48 sps:$4 sm:$0xff]  }
 0x223   :  { %v10366_v30 = vadd.f32 %v2315_v47, %v12855_v6  ;;  %v10430_v40 = vadd.f32 %v2701_v61, %v12858_v7  ;;  %v2317_v4 = vpop.f32.mrb[27].mxu0  ;;  %v2703_v13 = vpop.f32.mrb[27].mxu1  ;;  %3958 = vmatprep.subr.bf16.mxu1 %v11807_v48  ;;  %3572 = vmatprep.subr.bf16.mxu0 %v11810_v21  ;;  %v11816_v25 = vld [vmem:[#allocation7 + $0x144] ss:$48 sps:$4 sm:$0xff]   ;;  %v4484_v56 = vmax.f32 %v10364_v36, 0.0  ;;  %v4486_v19 = vmax.f32 %v10428_v54, 0.0 }
 0x224   :  { %v10367_v62 = vadd.f32 %v2317_v4, %v12861_v18  ;;  %v10431_v28 = vadd.f32 %v2703_v13, %v12865_v20  ;;  %v4485_v47 = vmax.f32 %v10365_v57, 0.0  ;;  %v4487_v61 = vmax.f32 %v10429_v44, 0.0  ;;  %v11811_v36 = vld [vmem:[#allocation7 + $0x148] ss:$48 sps:$4 sm:$0xff]   ;;  %v11814_v54 = vld [vmem:[#allocation7 + $0x140] ss:$48 sps:$4 sm:$0xff]  }
 0x225   :  { %v4496_v14 = vmax.f32 %v10366_v30, 0.0  ;;  %v4498_v41 = vmax.f32 %v10430_v40, 0.0  ;;  %3032 = vmatmul.mubr.bf16.gmra.mrb[68].mxu0 %v12710_v46  ;;  %3418 = vmatmul.mubr.bf16.gmra.mrb[68].mxu1 %v12710_v46  ;;  %v11819_v57 = vld [vmem:[#allocation7 + $0x1ac] ss:$48 sps:$4 sm:$0xff]   ;;  %v11822_v44 = vld [vmem:[#allocation7 + $0x1a4] ss:$48 sps:$4 sm:$0xff]  }
 0x226   :  { %v4497_v1 = vmax.f32 %v10367_v62, 0.0  ;;  %v4499_v48 = vmax.f32 %v10431_v28, 0.0  ;;  %3041 = vmatprep.mubr.bf16.mxu0 %v15079_v39  ;;  %3427 = vmatprep.mubr.bf16.mxu1 %v15079_v39 }
 0x227   :  { %v13001_v21 = vpack.c.bf16 %v4496_v14, %v4484_v56  ;;  %3959 = vmatpush1.bf16.msra.mxu1 %v11805_v34  ;;  %3573 = vmatpush1.bf16.msra.mxu0 %v11808_v45  ;;  %v13003_v30 = vpack.c.bf16 %v4498_v41, %v4486_v19 }
 0x228   :  { %v13005_v40 = vpack.c.bf16 %v4497_v1, %v4485_v47  ;;  %v2321_v4 = vpop.f32.mrb[28].mxu0  ;;  %v2707_v13 = vpop.f32.mrb[28].mxu1  ;;  %3960 = vmatprep.subr.bf16.mxu1 %v11813_v27  ;;  %3574 = vmatprep.subr.bf16.mxu0 %v11816_v25  ;;  %v13007_v62 = vpack.c.bf16 %v4499_v48, %v4487_v61  ;;  %v11817_v61 = vld [vmem:[#allocation7 + $0x1a8] ss:$48 sps:$4 sm:$0xff]   ;;  %v11820_v48 = vld [vmem:[#allocation7 + $0x1a0] ss:$48 sps:$4 sm:$0xff]  }
 0x229   :  { %15088 = vst [vmem:[#allocation59_spill] sm:$0xff] %v13001_v21  ;;  %15089 = vst [vmem:[#allocation60_spill] sm:$0xff] %v13003_v30  ;;  %v10368_v28 = vadd.f32 %v2321_v4, %v12855_v6  ;;  %v10432_v56 = vadd.f32 %v2707_v13, %v12858_v7  ;;  %v2323_v34 = vpop.f32.mrb[29].mxu0  ;;  %v2709_v45 = vpop.f32.mrb[29].mxu1 }
 0x22a   :  { %15090 = vst [vmem:[#allocation61_spill] sm:$0xff] %v13005_v40  ;;  %15091 = vst [vmem:[#allocation62_spill] sm:$0xff] %v13007_v62  ;;  %v10369_v14 = vadd.f32 %v2323_v34, %v12861_v18  ;;  %v10433_v19 = vadd.f32 %v2709_v45, %v12865_v20  ;;  %v2325_v1 = vpop.f32.mrb[30].mxu0  ;;  %v2711_v41 = vpop.f32.mrb[30].mxu1  ;;  %v11825_v34 = vld [vmem:[#allocation7 + $0x20c] ss:$48 sps:$4 sm:$0xff]  }
 0x22b   :  { %v10370_v47 = vadd.f32 %v2325_v1, %v12855_v6  ;;  %v10434_v27 = vadd.f32 %v2711_v41, %v12858_v7  ;;  %v2327_v25 = vpop.f32.mrb[31].mxu0  ;;  %v2713_v30 = vpop.f32.mrb[31].mxu1  ;;  %3961 = vmatpush1.bf16.msra.mxu1 %v11811_v36  ;;  %3575 = vmatpush1.bf16.msra.mxu0 %v11814_v54  ;;  %v11828_v45 = vld [vmem:[#allocation7 + $0x204] ss:$48 sps:$4 sm:$0xff]   ;;  %v4508_v62 = vmax.f32 %v10368_v28, 0.0  ;;  %v4510_v21 = vmax.f32 %v10432_v56, 0.0 }
 0x22c   :  { %v10371_v4 = vadd.f32 %v2327_v25, %v12861_v18  ;;  %v10435_v13 = vadd.f32 %v2713_v30, %v12865_v20  ;;  %3962 = vmatprep.subr.bf16.mxu1 %v11819_v57  ;;  %3576 = vmatprep.subr.bf16.mxu0 %v11822_v44  ;;  %v4509_v36 = vmax.f32 %v10369_v14, 0.0  ;;  %v4511_v54 = vmax.f32 %v10433_v19, 0.0  ;;  %v11823_v57 = vld [vmem:[#allocation7 + $0x208] ss:$48 sps:$4 sm:$0xff]   ;;  %v11826_v44 = vld [vmem:[#allocation7 + $0x200] ss:$48 sps:$4 sm:$0xff]  }
 0x22d   :  { %v4520_v40 = vmax.f32 %v10370_v47, 0.0  ;;  %v4522_v1 = vmax.f32 %v10434_v27, 0.0  ;;  %3042 = vmatmul.mubr.bf16.gmra.mrb[72].mxu0 %v12716_v0  ;;  %3428 = vmatmul.mubr.bf16.gmra.mrb[72].mxu1 %v12716_v0  ;;  %v11831_v14 = vld [vmem:[#allocation7 + $0x26c] ss:$48 sps:$4 sm:$0xff]   ;;  %v11834_v19 = vld [vmem:[#allocation7 + $0x264] ss:$48 sps:$4 sm:$0xff]  }
 0x22e   :  { %v4521_v41 = vmax.f32 %v10371_v4, 0.0  ;;  %v4523_v31 = vmax.f32 %v10435_v13, 0.0  ;;  %3051 = vmatprep.mubr.bf16.mxu0 %v15079_v39  ;;  %3437 = vmatprep.mubr.bf16.mxu1 %v15079_v39 }
 0x22f   :  { %v13021_v30 = vpack.c.bf16 %v4520_v40, %v4508_v62  ;;  %3963 = vmatpush1.bf16.msra.mxu1 %v11817_v61  ;;  %3577 = vmatpush1.bf16.msra.mxu0 %v11820_v48  ;;  %v13023_v28 = vpack.c.bf16 %v4522_v1, %v4510_v21 }
 0x230   :  { %v13025_v56 = vpack.c.bf16 %v4521_v41, %v4509_v36  ;;  %v2331_v47 = vpop.f32.mrb[32].mxu0  ;;  %v2717_v27 = vpop.f32.mrb[32].mxu1  ;;  %3964 = vmatprep.subr.bf16.mxu1 %v11825_v34  ;;  %3578 = vmatprep.subr.bf16.mxu0 %v11828_v45  ;;  %v13027_v25 = vpack.c.bf16 %v4523_v31, %v4511_v54  ;;  %v11829_v31 = vld [vmem:[#allocation7 + $0x268] ss:$48 sps:$4 sm:$0xff]   ;;  %v11832_v54 = vld [vmem:[#allocation7 + $0x260] ss:$48 sps:$4 sm:$0xff]  }
 0x231   :  { %15092 = vst [vmem:[#allocation63_spill] sm:$0xff] %v13021_v30  ;;  %15093 = vst [vmem:[#allocation64_spill] sm:$0xff] %v13023_v28  ;;  %v10372_v4 = vadd.f32 %v2331_v47, %v12855_v6  ;;  %v10436_v40 = vadd.f32 %v2717_v27, %v12858_v7  ;;  %v2333_v62 = vpop.f32.mrb[33].mxu0  ;;  %v2719_v61 = vpop.f32.mrb[33].mxu1 }
 0x232   :  { %15094 = vst [vmem:[#allocation65_spill] sm:$0xff] %v13025_v56  ;;  %15095 = vst [vmem:[#allocation66_spill] sm:$0xff] %v13027_v25  ;;  %v10373_v48 = vadd.f32 %v2333_v62, %v12861_v18  ;;  %v10437_v21 = vadd.f32 %v2719_v61, %v12865_v20  ;;  %v2335_v13 = vpop.f32.mrb[34].mxu0  ;;  %v2721_v1 = vpop.f32.mrb[34].mxu1  ;;  %v11837_v62 = vld [vmem:[#allocation7 + $0x2cc] ss:$48 sps:$4 sm:$0xff]  }
 0x233   :  { %v10374_v36 = vadd.f32 %v2335_v13, %v12855_v6  ;;  %v10438_v34 = vadd.f32 %v2721_v1, %v12858_v7  ;;  %v2337_v45 = vpop.f32.mrb[35].mxu0  ;;  %v2723_v41 = vpop.f32.mrb[35].mxu1  ;;  %3965 = vmatpush1.bf16.msra.mxu1 %v11823_v57  ;;  %3579 = vmatpush1.bf16.msra.mxu0 %v11826_v44  ;;  %v11840_v61 = vld [vmem:[#allocation7 + $0x2c4] ss:$48 sps:$4 sm:$0xff]   ;;  %v4532_v28 = vmax.f32 %v10372_v4, 0.0  ;;  %v4534_v25 = vmax.f32 %v10436_v40, 0.0 }
 0x234   :  { %v10375_v47 = vadd.f32 %v2337_v45, %v12861_v18  ;;  %v10439_v27 = vadd.f32 %v2723_v41, %v12865_v20  ;;  %3966 = vmatprep.subr.bf16.mxu1 %v11831_v14  ;;  %3580 = vmatprep.subr.bf16.mxu0 %v11834_v19  ;;  %v4533_v57 = vmax.f32 %v10373_v48, 0.0  ;;  %v4535_v44 = vmax.f32 %v10437_v21, 0.0  ;;  %v11835_v19 = vld [vmem:[#allocation7 + $0x2c8] ss:$48 sps:$4 sm:$0xff]   ;;  %v11838_v4 = vld [vmem:[#allocation7 + $0x2c0] ss:$48 sps:$4 sm:$0xff]  }
 0x235   :  { %v4544_v30 = vmax.f32 %v10374_v36, 0.0  ;;  %v4546_v13 = vmax.f32 %v10438_v34, 0.0  ;;  %3052 = vmatmul.mubr.bf16.gmra.mrb[76].mxu0 %v12722_v32  ;;  %3438 = vmatmul.mubr.bf16.gmra.mrb[76].mxu1 %v12722_v32  ;;  %v11843_v48 = vld [vmem:[#allocation7 + $0x32c] ss:$48 sps:$4 sm:$0xff]   ;;  %v11846_v21 = vld [vmem:[#allocation7 + $0x324] ss:$48 sps:$4 sm:$0xff]  }
 0x236   :  { %v4545_v1 = vmax.f32 %v10375_v47, 0.0  ;;  %v4547_v56 = vmax.f32 %v10439_v27, 0.0  ;;  %3061 = vmatprep.mubr.bf16.mxu0 %v15079_v39  ;;  %3447 = vmatprep.mubr.bf16.mxu1 %v15079_v39 }
 0x237   :  { %v13041_v14 = vpack.c.bf16 %v4544_v30, %v4532_v28  ;;  %3967 = vmatpush1.bf16.msra.mxu1 %v11829_v31  ;;  %3581 = vmatpush1.bf16.msra.mxu0 %v11832_v54  ;;  %v13043_v40 = vpack.c.bf16 %v4546_v13, %v4534_v25 }
 0x238   :  { %v13045_v36 = vpack.c.bf16 %v4545_v1, %v4533_v57  ;;  %v2341_v34 = vpop.f32.mrb[36].mxu0  ;;  %v2727_v45 = vpop.f32.mrb[36].mxu1  ;;  %3968 = vmatprep.subr.bf16.mxu1 %v11837_v62  ;;  %3582 = vmatprep.subr.bf16.mxu0 %v11840_v61  ;;  %v13047_v41 = vpack.c.bf16 %v4547_v56, %v4535_v44  ;;  %v11841_v56 = vld [vmem:[#allocation7 + $0x328] ss:$48 sps:$4 sm:$0xff]   ;;  %v11844_v44 = vld [vmem:[#allocation7 + $0x320] ss:$48 sps:$4 sm:$0xff]  }
 0x239   :  { %15096 = vst [vmem:[#allocation67_spill] sm:$0xff] %v13041_v14  ;;  %15097 = vst [vmem:[#allocation68_spill] sm:$0xff] %v13043_v40  ;;  %v10376_v47 = vadd.f32 %v2341_v34, %v12855_v6  ;;  %v10440_v30 = vadd.f32 %v2727_v45, %v12858_v7  ;;  %v2343_v28 = vpop.f32.mrb[37].mxu0  ;;  %v2729_v31 = vpop.f32.mrb[37].mxu1 }
 0x23a   :  { %15098 = vst [vmem:[#allocation69_spill] sm:$0xff] %v13045_v36  ;;  %15099 = vst [vmem:[#allocation70_spill] sm:$0xff] %v13047_v41  ;;  %v10377_v54 = vadd.f32 %v2343_v28, %v12861_v18  ;;  %v10441_v25 = vadd.f32 %v2729_v31, %v12865_v20  ;;  %v2345_v27 = vpop.f32.mrb[38].mxu0  ;;  %v2731_v13 = vpop.f32.mrb[38].mxu1  ;;  %v11849_v28 = vld [vmem:[#allocation7 + $0x38c] ss:$48 sps:$4 sm:$0xff]  }
 0x23b   :  { %v10378_v57 = vadd.f32 %v2345_v27, %v12855_v6  ;;  %v10442_v62 = vadd.f32 %v2731_v13, %v12858_v7  ;;  %v2347_v61 = vpop.f32.mrb[39].mxu0  ;;  %v2733_v1 = vpop.f32.mrb[39].mxu1  ;;  %3969 = vmatpush1.bf16.msra.mxu1 %v11835_v19  ;;  %3583 = vmatpush1.bf16.msra.mxu0 %v11838_v4  ;;  %v11852_v31 = vld [vmem:[#allocation7 + $0x384] ss:$48 sps:$4 sm:$0xff]   ;;  %v4556_v40 = vmax.f32 %v10376_v47, 0.0  ;;  %v4558_v41 = vmax.f32 %v10440_v30, 0.0 }
 0x23c   :  { %v10379_v34 = vadd.f32 %v2347_v61, %v12861_v18  ;;  %v10443_v45 = vadd.f32 %v2733_v1, %v12865_v20  ;;  %3970 = vmatprep.subr.bf16.mxu1 %v11843_v48  ;;  %3584 = vmatprep.subr.bf16.mxu0 %v11846_v21  ;;  %v4557_v19 = vmax.f32 %v10377_v54, 0.0  ;;  %v4559_v4 = vmax.f32 %v10441_v25, 0.0  ;;  %v11847_v21 = vld [vmem:[#allocation7 + $0x388] ss:$48 sps:$4 sm:$0xff]   ;;  %v11850_v47 = vld [vmem:[#allocation7 + $0x380] ss:$48 sps:$4 sm:$0xff]  }
 0x23d   :  { %v4568_v14 = vmax.f32 %v10378_v57, 0.0  ;;  %v4570_v27 = vmax.f32 %v10442_v62, 0.0  ;;  %3062 = vmatmul.mubr.bf16.gmra.mrb[80].mxu0 %v12728_v55  ;;  %3448 = vmatmul.mubr.bf16.gmra.mrb[80].mxu1 %v12728_v55  ;;  %v11855_v54 = vld [vmem:[#allocation7 + $0x3ec] ss:$48 sps:$4 sm:$0xff]   ;;  %v11858_v25 = vld [vmem:[#allocation7 + $0x3e4] ss:$48 sps:$4 sm:$0xff]  }
 0x23e   :  { %v4569_v13 = vmax.f32 %v10379_v34, 0.0  ;;  %v4571_v36 = vmax.f32 %v10443_v45, 0.0  ;;  %3071 = vmatprep.mubr.bf16.mxu0 %v15079_v39  ;;  %3457 = vmatprep.mubr.bf16.mxu1 %v15079_v39 }
 0x23f   :  { %v13061_v48 = vpack.c.bf16 %v4568_v14, %v4556_v40  ;;  %3971 = vmatpush1.bf16.msra.mxu1 %v11841_v56  ;;  %3585 = vmatpush1.bf16.msra.mxu0 %v11844_v44  ;;  %v13063_v30 = vpack.c.bf16 %v4570_v27, %v4558_v41 }
 0x240   :  { %v13065_v57 = vpack.c.bf16 %v4569_v13, %v4557_v19  ;;  %v2351_v62 = vpop.f32.mrb[40].mxu0  ;;  %v2737_v61 = vpop.f32.mrb[40].mxu1  ;;  %3972 = vmatprep.subr.bf16.mxu1 %v11849_v28  ;;  %3586 = vmatprep.subr.bf16.mxu0 %v11852_v31  ;;  %v13067_v1 = vpack.c.bf16 %v4571_v36, %v4559_v4  ;;  %v11853_v36 = vld [vmem:[#allocation7 + $0x3e8] ss:$48 sps:$4 sm:$0xff]   ;;  %v11856_v4 = vld [vmem:[#allocation7 + $0x3e0] ss:$48 sps:$4 sm:$0xff]  }
 0x241   :  { %15100 = vst [vmem:[#allocation71_spill] sm:$0xff] %v13061_v48  ;;  %15101 = vst [vmem:[#allocation72_spill] sm:$0xff] %v13063_v30  ;;  %v10380_v34 = vadd.f32 %v2351_v62, %v12855_v6  ;;  %v10444_v14 = vadd.f32 %v2737_v61, %v12858_v7  ;;  %v2353_v40 = vpop.f32.mrb[41].mxu0  ;;  %v2739_v56 = vpop.f32.mrb[41].mxu1 }
 0x242   :  { %15102 = vst [vmem:[#allocation73_spill] sm:$0xff] %v13065_v57  ;;  %15103 = vst [vmem:[#allocation74_spill] sm:$0xff] %v13067_v1  ;;  %v10381_v44 = vadd.f32 %v2353_v40, %v12861_v18  ;;  %v10445_v41 = vadd.f32 %v2739_v56, %v12865_v20  ;;  %v2355_v45 = vpop.f32.mrb[42].mxu0  ;;  %v2741_v27 = vpop.f32.mrb[42].mxu1  ;;  %v11861_v40 = vld [vmem:[#allocation7 + $0x44c] ss:$48 sps:$4 sm:$0xff]  }
 0x243   :  { %v10382_v19 = vadd.f32 %v2355_v45, %v12855_v6  ;;  %v10446_v28 = vadd.f32 %v2741_v27, %v12858_v7  ;;  %v2357_v31 = vpop.f32.mrb[43].mxu0  ;;  %v2743_v13 = vpop.f32.mrb[43].mxu1  ;;  %3973 = vmatpush1.bf16.msra.mxu1 %v11847_v21  ;;  %3587 = vmatpush1.bf16.msra.mxu0 %v11850_v47  ;;  %v11864_v56 = vld [vmem:[#allocation7 + $0x444] ss:$48 sps:$4 sm:$0xff]   ;;  %v4580_v30 = vmax.f32 %v10380_v34, 0.0  ;;  %v4582_v1 = vmax.f32 %v10444_v14, 0.0 }
 0x244   :  { %v10383_v62 = vadd.f32 %v2357_v31, %v12861_v18  ;;  %v10447_v61 = vadd.f32 %v2743_v13, %v12865_v20  ;;  %3974 = vmatprep.subr.bf16.mxu1 %v11855_v54  ;;  %3588 = vmatprep.subr.bf16.mxu0 %v11858_v25  ;;  %v4581_v21 = vmax.f32 %v10381_v44, 0.0  ;;  %v4583_v47 = vmax.f32 %v10445_v41, 0.0  ;;  %v11859_v25 = vld [vmem:[#allocation7 + $0x448] ss:$48 sps:$4 sm:$0xff]   ;;  %v11862_v34 = vld [vmem:[#allocation7 + $0x440] ss:$48 sps:$4 sm:$0xff]  }
 0x245   :  { %v4592_v48 = vmax.f32 %v10382_v19, 0.0  ;;  %v4594_v45 = vmax.f32 %v10446_v28, 0.0  ;;  %3072 = vmatmul.mubr.bf16.gmra.mrb[84].mxu0 %v12734_v15  ;;  %3458 = vmatmul.mubr.bf16.gmra.mrb[84].mxu1 %v12734_v15  ;;  %v11867_v44 = vld [vmem:[#allocation7 + $0x4ac] ss:$48 sps:$4 sm:$0xff]   ;;  %v11870_v41 = vld [vmem:[#allocation7 + $0x4a4] ss:$48 sps:$4 sm:$0xff]  }
 0x246   :  { %v4593_v27 = vmax.f32 %v10383_v62, 0.0  ;;  %v4595_v57 = vmax.f32 %v10447_v61, 0.0  ;;  %3081 = vmatprep.mubr.bf16.mxu0 %v15079_v39  ;;  %3467 = vmatprep.mubr.bf16.mxu1 %v15079_v39 }
 0x247   :  { %v13081_v54 = vpack.c.bf16 %v4592_v48, %v4580_v30  ;;  %3975 = vmatpush1.bf16.msra.mxu1 %v11853_v36  ;;  %3589 = vmatpush1.bf16.msra.mxu0 %v11856_v4  ;;  %v13083_v14 = vpack.c.bf16 %v4594_v45, %v4582_v1 }
 0x248   :  { %v13085_v19 = vpack.c.bf16 %v4593_v27, %v4581_v21  ;;  %v2361_v28 = vpop.f32.mrb[44].mxu0  ;;  %v2747_v31 = vpop.f32.mrb[44].mxu1  ;;  %3976 = vmatprep.subr.bf16.mxu1 %v11861_v40  ;;  %3590 = vmatprep.subr.bf16.mxu0 %v11864_v56  ;;  %v13087_v13 = vpack.c.bf16 %v4595_v57, %v4583_v47  ;;  %v11865_v57 = vld [vmem:[#allocation7 + $0x4a8] ss:$48 sps:$4 sm:$0xff]   ;;  %v11868_v47 = vld [vmem:[#allocation7 + $0x4a0] ss:$48 sps:$4 sm:$0xff]  }
 0x249   :  { %15104 = vst [vmem:[#allocation75_spill] sm:$0xff] %v13081_v54  ;;  %15105 = vst [vmem:[#allocation76_spill] sm:$0xff] %v13083_v14  ;;  %v10384_v62 = vadd.f32 %v2361_v28, %v12855_v6  ;;  %v10448_v48 = vadd.f32 %v2747_v31, %v12858_v7  ;;  %v2363_v30 = vpop.f32.mrb[45].mxu0  ;;  %v2749_v36 = vpop.f32.mrb[45].mxu1 }
 0x24a   :  { %15106 = vst [vmem:[#allocation77_spill] sm:$0xff] %v13085_v19  ;;  %15107 = vst [vmem:[#allocation78_spill] sm:$0xff] %v13087_v13  ;;  %v10385_v4 = vadd.f32 %v2363_v30, %v12861_v18  ;;  %v10449_v1 = vadd.f32 %v2749_v36, %v12865_v20  ;;  %v2365_v61 = vpop.f32.mrb[46].mxu0  ;;  %v2751_v45 = vpop.f32.mrb[46].mxu1  ;;  %v11873_v30 = vld [vmem:[#allocation7 + $0x50c] ss:$48 sps:$4 sm:$0xff]  }
 0x24b   :  { %v10386_v21 = vadd.f32 %v2365_v61, %v12855_v6  ;;  %v10450_v40 = vadd.f32 %v2751_v45, %v12858_v7  ;;  %v2367_v56 = vpop.f32.mrb[47].mxu0  ;;  %v2753_v27 = vpop.f32.mrb[47].mxu1  ;;  %3977 = vmatpush1.bf16.msra.mxu1 %v11859_v25  ;;  %3591 = vmatpush1.bf16.msra.mxu0 %v11862_v34  ;;  %v11876_v36 = vld [vmem:[#allocation7 + $0x504] ss:$48 sps:$4 sm:$0xff]   ;;  %v4604_v14 = vmax.f32 %v10384_v62, 0.0  ;;  %v4606_v13 = vmax.f32 %v10448_v48, 0.0 }
 0x24c   :  { %v10387_v28 = vadd.f32 %v2367_v56, %v12861_v18  ;;  %v10451_v31 = vadd.f32 %v2753_v27, %v12865_v20  ;;  %3978 = vmatprep.subr.bf16.mxu1 %v11867_v44  ;;  %3592 = vmatprep.subr.bf16.mxu0 %v11870_v41  ;;  %v4605_v25 = vmax.f32 %v10385_v4, 0.0  ;;  %v4607_v34 = vmax.f32 %v10449_v1, 0.0  ;;  %v11871_v41 = vld [vmem:[#allocation7 + $0x508] ss:$48 sps:$4 sm:$0xff]   ;;  %v11874_v62 = vld [vmem:[#allocation7 + $0x500] ss:$48 sps:$4 sm:$0xff]  }
 0x24d   :  { %v4616_v54 = vmax.f32 %v10386_v21, 0.0  ;;  %v4618_v61 = vmax.f32 %v10450_v40, 0.0  ;;  %3082 = vmatmul.mubr.bf16.gmra.mrb[88].mxu0 %v12740_v42  ;;  %3468 = vmatmul.mubr.bf16.gmra.mrb[88].mxu1 %v12740_v42  ;;  %v11879_v4 = vld [vmem:[#allocation7 + $0x56c] ss:$48 sps:$4 sm:$0xff]   ;;  %v11882_v1 = vld [vmem:[#allocation7 + $0x564] ss:$48 sps:$4 sm:$0xff]  }
 0x24e   :  { %v4617_v45 = vmax.f32 %v10387_v28, 0.0  ;;  %v4619_v19 = vmax.f32 %v10451_v31, 0.0  ;;  %3091 = vmatprep.mubr.bf16.mxu0 %v15079_v39  ;;  %3477 = vmatprep.mubr.bf16.mxu1 %v15079_v39 }
 0x24f   :  { %v13101_v44 = vpack.c.bf16 %v4616_v54, %v4604_v14  ;;  %3979 = vmatpush1.bf16.msra.mxu1 %v11865_v57  ;;  %3593 = vmatpush1.bf16.msra.mxu0 %v11868_v47  ;;  %v13103_v48 = vpack.c.bf16 %v4618_v61, %v4606_v13 }
 0x250   :  { %v13105_v21 = vpack.c.bf16 %v4617_v45, %v4605_v25  ;;  %v2371_v40 = vpop.f32.mrb[48].mxu0  ;;  %v2757_v56 = vpop.f32.mrb[48].mxu1  ;;  %3980 = vmatprep.subr.bf16.mxu1 %v11873_v30  ;;  %3594 = vmatprep.subr.bf16.mxu0 %v11876_v36  ;;  %v13107_v27 = vpack.c.bf16 %v4619_v19, %v4607_v34  ;;  %v11877_v19 = vld [vmem:[#allocation7 + $0x568] ss:$48 sps:$4 sm:$0xff]   ;;  %v11880_v34 = vld [vmem:[#allocation7 + $0x560] ss:$48 sps:$4 sm:$0xff]  }
 0x251   :  { %15108 = vst [vmem:[#allocation79_spill] sm:$0xff] %v13101_v44  ;;  %15109 = vst [vmem:[#allocation80_spill] sm:$0xff] %v13103_v48  ;;  %v10388_v28 = vadd.f32 %v2371_v40, %v12855_v6  ;;  %v10452_v54 = vadd.f32 %v2757_v56, %v12858_v7  ;;  %v2373_v14 = vpop.f32.mrb[49].mxu0  ;;  %v2759_v57 = vpop.f32.mrb[49].mxu1 }
 0x252   :  { %15110 = vst [vmem:[#allocation81_spill] sm:$0xff] %v13105_v21  ;;  %15111 = vst [vmem:[#allocation82_spill] sm:$0xff] %v13107_v27  ;;  %v10389_v47 = vadd.f32 %v2373_v14, %v12861_v18  ;;  %v10453_v13 = vadd.f32 %v2759_v57, %v12865_v20  ;;  %v2375_v31 = vpop.f32.mrb[50].mxu0  ;;  %v2761_v61 = vpop.f32.mrb[50].mxu1  ;;  %v11885_v14 = vld [vmem:[#allocation7 + $0x5cc] ss:$48 sps:$4 sm:$0xff]  }
 0x253   :  { %v10390_v25 = vadd.f32 %v2375_v31, %v12855_v6  ;;  %v10454_v30 = vadd.f32 %v2761_v61, %v12858_v7  ;;  %v2377_v36 = vpop.f32.mrb[51].mxu0  ;;  %v2763_v45 = vpop.f32.mrb[51].mxu1  ;;  %3981 = vmatpush1.bf16.msra.mxu1 %v11871_v41  ;;  %3595 = vmatpush1.bf16.msra.mxu0 %v11874_v62  ;;  %v11888_v57 = vld [vmem:[#allocation7 + $0x5c4] ss:$48 sps:$4 sm:$0xff]   ;;  %v4628_v48 = vmax.f32 %v10388_v28, 0.0  ;;  %v4630_v27 = vmax.f32 %v10452_v54, 0.0 }
 0x254   :  { %v10391_v40 = vadd.f32 %v2377_v36, %v12861_v18  ;;  %v10455_v56 = vadd.f32 %v2763_v45, %v12865_v20  ;;  %3982 = vmatprep.subr.bf16.mxu1 %v11879_v4  ;;  %3596 = vmatprep.subr.bf16.mxu0 %v11882_v1  ;;  %v4629_v41 = vmax.f32 %v10389_v47, 0.0  ;;  %v4631_v62 = vmax.f32 %v10453_v13, 0.0  ;;  %v11883_v1 = vld [vmem:[#allocation7 + $0x5c8] ss:$48 sps:$4 sm:$0xff]   ;;  %v11886_v28 = vld [vmem:[#allocation7 + $0x5c0] ss:$48 sps:$4 sm:$0xff]  }
 0x255   :  { %v4640_v44 = vmax.f32 %v10390_v25, 0.0  ;;  %v4642_v31 = vmax.f32 %v10454_v30, 0.0  ;;  %3092 = vmatmul.mubr.bf16.gmra.mrb[92].mxu0 %v12746_v5  ;;  %3478 = vmatmul.mubr.bf16.gmra.mrb[92].mxu1 %v12746_v5  ;;  %v11891_v47 = vld [vmem:[#allocation7 + $0x62c] ss:$48 sps:$4 sm:$0xff]   ;;  %v11894_v13 = vld [vmem:[#allocation7 + $0x624] ss:$48 sps:$4 sm:$0xff]  }
 0x256   :  { %v4641_v61 = vmax.f32 %v10391_v40, 0.0  ;;  %v4643_v21 = vmax.f32 %v10455_v56, 0.0  ;;  %3101 = vmatprep.mubr.bf16.mxu0 %v15079_v39  ;;  %3487 = vmatprep.mubr.bf16.mxu1 %v15079_v39 }
 0x257   :  { %v13121_v4 = vpack.c.bf16 %v4640_v44, %v4628_v48  ;;  %3983 = vmatpush1.bf16.msra.mxu1 %v11877_v19  ;;  %3597 = vmatpush1.bf16.msra.mxu0 %v11880_v34  ;;  %v13123_v54 = vpack.c.bf16 %v4642_v31, %v4630_v27 }
 0x258   :  { %v13125_v25 = vpack.c.bf16 %v4641_v61, %v4629_v41  ;;  %v2381_v30 = vpop.f32.mrb[52].mxu0  ;;  %v2767_v36 = vpop.f32.mrb[52].mxu1  ;;  %3984 = vmatprep.subr.bf16.mxu1 %v11885_v14  ;;  %3598 = vmatprep.subr.bf16.mxu0 %v11888_v57  ;;  %v13127_v45 = vpack.c.bf16 %v4643_v21, %v4631_v62 }
 0x259   :  { %15112 = vst [vmem:[#allocation83_spill] sm:$0xff] %v13123_v54  ;;  %v10392_v40 = vadd.f32 %v2381_v30, %v12855_v6  ;;  %v10456_v44 = vadd.f32 %v2767_v36, %v12858_v7  ;;  %v2383_v48 = vpop.f32.mrb[53].mxu0  ;;  %v2769_v19 = vpop.f32.mrb[53].mxu1 }
 0x25a   :  { %15113 = vst [vmem:[#allocation84_spill] sm:$0xff] %v13127_v45  ;;  %v10393_v34 = vadd.f32 %v2383_v48, %v12861_v18  ;;  %v10457_v27 = vadd.f32 %v2769_v19, %v12865_v20  ;;  %v2385_v56 = vpop.f32.mrb[54].mxu0  ;;  %v2771_v31 = vpop.f32.mrb[54].mxu1 }
 0x25b   :  { %v10394_v41 = vadd.f32 %v2385_v56, %v12855_v6  ;;  %v10458_v14 = vadd.f32 %v2771_v31, %v12858_v7  ;;  %v2387_v57 = vpop.f32.mrb[55].mxu0  ;;  %v2773_v61 = vpop.f32.mrb[55].mxu1  ;;  %3985 = vmatpush1.bf16.msra.mxu1 %v11883_v1  ;;  %3599 = vmatpush1.bf16.msra.mxu0 %v11886_v28  ;;  %v4652_v30 = vmax.f32 %v10392_v40, 0.0  ;;  %v4654_v36 = vmax.f32 %v10456_v44, 0.0 }
 0x25c   :  { %v10395_v21 = vadd.f32 %v2387_v57, %v12861_v18  ;;  %v10459_v62 = vadd.f32 %v2773_v61, %v12865_v20  ;;  %4147 = vmatprep.subr.bf16.mxu1 %v11891_v47  ;;  %3761 = vmatprep.subr.bf16.mxu0 %v11894_v13  ;;  %v4653_v56 = vmax.f32 %v10393_v34, 0.0  ;;  %v4655_v31 = vmax.f32 %v10457_v27, 0.0 }
 0x25d   :  { %v4664_v48 = vmax.f32 %v10394_v41, 0.0  ;;  %v4666_v19 = vmax.f32 %v10458_v14, 0.0  ;;  %3102 = vmatmul.mubr.bf16.gmra.mrb[96].mxu0 %v12752_v35  ;;  %3488 = vmatmul.mubr.bf16.gmra.mrb[96].mxu1 %v12752_v35 }
 0x25e   :  { %v4665_v54 = vmax.f32 %v10395_v21, 0.0  ;;  %v4667_v45 = vmax.f32 %v10459_v62, 0.0  ;;  %3111 = vmatprep.mubr.bf16.mxu0 %v15079_v39  ;;  %3497 = vmatprep.mubr.bf16.mxu1 %v15079_v39 }
 0x25f   :  { %v13141_v1 = vpack.c.bf16 %v4664_v48, %v4652_v30  ;;  %v13143_v28 = vpack.c.bf16 %v4666_v19, %v4654_v36 }
 0x260   :  { %v13145_v47 = vpack.c.bf16 %v4665_v54, %v4653_v56  ;;  %v2391_v13 = vpop.f32.mrb[56].mxu0  ;;  %v2777_v40 = vpop.f32.mrb[56].mxu1  ;;  %v13147_v44 = vpack.c.bf16 %v4667_v45, %v4655_v31 }
 0x261   :  { %15114 = vst [vmem:[#allocation85_spill] sm:$0xff] %v13143_v28  ;;  %v10396_v41 = vadd.f32 %v2391_v13, %v12855_v6  ;;  %v10460_v34 = vadd.f32 %v2777_v40, %v12858_v7  ;;  %v2393_v27 = vpop.f32.mrb[57].mxu0  ;;  %v2779_v14 = vpop.f32.mrb[57].mxu1 }
 0x262   :  { %15115 = vst [vmem:[#allocation86_spill] sm:$0xff] %v13147_v44  ;;  %v10397_v57 = vadd.f32 %v2393_v27, %v12861_v18  ;;  %v10461_v61 = vadd.f32 %v2779_v14, %v12865_v20  ;;  %v2395_v21 = vpop.f32.mrb[58].mxu0  ;;  %v2781_v62 = vpop.f32.mrb[58].mxu1 }
 0x263   :  { %v10398_v30 = vadd.f32 %v2395_v21, %v12855_v6  ;;  %v10462_v54 = vadd.f32 %v2781_v62, %v12858_v7  ;;  %v2397_v36 = vpop.f32.mrb[59].mxu0  ;;  %v2783_v48 = vpop.f32.mrb[59].mxu1  ;;  %v4676_v56 = vmax.f32 %v10396_v41, 0.0  ;;  %v4678_v31 = vmax.f32 %v10460_v34, 0.0 }
 0x264   :  { %v10399_v45 = vadd.f32 %v2397_v36, %v12861_v18  ;;  %v10463_v19 = vadd.f32 %v2783_v48, %v12865_v20  ;;  %v4677_v27 = vmax.f32 %v10397_v57, 0.0  ;;  %v4679_v14 = vmax.f32 %v10461_v61, 0.0 }
 0x265   :  { %v4688_v13 = vmax.f32 %v10398_v30, 0.0  ;;  %v4690_v40 = vmax.f32 %v10462_v54, 0.0  ;;  %3112 = vmatmul.mubr.bf16.gmra.mrb[100].mxu0 %v12758_v43  ;;  %3498 = vmatmul.mubr.bf16.gmra.mrb[100].mxu1 %v12758_v43 }
 0x266   :  { %v4689_v28 = vmax.f32 %v10399_v45, 0.0  ;;  %v4691_v21 = vmax.f32 %v10463_v19, 0.0  ;;  %3121 = vmatprep.mubr.bf16.mxu0 %v15079_v39  ;;  %3507 = vmatprep.mubr.bf16.mxu1 %v15079_v39 }
 0x267   :  { %v13161_v62 = vpack.c.bf16 %v4688_v13, %v4676_v56  ;;  %v13163_v36 = vpack.c.bf16 %v4690_v40, %v4678_v31 }
 0x268   :  { %v13165_v41 = vpack.c.bf16 %v4689_v28, %v4677_v27  ;;  %v2401_v34 = vpop.f32.mrb[60].mxu0  ;;  %v2787_v30 = vpop.f32.mrb[60].mxu1  ;;  %v13167_v54 = vpack.c.bf16 %v4691_v21, %v4679_v14 }
 0x269   :  { %15116 = vst [vmem:[#allocation87_spill] sm:$0xff] %v13161_v62  ;;  %15117 = vst [vmem:[#allocation88_spill] sm:$0xff] %v13163_v36  ;;  %v10400_v48 = vadd.f32 %v2401_v34, %v12855_v6  ;;  %v10464_v57 = vadd.f32 %v2787_v30, %v12858_v7  ;;  %v2403_v61 = vpop.f32.mrb[61].mxu0  ;;  %v2789_v45 = vpop.f32.mrb[61].mxu1 }
 0x26a   :  { %15118 = vst [vmem:[#allocation89_spill] sm:$0xff] %v13167_v54  ;;  %v10401_v19 = vadd.f32 %v2403_v61, %v12861_v18  ;;  %v10465_v44 = vadd.f32 %v2789_v45, %v12865_v20  ;;  %v2405_v56 = vpop.f32.mrb[62].mxu0  ;;  %v2791_v13 = vpop.f32.mrb[62].mxu1 }
 0x26b   :  { %v10402_v31 = vadd.f32 %v2405_v56, %v12855_v6  ;;  %v10466_v28 = vadd.f32 %v2791_v13, %v12858_v7  ;;  %v2407_v40 = vpop.f32.mrb[63].mxu0  ;;  %v2793_v27 = vpop.f32.mrb[63].mxu1  ;;  %v4700_v34 = vmax.f32 %v10400_v48, 0.0  ;;  %v4702_v30 = vmax.f32 %v10464_v57, 0.0  ;;  %v11895_v57 = vld [vmem:[#allocation7 + $0x688] ss:$48 sps:$4 sm:$0xff]  }
 0x26c   :  { %v10403_v14 = vadd.f32 %v2407_v40, %v12861_v18  ;;  %v10467_v21 = vadd.f32 %v2793_v27, %v12865_v20  ;;  %v4701_v61 = vmax.f32 %v10401_v19, 0.0  ;;  %v4703_v45 = vmax.f32 %v10465_v44, 0.0  ;;  %v11889_v44 = vld [vmem:[#allocation7 + $0x628] ss:$48 sps:$4 sm:$0xff]   ;;  %v11898_v19 = vld [vmem:[#allocation7 + $0x680] ss:$48 sps:$4 sm:$0xff]  }
 0x26d   :  { %v4712_v36 = vmax.f32 %v10402_v31, 0.0  ;;  %v4714_v54 = vmax.f32 %v10466_v28, 0.0  ;;  %3122 = vmatmul.mubr.bf16.gmra.mrb[104].mxu0 %v12764_v49  ;;  %3508 = vmatmul.mubr.bf16.gmra.mrb[104].mxu1 %v12764_v49  ;;  %v11903_v56 = vld [vmem:[#allocation7 + $0x6ec] ss:$48 sps:$4 sm:$0xff]   ;;  %v11906_v13 = vld [vmem:[#allocation7 + $0x6e4] ss:$48 sps:$4 sm:$0xff]  }
 0x26e   :  { %v4713_v62 = vmax.f32 %v10403_v14, 0.0  ;;  %v4715_v6 = vmax.f32 %v10467_v21, 0.0  ;;  %3131 = vmatprep.mubr.bf16.mxu0 %v15079_v39  ;;  %3517 = vmatprep.mubr.bf16.mxu1 %v15079_v39  ;;  %v11904_v31 = vld [vmem:[#allocation7 + $0x6e0] ss:$48 sps:$4 sm:$0xff]   ;;  %v11909_v28 = vld [vmem:[#allocation7 + $0x74c] ss:$48 sps:$4 sm:$0xff]  }
 0x26f   :  { %v13181_v7 = vpack.c.bf16 %v4712_v36, %v4700_v34  ;;  %v13187_v48 = vpack.c.bf16 %v4714_v54, %v4702_v30  ;;  %v11897_v36 = vld [vmem:[#allocation7 + $0x68c] ss:$48 sps:$4 sm:$0xff]   ;;  %v11900_v54 = vld [vmem:[#allocation7 + $0x684] ss:$48 sps:$4 sm:$0xff]   ;;  %v11910_v40 = vld [vmem:[#allocation7 + $0x740] ss:$48 sps:$4 sm:$0xff]  }
 0x270   :  { %v13183_v18 = vpack.c.bf16 %v4713_v62, %v4701_v61  ;;  %v13185_v20 = vpack.c.bf16 %v4715_v6, %v4703_v45  ;;  %v11892_v62 = vld [vmem:[#allocation7 + $0x620] ss:$48 sps:$4 sm:$0xff]   ;;  %v11915_v27 = vld [vmem:[#allocation7 + $0x7ac] ss:$48 sps:$4 sm:$0xff]   ;;  %v11918_v14 = vld [vmem:[#allocation7 + $0x7a4] ss:$48 sps:$4 sm:$0xff]  }
 0x271   :  { %v11913_v21 = vld [vmem:[#allocation7 + $0x7a8] ss:$48 sps:$4 sm:$0xff]   ;;  %v11916_v34 = vld [vmem:[#allocation7 + $0x7a0] ss:$48 sps:$4 sm:$0xff]   ;;  %v11921_v30 = vld [vmem:[#allocation7 + $0x80c] ss:$48 sps:$4 sm:$0xff]  }
 0x272   :  { %v11922_v61 = vld [vmem:[#allocation7 + $0x800] ss:$48 sps:$4 sm:$0xff]   ;;  %v11927_v45 = vld [vmem:[#allocation7 + $0x86c] ss:$48 sps:$4 sm:$0xff]   ;;  %v11930_v6 = vld [vmem:[#allocation7 + $0x864] ss:$48 sps:$4 sm:$0xff]  }
 0x275   :  { %3132 = vmatmul.mubr.bf16.gmra.mrb[108].mxu0 %v12770_v58  ;;  %3518 = vmatmul.mubr.bf16.gmra.mrb[108].mxu1 %v12770_v58 }
 0x276   :  { %3141 = vmatprep.mubr.bf16.mxu0 %v15079_v39  ;;  %3527 = vmatprep.mubr.bf16.mxu1 %v15079_v39 }
 0x27d   :  { %3142 = vmatmul.mubr.bf16.gmra.mrb[112].mxu0 %v12776_v63  ;;  %3528 = vmatmul.mubr.bf16.gmra.mrb[112].mxu1 %v12776_v63 }
 0x27e   :  { %3151 = vmatprep.mubr.bf16.mxu0 %v15079_v39  ;;  %3537 = vmatprep.mubr.bf16.mxu1 %v15079_v39 }
 0x285   :  { %3152 = vmatmul.mubr.bf16.gmra.mrb[116].mxu0 %v12782_v11  ;;  %3538 = vmatmul.mubr.bf16.gmra.mrb[116].mxu1 %v12782_v11 }
 0x286   :  { %3161 = vmatprep.mubr.bf16.mxu0 %v15079_v39  ;;  %3547 = vmatprep.mubr.bf16.mxu1 %v15079_v39 }
 0x28d   :  { %3162 = vmatmul.mubr.bf16.gmra.mrb[120].mxu0 %v12788_v26  ;;  %3548 = vmatmul.mubr.bf16.gmra.mrb[120].mxu1 %v12788_v26 }
 0x28e   :  { %3171 = vmatprep.mubr.bf16.mxu0 %v15079_v39  ;;  %3557 = vmatprep.mubr.bf16.mxu1 %v15079_v39 }
 0x295   :  { %3172 = vmatmul.mubr.bf16.gmra.mrb[124].mxu0 %v12794_v33  ;;  %3558 = vmatmul.mubr.bf16.gmra.mrb[124].mxu1 %v12794_v33 }
 0x296   :  { %3600 = vmatprep.mubr.bf16.mxu0 %v12574_v51  ;;  %3986 = vmatprep.mubr.bf16.mxu1 %v12574_v51  ;;  %v11901_v51 = vld [vmem:[#allocation7 + $0x6e8] ss:$48 sps:$4 sm:$0xff]  }
 0x29d   :  { %3601 = vmatmul.mubr.bf16.vlgmr.msra.gmra.mrb[128].mxu0 %v12578_v9  ;;  %3987 = vmatmul.mubr.bf16.vlgmr.msra.gmra.mrb[128].mxu1 %v12578_v9  ;;  %v11912_v9 = vld [vmem:[#allocation7 + $0x744] ss:$48 sps:$4 sm:$0xff]  }
 0x29e   :  { %4148 = vmatpush1.bf16.msra.mxu1 %v11889_v44  ;;  %3762 = vmatpush1.bf16.msra.mxu0 %v11892_v62  ;;  %v11925_v44 = vld [vmem:[#allocation7 + $0x868] ss:$48 sps:$4 sm:$0xff]   ;;  %v11928_v62 = vld [vmem:[#allocation7 + $0x860] ss:$48 sps:$4 sm:$0xff]  }
 0x29f   :  { %3610 = vmatprep.mubr.bf16.mxu0 %v12580_v12  ;;  %3996 = vmatprep.mubr.bf16.mxu1 %v12580_v12  ;;  %v11907_v12 = vld [vmem:[#allocation7 + $0x748] ss:$48 sps:$4 sm:$0xff]  }
 0x2a0   :  { %4149 = vmatprep.subr.bf16.mxu1 %v11897_v36  ;;  %3763 = vmatprep.subr.bf16.mxu0 %v11900_v54  ;;  %v11933_v36 = vld [vmem:[#allocation7 + $0x8cc] ss:$48 sps:$4 sm:$0xff]   ;;  %v11934_v54 = vld [vmem:[#allocation7 + $0x8c0] ss:$48 sps:$4 sm:$0xff]  }
 0x2a2   :  { %4150 = vmatpush1.bf16.msra.mxu1 %v11895_v57  ;;  %3764 = vmatpush1.bf16.msra.mxu0 %v11898_v19  ;;  %v11937_v57 = vld [vmem:[#allocation10 + $0xc8] ss:$12 sps:$4 sm:$0xff]   ;;  %v11941_v19 = vld [vmem:[#allocation10 + $0x4] ss:$12 sps:$4 sm:$0xff]  }
 0x2a3   :  { %4151 = vmatprep.subr.bf16.mxu1 %v11903_v56  ;;  %3765 = vmatprep.subr.bf16.mxu0 %v11906_v13  ;;  %v15125_v13 = vld [vmem:[#allocation23_spill] sm:$0xff] }
 0x2a5   :  { %3611 = vmatmul.mubr.bf16.gmra.mrb[132].mxu0 %v12586_v23  ;;  %3997 = vmatmul.mubr.bf16.gmra.mrb[132].mxu1 %v12586_v23  ;;  %v11924_v23 = vld [vmem:[#allocation7 + $0x804] ss:$48 sps:$4 sm:$0xff]  }
 0x2a6   :  { %3620 = vmatprep.mubr.bf16.mxu0 %v12588_v24  ;;  %4006 = vmatprep.mubr.bf16.mxu1 %v12588_v24  ;;  %v11919_v24 = vld [vmem:[#allocation7 + $0x808] ss:$48 sps:$4 sm:$0xff]  }
 0x2a7   :  { %4152 = vmatpush1.bf16.msra.mxu1 %v11901_v51  ;;  %3766 = vmatpush1.bf16.msra.mxu0 %v11904_v31  ;;  %v12321_v51 = vld [vmem:[#allocation9] sm:$0xff] }
 0x2a8   :  { %4153 = vmatprep.subr.bf16.mxu1 %v11909_v28  ;;  %3767 = vmatprep.subr.bf16.mxu0 %v11912_v9 }
 0x2ab   :  { %4154 = vmatpush1.bf16.msra.mxu1 %v11907_v12  ;;  %3768 = vmatpush1.bf16.msra.mxu0 %v11910_v40  ;;  %v15126_v40 = vld [vmem:[#allocation24_spill] sm:$0xff] }
 0x2ac   :  { %4155 = vmatprep.subr.bf16.mxu1 %v11915_v27  ;;  %3769 = vmatprep.subr.bf16.mxu0 %v11918_v14 }
 0x2ad   :  { %3621 = vmatmul.mubr.bf16.gmra.mrb[136].mxu0 %v12594_v37  ;;  %4007 = vmatmul.mubr.bf16.gmra.mrb[136].mxu1 %v12594_v37  ;;  %v11936_v37 = vld [vmem:[#allocation7 + $0x8c4] ss:$48 sps:$4 sm:$0xff]  }
 0x2ae   :  { %3630 = vmatprep.mubr.bf16.mxu0 %v12596_v38  ;;  %4016 = vmatprep.mubr.bf16.mxu1 %v12596_v38  ;;  %v11931_v38 = vld [vmem:[#allocation7 + $0x8c8] ss:$48 sps:$4 sm:$0xff]  }
 0x2af   :  { %4156 = vmatpush1.bf16.msra.mxu1 %v11913_v21  ;;  %3770 = vmatpush1.bf16.msra.mxu0 %v11916_v34 }
 0x2b0   :  { %4157 = vmatprep.subr.bf16.mxu1 %v11921_v30  ;;  %3771 = vmatprep.subr.bf16.mxu0 %v11924_v23 }
 0x2b3   :  { %4158 = vmatpush1.bf16.msra.mxu1 %v11919_v24  ;;  %3772 = vmatpush1.bf16.msra.mxu0 %v11922_v61 }
 0x2b4   :  { %4159 = vmatprep.subr.bf16.mxu1 %v11927_v45  ;;  %3773 = vmatprep.subr.bf16.mxu0 %v11930_v6 }
 0x2b5   :  { %3631 = vmatmul.mubr.bf16.gmra.mrb[140].mxu0 %v12602_v52  ;;  %4017 = vmatmul.mubr.bf16.gmra.mrb[140].mxu1 %v12602_v52  ;;  %v15119_v52 = vld [vmem:[#allocation18_spill] sm:$0xff] }
 0x2b6   :  { %3640 = vmatprep.mubr.bf16.mxu0 %v12604_v53  ;;  %4026 = vmatprep.mubr.bf16.mxu1 %v12604_v53  ;;  %v15120_v53 = vld [vmem:[#allocation19_spill] sm:$0xff] }
 0x2b7   :  { %4160 = vmatpush1.bf16.msra.mxu1 %v11925_v44  ;;  %3774 = vmatpush1.bf16.msra.mxu0 %v11928_v62 }
 0x2b8   :  { %4161 = vmatprep.subr.bf16.mxu1 %v11933_v36  ;;  %3775 = vmatprep.subr.bf16.mxu0 %v11936_v37 }
 0x2bb   :  { %4162 = vmatpush1.bf16.msra.mxu1 %v11931_v38  ;;  %3776 = vmatpush1.bf16.msra.mxu0 %v11934_v54 }
 0x2bc   :  { %9668 = vmatprep.subr.bf16.mxu1 %v11937_v57  ;;  %6853 = vmatprep.subr.bf16.mxu0 %v11941_v19 }
 0x2bd   :  { %3641 = vmatmul.mubr.bf16.gmra.mrb[144].mxu0 %v12610_v2  ;;  %4027 = vmatmul.mubr.bf16.gmra.mrb[144].mxu1 %v12610_v2  ;;  %v15121_v2 = vld [vmem:[#allocation20_spill] sm:$0xff] }
 0x2be   :  { %3650 = vmatprep.mubr.bf16.mxu0 %v12612_v3  ;;  %4036 = vmatprep.mubr.bf16.mxu1 %v12612_v3  ;;  %v15122_v3 = vld [vmem:[#allocation21_spill] sm:$0xff] }
 0x2c5   :  { %3651 = vmatmul.mubr.bf16.gmra.mrb[148].mxu0 %v12618_v8  ;;  %4037 = vmatmul.mubr.bf16.gmra.mrb[148].mxu1 %v12618_v8  ;;  %v15123_v8 = vld [vmem:[#allocation22_spill] sm:$0xff] }
 0x2c6   :  { %3660 = vmatprep.mubr.bf16.mxu0 %v12620_v10  ;;  %4046 = vmatprep.mubr.bf16.mxu1 %v12620_v10  ;;  %v15124_v10 = vld [vmem:[#allocation31_spill] sm:$0xff] }
 0x2c7   :  { %v554_v56 = vsub.s32 7, %v15124_v10 }
 0x2c9   :  { %v13261_v12 = vrot.slane %v12321_v51, %v554_v56 }
 0x2cd   :  { %3661 = vmatmul.mubr.bf16.gmra.mrb[152].mxu0 %v12626_v16  ;;  %4047 = vmatmul.mubr.bf16.gmra.mrb[152].mxu1 %v12626_v16  ;;  %v542_v16 = vsub.s32 4, %v15124_v10 }
 0x2ce   :  { %3670 = vmatprep.mubr.bf16.mxu0 %v12628_v17  ;;  %4056 = vmatprep.mubr.bf16.mxu1 %v12628_v17  ;;  %v550_v17 = vsub.s32 6, %v15124_v10 }
 0x2cf   :  { %v13255_v31 = vrot.slane %v12321_v51, %v542_v16 }
 0x2d0   :  { %v13257_v28 = vrot.slane %v12321_v51, %v550_v17  ;;  %v15127_v17 = vld [vmem:[#allocation25_spill] sm:$0xff] }
 0x2d5   :  { %3671 = vmatmul.mubr.bf16.gmra.mrb[156].mxu0 %v12634_v22  ;;  %4057 = vmatmul.mubr.bf16.gmra.mrb[156].mxu1 %v12634_v22  ;;  %v546_v22 = vsub.s32 5, %v15124_v10 }
 0x2d6   :  { %3680 = vmatprep.mubr.bf16.mxu0 %v15119_v52  ;;  %4066 = vmatprep.mubr.bf16.mxu1 %v15119_v52 }
 0x2d7   :  { %v13259_v9 = vrot.slane %v12321_v51, %v546_v22 }
 0x2dd   :  { %3681 = vmatmul.mubr.bf16.gmra.mrb[160].mxu0 %v15120_v53  ;;  %4067 = vmatmul.mubr.bf16.gmra.mrb[160].mxu1 %v15120_v53 }
 0x2de   :  { %3690 = vmatprep.mubr.bf16.mxu0 %v15121_v2  ;;  %4076 = vmatprep.mubr.bf16.mxu1 %v15121_v2 }
 0x2e5   :  { %3691 = vmatmul.mubr.bf16.gmra.mrb[164].mxu0 %v15122_v3  ;;  %4077 = vmatmul.mubr.bf16.gmra.mrb[164].mxu1 %v15122_v3 }
 0x2e6   :  { %3700 = vmatprep.mubr.bf16.mxu0 %v15123_v8  ;;  %4086 = vmatprep.mubr.bf16.mxu1 %v15123_v8 }
 0x2ed   :  { %3701 = vmatmul.mubr.bf16.gmra.mrb[168].mxu0 %v15125_v13  ;;  %4087 = vmatmul.mubr.bf16.gmra.mrb[168].mxu1 %v15125_v13 }
 0x2ee   :  { %3710 = vmatprep.mubr.bf16.mxu0 %v15126_v40  ;;  %4096 = vmatprep.mubr.bf16.mxu1 %v15126_v40 }
 0x2f0   :  { %v3023_v27 = vpop.f32.mrb[64].mxu0  ;;  %v3409_v14 = vpop.f32.mrb[64].mxu1 }
 0x2f1   :  { %v10468_v21 = vadd.f32 %v3023_v27, %v13255_v31  ;;  %v10532_v34 = vadd.f32 %v3409_v14, %v13257_v28  ;;  %v3025_v30 = vpop.f32.mrb[65].mxu0  ;;  %v3411_v23 = vpop.f32.mrb[65].mxu1 }
 0x2f2   :  { %v10469_v24 = vadd.f32 %v3025_v30, %v13259_v9  ;;  %v10533_v61 = vadd.f32 %v3411_v23, %v13261_v12  ;;  %v3027_v45 = vpop.f32.mrb[66].mxu0  ;;  %v3413_v6 = vpop.f32.mrb[66].mxu1 }
 0x2f3   :  { %v10470_v44 = vadd.f32 %v3027_v45, %v13255_v31  ;;  %v10534_v62 = vadd.f32 %v3413_v6, %v13257_v28  ;;  %v3029_v36 = vpop.f32.mrb[67].mxu0  ;;  %v3415_v37 = vpop.f32.mrb[67].mxu1  ;;  %v4344_v57 = vmax.f32 %v10468_v21, 0.0  ;;  %v4346_v19 = vmax.f32 %v10532_v34, 0.0 }
 0x2f4   :  { %v10471_v38 = vadd.f32 %v3029_v36, %v13259_v9  ;;  %v10535_v54 = vadd.f32 %v3415_v37, %v13261_v12  ;;  %v4345_v2 = vmax.f32 %v10469_v24, 0.0  ;;  %v4347_v3 = vmax.f32 %v10533_v61, 0.0 }
 0x2f5   :  { %v4356_v52 = vmax.f32 %v10470_v44, 0.0  ;;  %v4358_v53 = vmax.f32 %v10534_v62, 0.0  ;;  %3711 = vmatmul.mubr.bf16.gmra.mrb[172].mxu0 %v12666_v50  ;;  %4097 = vmatmul.mubr.bf16.gmra.mrb[172].mxu1 %v12666_v50 }
 0x2f6   :  { %v4357_v8 = vmax.f32 %v10471_v38, 0.0  ;;  %v4359_v16 = vmax.f32 %v10535_v54, 0.0  ;;  %3720 = vmatprep.mubr.bf16.mxu0 %v15127_v17  ;;  %4106 = vmatprep.mubr.bf16.mxu1 %v15127_v17 }
 0x2f7   :  { %v13277_v22 = vpack.c.bf16 %v4356_v52, %v4344_v57  ;;  %v13279_v56 = vpack.c.bf16 %v4358_v53, %v4346_v19 }
 0x2f8   :  { %v13281_v13 = vpack.c.bf16 %v4357_v8, %v4345_v2  ;;  %v3033_v51 = vpop.f32.mrb[68].mxu0  ;;  %v3419_v40 = vpop.f32.mrb[68].mxu1  ;;  %v13283_v27 = vpack.c.bf16 %v4359_v16, %v4347_v3 }
 0x2f9   :  { %15128 = vst [vmem:[#allocation18_spill] sm:$0xff] %v13279_v56  ;;  %v10472_v50 = vadd.f32 %v3033_v51, %v13255_v31  ;;  %v10536_v14 = vadd.f32 %v3419_v40, %v13257_v28  ;;  %v3035_v21 = vpop.f32.mrb[69].mxu0  ;;  %v3421_v34 = vpop.f32.mrb[69].mxu1 }
 0x2fa   :  { %15129 = vst [vmem:[#allocation19_spill] sm:$0xff] %v13283_v27  ;;  %v10473_v30 = vadd.f32 %v3035_v21, %v13259_v9  ;;  %v10537_v23 = vadd.f32 %v3421_v34, %v13261_v12  ;;  %v3037_v24 = vpop.f32.mrb[70].mxu0  ;;  %v3423_v61 = vpop.f32.mrb[70].mxu1 }
 0x2fb   :  { %v10474_v45 = vadd.f32 %v3037_v24, %v13255_v31  ;;  %v10538_v6 = vadd.f32 %v3423_v61, %v13257_v28  ;;  %v3039_v44 = vpop.f32.mrb[71].mxu0  ;;  %v3425_v62 = vpop.f32.mrb[71].mxu1  ;;  %v4368_v38 = vmax.f32 %v10472_v50, 0.0  ;;  %v4370_v54 = vmax.f32 %v10536_v14, 0.0 }
 0x2fc   :  { %v10475_v36 = vadd.f32 %v3039_v44, %v13259_v9  ;;  %v10539_v37 = vadd.f32 %v3425_v62, %v13261_v12  ;;  %v4369_v52 = vmax.f32 %v10473_v30, 0.0  ;;  %v4371_v53 = vmax.f32 %v10537_v23, 0.0 }
 0x2fd   :  { %v4380_v57 = vmax.f32 %v10474_v45, 0.0  ;;  %v4382_v19 = vmax.f32 %v10538_v6, 0.0  ;;  %3721 = vmatmul.mubr.bf16.gmra.mrb[176].mxu0 %v12674_v59  ;;  %4107 = vmatmul.mubr.bf16.gmra.mrb[176].mxu1 %v12674_v59 }
 0x2fe   :  { %v4381_v2 = vmax.f32 %v10475_v36, 0.0  ;;  %v4383_v3 = vmax.f32 %v10539_v37, 0.0  ;;  %3730 = vmatprep.mubr.bf16.mxu0 %v12676_v60  ;;  %4116 = vmatprep.mubr.bf16.mxu1 %v12676_v60 }
 0x2ff   :  { %v13297_v8 = vpack.c.bf16 %v4380_v57, %v4368_v38  ;;  %v13299_v16 = vpack.c.bf16 %v4382_v19, %v4370_v54  ;;  %v15132_v19 = vld [vmem:[#allocation26_spill] sm:$0xff] }
 0x300   :  { %v13301_v17 = vpack.c.bf16 %v4381_v2, %v4369_v52  ;;  %v3043_v51 = vpop.f32.mrb[72].mxu0  ;;  %v3429_v40 = vpop.f32.mrb[72].mxu1  ;;  %v13303_v50 = vpack.c.bf16 %v4383_v3, %v4371_v53 }
 0x301   :  { %15130 = vst [vmem:[#allocation20_spill] sm:$0xff] %v13299_v16  ;;  %v10476_v59 = vadd.f32 %v3043_v51, %v13255_v31  ;;  %v10540_v14 = vadd.f32 %v3429_v40, %v13257_v28  ;;  %v3045_v21 = vpop.f32.mrb[73].mxu0  ;;  %v3431_v34 = vpop.f32.mrb[73].mxu1  ;;  %v15133_v51 = vld [vmem:[#allocation27_spill] sm:$0xff] }
 0x302   :  { %15131 = vst [vmem:[#allocation21_spill] sm:$0xff] %v13303_v50  ;;  %v10477_v30 = vadd.f32 %v3045_v21, %v13259_v9  ;;  %v10541_v60 = vadd.f32 %v3431_v34, %v13261_v12  ;;  %v3047_v23 = vpop.f32.mrb[74].mxu0  ;;  %v3433_v24 = vpop.f32.mrb[74].mxu1  ;;  %v11942_v50 = vld [vmem:[#allocation10 + $0x18] ss:$12 sps:$4 sm:$0xff]  }
 0x303   :  { %v10478_v61 = vadd.f32 %v3047_v23, %v13255_v31  ;;  %v10542_v45 = vadd.f32 %v3433_v24, %v13257_v28  ;;  %v3049_v6 = vpop.f32.mrb[75].mxu0  ;;  %v3435_v44 = vpop.f32.mrb[75].mxu1  ;;  %v4392_v37 = vmax.f32 %v10476_v59, 0.0  ;;  %v4394_v38 = vmax.f32 %v10540_v14, 0.0 }
 0x304   :  { %v10479_v62 = vadd.f32 %v3049_v6, %v13259_v9  ;;  %v10543_v36 = vadd.f32 %v3435_v44, %v13261_v12  ;;  %v4393_v52 = vmax.f32 %v10477_v30, 0.0  ;;  %v4395_v53 = vmax.f32 %v10541_v60, 0.0 }
 0x305   :  { %v4404_v54 = vmax.f32 %v10478_v61, 0.0  ;;  %v4406_v57 = vmax.f32 %v10542_v45, 0.0  ;;  %3731 = vmatmul.mubr.bf16.gmra.mrb[180].mxu0 %v15132_v19  ;;  %4117 = vmatmul.mubr.bf16.gmra.mrb[180].mxu1 %v15132_v19 }
 0x306   :  { %v4405_v2 = vmax.f32 %v10479_v62, 0.0  ;;  %v4407_v3 = vmax.f32 %v10543_v36, 0.0  ;;  %3740 = vmatprep.mubr.bf16.mxu0 %v15133_v51  ;;  %4126 = vmatprep.mubr.bf16.mxu1 %v15133_v51  ;;  %v15136_v51 = vld [vmem:[#allocation28_spill] sm:$0xff] }
 0x307   :  { %v13317_v40 = vpack.c.bf16 %v4404_v54, %v4392_v37  ;;  %v13319_v21 = vpack.c.bf16 %v4406_v57, %v4394_v38 }
 0x308   :  { %v13321_v59 = vpack.c.bf16 %v4405_v2, %v4393_v52  ;;  %v3053_v14 = vpop.f32.mrb[76].mxu0  ;;  %v3439_v34 = vpop.f32.mrb[76].mxu1  ;;  %v13323_v23 = vpack.c.bf16 %v4407_v3, %v4395_v53 }
 0x309   :  { %15134 = vst [vmem:[#allocation22_spill] sm:$0xff] %v13319_v21  ;;  %v10480_v24 = vadd.f32 %v3053_v14, %v13255_v31  ;;  %v10544_v30 = vadd.f32 %v3439_v34, %v13257_v28  ;;  %v3055_v60 = vpop.f32.mrb[77].mxu0  ;;  %v3441_v61 = vpop.f32.mrb[77].mxu1 }
 0x30a   :  { %15135 = vst [vmem:[#allocation31_spill] sm:$0xff] %v13323_v23  ;;  %v10481_v45 = vadd.f32 %v3055_v60, %v13259_v9  ;;  %v10545_v6 = vadd.f32 %v3441_v61, %v13261_v12  ;;  %v3057_v44 = vpop.f32.mrb[78].mxu0  ;;  %v3443_v62 = vpop.f32.mrb[78].mxu1 }
 0x30b   :  { %v10482_v36 = vadd.f32 %v3057_v44, %v13255_v31  ;;  %v10546_v37 = vadd.f32 %v3443_v62, %v13257_v28  ;;  %v3059_v38 = vpop.f32.mrb[79].mxu0  ;;  %v3445_v54 = vpop.f32.mrb[79].mxu1  ;;  %v4416_v52 = vmax.f32 %v10480_v24, 0.0  ;;  %v4418_v53 = vmax.f32 %v10544_v30, 0.0  ;;  %v15137_v44 = vld [vmem:[#allocation29_spill] sm:$0xff] }
 0x30c   :  { %v10483_v57 = vadd.f32 %v3059_v38, %v13259_v9  ;;  %v10547_v19 = vadd.f32 %v3445_v54, %v13261_v12  ;;  %v4417_v14 = vmax.f32 %v10481_v45, 0.0  ;;  %v4419_v34 = vmax.f32 %v10545_v6, 0.0 }
 0x30d   :  { %v4428_v2 = vmax.f32 %v10482_v36, 0.0  ;;  %v4430_v3 = vmax.f32 %v10546_v37, 0.0  ;;  %3741 = vmatmul.mubr.bf16.gmra.mrb[184].mxu0 %v15136_v51  ;;  %4127 = vmatmul.mubr.bf16.gmra.mrb[184].mxu1 %v15136_v51 }
 0x30e   :  { %v4429_v60 = vmax.f32 %v10483_v57, 0.0  ;;  %v4431_v61 = vmax.f32 %v10547_v19, 0.0  ;;  %3750 = vmatprep.mubr.bf16.mxu0 %v15137_v44  ;;  %4136 = vmatprep.mubr.bf16.mxu1 %v15137_v44 }
 0x30f   :  { %v13337_v62 = vpack.c.bf16 %v4428_v2, %v4416_v52  ;;  %v13339_v38 = vpack.c.bf16 %v4430_v3, %v4418_v53 }
 0x310   :  { %v13341_v24 = vpack.c.bf16 %v4429_v60, %v4417_v14  ;;  %v3063_v30 = vpop.f32.mrb[80].mxu0  ;;  %v3449_v36 = vpop.f32.mrb[80].mxu1  ;;  %v13343_v37 = vpack.c.bf16 %v4431_v61, %v4419_v34 }
 0x311   :  { %15138 = vst [vmem:[#allocation23_spill] sm:$0xff] %v13339_v38  ;;  %v10484_v54 = vadd.f32 %v3063_v30, %v13255_v31  ;;  %v10548_v45 = vadd.f32 %v3449_v36, %v13257_v28  ;;  %v3065_v6 = vpop.f32.mrb[81].mxu0  ;;  %v3451_v57 = vpop.f32.mrb[81].mxu1 }
 0x312   :  { %15139 = vst [vmem:[#allocation24_spill] sm:$0xff] %v13343_v37  ;;  %v10485_v19 = vadd.f32 %v3065_v6, %v13259_v9  ;;  %v10549_v51 = vadd.f32 %v3451_v57, %v13261_v12  ;;  %v3067_v52 = vpop.f32.mrb[82].mxu0  ;;  %v3453_v2 = vpop.f32.mrb[82].mxu1  ;;  %v15140_v37 = vld [vmem:[#allocation30_spill] sm:$0xff] }
 0x313   :  { %v10486_v53 = vadd.f32 %v3067_v52, %v13255_v31  ;;  %v10550_v3 = vadd.f32 %v3453_v2, %v13257_v28  ;;  %v3069_v14 = vpop.f32.mrb[83].mxu0  ;;  %v3455_v60 = vpop.f32.mrb[83].mxu1  ;;  %v4440_v44 = vmax.f32 %v10484_v54, 0.0  ;;  %v4442_v30 = vmax.f32 %v10548_v45, 0.0 }
 0x314   :  { %v10487_v34 = vadd.f32 %v3069_v14, %v13259_v9  ;;  %v10551_v61 = vadd.f32 %v3455_v60, %v13261_v12  ;;  %v4441_v6 = vmax.f32 %v10485_v19, 0.0  ;;  %v4443_v57 = vmax.f32 %v10549_v51, 0.0 }
 0x315   :  { %v4452_v36 = vmax.f32 %v10486_v53, 0.0  ;;  %v4454_v38 = vmax.f32 %v10550_v3, 0.0  ;;  %3751 = vmatmul.mubr.bf16.gmra.mrb[188].mxu0 %v15140_v37  ;;  %4137 = vmatmul.mubr.bf16.gmra.mrb[188].mxu1 %v15140_v37 }
 0x316   :  { %v4453_v21 = vmax.f32 %v10487_v34, 0.0  ;;  %v4455_v52 = vmax.f32 %v10551_v61, 0.0  ;;  %3793 = vmatprep.mubr.bf16.mxu0 %v15079_v39  ;;  %4179 = vmatprep.mubr.bf16.mxu1 %v15079_v39 }
 0x317   :  { %v13357_v2 = vpack.c.bf16 %v4452_v36, %v4440_v44  ;;  %v13359_v14 = vpack.c.bf16 %v4454_v38, %v4442_v30  ;;  %v11938_v38 = vld [vmem:[#allocation10 + $0x8] ss:$12 sps:$4 sm:$0xff]   ;;  %v11939_v30 = vld [vmem:[#allocation10] ss:$12 sps:$4 sm:$0xff]  }
 0x318   :  { %v13361_v54 = vpack.c.bf16 %v4453_v21, %v4441_v6  ;;  %v3073_v45 = vpop.f32.mrb[84].mxu0  ;;  %v3459_v53 = vpop.f32.mrb[84].mxu1  ;;  %v13363_v3 = vpack.c.bf16 %v4455_v52, %v4443_v57 }
 0x319   :  { %15141 = vst [vmem:[#allocation25_spill] sm:$0xff] %v13357_v2  ;;  %15142 = vst [vmem:[#allocation26_spill] sm:$0xff] %v13359_v14  ;;  %v10488_v37 = vadd.f32 %v3073_v45, %v13255_v31  ;;  %v10552_v19 = vadd.f32 %v3459_v53, %v13257_v28  ;;  %v3075_v51 = vpop.f32.mrb[85].mxu0  ;;  %v3461_v60 = vpop.f32.mrb[85].mxu1  ;;  %v11944_v14 = vld [vmem:[#allocation10 + $0x1c] ss:$12 sps:$4 sm:$0xff]  }
 0x31a   :  { %15143 = vst [vmem:[#allocation27_spill] sm:$0xff] %v13363_v3  ;;  %v10489_v34 = vadd.f32 %v3075_v51, %v13259_v9  ;;  %v10553_v61 = vadd.f32 %v3461_v60, %v13261_v12  ;;  %v3077_v44 = vpop.f32.mrb[86].mxu0  ;;  %v3463_v36 = vpop.f32.mrb[86].mxu1  ;;  %v11945_v3 = vld [vmem:[#allocation10 + $0xe0] ss:$12 sps:$4 sm:$0xff]  }
 0x31b   :  { %v10490_v21 = vadd.f32 %v3077_v44, %v13255_v31  ;;  %v10554_v6 = vadd.f32 %v3463_v36, %v13257_v28  ;;  %v3079_v57 = vpop.f32.mrb[87].mxu0  ;;  %v3465_v52 = vpop.f32.mrb[87].mxu1  ;;  %v4464_v23 = vmax.f32 %v10488_v37, 0.0  ;;  %v4466_v51 = vmax.f32 %v10552_v19, 0.0  ;;  %v11949_v37 = vld [vmem:[#allocation10 + $0x34] ss:$12 sps:$4 sm:$0xff]  }
 0x31c   :  { %v10491_v45 = vadd.f32 %v3079_v57, %v13259_v9  ;;  %v10555_v53 = vadd.f32 %v3465_v52, %v13261_v12  ;;  %v4465_v44 = vmax.f32 %v10489_v34, 0.0  ;;  %v4467_v56 = vmax.f32 %v10553_v61, 0.0  ;;  %v11946_v57 = vld [vmem:[#allocation10 + $0x20] ss:$12 sps:$4 sm:$0xff]   ;;  %v11953_v19 = vld [vmem:[#allocation10 + $0xf8] ss:$12 sps:$4 sm:$0xff]  }
 0x31d   :  { %v4476_v16 = vmax.f32 %v10490_v21, 0.0  ;;  %v4478_v60 = vmax.f32 %v10554_v6, 0.0  ;;  %3794 = vmatmul.mubr.bf16.vlgmr.msra.gmra.mrb[128].mxu0 %v12704_v29  ;;  %4180 = vmatmul.mubr.bf16.vlgmr.msra.gmra.mrb[128].mxu1 %v12704_v29 }
 0x31e   :  { %v4477_v36 = vmax.f32 %v10491_v45, 0.0  ;;  %v4479_v27 = vmax.f32 %v10555_v53, 0.0  ;;  %9669 = vmatpush3.bf16.msra.mxu1 %v11938_v38  ;;  %6854 = vmatpush1.bf16.msra.mxu0 %v11939_v30 }
 0x31f   :  { %v13375_v2 = vpack.c.bf16 %v4476_v16, %v4464_v23  ;;  %3803 = vmatprep.mubr.bf16.mxu0 %v15079_v39  ;;  %4189 = vmatprep.mubr.bf16.mxu1 %v15079_v39  ;;  %v13379_v21 = vpack.c.bf16 %v4478_v60, %v4466_v51 }
 0x320   :  { %v13381_v6 = vpack.c.bf16 %v4477_v36, %v4465_v44  ;;  %v3083_v29 = vpop.f32.mrb[88].mxu0  ;;  %v3469_v34 = vpop.f32.mrb[88].mxu1  ;;  %6855 = vmatprep.subr.bf16.mxu0 %v11944_v14  ;;  %9670 = vmatprep.subr.bf16.mxu1 %v11945_v3  ;;  %v13383_v61 = vpack.c.bf16 %v4479_v27, %v4467_v56  ;;  %v11947_v3 = vld [vmem:[#allocation10 + $0x30] ss:$12 sps:$4 sm:$0xff]   ;;  %v11954_v44 = vld [vmem:[#allocation10 + $0x38] ss:$12 sps:$4 sm:$0xff]  }
 0x321   :  { %15144 = vst [vmem:[#allocation28_spill] sm:$0xff] %v13379_v21  ;;  %v10492_v38 = vadd.f32 %v3083_v29, %v13255_v31  ;;  %v10556_v16 = vadd.f32 %v3469_v34, %v13257_v28  ;;  %v3085_v23 = vpop.f32.mrb[89].mxu0  ;;  %v3471_v30 = vpop.f32.mrb[89].mxu1  ;;  %v11952_v34 = vld [vmem:[#allocation10 + $0x4c] ss:$12 sps:$4 sm:$0xff]  }
 0x322   :  { %15145 = vst [vmem:[#allocation29_spill] sm:$0xff] %v13383_v61  ;;  %v10493_v52 = vadd.f32 %v3085_v23, %v13259_v9  ;;  %v10557_v45 = vadd.f32 %v3471_v30, %v13261_v12  ;;  %v3087_v53 = vpop.f32.mrb[90].mxu0  ;;  %v3473_v51 = vpop.f32.mrb[90].mxu1  ;;  %6856 = vmatpush1.bf16.msra.mxu0 %v11942_v50  ;;  %9671 = vmatpush3.bf16.msra.mxu1 %v11946_v57  ;;  %v11961_v23 = vld [vmem:[#allocation10 + $0x110] ss:$12 sps:$4 sm:$0xff]  }
 0x323   :  { %v10494_v60 = vadd.f32 %v3087_v53, %v13255_v31  ;;  %v10558_v14 = vadd.f32 %v3473_v51, %v13257_v28  ;;  %v3089_v56 = vpop.f32.mrb[91].mxu0  ;;  %v3475_v27 = vpop.f32.mrb[91].mxu1  ;;  %6857 = vmatprep.subr.bf16.mxu0 %v11949_v37  ;;  %9672 = vmatprep.subr.bf16.mxu1 %v11953_v19  ;;  %v4488_v30 = vmax.f32 %v10492_v38, 0.0  ;;  %v4490_v21 = vmax.f32 %v10556_v16, 0.0  ;;  %v11962_v38 = vld [vmem:[#allocation10 + $0x50] ss:$12 sps:$4 sm:$0xff]  }
 0x324   :  { %v10495_v36 = vadd.f32 %v3089_v56, %v13259_v9  ;;  %v10559_v29 = vadd.f32 %v3475_v27, %v13261_v12  ;;  %v4489_v53 = vmax.f32 %v10493_v52, 0.0  ;;  %v4491_v51 = vmax.f32 %v10557_v45, 0.0  ;;  %v11950_v56 = vld [vmem:[#allocation10 + $0x48] ss:$12 sps:$4 sm:$0xff]   ;;  %v11957_v52 = vld [vmem:[#allocation10 + $0x64] ss:$12 sps:$4 sm:$0xff]  }
 0x325   :  { %v4500_v50 = vmax.f32 %v10494_v60, 0.0  ;;  %v4502_v57 = vmax.f32 %v10558_v14, 0.0  ;;  %3804 = vmatmul.mubr.bf16.gmra.mrb[132].mxu0 %v12710_v46  ;;  %4190 = vmatmul.mubr.bf16.gmra.mrb[132].mxu1 %v12710_v46  ;;  %v11969_v45 = vld [vmem:[#allocation10 + $0x128] ss:$12 sps:$4 sm:$0xff]  }
 0x326   :  { %v4501_v61 = vmax.f32 %v10495_v36, 0.0  ;;  %v4503_v37 = vmax.f32 %v10559_v29, 0.0  ;;  %3813 = vmatprep.mubr.bf16.mxu0 %v15079_v39  ;;  %4199 = vmatprep.mubr.bf16.mxu1 %v15079_v39 }
 0x327   :  { %v13397_v19 = vpack.c.bf16 %v4500_v50, %v4488_v30  ;;  %6858 = vmatpush1.bf16.msra.mxu0 %v11947_v3  ;;  %9673 = vmatpush3.bf16.msra.mxu1 %v11954_v44  ;;  %v13399_v16 = vpack.c.bf16 %v4502_v57, %v4490_v21 }
 0x328   :  { %v13401_v60 = vpack.c.bf16 %v4501_v61, %v4489_v53  ;;  %v3093_v14 = vpop.f32.mrb[92].mxu0  ;;  %v3479_v46 = vpop.f32.mrb[92].mxu1  ;;  %6859 = vmatprep.subr.bf16.mxu0 %v11952_v34  ;;  %9674 = vmatprep.subr.bf16.mxu1 %v11961_v23  ;;  %v13403_v27 = vpack.c.bf16 %v4503_v37, %v4491_v51  ;;  %v11955_v51 = vld [vmem:[#allocation10 + $0x60] ss:$12 sps:$4 sm:$0xff]   ;;  %v11970_v37 = vld [vmem:[#allocation10 + $0x68] ss:$12 sps:$4 sm:$0xff]  }
 0x329   :  { %15146 = vst [vmem:[#allocation30_spill] sm:$0xff] %v13397_v19  ;;  %15147 = vst [vmem:[#allocation90_spill] sm:$0xff] %v13399_v16  ;;  %v10496_v36 = vadd.f32 %v3093_v14, %v13255_v31  ;;  %v10560_v29 = vadd.f32 %v3479_v46, %v13257_v28  ;;  %v3095_v3 = vpop.f32.mrb[93].mxu0  ;;  %v3481_v30 = vpop.f32.mrb[93].mxu1 }
 0x32a   :  { %15148 = vst [vmem:[#allocation91_spill] sm:$0xff] %v13401_v60  ;;  %15149 = vst [vmem:[#allocation92_spill] sm:$0xff] %v13403_v27  ;;  %v10497_v44 = vadd.f32 %v3095_v3, %v13259_v9  ;;  %v10561_v21 = vadd.f32 %v3481_v30, %v13261_v12  ;;  %v3097_v61 = vpop.f32.mrb[94].mxu0  ;;  %v3483_v50 = vpop.f32.mrb[94].mxu1  ;;  %v11960_v3 = vld [vmem:[#allocation10 + $0x7c] ss:$12 sps:$4 sm:$0xff]  }
 0x32b   :  { %v10498_v57 = vadd.f32 %v3097_v61, %v13255_v31  ;;  %v10562_v34 = vadd.f32 %v3483_v50, %v13257_v28  ;;  %v3099_v23 = vpop.f32.mrb[95].mxu0  ;;  %v3485_v53 = vpop.f32.mrb[95].mxu1  ;;  %6860 = vmatpush1.bf16.msra.mxu0 %v11950_v56  ;;  %9675 = vmatpush3.bf16.msra.mxu1 %v11962_v38  ;;  %v11977_v30 = vld [vmem:[#allocation10 + $0x140] ss:$12 sps:$4 sm:$0xff]   ;;  %v4512_v16 = vmax.f32 %v10496_v36, 0.0  ;;  %v4514_v27 = vmax.f32 %v10560_v29, 0.0 }
 0x32c   :  { %v10499_v14 = vadd.f32 %v3099_v23, %v13259_v9  ;;  %v10563_v46 = vadd.f32 %v3485_v53, %v13261_v12  ;;  %6861 = vmatprep.subr.bf16.mxu0 %v11957_v52  ;;  %9676 = vmatprep.subr.bf16.mxu1 %v11969_v45  ;;  %v4513_v56 = vmax.f32 %v10497_v44, 0.0  ;;  %v4515_v50 = vmax.f32 %v10561_v21, 0.0  ;;  %v11958_v45 = vld [vmem:[#allocation10 + $0x78] ss:$12 sps:$4 sm:$0xff]   ;;  %v11978_v36 = vld [vmem:[#allocation10 + $0x80] ss:$12 sps:$4 sm:$0xff]  }
 0x32d   :  { %v4524_v19 = vmax.f32 %v10498_v57, 0.0  ;;  %v4526_v61 = vmax.f32 %v10562_v34, 0.0  ;;  %3814 = vmatmul.mubr.bf16.gmra.mrb[136].mxu0 %v12716_v0  ;;  %4200 = vmatmul.mubr.bf16.gmra.mrb[136].mxu1 %v12716_v0  ;;  %v11965_v44 = vld [vmem:[#allocation10 + $0x94] ss:$12 sps:$4 sm:$0xff]   ;;  %v11985_v21 = vld [vmem:[#allocation10 + $0x158] ss:$12 sps:$4 sm:$0xff]  }
 0x32e   :  { %v4525_v38 = vmax.f32 %v10499_v14, 0.0  ;;  %v4527_v60 = vmax.f32 %v10563_v46, 0.0  ;;  %3823 = vmatprep.mubr.bf16.mxu0 %v15079_v39  ;;  %4209 = vmatprep.mubr.bf16.mxu1 %v15079_v39 }
 0x32f   :  { %v13417_v52 = vpack.c.bf16 %v4524_v19, %v4512_v16  ;;  %6862 = vmatpush1.bf16.msra.mxu0 %v11955_v51  ;;  %9677 = vmatpush3.bf16.msra.mxu1 %v11970_v37  ;;  %v13419_v29 = vpack.c.bf16 %v4526_v61, %v4514_v27 }
 0x330   :  { %v13421_v57 = vpack.c.bf16 %v4525_v38, %v4513_v56  ;;  %v3103_v34 = vpop.f32.mrb[96].mxu0  ;;  %v3489_v0 = vpop.f32.mrb[96].mxu1  ;;  %6863 = vmatprep.subr.bf16.mxu0 %v11960_v3  ;;  %9678 = vmatprep.subr.bf16.mxu1 %v11977_v30  ;;  %v13423_v23 = vpack.c.bf16 %v4527_v60, %v4515_v50  ;;  %v11963_v60 = vld [vmem:[#allocation10 + $0x90] ss:$12 sps:$4 sm:$0xff]   ;;  %v11986_v50 = vld [vmem:[#allocation10 + $0x98] ss:$12 sps:$4 sm:$0xff]  }
 0x331   :  { %15150 = vst [vmem:[#allocation93_spill] sm:$0xff] %v13417_v52  ;;  %15151 = vst [vmem:[#allocation94_spill] sm:$0xff] %v13419_v29  ;;  %v10500_v53 = vadd.f32 %v3103_v34, %v13255_v31  ;;  %v10564_v19 = vadd.f32 %v3489_v0, %v13257_v28  ;;  %v3105_v16 = vpop.f32.mrb[97].mxu0  ;;  %v3491_v51 = vpop.f32.mrb[97].mxu1  ;;  %v11968_v0 = vld [vmem:[#allocation10 + $0xac] ss:$12 sps:$4 sm:$0xff]  }
 0x332   :  { %15152 = vst [vmem:[#allocation95_spill] sm:$0xff] %v13423_v23  ;;  %v10501_v37 = vadd.f32 %v3105_v16, %v13259_v9  ;;  %v10565_v27 = vadd.f32 %v3491_v51, %v13261_v12  ;;  %v3107_v14 = vpop.f32.mrb[98].mxu0  ;;  %v3493_v46 = vpop.f32.mrb[98].mxu1  ;;  %v11993_v16 = vld [vmem:[#allocation10 + $0x170] ss:$12 sps:$4 sm:$0xff]  }
 0x333   :  { %v10502_v61 = vadd.f32 %v3107_v14, %v13255_v31  ;;  %v10566_v3 = vadd.f32 %v3493_v46, %v13257_v28  ;;  %v3109_v30 = vpop.f32.mrb[99].mxu0  ;;  %v3495_v56 = vpop.f32.mrb[99].mxu1  ;;  %6864 = vmatpush1.bf16.msra.mxu0 %v11958_v45  ;;  %9679 = vmatpush3.bf16.msra.mxu1 %v11978_v36  ;;  %v4536_v51 = vmax.f32 %v10500_v53, 0.0  ;;  %v4538_v29 = vmax.f32 %v10564_v19, 0.0  ;;  %v11994_v53 = vld [vmem:[#allocation10 + $0xb0] ss:$12 sps:$4 sm:$0xff]  }
 0x334   :  { %v10503_v38 = vadd.f32 %v3109_v30, %v13259_v9  ;;  %v10567_v34 = vadd.f32 %v3495_v56, %v13261_v12  ;;  %6865 = vmatprep.subr.bf16.mxu0 %v11965_v44  ;;  %9680 = vmatprep.subr.bf16.mxu1 %v11985_v21  ;;  %v4537_v45 = vmax.f32 %v10501_v37, 0.0  ;;  %v4539_v46 = vmax.f32 %v10565_v27, 0.0  ;;  %v11966_v21 = vld [vmem:[#allocation10 + $0xa8] ss:$12 sps:$4 sm:$0xff]   ;;  %v11973_v37 = vld [vmem:[#allocation10 + $0xc4] ss:$12 sps:$4 sm:$0xff]  }
 0x335   :  { %v4548_v23 = vmax.f32 %v10502_v61, 0.0  ;;  %v4550_v14 = vmax.f32 %v10566_v3, 0.0  ;;  %3824 = vmatmul.mubr.bf16.gmra.mrb[140].mxu0 %v12722_v32  ;;  %4210 = vmatmul.mubr.bf16.gmra.mrb[140].mxu1 %v12722_v32  ;;  %v12001_v27 = vld [vmem:[#allocation10 + $0x248] ss:$12 sps:$4 sm:$0xff]  }
 0x336   :  { %v4549_v36 = vmax.f32 %v10503_v38, 0.0  ;;  %v4551_v52 = vmax.f32 %v10567_v34, 0.0  ;;  %3833 = vmatprep.mubr.bf16.mxu0 %v15079_v39  ;;  %4219 = vmatprep.mubr.bf16.mxu1 %v15079_v39 }
 0x337   :  { %v13437_v44 = vpack.c.bf16 %v4548_v23, %v4536_v51  ;;  %6866 = vmatpush1.bf16.msra.mxu0 %v11963_v60  ;;  %9681 = vmatpush3.bf16.msra.mxu1 %v11986_v50  ;;  %v13439_v19 = vpack.c.bf16 %v4550_v14, %v4538_v29 }
 0x338   :  { %v13441_v61 = vpack.c.bf16 %v4549_v36, %v4537_v45  ;;  %v3113_v3 = vpop.f32.mrb[100].mxu0  ;;  %v3499_v32 = vpop.f32.mrb[100].mxu1  ;;  %6867 = vmatprep.subr.bf16.mxu0 %v11968_v0  ;;  %9682 = vmatprep.subr.bf16.mxu1 %v11993_v16  ;;  %v13443_v30 = vpack.c.bf16 %v4551_v52, %v4539_v46  ;;  %v11971_v52 = vld [vmem:[#allocation10 + $0xc0] ss:$12 sps:$4 sm:$0xff]  }
 0x339   :  { %15153 = vst [vmem:[#allocation96_spill] sm:$0xff] %v13439_v19  ;;  %v10504_v56 = vadd.f32 %v3113_v3, %v13255_v31  ;;  %v10568_v23 = vadd.f32 %v3499_v32, %v13257_v28  ;;  %v3115_v60 = vpop.f32.mrb[101].mxu0  ;;  %v3501_v38 = vpop.f32.mrb[101].mxu1  ;;  %v11976_v3 = vld [vmem:[#allocation10 + $0xdc] ss:$12 sps:$4 sm:$0xff]  }
 0x33a   :  { %15154 = vst [vmem:[#allocation97_spill] sm:$0xff] %v13443_v30  ;;  %v10505_v50 = vadd.f32 %v3115_v60, %v13259_v9  ;;  %v10569_v29 = vadd.f32 %v3501_v38, %v13261_v12  ;;  %v3117_v34 = vpop.f32.mrb[102].mxu0  ;;  %v3503_v51 = vpop.f32.mrb[102].mxu1 }
 0x33b   :  { %v10506_v14 = vadd.f32 %v3117_v34, %v13255_v31  ;;  %v10570_v0 = vadd.f32 %v3503_v51, %v13257_v28  ;;  %v3119_v16 = vpop.f32.mrb[103].mxu0  ;;  %v3505_v45 = vpop.f32.mrb[103].mxu1  ;;  %6868 = vmatpush1.bf16.msra.mxu0 %v11966_v21  ;;  %9683 = vmatpush3.bf16.msra.mxu1 %v11994_v53  ;;  %v4560_v32 = vmax.f32 %v10504_v56, 0.0  ;;  %v4562_v60 = vmax.f32 %v10568_v23, 0.0 }
 0x33c   :  { %v10507_v46 = vadd.f32 %v3119_v16, %v13259_v9  ;;  %v10571_v36 = vadd.f32 %v3505_v45, %v13261_v12  ;;  %6869 = vmatprep.subr.bf16.mxu0 %v11973_v37  ;;  %9780 = vmatprep.subr.bf16.mxu1 %v12001_v27  ;;  %v4561_v34 = vmax.f32 %v10505_v50, 0.0  ;;  %v4563_v51 = vmax.f32 %v10569_v29, 0.0  ;;  %v11974_v37 = vld [vmem:[#allocation10 + $0xd8] ss:$12 sps:$4 sm:$0xff]  }
 0x33d   :  { %v4572_v38 = vmax.f32 %v10506_v14, 0.0  ;;  %v4574_v19 = vmax.f32 %v10570_v0, 0.0  ;;  %3834 = vmatmul.mubr.bf16.gmra.mrb[144].mxu0 %v12728_v55  ;;  %4220 = vmatmul.mubr.bf16.gmra.mrb[144].mxu1 %v12728_v55  ;;  %v11981_v55 = vld [vmem:[#allocation10 + $0xf4] ss:$12 sps:$4 sm:$0xff]  }
 0x33e   :  { %v4573_v21 = vmax.f32 %v10507_v46, 0.0  ;;  %v4575_v30 = vmax.f32 %v10571_v36, 0.0  ;;  %3843 = vmatprep.mubr.bf16.mxu0 %v15079_v39  ;;  %4229 = vmatprep.mubr.bf16.mxu1 %v15079_v39 }
 0x33f   :  { %v13457_v53 = vpack.c.bf16 %v4572_v38, %v4560_v32  ;;  %6870 = vmatpush1.bf16.msra.mxu0 %v11971_v52  ;;  %v13459_v27 = vpack.c.bf16 %v4574_v19, %v4562_v60 }
 0x340   :  { %v13461_v56 = vpack.c.bf16 %v4573_v21, %v4561_v34  ;;  %v3123_v23 = vpop.f32.mrb[104].mxu0  ;;  %v3509_v14 = vpop.f32.mrb[104].mxu1  ;;  %6871 = vmatprep.subr.bf16.mxu0 %v11976_v3  ;;  %v13463_v50 = vpack.c.bf16 %v4575_v30, %v4563_v51  ;;  %v11979_v30 = vld [vmem:[#allocation10 + $0xf0] ss:$12 sps:$4 sm:$0xff]   ;;  %v11984_v21 = vld [vmem:[#allocation10 + $0x10c] ss:$12 sps:$4 sm:$0xff]  }
 0x341   :  { %15155 = vst [vmem:[#allocation98_spill] sm:$0xff] %v13459_v27  ;;  %v10508_v29 = vadd.f32 %v3123_v23, %v13255_v31  ;;  %v10572_v0 = vadd.f32 %v3509_v14, %v13257_v28  ;;  %v3125_v16 = vpop.f32.mrb[105].mxu0  ;;  %v3511_v45 = vpop.f32.mrb[105].mxu1 }
 0x342   :  { %15156 = vst [vmem:[#allocation99_spill] sm:$0xff] %v13463_v50  ;;  %v10509_v46 = vadd.f32 %v3125_v16, %v13259_v9  ;;  %v10573_v52 = vadd.f32 %v3511_v45, %v13261_v12  ;;  %v3127_v19 = vpop.f32.mrb[106].mxu0  ;;  %v3513_v36 = vpop.f32.mrb[106].mxu1 }
 0x343   :  { %v10510_v32 = vadd.f32 %v3127_v19, %v13255_v31  ;;  %v10574_v60 = vadd.f32 %v3513_v36, %v13257_v28  ;;  %v3129_v3 = vpop.f32.mrb[107].mxu0  ;;  %v3515_v38 = vpop.f32.mrb[107].mxu1  ;;  %6872 = vmatpush1.bf16.msra.mxu0 %v11974_v37  ;;  %v4584_v23 = vmax.f32 %v10508_v29, 0.0  ;;  %v4586_v14 = vmax.f32 %v10572_v0, 0.0 }
 0x344   :  { %v10511_v34 = vadd.f32 %v3129_v3, %v13259_v9  ;;  %v10575_v51 = vadd.f32 %v3515_v38, %v13261_v12  ;;  %6873 = vmatprep.subr.bf16.mxu0 %v11981_v55  ;;  %v4585_v19 = vmax.f32 %v10509_v46, 0.0  ;;  %v4587_v36 = vmax.f32 %v10573_v52, 0.0  ;;  %v11982_v55 = vld [vmem:[#allocation10 + $0x108] ss:$12 sps:$4 sm:$0xff]  }
 0x345   :  { %v4596_v16 = vmax.f32 %v10510_v32, 0.0  ;;  %v4598_v45 = vmax.f32 %v10574_v60, 0.0  ;;  %3844 = vmatmul.mubr.bf16.gmra.mrb[148].mxu0 %v12734_v15  ;;  %4230 = vmatmul.mubr.bf16.gmra.mrb[148].mxu1 %v12734_v15  ;;  %v11989_v15 = vld [vmem:[#allocation10 + $0x124] ss:$12 sps:$4 sm:$0xff]  }
 0x346   :  { %v4597_v27 = vmax.f32 %v10511_v34, 0.0  ;;  %v4599_v50 = vmax.f32 %v10575_v51, 0.0  ;;  %3853 = vmatprep.mubr.bf16.mxu0 %v15079_v39  ;;  %4239 = vmatprep.mubr.bf16.mxu1 %v15079_v39 }
 0x347   :  { %v13477_v37 = vpack.c.bf16 %v4596_v16, %v4584_v23  ;;  %6874 = vmatpush1.bf16.msra.mxu0 %v11979_v30  ;;  %v13479_v29 = vpack.c.bf16 %v4598_v45, %v4586_v14 }
 0x348   :  { %v13481_v0 = vpack.c.bf16 %v4597_v27, %v4585_v19  ;;  %v3133_v32 = vpop.f32.mrb[108].mxu0  ;;  %v3519_v60 = vpop.f32.mrb[108].mxu1  ;;  %6875 = vmatprep.subr.bf16.mxu0 %v11984_v21  ;;  %v13483_v46 = vpack.c.bf16 %v4599_v50, %v4587_v36  ;;  %v11987_v50 = vld [vmem:[#allocation10 + $0x120] ss:$12 sps:$4 sm:$0xff]  }
 0x349   :  { %15157 = vst [vmem:[#allocation100_spill] sm:$0xff] %v13477_v37  ;;  %15158 = vst [vmem:[#allocation101_spill] sm:$0xff] %v13479_v29  ;;  %v10512_v52 = vadd.f32 %v3133_v32, %v13255_v31  ;;  %v10576_v3 = vadd.f32 %v3519_v60, %v13257_v28  ;;  %v3135_v38 = vpop.f32.mrb[109].mxu0  ;;  %v3521_v34 = vpop.f32.mrb[109].mxu1  ;;  %v11992_v32 = vld [vmem:[#allocation10 + $0x13c] ss:$12 sps:$4 sm:$0xff]  }
 0x34a   :  { %15159 = vst [vmem:[#allocation102_spill] sm:$0xff] %v13483_v46  ;;  %v10513_v51 = vadd.f32 %v3135_v38, %v13259_v9  ;;  %v10577_v30 = vadd.f32 %v3521_v34, %v13261_v12  ;;  %v3137_v23 = vpop.f32.mrb[110].mxu0  ;;  %v3523_v14 = vpop.f32.mrb[110].mxu1 }
 0x34b   :  { %v10514_v27 = vadd.f32 %v3137_v23, %v13255_v31  ;;  %v10578_v16 = vadd.f32 %v3523_v14, %v13257_v28  ;;  %v3139_v21 = vpop.f32.mrb[111].mxu0  ;;  %v3525_v45 = vpop.f32.mrb[111].mxu1  ;;  %6876 = vmatpush1.bf16.msra.mxu0 %v11982_v55  ;;  %v4608_v60 = vmax.f32 %v10512_v52, 0.0  ;;  %v4610_v38 = vmax.f32 %v10576_v3, 0.0 }
 0x34c   :  { %v10515_v19 = vadd.f32 %v3139_v21, %v13259_v9  ;;  %v10579_v36 = vadd.f32 %v3525_v45, %v13261_v12  ;;  %6877 = vmatprep.subr.bf16.mxu0 %v11989_v15  ;;  %v4609_v23 = vmax.f32 %v10513_v51, 0.0  ;;  %v4611_v14 = vmax.f32 %v10577_v30, 0.0  ;;  %v11990_v15 = vld [vmem:[#allocation10 + $0x138] ss:$12 sps:$4 sm:$0xff]  }
 0x34d   :  { %v4620_v29 = vmax.f32 %v10514_v27, 0.0  ;;  %v4622_v34 = vmax.f32 %v10578_v16, 0.0  ;;  %3854 = vmatmul.mubr.bf16.gmra.mrb[152].mxu0 %v12740_v42  ;;  %4240 = vmatmul.mubr.bf16.gmra.mrb[152].mxu1 %v12740_v42  ;;  %v11997_v42 = vld [vmem:[#allocation10 + $0x154] ss:$12 sps:$4 sm:$0xff]  }
 0x34e   :  { %v4621_v46 = vmax.f32 %v10515_v19, 0.0  ;;  %v4623_v37 = vmax.f32 %v10579_v36, 0.0  ;;  %3863 = vmatprep.mubr.bf16.mxu0 %v15079_v39  ;;  %4249 = vmatprep.mubr.bf16.mxu1 %v15079_v39 }
 0x34f   :  { %v13497_v55 = vpack.c.bf16 %v4620_v29, %v4608_v60  ;;  %6878 = vmatpush1.bf16.msra.mxu0 %v11987_v50  ;;  %v13499_v52 = vpack.c.bf16 %v4622_v34, %v4610_v38 }
 0x350   :  { %v13501_v3 = vpack.c.bf16 %v4621_v46, %v4609_v23  ;;  %v3143_v27 = vpop.f32.mrb[112].mxu0  ;;  %v3529_v16 = vpop.f32.mrb[112].mxu1  ;;  %6879 = vmatprep.subr.bf16.mxu0 %v11992_v32  ;;  %v13503_v51 = vpack.c.bf16 %v4623_v37, %v4611_v14  ;;  %v11995_v37 = vld [vmem:[#allocation10 + $0x150] ss:$12 sps:$4 sm:$0xff]  }
 0x351   :  { %15160 = vst [vmem:[#allocation103_spill] sm:$0xff] %v13497_v55  ;;  %15161 = vst [vmem:[#allocation104_spill] sm:$0xff] %v13499_v52  ;;  %v10516_v30 = vadd.f32 %v3143_v27, %v13255_v31  ;;  %v10580_v21 = vadd.f32 %v3529_v16, %v13257_v28  ;;  %v3145_v45 = vpop.f32.mrb[113].mxu0  ;;  %v3531_v19 = vpop.f32.mrb[113].mxu1  ;;  %v12000_v27 = vld [vmem:[#allocation10 + $0x16c] ss:$12 sps:$4 sm:$0xff]  }
 0x352   :  { %15162 = vst [vmem:[#allocation105_spill] sm:$0xff] %v13503_v51  ;;  %v10517_v29 = vadd.f32 %v3145_v45, %v13259_v9  ;;  %v10581_v50 = vadd.f32 %v3531_v19, %v13261_v12  ;;  %v3147_v36 = vpop.f32.mrb[114].mxu0  ;;  %v3533_v60 = vpop.f32.mrb[114].mxu1 }
 0x353   :  { %v10518_v46 = vadd.f32 %v3147_v36, %v13255_v31  ;;  %v10582_v38 = vadd.f32 %v3533_v60, %v13257_v28  ;;  %v3149_v32 = vpop.f32.mrb[115].mxu0  ;;  %v3535_v34 = vpop.f32.mrb[115].mxu1  ;;  %6880 = vmatpush1.bf16.msra.mxu0 %v11990_v15  ;;  %v4632_v16 = vmax.f32 %v10516_v30, 0.0  ;;  %v4634_v45 = vmax.f32 %v10580_v21, 0.0 }
 0x354   :  { %v10519_v23 = vadd.f32 %v3149_v32, %v13259_v9  ;;  %v10583_v14 = vadd.f32 %v3535_v34, %v13261_v12  ;;  %6881 = vmatprep.subr.bf16.mxu0 %v11997_v42  ;;  %v4633_v36 = vmax.f32 %v10517_v29, 0.0  ;;  %v4635_v60 = vmax.f32 %v10581_v50, 0.0  ;;  %v11998_v42 = vld [vmem:[#allocation10 + $0x168] ss:$12 sps:$4 sm:$0xff]  }
 0x355   :  { %v4644_v52 = vmax.f32 %v10518_v46, 0.0  ;;  %v4646_v19 = vmax.f32 %v10582_v38, 0.0  ;;  %3864 = vmatmul.mubr.bf16.gmra.mrb[156].mxu0 %v12746_v5  ;;  %4250 = vmatmul.mubr.bf16.gmra.mrb[156].mxu1 %v12746_v5  ;;  %v12005_v5 = vld [vmem:[#allocation10 + $0x184] ss:$12 sps:$4 sm:$0xff]  }
 0x356   :  { %v4645_v51 = vmax.f32 %v10519_v23, 0.0  ;;  %v4647_v55 = vmax.f32 %v10583_v14, 0.0  ;;  %3873 = vmatprep.mubr.bf16.mxu0 %v15079_v39  ;;  %4259 = vmatprep.mubr.bf16.mxu1 %v15079_v39 }
 0x357   :  { %v13517_v15 = vpack.c.bf16 %v4644_v52, %v4632_v16  ;;  %6882 = vmatpush1.bf16.msra.mxu0 %v11995_v37  ;;  %v13519_v30 = vpack.c.bf16 %v4646_v19, %v4634_v45 }
 0x358   :  { %v13521_v21 = vpack.c.bf16 %v4645_v51, %v4633_v36  ;;  %v3153_v46 = vpop.f32.mrb[116].mxu0  ;;  %v3539_v38 = vpop.f32.mrb[116].mxu1  ;;  %6883 = vmatprep.subr.bf16.mxu0 %v12000_v27  ;;  %v13523_v29 = vpack.c.bf16 %v4647_v55, %v4635_v60 }
 0x359   :  { %15163 = vst [vmem:[#allocation106_spill] sm:$0xff] %v13519_v30  ;;  %v10520_v50 = vadd.f32 %v3153_v46, %v13255_v31  ;;  %v10584_v32 = vadd.f32 %v3539_v38, %v13257_v28  ;;  %v3155_v34 = vpop.f32.mrb[117].mxu0  ;;  %v3541_v23 = vpop.f32.mrb[117].mxu1 }
 0x35a   :  { %15164 = vst [vmem:[#allocation107_spill] sm:$0xff] %v13523_v29  ;;  %v10521_v52 = vadd.f32 %v3155_v34, %v13259_v9  ;;  %v10585_v37 = vadd.f32 %v3541_v23, %v13261_v12  ;;  %v3157_v14 = vpop.f32.mrb[118].mxu0  ;;  %v3543_v16 = vpop.f32.mrb[118].mxu1 }
 0x35b   :  { %v10522_v51 = vadd.f32 %v3157_v14, %v13255_v31  ;;  %v10586_v45 = vadd.f32 %v3543_v16, %v13257_v28  ;;  %v3159_v27 = vpop.f32.mrb[119].mxu0  ;;  %v3545_v19 = vpop.f32.mrb[119].mxu1  ;;  %6884 = vmatpush1.bf16.msra.mxu0 %v11998_v42  ;;  %v4656_v60 = vmax.f32 %v10520_v50, 0.0  ;;  %v4658_v46 = vmax.f32 %v10584_v32, 0.0 }
 0x35c   :  { %v10523_v55 = vadd.f32 %v3159_v27, %v13259_v9  ;;  %v10587_v36 = vadd.f32 %v3545_v19, %v13261_v12  ;;  %7046 = vmatprep.subr.bf16.mxu0 %v12005_v5  ;;  %v4657_v23 = vmax.f32 %v10521_v52, 0.0  ;;  %v4659_v14 = vmax.f32 %v10585_v37, 0.0 }
 0x35d   :  { %v4668_v38 = vmax.f32 %v10522_v51, 0.0  ;;  %v4670_v34 = vmax.f32 %v10586_v45, 0.0  ;;  %3874 = vmatmul.mubr.bf16.gmra.mrb[160].mxu0 %v12752_v35  ;;  %4260 = vmatmul.mubr.bf16.gmra.mrb[160].mxu1 %v12752_v35 }
 0x35e   :  { %v4669_v30 = vmax.f32 %v10523_v55, 0.0  ;;  %v4671_v16 = vmax.f32 %v10587_v36, 0.0  ;;  %3883 = vmatprep.mubr.bf16.mxu0 %v15079_v39  ;;  %4269 = vmatprep.mubr.bf16.mxu1 %v15079_v39 }
 0x35f   :  { %v13537_v42 = vpack.c.bf16 %v4668_v38, %v4656_v60  ;;  %v13539_v27 = vpack.c.bf16 %v4670_v34, %v4658_v46 }
 0x360   :  { %v13541_v5 = vpack.c.bf16 %v4669_v30, %v4657_v23  ;;  %v3163_v50 = vpop.f32.mrb[120].mxu0  ;;  %v3549_v32 = vpop.f32.mrb[120].mxu1  ;;  %v13543_v51 = vpack.c.bf16 %v4671_v16, %v4659_v14 }
 0x361   :  { %15165 = vst [vmem:[#allocation108_spill] sm:$0xff] %v13539_v27  ;;  %v10524_v35 = vadd.f32 %v3163_v50, %v13255_v31  ;;  %v10588_v52 = vadd.f32 %v3549_v32, %v13257_v28  ;;  %v3165_v37 = vpop.f32.mrb[121].mxu0  ;;  %v3551_v45 = vpop.f32.mrb[121].mxu1 }
 0x362   :  { %15166 = vst [vmem:[#allocation109_spill] sm:$0xff] %v13543_v51  ;;  %v10525_v19 = vadd.f32 %v3165_v37, %v13259_v9  ;;  %v10589_v55 = vadd.f32 %v3551_v45, %v13261_v12  ;;  %v3167_v36 = vpop.f32.mrb[122].mxu0  ;;  %v3553_v60 = vpop.f32.mrb[122].mxu1 }
 0x363   :  { %v10526_v46 = vadd.f32 %v3167_v36, %v13255_v31  ;;  %v10590_v30 = vadd.f32 %v3553_v60, %v13257_v28  ;;  %v3169_v38 = vpop.f32.mrb[123].mxu0  ;;  %v3555_v34 = vpop.f32.mrb[123].mxu1  ;;  %v4680_v16 = vmax.f32 %v10524_v35, 0.0  ;;  %v4682_v50 = vmax.f32 %v10588_v52, 0.0 }
 0x364   :  { %v10527_v23 = vadd.f32 %v3169_v38, %v13259_v9  ;;  %v10591_v14 = vadd.f32 %v3555_v34, %v13261_v12  ;;  %v4681_v37 = vmax.f32 %v10525_v19, 0.0  ;;  %v4683_v45 = vmax.f32 %v10589_v55, 0.0 }
 0x365   :  { %v4692_v32 = vmax.f32 %v10526_v46, 0.0  ;;  %v4694_v27 = vmax.f32 %v10590_v30, 0.0  ;;  %3884 = vmatmul.mubr.bf16.gmra.mrb[164].mxu0 %v12758_v43  ;;  %4270 = vmatmul.mubr.bf16.gmra.mrb[164].mxu1 %v12758_v43 }
 0x366   :  { %v4693_v51 = vmax.f32 %v10527_v23, 0.0  ;;  %v4695_v36 = vmax.f32 %v10591_v14, 0.0  ;;  %3893 = vmatprep.mubr.bf16.mxu0 %v15079_v39  ;;  %4279 = vmatprep.mubr.bf16.mxu1 %v15079_v39 }
 0x367   :  { %v13557_v60 = vpack.c.bf16 %v4692_v32, %v4680_v16  ;;  %v13559_v38 = vpack.c.bf16 %v4694_v27, %v4682_v50 }
 0x368   :  { %v13561_v35 = vpack.c.bf16 %v4693_v51, %v4681_v37  ;;  %v3173_v52 = vpop.f32.mrb[124].mxu0  ;;  %v3559_v46 = vpop.f32.mrb[124].mxu1  ;;  %v13563_v30 = vpack.c.bf16 %v4695_v36, %v4683_v45 }
 0x369   :  { %15167 = vst [vmem:[#allocation110_spill] sm:$0xff] %v13559_v38  ;;  %v10528_v43 = vadd.f32 %v3173_v52, %v13255_v31  ;;  %v10592_v19 = vadd.f32 %v3559_v46, %v13257_v28  ;;  %v3175_v55 = vpop.f32.mrb[125].mxu0  ;;  %v3561_v34 = vpop.f32.mrb[125].mxu1 }
 0x36a   :  { %15168 = vst [vmem:[#allocation111_spill] sm:$0xff] %v13563_v30  ;;  %v10529_v23 = vadd.f32 %v3175_v55, %v13259_v9  ;;  %v3177_v14 = vpop.f32.mrb[126].mxu0  ;;  %v3563_v29 = vpop.f32.mrb[126].mxu1  ;;  %v10593_v16 = vadd.f32 %v3561_v34, %v13261_v12 }
 0x36b   :  { %v10530_v27 = vadd.f32 %v3177_v14, %v13255_v31  ;;  %v10594_v51 = vadd.f32 %v3563_v29, %v13257_v28  ;;  %v3179_v50 = vpop.f32.mrb[127].mxu0  ;;  %v3565_v32 = vpop.f32.mrb[127].mxu1  ;;  %v4704_v36 = vmax.f32 %v10528_v43, 0.0  ;;  %v4706_v52 = vmax.f32 %v10592_v19, 0.0  ;;  %v12013_v43 = vld [vmem:[#allocation10 + $0x1b4] ss:$12 sps:$4 sm:$0xff]  }
 0x36c   :  { %v10531_v37 = vadd.f32 %v3179_v50, %v13259_v9  ;;  %v10595_v45 = vadd.f32 %v3565_v32, %v13261_v12  ;;  %v4705_v55 = vmax.f32 %v10529_v23, 0.0  ;;  %v4707_v31 = vmax.f32 %v10593_v16, 0.0  ;;  %v12017_v19 = vld [vmem:[#allocation10 + $0x278] ss:$12 sps:$4 sm:$0xff]   ;;  %v12011_v23 = vld [vmem:[#allocation10 + $0x1b0] ss:$12 sps:$4 sm:$0xff]  }
 0x36d   :  { %v4716_v46 = vmax.f32 %v10530_v27, 0.0  ;;  %v4718_v38 = vmax.f32 %v10594_v51, 0.0  ;;  %3894 = vmatmul.mubr.bf16.gmra.mrb[168].mxu0 %v12764_v49  ;;  %4280 = vmatmul.mubr.bf16.gmra.mrb[168].mxu1 %v12764_v49  ;;  %v15169_v49 = vld [vmem:[#allocation37_spill] sm:$0xff]  ;;  %v12018_v14 = vld [vmem:[#allocation10 + $0x1b8] ss:$12 sps:$4 sm:$0xff]   ;;  %v15172_v51 = vld [vmem:[#allocation39_spill] sm:$0xff] }
 0x36e   :  { %v4717_v34 = vmax.f32 %v10531_v37, 0.0  ;;  %v4719_v30 = vmax.f32 %v10595_v45, 0.0  ;;  %3903 = vmatprep.mubr.bf16.mxu0 %v15079_v39  ;;  %4289 = vmatprep.mubr.bf16.mxu1 %v15079_v39  ;;  %v12016_v16 = vld [vmem:[#allocation10 + $0x1cc] ss:$12 sps:$4 sm:$0xff]   ;;  %v12025_v27 = vld [vmem:[#allocation10 + $0x290] ss:$12 sps:$4 sm:$0xff]  }
 0x36f   :  { %v13577_v28 = vpack.c.bf16 %v4716_v46, %v4704_v36  ;;  %v13579_v9 = vpack.c.bf16 %v4718_v38, %v4706_v52  ;;  %v12009_v38 = vld [vmem:[#allocation10 + $0x260] ss:$12 sps:$4 sm:$0xff]   ;;  %v12014_v32 = vld [vmem:[#allocation10 + $0x1c8] ss:$12 sps:$4 sm:$0xff]   ;;  %v12026_v37 = vld [vmem:[#allocation10 + $0x1d0] ss:$12 sps:$4 sm:$0xff]  }
 0x370   :  { %v13581_v12 = vpack.c.bf16 %v4717_v34, %v4705_v55  ;;  %v13583_v29 = vpack.c.bf16 %v4719_v30, %v4707_v31  ;;  %v15170_v30 = vld [vmem:[#allocation35_spill] sm:$0xff]  ;;  %v15173_v50 = vld [vmem:[#allocation45_spill] sm:$0xff]  ;;  %v12033_v36 = vld [vmem:[#allocation10 + $0x2a8] ss:$12 sps:$4 sm:$0xff]  }
 0x371   :  { %v12021_v45 = vld [vmem:[#allocation10 + $0x1e4] ss:$12 sps:$4 sm:$0xff]   ;;  %v12019_v52 = vld [vmem:[#allocation10 + $0x1e0] ss:$12 sps:$4 sm:$0xff]   ;;  %v12034_v46 = vld [vmem:[#allocation10 + $0x1e8] ss:$12 sps:$4 sm:$0xff]  }
 0x372   :  { %v12024_v55 = vld [vmem:[#allocation10 + $0x1fc] ss:$12 sps:$4 sm:$0xff]   ;;  %v12041_v34 = vld [vmem:[#allocation10 + $0x2c0] ss:$12 sps:$4 sm:$0xff]  }
 0x373   :  { %v15174_v31 = vld [vmem:[#allocation43_spill] sm:$0xff] }
 0x375   :  { %3904 = vmatmul.mubr.bf16.gmra.mrb[172].mxu0 %v12770_v58  ;;  %4290 = vmatmul.mubr.bf16.gmra.mrb[172].mxu1 %v12770_v58  ;;  %v12002_v58 = vld [vmem:[#allocation10 + $0x188] ss:$12 sps:$4 sm:$0xff]  }
 0x376   :  { %3913 = vmatprep.mubr.bf16.mxu0 %v15079_v39  ;;  %4299 = vmatprep.mubr.bf16.mxu1 %v15079_v39 }
 0x37d   :  { %3914 = vmatmul.mubr.bf16.gmra.mrb[176].mxu0 %v12776_v63  ;;  %4300 = vmatmul.mubr.bf16.gmra.mrb[176].mxu1 %v12776_v63  ;;  %v12003_v63 = vld [vmem:[#allocation10 + $0x180] ss:$12 sps:$4 sm:$0xff]  }
 0x37e   :  { %3923 = vmatprep.mubr.bf16.mxu0 %v15079_v39  ;;  %4309 = vmatprep.mubr.bf16.mxu1 %v15079_v39 }
 0x385   :  { %3924 = vmatmul.mubr.bf16.gmra.mrb[180].mxu0 %v12782_v11  ;;  %4310 = vmatmul.mubr.bf16.gmra.mrb[180].mxu1 %v12782_v11  ;;  %v12008_v11 = vld [vmem:[#allocation10 + $0x19c] ss:$12 sps:$4 sm:$0xff]  }
 0x386   :  { %3933 = vmatprep.mubr.bf16.mxu0 %v15079_v39  ;;  %4319 = vmatprep.mubr.bf16.mxu1 %v15079_v39 }
 0x38d   :  { %3934 = vmatmul.mubr.bf16.gmra.mrb[184].mxu0 %v12788_v26  ;;  %4320 = vmatmul.mubr.bf16.gmra.mrb[184].mxu1 %v12788_v26  ;;  %v15171_v26 = vld [vmem:[#allocation41_spill] sm:$0xff] }
 0x38e   :  { %3943 = vmatprep.mubr.bf16.mxu0 %v15079_v39  ;;  %4329 = vmatprep.mubr.bf16.mxu1 %v15079_v39  ;;  %v12006_v39 = vld [vmem:[#allocation10 + $0x198] ss:$12 sps:$4 sm:$0xff]  }
 0x395   :  { %3944 = vmatmul.mubr.bf16.gmra.mrb[188].mxu0 %v12794_v33  ;;  %4330 = vmatmul.mubr.bf16.gmra.mrb[188].mxu1 %v12794_v33  ;;  %v12010_v33 = vld [vmem:[#allocation10 + $0x1a0] ss:$12 sps:$4 sm:$0xff]  }
 0x396   :  { %6885 = vmatprep.mubr.bf16.mxu0 %v15169_v49  ;;  %8043 = vmatprep.mubr.bf16.mxu1 %v15169_v49  ;;  %v15175_v49 = vld [vmem:[#allocation49_spill] sm:$0xff] }
 0x39d   :  { %6886 = vmatmul.mubr.bf16.vlgmr.msra.gmra.mrb[192].mxu0 %v15170_v30  ;;  %8044 = vmatmul.mubr.bf16.vlgmr.msra.gmra.mrb[192].mxu1 %v15170_v30  ;;  %v12027_v30 = vld [vmem:[#allocation10 + $0x210] ss:$12 sps:$4 sm:$0xff]  }
 0x39e   :  { %6895 = vmatprep.mubr.bf16.mxu0 %v15171_v26  ;;  %8051 = vmatprep.mubr.bf16.mxu1 %v15171_v26  ;;  %v12050_v26 = vld [vmem:[#allocation10 + $0x218] ss:$12 sps:$4 sm:$0xff]  }
 0x39f   :  { %9781 = vmatpush3.bf16.msra.mxu1 %v12002_v58  ;;  %7047 = vmatpush1.bf16.msra.mxu0 %v12003_v63  ;;  %v12022_v58 = vld [vmem:[#allocation10 + $0x1f8] ss:$12 sps:$4 sm:$0xff]   ;;  %v12042_v63 = vld [vmem:[#allocation10 + $0x200] ss:$12 sps:$4 sm:$0xff]  }
 0x3a0   :  { %7048 = vmatprep.subr.bf16.mxu0 %v12008_v11  ;;  %9782 = vmatprep.subr.bf16.mxu1 %v12009_v38  ;;  %v12029_v11 = vld [vmem:[#allocation10 + $0x214] ss:$12 sps:$4 sm:$0xff]   ;;  %v12049_v38 = vld [vmem:[#allocation10 + $0x2d8] ss:$12 sps:$4 sm:$0xff]  }
 0x3a3   :  { %7049 = vmatpush1.bf16.msra.mxu0 %v12006_v39  ;;  %9783 = vmatpush3.bf16.msra.mxu1 %v12010_v33  ;;  %v12032_v39 = vld [vmem:[#allocation10 + $0x22c] ss:$12 sps:$4 sm:$0xff]   ;;  %v12057_v33 = vld [vmem:[#allocation10 + $0x2f0] ss:$12 sps:$4 sm:$0xff]  }
 0x3a4   :  { %7050 = vmatprep.subr.bf16.mxu0 %v12013_v43  ;;  %9784 = vmatprep.subr.bf16.mxu1 %v12017_v19  ;;  %v15176_v43 = vld [vmem:[#allocation47_spill] sm:$0xff]  ;;  %v15177_v19 = vld [vmem:[#allocation53_spill] sm:$0xff] }
 0x3a5   :  { %6896 = vmatmul.mubr.bf16.gmra.mrb[196].mxu0 %v15172_v51  ;;  %8052 = vmatmul.mubr.bf16.gmra.mrb[196].mxu1 %v15172_v51  ;;  %v12035_v51 = vld [vmem:[#allocation10 + $0x240] ss:$12 sps:$4 sm:$0xff]  }
 0x3a6   :  { %6905 = vmatprep.mubr.bf16.mxu0 %v15173_v50  ;;  %8059 = vmatprep.mubr.bf16.mxu1 %v15173_v50  ;;  %v12040_v50 = vld [vmem:[#allocation10 + $0x25c] ss:$12 sps:$4 sm:$0xff]  }
 0x3a7   :  { %7051 = vmatpush1.bf16.msra.mxu0 %v12011_v23  ;;  %9785 = vmatpush3.bf16.msra.mxu1 %v12018_v14  ;;  %v12030_v23 = vld [vmem:[#allocation10 + $0x228] ss:$12 sps:$4 sm:$0xff]   ;;  %v12058_v14 = vld [vmem:[#allocation10 + $0x230] ss:$12 sps:$4 sm:$0xff]  }
 0x3a8   :  { %7052 = vmatprep.subr.bf16.mxu0 %v12016_v16  ;;  %9786 = vmatprep.subr.bf16.mxu1 %v12025_v27  ;;  %v12037_v16 = vld [vmem:[#allocation10 + $0x244] ss:$12 sps:$4 sm:$0xff]   ;;  %v12065_v27 = vld [vmem:[#allocation10 + $0x3c8] ss:$12 sps:$4 sm:$0xff]  }
 0x3ab   :  { %7053 = vmatpush1.bf16.msra.mxu0 %v12014_v32  ;;  %9787 = vmatpush3.bf16.msra.mxu1 %v12026_v37  ;;  %v15178_v32 = vld [vmem:[#allocation51_spill] sm:$0xff]  ;;  %v15179_v37 = vld [vmem:[#allocation57_spill] sm:$0xff] }
 0x3ac   :  { %7054 = vmatprep.subr.bf16.mxu0 %v12021_v45  ;;  %9788 = vmatprep.subr.bf16.mxu1 %v12033_v36  ;;  %v12038_v45 = vld [vmem:[#allocation10 + $0x258] ss:$12 sps:$4 sm:$0xff]   ;;  %v12045_v36 = vld [vmem:[#allocation10 + $0x274] ss:$12 sps:$4 sm:$0xff]  }
 0x3ad   :  { %6906 = vmatmul.mubr.bf16.gmra.mrb[200].mxu0 %v15174_v31  ;;  %8060 = vmatmul.mubr.bf16.gmra.mrb[200].mxu1 %v15174_v31  ;;  %v12046_v31 = vld [vmem:[#allocation10 + $0x288] ss:$12 sps:$4 sm:$0xff]  }
 0x3ae   :  { %6915 = vmatprep.mubr.bf16.mxu0 %v15175_v49  ;;  %8067 = vmatprep.mubr.bf16.mxu1 %v15175_v49  ;;  %v12053_v49 = vld [vmem:[#allocation10 + $0x2a4] ss:$12 sps:$4 sm:$0xff]  }
 0x3af   :  { %7055 = vmatpush1.bf16.msra.mxu0 %v12019_v52  ;;  %9789 = vmatpush3.bf16.msra.mxu1 %v12034_v46  ;;  %v12043_v52 = vld [vmem:[#allocation10 + $0x270] ss:$12 sps:$4 sm:$0xff]   ;;  %v12048_v46 = vld [vmem:[#allocation10 + $0x28c] ss:$12 sps:$4 sm:$0xff]  }
 0x3b0   :  { %7056 = vmatprep.subr.bf16.mxu0 %v12024_v55  ;;  %9790 = vmatprep.subr.bf16.mxu1 %v12041_v34  ;;  %v15180_v55 = vld [vmem:[#allocation55_spill] sm:$0xff]  ;;  %v15181_v34 = vld [vmem:[#allocation61_spill] sm:$0xff] }
 0x3b3   :  { %7057 = vmatpush1.bf16.msra.mxu0 %v12022_v58  ;;  %9791 = vmatpush3.bf16.msra.mxu1 %v12042_v63  ;;  %v12051_v58 = vld [vmem:[#allocation10 + $0x2a0] ss:$12 sps:$4 sm:$0xff]   ;;  %v12056_v63 = vld [vmem:[#allocation10 + $0x2bc] ss:$12 sps:$4 sm:$0xff]  }
 0x3b4   :  { %7058 = vmatprep.subr.bf16.mxu0 %v12029_v11  ;;  %9792 = vmatprep.subr.bf16.mxu1 %v12049_v38  ;;  %v15182_v11 = vld [vmem:[#allocation59_spill] sm:$0xff]  ;;  %v15183_v38 = vld [vmem:[#allocation65_spill] sm:$0xff] }
 0x3b5   :  { %6916 = vmatmul.mubr.bf16.gmra.mrb[204].mxu0 %v15176_v43  ;;  %8068 = vmatmul.mubr.bf16.gmra.mrb[204].mxu1 %v15176_v43  ;;  %v15184_v43 = vld [vmem:[#allocation63_spill] sm:$0xff] }
 0x3b6   :  { %6925 = vmatprep.mubr.bf16.mxu0 %v15177_v19  ;;  %8075 = vmatprep.mubr.bf16.mxu1 %v15177_v19  ;;  %v15185_v19 = vld [vmem:[#allocation69_spill] sm:$0xff] }
 0x3b7   :  { %7059 = vmatpush1.bf16.msra.mxu0 %v12027_v30  ;;  %9793 = vmatpush3.bf16.msra.mxu1 %v12050_v26  ;;  %v12054_v30 = vld [vmem:[#allocation10 + $0x2b8] ss:$12 sps:$4 sm:$0xff]   ;;  %v12061_v26 = vld [vmem:[#allocation10 + $0x2d4] ss:$12 sps:$4 sm:$0xff]  }
 0x3b8   :  { %7060 = vmatprep.subr.bf16.mxu0 %v12032_v39  ;;  %9794 = vmatprep.subr.bf16.mxu1 %v12057_v33  ;;  %v12059_v39 = vld [vmem:[#allocation10 + $0x2d0] ss:$12 sps:$4 sm:$0xff]   ;;  %v12064_v33 = vld [vmem:[#allocation10 + $0x2ec] ss:$12 sps:$4 sm:$0xff]  }
 0x3bb   :  { %7061 = vmatpush1.bf16.msra.mxu0 %v12030_v23  ;;  %9795 = vmatpush3.bf16.msra.mxu1 %v12058_v14  ;;  %v12062_v23 = vld [vmem:[#allocation10 + $0x2e8] ss:$12 sps:$4 sm:$0xff]   ;;  %v12069_v14 = vld [vmem:[#allocation10 + $0x304] ss:$12 sps:$4 sm:$0xff]  }
 0x3bc   :  { %7062 = vmatprep.subr.bf16.mxu0 %v12037_v16  ;;  %9892 = vmatprep.subr.bf16.mxu1 %v12065_v27  ;;  %v15186_v16 = vld [vmem:[#allocation67_spill] sm:$0xff]  ;;  %v15187_v27 = vld [vmem:[#allocation73_spill] sm:$0xff] }
 0x3bd   :  { %6926 = vmatmul.mubr.bf16.gmra.mrb[208].mxu0 %v15178_v32  ;;  %8076 = vmatmul.mubr.bf16.gmra.mrb[208].mxu1 %v15178_v32  ;;  %v521_v32 = vld [vmem:[#allocation9 + $0x8] sm:$0xf] }
 0x3be   :  { %6935 = vmatprep.mubr.bf16.mxu0 %v15179_v37  ;;  %8083 = vmatprep.mubr.bf16.mxu1 %v15179_v37  ;;  %v15190_v37 = vld [vmem:[#allocation75_spill] sm:$0xff] }
 0x3bf   :  { %7063 = vmatpush1.bf16.msra.mxu0 %v12035_v51  ;;  %v15188_v51 = vld [vmem:[#allocation71_spill] sm:$0xff] }
 0x3c0   :  { %7064 = vmatprep.subr.bf16.mxu0 %v12040_v50  ;;  %v15189_v50 = vld [vmem:[#allocation77_spill] sm:$0xff] }
 0x3c3   :  { %7065 = vmatpush1.bf16.msra.mxu0 %v12038_v45  ;;  %v15191_v45 = vld [vmem:[#allocation32_spill] sm:$0xff] }
 0x3c4   :  { %7066 = vmatprep.subr.bf16.mxu0 %v12045_v36  ;;  %v13648_v36 = vrot.slane %v521_v32, %v15191_v45 }
 0x3c5   :  { %6936 = vmatmul.mubr.bf16.gmra.mrb[212].mxu0 %v15180_v55  ;;  %8084 = vmatmul.mubr.bf16.gmra.mrb[212].mxu1 %v15180_v55  ;;  %v15193_v55 = vld [vmem:[#allocation81_spill] sm:$0xff] }
 0x3c6   :  { %6945 = vmatprep.mubr.bf16.mxu0 %v15181_v34  ;;  %8091 = vmatprep.mubr.bf16.mxu1 %v15181_v34  ;;  %v15194_v34 = vld [vmem:[#allocation34_spill] sm:$0xff] }
 0x3c7   :  { %7067 = vmatpush1.bf16.msra.mxu0 %v12043_v52  ;;  %v15192_v52 = vld [vmem:[#allocation33_spill] sm:$0xff] }
 0x3c8   :  { %7068 = vmatprep.subr.bf16.mxu0 %v12048_v46  ;;  %v13651_v46 = vrot.slane %v521_v32, %v15192_v52 }
 0x3cb   :  { %7069 = vmatpush1.bf16.msra.mxu0 %v12046_v31  ;;  %v13656_v31 = vrot.slane %v521_v32, %v15194_v34 }
 0x3cc   :  { %7070 = vmatprep.subr.bf16.mxu0 %v12053_v49  ;;  %v15195_v49 = vsub.s32 3, %v15124_v10 }
 0x3cd   :  { %6946 = vmatmul.mubr.bf16.gmra.mrb[216].mxu0 %v15182_v11  ;;  %8092 = vmatmul.mubr.bf16.gmra.mrb[216].mxu1 %v15182_v11 }
 0x3ce   :  { %6955 = vmatprep.mubr.bf16.mxu0 %v15183_v38  ;;  %8099 = vmatprep.mubr.bf16.mxu1 %v15183_v38 }
 0x3cf   :  { %7071 = vmatpush1.bf16.msra.mxu0 %v12051_v58  ;;  %v13660_v58 = vrot.slane %v521_v32, %v15195_v49 }
 0x3d0   :  { %7072 = vmatprep.subr.bf16.mxu0 %v12056_v63 }
 0x3d3   :  { %7073 = vmatpush1.bf16.msra.mxu0 %v12054_v30 }
 0x3d4   :  { %7074 = vmatprep.subr.bf16.mxu0 %v12061_v26 }
 0x3d5   :  { %6956 = vmatmul.mubr.bf16.gmra.mrb[220].mxu0 %v15184_v43  ;;  %8100 = vmatmul.mubr.bf16.gmra.mrb[220].mxu1 %v15184_v43 }
 0x3d6   :  { %6965 = vmatprep.mubr.bf16.mxu0 %v15185_v19  ;;  %8107 = vmatprep.mubr.bf16.mxu1 %v15185_v19 }
 0x3d7   :  { %7075 = vmatpush1.bf16.msra.mxu0 %v12059_v39 }
 0x3d8   :  { %7076 = vmatprep.subr.bf16.mxu0 %v12064_v33 }
 0x3db   :  { %7077 = vmatpush1.bf16.msra.mxu0 %v12062_v23 }
 0x3dc   :  { %7239 = vmatprep.subr.bf16.mxu0 %v12069_v14 }
 0x3dd   :  { %6966 = vmatmul.mubr.bf16.gmra.mrb[224].mxu0 %v15186_v16  ;;  %8108 = vmatmul.mubr.bf16.gmra.mrb[224].mxu1 %v15186_v16 }
 0x3de   :  { %6975 = vmatprep.mubr.bf16.mxu0 %v15187_v27  ;;  %8115 = vmatprep.mubr.bf16.mxu1 %v15187_v27 }
 0x3e5   :  { %6976 = vmatmul.mubr.bf16.gmra.mrb[228].mxu0 %v15188_v51  ;;  %8116 = vmatmul.mubr.bf16.gmra.mrb[228].mxu1 %v15188_v51 }
 0x3e6   :  { %6985 = vmatprep.mubr.bf16.mxu0 %v15189_v50  ;;  %8123 = vmatprep.mubr.bf16.mxu1 %v15189_v50 }
 0x3ed   :  { %6986 = vmatmul.mubr.bf16.gmra.mrb[232].mxu0 %v15190_v37  ;;  %8124 = vmatmul.mubr.bf16.gmra.mrb[232].mxu1 %v15190_v37 }
 0x3ee   :  { %6995 = vmatprep.mubr.bf16.mxu0 %v15193_v55  ;;  %8131 = vmatprep.mubr.bf16.mxu1 %v15193_v55 }
 0x3f0   :  { %v3795_v63 = vpop.f32.mrb[128].mxu0  ;;  %v4181_v11 = vpop.f32.mrb[128].mxu1 }
 0x3f1   :  { %v10596_v38 = vadd.f32 %v3795_v63, %v13648_v36  ;;  %v10660_v30 = vadd.f32 %v4181_v11, %v13651_v46  ;;  %v3797_v26 = vpop.f32.mrb[129].mxu0  ;;  %v4183_v39 = vpop.f32.mrb[129].mxu1  ;;  %v15196_v63 = vld [vmem:[#allocation79_spill] sm:$0xff] }
 0x3f2   :  { %v10597_v33 = vadd.f32 %v3797_v26, %v13656_v31  ;;  %v10661_v43 = vadd.f32 %v4183_v39, %v13660_v58  ;;  %v3799_v19 = vpop.f32.mrb[130].mxu0  ;;  %v4185_v23 = vpop.f32.mrb[130].mxu1 }
 0x3f3   :  { %v10598_v14 = vadd.f32 %v3799_v19, %v13648_v36  ;;  %v10662_v10 = vadd.f32 %v4185_v23, %v13651_v46  ;;  %v3801_v16 = vpop.f32.mrb[131].mxu0  ;;  %v4187_v27 = vpop.f32.mrb[131].mxu1  ;;  %v4348_v32 = vmax.f32 %v10596_v38, 0.0  ;;  %v4350_v37 = vmax.f32 %v10660_v30, 0.0 }
 0x3f4   :  { %v10599_v51 = vadd.f32 %v3801_v16, %v13656_v31  ;;  %v10663_v50 = vadd.f32 %v4187_v27, %v13660_v58  ;;  %v4349_v11 = vmax.f32 %v10597_v33, 0.0  ;;  %v4351_v26 = vmax.f32 %v10661_v43, 0.0 }
 0x3f5   :  { %v4360_v55 = vmax.f32 %v10598_v14, 0.0  ;;  %v4362_v49 = vmax.f32 %v10662_v10, 0.0  ;;  %6996 = vmatmul.mubr.bf16.gmra.mrb[236].mxu0 %v15196_v63  ;;  %8132 = vmatmul.mubr.bf16.gmra.mrb[236].mxu1 %v15196_v63 }
 0x3f6   :  { %v4361_v39 = vmax.f32 %v10599_v51, 0.0  ;;  %v4363_v19 = vmax.f32 %v10663_v50, 0.0  ;;  %7005 = vmatprep.mubr.bf16.mxu0 %v13125_v25  ;;  %8139 = vmatprep.mubr.bf16.mxu1 %v13125_v25 }
 0x3f7   :  { %v13674_v23 = vpack.c.bf16 %v4360_v55, %v4348_v32  ;;  %v13676_v16 = vpack.c.bf16 %v4362_v49, %v4350_v37 }
 0x3f8   :  { %v13678_v38 = vpack.c.bf16 %v4361_v39, %v4349_v11  ;;  %v3805_v30 = vpop.f32.mrb[132].mxu0  ;;  %v4191_v14 = vpop.f32.mrb[132].mxu1  ;;  %v13680_v10 = vpack.c.bf16 %v4363_v19, %v4351_v26 }
 0x3f9   :  { %15197 = vst [vmem:[#allocation37_spill] sm:$0xff] %v13676_v16  ;;  %v10600_v27 = vadd.f32 %v3805_v30, %v13648_v36  ;;  %v10664_v33 = vadd.f32 %v4191_v14, %v13651_v46  ;;  %v3807_v43 = vpop.f32.mrb[133].mxu0  ;;  %v4193_v51 = vpop.f32.mrb[133].mxu1 }
 0x3fa   :  { %15198 = vst [vmem:[#allocation35_spill] sm:$0xff] %v13680_v10  ;;  %v10601_v50 = vadd.f32 %v3807_v43, %v13656_v31  ;;  %v10665_v25 = vadd.f32 %v4193_v51, %v13660_v58  ;;  %v3809_v32 = vpop.f32.mrb[134].mxu0  ;;  %v4195_v55 = vpop.f32.mrb[134].mxu1  ;;  %v15211_v10 = vld [vmem:[#allocation38_spill] sm:$0xff] }
 0x3fb   :  { %v10602_v37 = vadd.f32 %v3809_v32, %v13648_v36  ;;  %v10666_v49 = vadd.f32 %v4195_v55, %v13651_v46  ;;  %v3811_v63 = vpop.f32.mrb[135].mxu0  ;;  %v4197_v11 = vpop.f32.mrb[135].mxu1  ;;  %v4372_v19 = vmax.f32 %v10600_v27, 0.0  ;;  %v4374_v30 = vmax.f32 %v10664_v33, 0.0 }
 0x3fc   :  { %v10603_v26 = vadd.f32 %v3811_v63, %v13656_v31  ;;  %v10667_v39 = vadd.f32 %v4197_v11, %v13660_v58  ;;  %v4373_v43 = vmax.f32 %v10601_v50, 0.0  ;;  %v4375_v51 = vmax.f32 %v10665_v25, 0.0 }
 0x3fd   :  { %v4384_v14 = vmax.f32 %v10602_v37, 0.0  ;;  %v4386_v34 = vmax.f32 %v10666_v49, 0.0  ;;  %7006 = vmatmul.mubr.bf16.gmra.mrb[240].mxu0 %v13121_v4  ;;  %8140 = vmatmul.mubr.bf16.gmra.mrb[240].mxu1 %v13121_v4 }
 0x3fe   :  { %v4385_v45 = vmax.f32 %v10603_v26, 0.0  ;;  %v4387_v32 = vmax.f32 %v10667_v39, 0.0  ;;  %7015 = vmatprep.mubr.bf16.mxu0 %v13145_v47  ;;  %8147 = vmatprep.mubr.bf16.mxu1 %v13145_v47 }
 0x3ff   :  { %v13694_v55 = vpack.c.bf16 %v4384_v14, %v4372_v19  ;;  %v13696_v63 = vpack.c.bf16 %v4386_v34, %v4374_v30 }
 0x400   :  { %v13698_v27 = vpack.c.bf16 %v4385_v45, %v4373_v43  ;;  %v3815_v33 = vpop.f32.mrb[136].mxu0  ;;  %v4201_v37 = vpop.f32.mrb[136].mxu1  ;;  %v13700_v49 = vpack.c.bf16 %v4387_v32, %v4375_v51 }
 0x401   :  { %15199 = vst [vmem:[#allocation41_spill] sm:$0xff] %v13694_v55  ;;  %15200 = vst [vmem:[#allocation39_spill] sm:$0xff] %v13696_v63  ;;  %v10604_v4 = vadd.f32 %v3815_v33, %v13648_v36  ;;  %v10668_v50 = vadd.f32 %v4201_v37, %v13651_v46  ;;  %v3817_v25 = vpop.f32.mrb[137].mxu0  ;;  %v4203_v11 = vpop.f32.mrb[137].mxu1  ;;  %v15223_v55 = vld [vmem:[#allocation46_spill] sm:$0xff] }
 0x402   :  { %15201 = vst [vmem:[#allocation45_spill] sm:$0xff] %v13700_v49  ;;  %v10605_v26 = vadd.f32 %v3817_v25, %v13656_v31  ;;  %v10669_v47 = vadd.f32 %v4203_v11, %v13660_v58  ;;  %v3819_v39 = vpop.f32.mrb[138].mxu0  ;;  %v4205_v19 = vpop.f32.mrb[138].mxu1 }
 0x403   :  { %v10606_v34 = vadd.f32 %v3819_v39, %v13648_v36  ;;  %v10670_v45 = vadd.f32 %v4205_v19, %v13651_v46  ;;  %v3821_v30 = vpop.f32.mrb[139].mxu0  ;;  %v4207_v14 = vpop.f32.mrb[139].mxu1  ;;  %v4396_v32 = vmax.f32 %v10604_v4, 0.0  ;;  %v4398_v33 = vmax.f32 %v10668_v50, 0.0 }
 0x404   :  { %v10607_v43 = vadd.f32 %v3821_v30, %v13656_v31  ;;  %v10671_v51 = vadd.f32 %v4207_v14, %v13660_v58  ;;  %v4397_v25 = vmax.f32 %v10605_v26, 0.0  ;;  %v4399_v11 = vmax.f32 %v10669_v47, 0.0 }
 0x405   :  { %v4408_v37 = vmax.f32 %v10606_v34, 0.0  ;;  %v4410_v63 = vmax.f32 %v10670_v45, 0.0  ;;  %7016 = vmatmul.mubr.bf16.gmra.mrb[244].mxu0 %v13141_v1  ;;  %8148 = vmatmul.mubr.bf16.gmra.mrb[244].mxu1 %v13141_v1 }
 0x406   :  { %v4409_v49 = vmax.f32 %v10607_v43, 0.0  ;;  %v4411_v39 = vmax.f32 %v10671_v51, 0.0  ;;  %7025 = vmatprep.mubr.bf16.mxu0 %v13165_v41  ;;  %8155 = vmatprep.mubr.bf16.mxu1 %v13165_v41 }
 0x407   :  { %v13714_v19 = vpack.c.bf16 %v4408_v37, %v4396_v32  ;;  %v13716_v30 = vpack.c.bf16 %v4410_v63, %v4398_v33 }
 0x408   :  { %v13718_v4 = vpack.c.bf16 %v4409_v49, %v4397_v25  ;;  %v3825_v50 = vpop.f32.mrb[140].mxu0  ;;  %v4211_v34 = vpop.f32.mrb[140].mxu1  ;;  %v13720_v45 = vpack.c.bf16 %v4411_v39, %v4399_v11 }
 0x409   :  { %15202 = vst [vmem:[#allocation43_spill] sm:$0xff] %v13714_v19  ;;  %15203 = vst [vmem:[#allocation49_spill] sm:$0xff] %v13716_v30  ;;  %v10608_v1 = vadd.f32 %v3825_v50, %v13648_v36  ;;  %v10672_v26 = vadd.f32 %v4211_v34, %v13651_v46  ;;  %v3827_v47 = vpop.f32.mrb[141].mxu0  ;;  %v4213_v14 = vpop.f32.mrb[141].mxu1  ;;  %v15217_v19 = vld [vmem:[#allocation42_spill] sm:$0xff] }
 0x40a   :  { %15204 = vst [vmem:[#allocation47_spill] sm:$0xff] %v13718_v4  ;;  %15205 = vst [vmem:[#allocation53_spill] sm:$0xff] %v13720_v45  ;;  %v10609_v43 = vadd.f32 %v3827_v47, %v13656_v31  ;;  %v10673_v41 = vadd.f32 %v4213_v14, %v13660_v58  ;;  %v3829_v51 = vpop.f32.mrb[142].mxu0  ;;  %v4215_v32 = vpop.f32.mrb[142].mxu1  ;;  %v15206_v45 = vld [vmem:[#allocation87_spill] sm:$0xff] }
 0x40b   :  { %v10610_v63 = vadd.f32 %v3829_v51, %v13648_v36  ;;  %v10674_v49 = vadd.f32 %v4215_v32, %v13651_v46  ;;  %v3831_v33 = vpop.f32.mrb[143].mxu0  ;;  %v4217_v37 = vpop.f32.mrb[143].mxu1  ;;  %v4420_v39 = vmax.f32 %v10608_v1, 0.0  ;;  %v4422_v50 = vmax.f32 %v10672_v26, 0.0 }
 0x40c   :  { %v10611_v25 = vadd.f32 %v3831_v33, %v13656_v31  ;;  %v10675_v11 = vadd.f32 %v4217_v37, %v13660_v58  ;;  %v4421_v47 = vmax.f32 %v10609_v43, 0.0  ;;  %v4423_v14 = vmax.f32 %v10673_v41, 0.0 }
 0x40d   :  { %v4432_v34 = vmax.f32 %v10610_v63, 0.0  ;;  %v4434_v30 = vmax.f32 %v10674_v49, 0.0  ;;  %7026 = vmatmul.mubr.bf16.gmra.mrb[248].mxu0 %v15206_v45  ;;  %8156 = vmatmul.mubr.bf16.gmra.mrb[248].mxu1 %v15206_v45 }
 0x40e   :  { %v4433_v16 = vmax.f32 %v10611_v25, 0.0  ;;  %v4435_v51 = vmax.f32 %v10675_v11, 0.0  ;;  %7035 = vmatprep.mubr.bf16.mxu0 %v13183_v18  ;;  %8163 = vmatprep.mubr.bf16.mxu1 %v13183_v18 }
 0x40f   :  { %v13734_v32 = vpack.c.bf16 %v4432_v34, %v4420_v39  ;;  %v13736_v33 = vpack.c.bf16 %v4434_v30, %v4422_v50 }
 0x410   :  { %v13738_v1 = vpack.c.bf16 %v4433_v16, %v4421_v47  ;;  %v3835_v26 = vpop.f32.mrb[144].mxu0  ;;  %v4221_v63 = vpop.f32.mrb[144].mxu1  ;;  %v13740_v49 = vpack.c.bf16 %v4435_v51, %v4423_v14 }
 0x411   :  { %15207 = vst [vmem:[#allocation51_spill] sm:$0xff] %v13734_v32  ;;  %15208 = vst [vmem:[#allocation57_spill] sm:$0xff] %v13736_v33  ;;  %v10612_v45 = vadd.f32 %v3835_v26, %v13648_v36  ;;  %v10676_v43 = vadd.f32 %v4221_v63, %v13651_v46  ;;  %v3837_v41 = vpop.f32.mrb[145].mxu0  ;;  %v4223_v37 = vpop.f32.mrb[145].mxu1 }
 0x412   :  { %15209 = vst [vmem:[#allocation55_spill] sm:$0xff] %v13738_v1  ;;  %15210 = vst [vmem:[#allocation61_spill] sm:$0xff] %v13740_v49  ;;  %v10613_v25 = vadd.f32 %v3837_v41, %v13656_v31  ;;  %v10677_v18 = vadd.f32 %v4223_v37, %v13660_v58  ;;  %v3839_v11 = vpop.f32.mrb[146].mxu0  ;;  %v4225_v39 = vpop.f32.mrb[146].mxu1 }
 0x413   :  { %v10614_v30 = vadd.f32 %v3839_v11, %v13648_v36  ;;  %v10678_v16 = vadd.f32 %v4225_v39, %v13651_v46  ;;  %v3841_v50 = vpop.f32.mrb[147].mxu0  ;;  %v4227_v34 = vpop.f32.mrb[147].mxu1  ;;  %v4444_v51 = vmax.f32 %v10612_v45, 0.0  ;;  %v4446_v26 = vmax.f32 %v10676_v43, 0.0 }
 0x414   :  { %v10615_v47 = vadd.f32 %v3841_v50, %v13656_v31  ;;  %v10679_v14 = vadd.f32 %v4227_v34, %v13660_v58  ;;  %v4445_v41 = vmax.f32 %v10613_v25, 0.0  ;;  %v4447_v37 = vmax.f32 %v10677_v18, 0.0 }
 0x415   :  { %v4456_v63 = vmax.f32 %v10614_v30, 0.0  ;;  %v4458_v33 = vmax.f32 %v10678_v16, 0.0  ;;  %7036 = vmatmul.mubr.bf16.gmra.mrb[252].mxu0 %v13181_v7  ;;  %8164 = vmatmul.mubr.bf16.gmra.mrb[252].mxu1 %v13181_v7 }
 0x416   :  { %v4457_v49 = vmax.f32 %v10615_v47, 0.0  ;;  %v4459_v11 = vmax.f32 %v10679_v14, 0.0  ;;  %7078 = vmatprep.mubr.bf16.mxu0 %v15211_v10  ;;  %8204 = vmatprep.mubr.bf16.mxu1 %v15211_v10 }
 0x417   :  { %v13754_v39 = vpack.c.bf16 %v4456_v63, %v4444_v51  ;;  %v13756_v50 = vpack.c.bf16 %v4458_v33, %v4446_v26 }
 0x418   :  { %v13758_v45 = vpack.c.bf16 %v4457_v49, %v4445_v41  ;;  %v3845_v43 = vpop.f32.mrb[148].mxu0  ;;  %v4231_v30 = vpop.f32.mrb[148].mxu1  ;;  %v13760_v16 = vpack.c.bf16 %v4459_v11, %v4447_v37  ;;  %v12066_v41 = vld [vmem:[#allocation10 + $0x308] ss:$12 sps:$4 sm:$0xff]   ;;  %v12067_v37 = vld [vmem:[#allocation10 + $0x300] ss:$12 sps:$4 sm:$0xff]  }
 0x419   :  { %15212 = vst [vmem:[#allocation59_spill] sm:$0xff] %v13754_v39  ;;  %15213 = vst [vmem:[#allocation65_spill] sm:$0xff] %v13756_v50  ;;  %v10616_v7 = vadd.f32 %v3845_v43, %v13648_v36  ;;  %v10680_v25 = vadd.f32 %v4231_v30, %v13651_v46  ;;  %v3847_v18 = vpop.f32.mrb[149].mxu0  ;;  %v4233_v34 = vpop.f32.mrb[149].mxu1  ;;  %v12072_v30 = vld [vmem:[#allocation10 + $0x31c] ss:$12 sps:$4 sm:$0xff]  }
 0x41a   :  { %15214 = vst [vmem:[#allocation63_spill] sm:$0xff] %v13758_v45  ;;  %15215 = vst [vmem:[#allocation69_spill] sm:$0xff] %v13760_v16  ;;  %v10617_v47 = vadd.f32 %v3847_v18, %v13656_v31  ;;  %v10681_v10 = vadd.f32 %v4233_v34, %v13660_v58  ;;  %v3849_v14 = vpop.f32.mrb[150].mxu0  ;;  %v4235_v51 = vpop.f32.mrb[150].mxu1  ;;  %v12073_v50 = vld [vmem:[#allocation10 + $0x3e0] ss:$12 sps:$4 sm:$0xff]  }
 0x41b   :  { %v10618_v33 = vadd.f32 %v3849_v14, %v13648_v36  ;;  %v10682_v49 = vadd.f32 %v4235_v51, %v13651_v46  ;;  %v3851_v26 = vpop.f32.mrb[151].mxu0  ;;  %v4237_v63 = vpop.f32.mrb[151].mxu1  ;;  %v4468_v16 = vmax.f32 %v10616_v7, 0.0  ;;  %v4470_v18 = vmax.f32 %v10680_v25, 0.0  ;;  %v15216_v45 = vld [vmem:[#allocation36_spill] sm:$0xff] }
 0x41c   :  { %v10619_v11 = vadd.f32 %v3851_v26, %v13656_v31  ;;  %v10683_v43 = vadd.f32 %v4237_v63, %v13660_v58  ;;  %v4469_v14 = vmax.f32 %v10617_v47, 0.0  ;;  %v4471_v51 = vmax.f32 %v10681_v10, 0.0  ;;  %v12070_v7 = vld [vmem:[#allocation10 + $0x318] ss:$12 sps:$4 sm:$0xff]   ;;  %v12074_v25 = vld [vmem:[#allocation10 + $0x320] ss:$12 sps:$4 sm:$0xff]  }
 0x41d   :  { %v4480_v39 = vmax.f32 %v10618_v33, 0.0  ;;  %v4482_v34 = vmax.f32 %v10682_v49, 0.0  ;;  %7079 = vmatmul.mubr.bf16.vlgmr.msra.gmra.mrb[192].mxu0 %v15216_v45  ;;  %8205 = vmatmul.mubr.bf16.vlgmr.msra.gmra.mrb[0].mxu1 %v15216_v45  ;;  %v12077_v47 = vld [vmem:[#allocation10 + $0x334] ss:$12 sps:$4 sm:$0xff]   ;;  %v12081_v10 = vld [vmem:[#allocation10 + $0x3f8] ss:$12 sps:$4 sm:$0xff]  }
 0x41e   :  { %v4481_v32 = vmax.f32 %v10619_v11, 0.0  ;;  %v4483_v1 = vmax.f32 %v10683_v43, 0.0  ;;  %7088 = vmatprep.mubr.bf16.mxu0 %v15217_v19  ;;  %8212 = vmatprep.mubr.bf16.mxu1 %v15217_v19 }
 0x41f   :  { %v13774_v26 = vpack.c.bf16 %v4480_v39, %v4468_v16  ;;  %9893 = vmatpush3.bf16.msra.mxu1 %v12066_v41  ;;  %7240 = vmatpush1.bf16.msra.mxu0 %v12067_v37  ;;  %v13776_v33 = vpack.c.bf16 %v4482_v34, %v4470_v18 }
 0x420   :  { %v13778_v49 = vpack.c.bf16 %v4481_v32, %v4469_v14  ;;  %v3855_v63 = vpop.f32.mrb[152].mxu0  ;;  %v4241_v45 = vpop.f32.mrb[152].mxu1  ;;  %7241 = vmatprep.subr.bf16.mxu0 %v12072_v30  ;;  %9894 = vmatprep.subr.bf16.mxu1 %v12073_v50  ;;  %v13780_v11 = vpack.c.bf16 %v4483_v1, %v4471_v51  ;;  %v12075_v1 = vld [vmem:[#allocation10 + $0x330] ss:$12 sps:$4 sm:$0xff]   ;;  %v12082_v51 = vld [vmem:[#allocation10 + $0x338] ss:$12 sps:$4 sm:$0xff]  }
 0x421   :  { %15218 = vst [vmem:[#allocation67_spill] sm:$0xff] %v13774_v26  ;;  %15219 = vst [vmem:[#allocation73_spill] sm:$0xff] %v13776_v33  ;;  %v10620_v19 = vadd.f32 %v3855_v63, %v13648_v36  ;;  %v10684_v39 = vadd.f32 %v4241_v45, %v13651_v46  ;;  %v3857_v16 = vpop.f32.mrb[153].mxu0  ;;  %v4243_v41 = vpop.f32.mrb[153].mxu1 }
 0x422   :  { %15220 = vst [vmem:[#allocation71_spill] sm:$0xff] %v13778_v49  ;;  %15221 = vst [vmem:[#allocation77_spill] sm:$0xff] %v13780_v11  ;;  %v10621_v37 = vadd.f32 %v3857_v16, %v13656_v31  ;;  %v10685_v43 = vadd.f32 %v4243_v41, %v13660_v58  ;;  %v3859_v32 = vpop.f32.mrb[154].mxu0  ;;  %v4245_v18 = vpop.f32.mrb[154].mxu1  ;;  %v12080_v16 = vld [vmem:[#allocation10 + $0x34c] ss:$12 sps:$4 sm:$0xff]  }
 0x423   :  { %v10622_v34 = vadd.f32 %v3859_v32, %v13648_v36  ;;  %v10686_v50 = vadd.f32 %v4245_v18, %v13651_v46  ;;  %v3861_v30 = vpop.f32.mrb[155].mxu0  ;;  %v4247_v14 = vpop.f32.mrb[155].mxu1  ;;  %7242 = vmatpush1.bf16.msra.mxu0 %v12070_v7  ;;  %9895 = vmatpush3.bf16.msra.mxu1 %v12074_v25  ;;  %v12089_v41 = vld [vmem:[#allocation10 + $0x410] ss:$12 sps:$4 sm:$0xff]   ;;  %v4492_v33 = vmax.f32 %v10620_v19, 0.0  ;;  %v4494_v11 = vmax.f32 %v10684_v39, 0.0 }
 0x424   :  { %v10623_v63 = vadd.f32 %v3861_v30, %v13656_v31  ;;  %v10687_v45 = vadd.f32 %v4247_v14, %v13660_v58  ;;  %7243 = vmatprep.subr.bf16.mxu0 %v12077_v47  ;;  %9896 = vmatprep.subr.bf16.mxu1 %v12081_v10  ;;  %v15222_v49 = vld [vmem:[#allocation40_spill] sm:$0xff]  ;;  %v4493_v7 = vmax.f32 %v10621_v37, 0.0  ;;  %v4495_v25 = vmax.f32 %v10685_v43, 0.0  ;;  %v12090_v19 = vld [vmem:[#allocation10 + $0x350] ss:$12 sps:$4 sm:$0xff]  }
 0x425   :  { %v4504_v26 = vmax.f32 %v10622_v34, 0.0  ;;  %v4506_v32 = vmax.f32 %v10686_v50, 0.0  ;;  %7089 = vmatmul.mubr.bf16.gmra.mrb[196].mxu0 %v15222_v49  ;;  %8213 = vmatmul.mubr.bf16.gmra.mrb[4].mxu1 %v15222_v49  ;;  %v12078_v10 = vld [vmem:[#allocation10 + $0x348] ss:$12 sps:$4 sm:$0xff]   ;;  %v12085_v37 = vld [vmem:[#allocation10 + $0x364] ss:$12 sps:$4 sm:$0xff]  }
 0x426   :  { %v4505_v18 = vmax.f32 %v10623_v63, 0.0  ;;  %v4507_v4 = vmax.f32 %v10687_v45, 0.0  ;;  %7098 = vmatprep.mubr.bf16.mxu0 %v15223_v55  ;;  %8220 = vmatprep.mubr.bf16.mxu1 %v15223_v55  ;;  %v12097_v43 = vld [vmem:[#allocation10 + $0x428] ss:$12 sps:$4 sm:$0xff]  }
 0x427   :  { %v13794_v47 = vpack.c.bf16 %v4504_v26, %v4492_v33  ;;  %7244 = vmatpush1.bf16.msra.mxu0 %v12075_v1  ;;  %9897 = vmatpush3.bf16.msra.mxu1 %v12082_v51  ;;  %v13796_v39 = vpack.c.bf16 %v4506_v32, %v4494_v11 }
 0x428   :  { %v13798_v34 = vpack.c.bf16 %v4505_v18, %v4493_v7  ;;  %v3865_v50 = vpop.f32.mrb[156].mxu0  ;;  %v4251_v49 = vpop.f32.mrb[156].mxu1  ;;  %7245 = vmatprep.subr.bf16.mxu0 %v12080_v16  ;;  %9898 = vmatprep.subr.bf16.mxu1 %v12089_v41  ;;  %v13800_v30 = vpack.c.bf16 %v4507_v4, %v4495_v25  ;;  %v12083_v4 = vld [vmem:[#allocation10 + $0x360] ss:$12 sps:$4 sm:$0xff]   ;;  %v12098_v7 = vld [vmem:[#allocation10 + $0x368] ss:$12 sps:$4 sm:$0xff]  }
 0x429   :  { %15224 = vst [vmem:[#allocation75_spill] sm:$0xff] %v13794_v47  ;;  %15225 = vst [vmem:[#allocation33_spill] sm:$0xff] %v13796_v39  ;;  %v10624_v55 = vadd.f32 %v3865_v50, %v13648_v36  ;;  %v10688_v26 = vadd.f32 %v4251_v49, %v13651_v46  ;;  %v3867_v33 = vpop.f32.mrb[157].mxu0  ;;  %v4253_v14 = vpop.f32.mrb[157].mxu1  ;;  %v12088_v50 = vld [vmem:[#allocation10 + $0x37c] ss:$12 sps:$4 sm:$0xff]  }
 0x42a   :  { %15226 = vst [vmem:[#allocation81_spill] sm:$0xff] %v13798_v34  ;;  %15227 = vst [vmem:[#allocation79_spill] sm:$0xff] %v13800_v30  ;;  %v10625_v1 = vadd.f32 %v3867_v33, %v13656_v31  ;;  %v10689_v11 = vadd.f32 %v4253_v14, %v13660_v58  ;;  %v3869_v51 = vpop.f32.mrb[158].mxu0  ;;  %v4255_v63 = vpop.f32.mrb[158].mxu1  ;;  %v12105_v49 = vld [vmem:[#allocation10 + $0x440] ss:$12 sps:$4 sm:$0xff]  }
 0x42b   :  { %v10626_v45 = vadd.f32 %v3869_v51, %v13648_v36  ;;  %v10690_v16 = vadd.f32 %v4255_v63, %v13651_v46  ;;  %v3871_v41 = vpop.f32.mrb[159].mxu0  ;;  %v4257_v32 = vpop.f32.mrb[159].mxu1  ;;  %7246 = vmatpush1.bf16.msra.mxu0 %v12078_v10  ;;  %9899 = vmatpush3.bf16.msra.mxu1 %v12090_v19  ;;  %v4516_v33 = vmax.f32 %v10624_v55, 0.0  ;;  %v4518_v14 = vmax.f32 %v10688_v26, 0.0  ;;  %v15228_v30 = vld [vmem:[#allocation44_spill] sm:$0xff]  ;;  %v15229_v34 = vld [vmem:[#allocation50_spill] sm:$0xff] }
 0x42c   :  { %v10627_v25 = vadd.f32 %v3871_v41, %v13656_v31  ;;  %v10691_v18 = vadd.f32 %v4257_v32, %v13660_v58  ;;  %7247 = vmatprep.subr.bf16.mxu0 %v12085_v37  ;;  %9900 = vmatprep.subr.bf16.mxu1 %v12097_v43  ;;  %v4517_v10 = vmax.f32 %v10625_v1, 0.0  ;;  %v4519_v63 = vmax.f32 %v10689_v11, 0.0  ;;  %v12086_v43 = vld [vmem:[#allocation10 + $0x378] ss:$12 sps:$4 sm:$0xff]   ;;  %v12106_v55 = vld [vmem:[#allocation10 + $0x380] ss:$12 sps:$4 sm:$0xff]  }
 0x42d   :  { %v4528_v39 = vmax.f32 %v10626_v45, 0.0  ;;  %v4530_v51 = vmax.f32 %v10690_v16, 0.0  ;;  %7099 = vmatmul.mubr.bf16.gmra.mrb[200].mxu0 %v15228_v30  ;;  %8221 = vmatmul.mubr.bf16.gmra.mrb[8].mxu1 %v15228_v30  ;;  %v12093_v1 = vld [vmem:[#allocation10 + $0x394] ss:$12 sps:$4 sm:$0xff]   ;;  %v12113_v11 = vld [vmem:[#allocation10 + $0x458] ss:$12 sps:$4 sm:$0xff]  }
 0x42e   :  { %v4529_v19 = vmax.f32 %v10627_v25, 0.0  ;;  %v4531_v47 = vmax.f32 %v10691_v18, 0.0  ;;  %7108 = vmatprep.mubr.bf16.mxu0 %v15229_v34  ;;  %8228 = vmatprep.mubr.bf16.mxu1 %v15229_v34 }
 0x42f   :  { %v13814_v37 = vpack.c.bf16 %v4528_v39, %v4516_v33  ;;  %7248 = vmatpush1.bf16.msra.mxu0 %v12083_v4  ;;  %9901 = vmatpush3.bf16.msra.mxu1 %v12098_v7  ;;  %v13816_v26 = vpack.c.bf16 %v4530_v51, %v4518_v14 }
 0x430   :  { %v13818_v45 = vpack.c.bf16 %v4529_v19, %v4517_v10  ;;  %v3875_v16 = vpop.f32.mrb[160].mxu0  ;;  %v4261_v30 = vpop.f32.mrb[160].mxu1  ;;  %7249 = vmatprep.subr.bf16.mxu0 %v12088_v50  ;;  %9902 = vmatprep.subr.bf16.mxu1 %v12105_v49  ;;  %v13820_v41 = vpack.c.bf16 %v4531_v47, %v4519_v63  ;;  %v12091_v47 = vld [vmem:[#allocation10 + $0x390] ss:$12 sps:$4 sm:$0xff]   ;;  %v12114_v10 = vld [vmem:[#allocation10 + $0x398] ss:$12 sps:$4 sm:$0xff]  }
 0x431   :  { %15230 = vst [vmem:[#allocation87_spill] sm:$0xff] %v13814_v37  ;;  %15231 = vst [vmem:[#allocation38_spill] sm:$0xff] %v13816_v26  ;;  %v10628_v34 = vadd.f32 %v3875_v16, %v13648_v36  ;;  %v10692_v39 = vadd.f32 %v4261_v30, %v13651_v46  ;;  %v3877_v32 = vpop.f32.mrb[161].mxu0  ;;  %v4263_v4 = vpop.f32.mrb[161].mxu1  ;;  %v12096_v16 = vld [vmem:[#allocation10 + $0x3ac] ss:$12 sps:$4 sm:$0xff]  }
 0x432   :  { %15232 = vst [vmem:[#allocation36_spill] sm:$0xff] %v13818_v45  ;;  %15233 = vst [vmem:[#allocation42_spill] sm:$0xff] %v13820_v41  ;;  %v10629_v7 = vadd.f32 %v3877_v32, %v13656_v31  ;;  %v10693_v25 = vadd.f32 %v4263_v4, %v13660_v58  ;;  %v3879_v18 = vpop.f32.mrb[162].mxu0  ;;  %v4265_v33 = vpop.f32.mrb[162].mxu1  ;;  %v12121_v30 = vld [vmem:[#allocation10 + $0x470] ss:$12 sps:$4 sm:$0xff]  }
 0x433   :  { %v10630_v14 = vadd.f32 %v3879_v18, %v13648_v36  ;;  %v10694_v50 = vadd.f32 %v4265_v33, %v13651_v46  ;;  %v3881_v49 = vpop.f32.mrb[163].mxu0  ;;  %v4267_v51 = vpop.f32.mrb[163].mxu1  ;;  %7250 = vmatpush1.bf16.msra.mxu0 %v12086_v43  ;;  %9903 = vmatpush3.bf16.msra.mxu1 %v12106_v55  ;;  %v4540_v32 = vmax.f32 %v10628_v34, 0.0  ;;  %v4542_v4 = vmax.f32 %v10692_v39, 0.0  ;;  %v15234_v41 = vld [vmem:[#allocation48_spill] sm:$0xff]  ;;  %v15235_v45 = vld [vmem:[#allocation54_spill] sm:$0xff] }
 0x434   :  { %v10631_v63 = vadd.f32 %v3881_v49, %v13656_v31  ;;  %v10695_v19 = vadd.f32 %v4267_v51, %v13660_v58  ;;  %7251 = vmatprep.subr.bf16.mxu0 %v12093_v1  ;;  %9904 = vmatprep.subr.bf16.mxu1 %v12113_v11  ;;  %v4541_v43 = vmax.f32 %v10629_v7, 0.0  ;;  %v4543_v33 = vmax.f32 %v10693_v25, 0.0  ;;  %v12094_v11 = vld [vmem:[#allocation10 + $0x3a8] ss:$12 sps:$4 sm:$0xff]   ;;  %v12122_v34 = vld [vmem:[#allocation10 + $0x3b0] ss:$12 sps:$4 sm:$0xff]  }
 0x435   :  { %v4552_v26 = vmax.f32 %v10630_v14, 0.0  ;;  %v4554_v18 = vmax.f32 %v10694_v50, 0.0  ;;  %7109 = vmatmul.mubr.bf16.gmra.mrb[204].mxu0 %v15234_v41  ;;  %8229 = vmatmul.mubr.bf16.gmra.mrb[12].mxu1 %v15234_v41  ;;  %v12101_v7 = vld [vmem:[#allocation10 + $0x3c4] ss:$12 sps:$4 sm:$0xff]   ;;  %v12129_v25 = vld [vmem:[#allocation10 + $0x548] ss:$12 sps:$4 sm:$0xff]  }
 0x436   :  { %v4553_v55 = vmax.f32 %v10631_v63, 0.0  ;;  %v4555_v37 = vmax.f32 %v10695_v19, 0.0  ;;  %7118 = vmatprep.mubr.bf16.mxu0 %v15235_v45  ;;  %8236 = vmatprep.mubr.bf16.mxu1 %v15235_v45 }
 0x437   :  { %v13834_v1 = vpack.c.bf16 %v4552_v26, %v4540_v32  ;;  %7252 = vmatpush1.bf16.msra.mxu0 %v12091_v47  ;;  %9905 = vmatpush3.bf16.msra.mxu1 %v12114_v10  ;;  %v13836_v39 = vpack.c.bf16 %v4554_v18, %v4542_v4 }
 0x438   :  { %v13838_v14 = vpack.c.bf16 %v4553_v55, %v4541_v43  ;;  %v3885_v50 = vpop.f32.mrb[164].mxu0  ;;  %v4271_v41 = vpop.f32.mrb[164].mxu1  ;;  %7253 = vmatprep.subr.bf16.mxu0 %v12096_v16  ;;  %9906 = vmatprep.subr.bf16.mxu1 %v12121_v30  ;;  %v13840_v49 = vpack.c.bf16 %v4555_v37, %v4543_v33  ;;  %v12099_v37 = vld [vmem:[#allocation10 + $0x3c0] ss:$12 sps:$4 sm:$0xff]   ;;  %v12104_v55 = vld [vmem:[#allocation10 + $0x3dc] ss:$12 sps:$4 sm:$0xff]  }
 0x439   :  { %15236 = vst [vmem:[#allocation40_spill] sm:$0xff] %v13836_v39  ;;  %v10632_v45 = vadd.f32 %v3885_v50, %v13648_v36  ;;  %v10696_v26 = vadd.f32 %v4271_v41, %v13651_v46  ;;  %v3887_v51 = vpop.f32.mrb[165].mxu0  ;;  %v4273_v47 = vpop.f32.mrb[165].mxu1  ;;  %v15238_v39 = vld [vmem:[#allocation52_spill] sm:$0xff] }
 0x43a   :  { %15237 = vst [vmem:[#allocation46_spill] sm:$0xff] %v13840_v49  ;;  %v10633_v10 = vadd.f32 %v3887_v51, %v13656_v31  ;;  %v10697_v63 = vadd.f32 %v4273_v47, %v13660_v58  ;;  %v3889_v19 = vpop.f32.mrb[166].mxu0  ;;  %v4275_v32 = vpop.f32.mrb[166].mxu1 }
 0x43b   :  { %v10634_v4 = vadd.f32 %v3889_v19, %v13648_v36  ;;  %v10698_v16 = vadd.f32 %v4275_v32, %v13651_v46  ;;  %v3891_v30 = vpop.f32.mrb[167].mxu0  ;;  %v4277_v18 = vpop.f32.mrb[167].mxu1  ;;  %7254 = vmatpush1.bf16.msra.mxu0 %v12094_v11  ;;  %9907 = vmatpush3.bf16.msra.mxu1 %v12122_v34  ;;  %v4564_v50 = vmax.f32 %v10632_v45, 0.0  ;;  %v4566_v41 = vmax.f32 %v10696_v26, 0.0  ;;  %v15239_v34 = vld [vmem:[#allocation58_spill] sm:$0xff] }
 0x43c   :  { %v10635_v43 = vadd.f32 %v3891_v30, %v13656_v31  ;;  %v10699_v33 = vadd.f32 %v4277_v18, %v13660_v58  ;;  %7255 = vmatprep.subr.bf16.mxu0 %v12101_v7  ;;  %10004 = vmatprep.subr.bf16.mxu1 %v12129_v25  ;;  %v4565_v19 = vmax.f32 %v10633_v10, 0.0  ;;  %v4567_v32 = vmax.f32 %v10697_v63, 0.0  ;;  %v12102_v7 = vld [vmem:[#allocation10 + $0x3d8] ss:$12 sps:$4 sm:$0xff]  }
 0x43d   :  { %v4576_v51 = vmax.f32 %v10634_v4, 0.0  ;;  %v4578_v47 = vmax.f32 %v10698_v16, 0.0  ;;  %7119 = vmatmul.mubr.bf16.gmra.mrb[208].mxu0 %v15238_v39  ;;  %8237 = vmatmul.mubr.bf16.gmra.mrb[16].mxu1 %v15238_v39  ;;  %v12109_v39 = vld [vmem:[#allocation10 + $0x3f4] ss:$12 sps:$4 sm:$0xff]  }
 0x43e   :  { %v4577_v11 = vmax.f32 %v10635_v43, 0.0  ;;  %v4579_v49 = vmax.f32 %v10699_v33, 0.0  ;;  %7128 = vmatprep.mubr.bf16.mxu0 %v15239_v34  ;;  %8244 = vmatprep.mubr.bf16.mxu1 %v15239_v34  ;;  %v12112_v34 = vld [vmem:[#allocation10 + $0x40c] ss:$12 sps:$4 sm:$0xff]  }
 0x43f   :  { %v13854_v30 = vpack.c.bf16 %v4576_v51, %v4564_v50  ;;  %7256 = vmatpush1.bf16.msra.mxu0 %v12099_v37  ;;  %v13856_v25 = vpack.c.bf16 %v4578_v47, %v4566_v41 }
 0x440   :  { %v13858_v45 = vpack.c.bf16 %v4577_v11, %v4565_v19  ;;  %v3895_v26 = vpop.f32.mrb[168].mxu0  ;;  %v4281_v4 = vpop.f32.mrb[168].mxu1  ;;  %7257 = vmatprep.subr.bf16.mxu0 %v12104_v55  ;;  %v13860_v10 = vpack.c.bf16 %v4579_v49, %v4567_v32  ;;  %v12107_v49 = vld [vmem:[#allocation10 + $0x3f0] ss:$12 sps:$4 sm:$0xff]  }
 0x441   :  { %15240 = vst [vmem:[#allocation44_spill] sm:$0xff] %v13854_v30  ;;  %15241 = vst [vmem:[#allocation50_spill] sm:$0xff] %v13856_v25  ;;  %v10636_v63 = vadd.f32 %v3895_v26, %v13648_v36  ;;  %v10700_v16 = vadd.f32 %v4281_v4, %v13651_v46  ;;  %v3897_v18 = vpop.f32.mrb[169].mxu0  ;;  %v4283_v43 = vpop.f32.mrb[169].mxu1  ;;  %v15243_v25 = vld [vmem:[#allocation56_spill] sm:$0xff] }
 0x442   :  { %15242 = vst [vmem:[#allocation48_spill] sm:$0xff] %v13860_v10  ;;  %v10637_v33 = vadd.f32 %v3897_v18, %v13656_v31  ;;  %v10701_v37 = vadd.f32 %v4283_v43, %v13660_v58  ;;  %v3899_v50 = vpop.f32.mrb[170].mxu0  ;;  %v4285_v41 = vpop.f32.mrb[170].mxu1 }
 0x443   :  { %v10638_v51 = vadd.f32 %v3899_v50, %v13648_v36  ;;  %v10702_v47 = vadd.f32 %v4285_v41, %v13651_v46  ;;  %v3901_v55 = vpop.f32.mrb[171].mxu0  ;;  %v4287_v19 = vpop.f32.mrb[171].mxu1  ;;  %7258 = vmatpush1.bf16.msra.mxu0 %v12102_v7  ;;  %v4588_v26 = vmax.f32 %v10636_v63, 0.0  ;;  %v4590_v4 = vmax.f32 %v10700_v16, 0.0  ;;  %v15244_v7 = vld [vmem:[#allocation62_spill] sm:$0xff] }
 0x444   :  { %v10639_v32 = vadd.f32 %v3901_v55, %v13656_v31  ;;  %v10703_v11 = vadd.f32 %v4287_v19, %v13660_v58  ;;  %7259 = vmatprep.subr.bf16.mxu0 %v12109_v39  ;;  %v4589_v50 = vmax.f32 %v10637_v33, 0.0  ;;  %v4591_v41 = vmax.f32 %v10701_v37, 0.0  ;;  %v12110_v39 = vld [vmem:[#allocation10 + $0x408] ss:$12 sps:$4 sm:$0xff]  }
 0x445   :  { %v4600_v18 = vmax.f32 %v10638_v51, 0.0  ;;  %v4602_v43 = vmax.f32 %v10702_v47, 0.0  ;;  %7129 = vmatmul.mubr.bf16.gmra.mrb[212].mxu0 %v15243_v25  ;;  %8245 = vmatmul.mubr.bf16.gmra.mrb[20].mxu1 %v15243_v25  ;;  %v12117_v25 = vld [vmem:[#allocation10 + $0x424] ss:$12 sps:$4 sm:$0xff]  }
 0x446   :  { %v4601_v10 = vmax.f32 %v10639_v32, 0.0  ;;  %v4603_v30 = vmax.f32 %v10703_v11, 0.0  ;;  %7138 = vmatprep.mubr.bf16.mxu0 %v15244_v7  ;;  %8252 = vmatprep.mubr.bf16.mxu1 %v15244_v7 }
 0x447   :  { %v13874_v55 = vpack.c.bf16 %v4600_v18, %v4588_v26  ;;  %7260 = vmatpush1.bf16.msra.mxu0 %v12107_v49  ;;  %v13876_v63 = vpack.c.bf16 %v4602_v43, %v4590_v4 }
 0x448   :  { %v13878_v16 = vpack.c.bf16 %v4601_v10, %v4589_v50  ;;  %v3905_v51 = vpop.f32.mrb[172].mxu0  ;;  %v4291_v47 = vpop.f32.mrb[172].mxu1  ;;  %7261 = vmatprep.subr.bf16.mxu0 %v12112_v34  ;;  %v13880_v33 = vpack.c.bf16 %v4603_v30, %v4591_v41  ;;  %v12115_v30 = vld [vmem:[#allocation10 + $0x420] ss:$12 sps:$4 sm:$0xff]  }
 0x449   :  { %15245 = vst [vmem:[#allocation54_spill] sm:$0xff] %v13874_v55  ;;  %15246 = vst [vmem:[#allocation52_spill] sm:$0xff] %v13876_v63  ;;  %v10640_v37 = vadd.f32 %v3905_v51, %v13648_v36  ;;  %v10704_v19 = vadd.f32 %v4291_v47, %v13651_v46  ;;  %v3907_v32 = vpop.f32.mrb[173].mxu0  ;;  %v4293_v11 = vpop.f32.mrb[173].mxu1  ;;  %v12120_v51 = vld [vmem:[#allocation10 + $0x43c] ss:$12 sps:$4 sm:$0xff]  }
 0x44a   :  { %15247 = vst [vmem:[#allocation58_spill] sm:$0xff] %v13878_v16  ;;  %15248 = vst [vmem:[#allocation56_spill] sm:$0xff] %v13880_v33  ;;  %v10641_v26 = vadd.f32 %v3907_v32, %v13656_v31  ;;  %v10705_v49 = vadd.f32 %v4293_v11, %v13660_v58  ;;  %v3909_v4 = vpop.f32.mrb[174].mxu0  ;;  %v4295_v18 = vpop.f32.mrb[174].mxu1  ;;  %v15249_v33 = vld [vmem:[#allocation60_spill] sm:$0xff] }
 0x44b   :  { %v10642_v10 = vadd.f32 %v3909_v4, %v13648_v36  ;;  %v10706_v43 = vadd.f32 %v4295_v18, %v13651_v46  ;;  %v3911_v34 = vpop.f32.mrb[175].mxu0  ;;  %v4297_v50 = vpop.f32.mrb[175].mxu1  ;;  %7262 = vmatpush1.bf16.msra.mxu0 %v12110_v39  ;;  %v4612_v47 = vmax.f32 %v10640_v37, 0.0  ;;  %v4614_v32 = vmax.f32 %v10704_v19, 0.0  ;;  %v15250_v39 = vld [vmem:[#allocation66_spill] sm:$0xff] }
 0x44c   :  { %v10643_v41 = vadd.f32 %v3911_v34, %v13656_v31  ;;  %v10707_v7 = vadd.f32 %v4297_v50, %v13660_v58  ;;  %7263 = vmatprep.subr.bf16.mxu0 %v12117_v25  ;;  %v4613_v4 = vmax.f32 %v10641_v26, 0.0  ;;  %v4615_v18 = vmax.f32 %v10705_v49, 0.0  ;;  %v12118_v25 = vld [vmem:[#allocation10 + $0x438] ss:$12 sps:$4 sm:$0xff]  }
 0x44d   :  { %v4624_v63 = vmax.f32 %v10642_v10, 0.0  ;;  %v4626_v11 = vmax.f32 %v10706_v43, 0.0  ;;  %7139 = vmatmul.mubr.bf16.gmra.mrb[216].mxu0 %v15249_v33  ;;  %8253 = vmatmul.mubr.bf16.gmra.mrb[24].mxu1 %v15249_v33  ;;  %v12125_v33 = vld [vmem:[#allocation10 + $0x454] ss:$12 sps:$4 sm:$0xff]  }
 0x44e   :  { %v4625_v55 = vmax.f32 %v10643_v41, 0.0  ;;  %v4627_v16 = vmax.f32 %v10707_v7, 0.0  ;;  %7148 = vmatprep.mubr.bf16.mxu0 %v15250_v39  ;;  %8260 = vmatprep.mubr.bf16.mxu1 %v15250_v39 }
 0x44f   :  { %v13894_v34 = vpack.c.bf16 %v4624_v63, %v4612_v47  ;;  %7264 = vmatpush1.bf16.msra.mxu0 %v12115_v30  ;;  %v13896_v37 = vpack.c.bf16 %v4626_v11, %v4614_v32 }
 0x450   :  { %v13898_v19 = vpack.c.bf16 %v4625_v55, %v4613_v4  ;;  %v3915_v10 = vpop.f32.mrb[176].mxu0  ;;  %v4301_v43 = vpop.f32.mrb[176].mxu1  ;;  %7265 = vmatprep.subr.bf16.mxu0 %v12120_v51  ;;  %v13900_v26 = vpack.c.bf16 %v4627_v16, %v4615_v18  ;;  %v12123_v16 = vld [vmem:[#allocation10 + $0x450] ss:$12 sps:$4 sm:$0xff]  }
 0x451   :  { %15251 = vst [vmem:[#allocation62_spill] sm:$0xff] %v13894_v34  ;;  %15252 = vst [vmem:[#allocation60_spill] sm:$0xff] %v13896_v37  ;;  %v10644_v49 = vadd.f32 %v3915_v10, %v13648_v36  ;;  %v10708_v50 = vadd.f32 %v4301_v43, %v13651_v46  ;;  %v3917_v41 = vpop.f32.mrb[177].mxu0  ;;  %v4303_v7 = vpop.f32.mrb[177].mxu1  ;;  %v12128_v10 = vld [vmem:[#allocation10 + $0x46c] ss:$12 sps:$4 sm:$0xff]  }
 0x452   :  { %15253 = vst [vmem:[#allocation66_spill] sm:$0xff] %v13898_v19  ;;  %15254 = vst [vmem:[#allocation112_spill] sm:$0xff] %v13900_v26  ;;  %v10645_v63 = vadd.f32 %v3917_v41, %v13656_v31  ;;  %v10709_v30 = vadd.f32 %v4303_v7, %v13660_v58  ;;  %v3919_v47 = vpop.f32.mrb[178].mxu0  ;;  %v4305_v32 = vpop.f32.mrb[178].mxu1  ;;  %v15255_v26 = vld [vmem:[#allocation64_spill] sm:$0xff] }
 0x453   :  { %v10646_v55 = vadd.f32 %v3919_v47, %v13648_v36  ;;  %v10710_v11 = vadd.f32 %v4305_v32, %v13651_v46  ;;  %v3921_v51 = vpop.f32.mrb[179].mxu0  ;;  %v4307_v4 = vpop.f32.mrb[179].mxu1  ;;  %7266 = vmatpush1.bf16.msra.mxu0 %v12118_v25  ;;  %v4636_v43 = vmax.f32 %v10644_v49, 0.0  ;;  %v4638_v41 = vmax.f32 %v10708_v50, 0.0  ;;  %v15256_v25 = vld [vmem:[#allocation70_spill] sm:$0xff] }
 0x454   :  { %v10647_v18 = vadd.f32 %v3921_v51, %v13656_v31  ;;  %v10711_v39 = vadd.f32 %v4307_v4, %v13660_v58  ;;  %7267 = vmatprep.subr.bf16.mxu0 %v12125_v33  ;;  %v4637_v47 = vmax.f32 %v10645_v63, 0.0  ;;  %v4639_v32 = vmax.f32 %v10709_v30, 0.0  ;;  %v12126_v33 = vld [vmem:[#allocation10 + $0x468] ss:$12 sps:$4 sm:$0xff]  }
 0x455   :  { %v4648_v37 = vmax.f32 %v10646_v55, 0.0  ;;  %v4650_v7 = vmax.f32 %v10710_v11, 0.0  ;;  %7149 = vmatmul.mubr.bf16.gmra.mrb[220].mxu0 %v15255_v26  ;;  %8261 = vmatmul.mubr.bf16.gmra.mrb[28].mxu1 %v15255_v26  ;;  %v12133_v26 = vld [vmem:[#allocation10 + $0x484] ss:$12 sps:$4 sm:$0xff]  }
 0x456   :  { %v4649_v34 = vmax.f32 %v10647_v18, 0.0  ;;  %v4651_v19 = vmax.f32 %v10711_v39, 0.0  ;;  %7158 = vmatprep.mubr.bf16.mxu0 %v15256_v25  ;;  %8268 = vmatprep.mubr.bf16.mxu1 %v15256_v25 }
 0x457   :  { %v13914_v51 = vpack.c.bf16 %v4648_v37, %v4636_v43  ;;  %7268 = vmatpush1.bf16.msra.mxu0 %v12123_v16  ;;  %v13916_v49 = vpack.c.bf16 %v4650_v7, %v4638_v41 }
 0x458   :  { %v13918_v50 = vpack.c.bf16 %v4649_v34, %v4637_v47  ;;  %v3925_v55 = vpop.f32.mrb[180].mxu0  ;;  %v4311_v11 = vpop.f32.mrb[180].mxu1  ;;  %7269 = vmatprep.subr.bf16.mxu0 %v12128_v10  ;;  %v13920_v63 = vpack.c.bf16 %v4651_v19, %v4639_v32 }
 0x459   :  { %15257 = vst [vmem:[#allocation64_spill] sm:$0xff] %v13914_v51  ;;  %15258 = vst [vmem:[#allocation70_spill] sm:$0xff] %v13916_v49  ;;  %v10648_v30 = vadd.f32 %v3925_v55, %v13648_v36  ;;  %v10712_v4 = vadd.f32 %v4311_v11, %v13651_v46  ;;  %v3927_v18 = vpop.f32.mrb[181].mxu0  ;;  %v4313_v39 = vpop.f32.mrb[181].mxu1  ;;  %v15260_v49 = vld [vmem:[#allocation68_spill] sm:$0xff]  ;;  %v15261_v51 = vld [vmem:[#allocation74_spill] sm:$0xff] }
 0x45a   :  { %15259 = vst [vmem:[#allocation113_spill] sm:$0xff] %v13920_v63  ;;  %v10649_v37 = vadd.f32 %v3927_v18, %v13656_v31  ;;  %v10713_v16 = vadd.f32 %v4313_v39, %v13660_v58  ;;  %v3929_v43 = vpop.f32.mrb[182].mxu0  ;;  %v4315_v41 = vpop.f32.mrb[182].mxu1 }
 0x45b   :  { %v10650_v34 = vadd.f32 %v3929_v43, %v13648_v36  ;;  %v10714_v7 = vadd.f32 %v4315_v41, %v13651_v46  ;;  %v3931_v10 = vpop.f32.mrb[183].mxu0  ;;  %v4317_v47 = vpop.f32.mrb[183].mxu1  ;;  %7270 = vmatpush1.bf16.msra.mxu0 %v12126_v33  ;;  %v4660_v25 = vmax.f32 %v10648_v30, 0.0  ;;  %v4662_v55 = vmax.f32 %v10712_v4, 0.0 }
 0x45c   :  { %v10651_v19 = vadd.f32 %v3931_v10, %v13656_v31  ;;  %v10715_v32 = vadd.f32 %v4317_v47, %v13660_v58  ;;  %7432 = vmatprep.subr.bf16.mxu0 %v12133_v26  ;;  %v4661_v39 = vmax.f32 %v10649_v37, 0.0  ;;  %v4663_v43 = vmax.f32 %v10713_v16, 0.0 }
 0x45d   :  { %v4672_v11 = vmax.f32 %v10650_v34, 0.0  ;;  %v4674_v18 = vmax.f32 %v10714_v7, 0.0  ;;  %7159 = vmatmul.mubr.bf16.gmra.mrb[224].mxu0 %v15260_v49  ;;  %8269 = vmatmul.mubr.bf16.gmra.mrb[32].mxu1 %v15260_v49 }
 0x45e   :  { %v4673_v63 = vmax.f32 %v10651_v19, 0.0  ;;  %v4675_v41 = vmax.f32 %v10715_v32, 0.0  ;;  %7168 = vmatprep.mubr.bf16.mxu0 %v15261_v51  ;;  %8276 = vmatprep.mubr.bf16.mxu1 %v15261_v51 }
 0x45f   :  { %v13934_v33 = vpack.c.bf16 %v4672_v11, %v4660_v25  ;;  %v13936_v10 = vpack.c.bf16 %v4674_v18, %v4662_v55 }
 0x460   :  { %v13938_v26 = vpack.c.bf16 %v4673_v63, %v4661_v39  ;;  %v3935_v30 = vpop.f32.mrb[184].mxu0  ;;  %v4321_v4 = vpop.f32.mrb[184].mxu1  ;;  %v13940_v34 = vpack.c.bf16 %v4675_v41, %v4663_v43 }
 0x461   :  { %15262 = vst [vmem:[#allocation68_spill] sm:$0xff] %v13934_v33  ;;  %15263 = vst [vmem:[#allocation74_spill] sm:$0xff] %v13936_v10  ;;  %v10652_v49 = vadd.f32 %v3935_v30, %v13648_v36  ;;  %v10716_v37 = vadd.f32 %v4321_v4, %v13651_v46  ;;  %v3937_v16 = vpop.f32.mrb[185].mxu0  ;;  %v4323_v7 = vpop.f32.mrb[185].mxu1  ;;  %v15265_v10 = vld [vmem:[#allocation72_spill] sm:$0xff]  ;;  %v15266_v33 = vld [vmem:[#allocation78_spill] sm:$0xff] }
 0x462   :  { %15264 = vst [vmem:[#allocation114_spill] sm:$0xff] %v13940_v34  ;;  %v10653_v47 = vadd.f32 %v3937_v16, %v13656_v31  ;;  %v10717_v51 = vadd.f32 %v4323_v7, %v13660_v58  ;;  %v3939_v19 = vpop.f32.mrb[186].mxu0  ;;  %v4325_v32 = vpop.f32.mrb[186].mxu1 }
 0x463   :  { %v10654_v25 = vadd.f32 %v3939_v19, %v13648_v36  ;;  %v10718_v63 = vadd.f32 %v4325_v32, %v13651_v46  ;;  %v3941_v55 = vpop.f32.mrb[187].mxu0  ;;  %v4327_v11 = vpop.f32.mrb[187].mxu1  ;;  %v4684_v43 = vmax.f32 %v10652_v49, 0.0  ;;  %v4686_v41 = vmax.f32 %v10716_v37, 0.0 }
 0x464   :  { %v10655_v18 = vadd.f32 %v3941_v55, %v13656_v31  ;;  %v10719_v39 = vadd.f32 %v4327_v11, %v13660_v58  ;;  %v4685_v16 = vmax.f32 %v10653_v47, 0.0  ;;  %v4687_v7 = vmax.f32 %v10717_v51, 0.0 }
 0x465   :  { %v4696_v30 = vmax.f32 %v10654_v25, 0.0  ;;  %v4698_v4 = vmax.f32 %v10718_v63, 0.0  ;;  %7169 = vmatmul.mubr.bf16.gmra.mrb[228].mxu0 %v15265_v10  ;;  %8277 = vmatmul.mubr.bf16.gmra.mrb[36].mxu1 %v15265_v10 }
 0x466   :  { %v4697_v34 = vmax.f32 %v10655_v18, 0.0  ;;  %v4699_v19 = vmax.f32 %v10719_v39, 0.0  ;;  %7178 = vmatprep.mubr.bf16.mxu0 %v15266_v33  ;;  %8284 = vmatprep.mubr.bf16.mxu1 %v15266_v33 }
 0x467   :  { %v13954_v32 = vpack.c.bf16 %v4696_v30, %v4684_v43  ;;  %v13956_v55 = vpack.c.bf16 %v4698_v4, %v4686_v41 }
 0x468   :  { %v13958_v49 = vpack.c.bf16 %v4697_v34, %v4685_v16  ;;  %v3945_v37 = vpop.f32.mrb[188].mxu0  ;;  %v4331_v25 = vpop.f32.mrb[188].mxu1  ;;  %v13960_v63 = vpack.c.bf16 %v4699_v19, %v4687_v7 }
 0x469   :  { %15267 = vst [vmem:[#allocation72_spill] sm:$0xff] %v13954_v32  ;;  %15268 = vst [vmem:[#allocation78_spill] sm:$0xff] %v13956_v55  ;;  %v10656_v10 = vadd.f32 %v3945_v37, %v13648_v36  ;;  %v10720_v47 = vadd.f32 %v4331_v25, %v13651_v46  ;;  %v3947_v51 = vpop.f32.mrb[189].mxu0  ;;  %v4333_v11 = vpop.f32.mrb[189].mxu1 }
 0x46a   :  { %15269 = vst [vmem:[#allocation115_spill] sm:$0xff] %v13960_v63  ;;  %v10657_v18 = vadd.f32 %v3947_v51, %v13656_v31  ;;  %v10721_v33 = vadd.f32 %v4333_v11, %v13660_v58  ;;  %v3949_v39 = vpop.f32.mrb[190].mxu0  ;;  %v4335_v43 = vpop.f32.mrb[190].mxu1  ;;  %v15270_v63 = vld [vmem:[#allocation76_spill] sm:$0xff] }
 0x46b   :  { %v10658_v41 = vadd.f32 %v3949_v39, %v13648_v36  ;;  %v10722_v34 = vadd.f32 %v4335_v43, %v13651_v46  ;;  %v3951_v30 = vpop.f32.mrb[191].mxu0  ;;  %v4337_v4 = vpop.f32.mrb[191].mxu1  ;;  %v4708_v19 = vmax.f32 %v10656_v10, 0.0  ;;  %v4710_v37 = vmax.f32 %v10720_v47, 0.0  ;;  %v15271_v39 = vld [vmem:[#allocation82_spill] sm:$0xff] }
 0x46c   :  { %v10659_v16 = vadd.f32 %v3951_v30, %v13656_v31  ;;  %v10723_v7 = vadd.f32 %v4337_v4, %v13660_v58  ;;  %v4709_v51 = vmax.f32 %v10657_v18, 0.0  ;;  %v4711_v11 = vmax.f32 %v10721_v33, 0.0  ;;  %v15277_v30 = vld [vmem:[#allocation84_spill] sm:$0xff] }
 0x46d   :  { %v4720_v25 = vmax.f32 %v10658_v41, 0.0  ;;  %v4722_v55 = vmax.f32 %v10722_v34, 0.0  ;;  %7179 = vmatmul.mubr.bf16.gmra.mrb[232].mxu0 %v15270_v63  ;;  %8285 = vmatmul.mubr.bf16.gmra.mrb[40].mxu1 %v15270_v63  ;;  %v15276_v34 = vld [vmem:[#allocation80_spill] sm:$0xff] }
 0x46e   :  { %v4721_v32 = vmax.f32 %v10659_v16, 0.0  ;;  %v4723_v36 = vmax.f32 %v10723_v7, 0.0  ;;  %7188 = vmatprep.mubr.bf16.mxu0 %v15271_v39  ;;  %8292 = vmatprep.mubr.bf16.mxu1 %v15271_v39 }
 0x46f   :  { %v13974_v46 = vpack.c.bf16 %v4720_v25, %v4708_v19  ;;  %v13976_v31 = vpack.c.bf16 %v4722_v55, %v4710_v37  ;;  %v15278_v37 = vld [vmem:[#allocation83_spill] sm:$0xff]  ;;  %v15279_v25 = vld [vmem:[#allocation86_spill] sm:$0xff] }
 0x470   :  { %v13978_v58 = vpack.c.bf16 %v4721_v32, %v4709_v51  ;;  %v9684_v10 = vpop.f32.mrb[192].mxu1  ;;  %v13980_v47 = vpack.c.bf16 %v4723_v36, %v4711_v11 }
 0x471   :  { %15272 = vst [vmem:[#allocation76_spill] sm:$0xff] %v13974_v46  ;;  %15273 = vst [vmem:[#allocation82_spill] sm:$0xff] %v13976_v31  ;;  %v9685_v43 = vpop.f32.mrb[193].mxu1  ;;  %v12146_v46 = vld [vmem:[#allocation10 + $0x4b8] ss:$12 sps:$4 sm:$0xff]  }
 0x472   :  { %15274 = vst [vmem:[#allocation116_spill] sm:$0xff] %v13978_v58  ;;  %15275 = vst [vmem:[#allocation117_spill] sm:$0xff] %v13980_v47  ;;  %v13982_v41 = vadd.f32 %v9685_v43, %v9684_v10  ;;  %v9687_v63 = vpop.f32.mrb[194].mxu1 }
 0x473   :  { %v9688_v18 = vpop.f32.mrb[195].mxu1 }
 0x474   :  { %v13984_v33 = vadd.f32 %v9688_v18, %v9687_v63  ;;  %v15280_v63 = vld [vmem:[#allocation85_spill] sm:$0xff] }
 0x475   :  { %7189 = vmatmul.mubr.bf16.gmra.mrb[236].mxu0 %v15276_v34  ;;  %8293 = vmatmul.mubr.bf16.gmra.mrb[44].mxu1 %v15276_v34  ;;  %v15281_v18 = vld [vmem:[#allocation89_spill] sm:$0xff] }
 0x476   :  { %7198 = vmatprep.mubr.bf16.mxu0 %v15277_v30  ;;  %8300 = vmatprep.mubr.bf16.mxu1 %v15277_v30 }
 0x478   :  { %v9690_v32 = vpop.f32.mrb[196].mxu1 }
 0x479   :  { %v9691_v55 = vpop.f32.mrb[197].mxu1 }
 0x47a   :  { %v13990_v4 = vadd.f32 %v9691_v55, %v9690_v32  ;;  %v9693_v16 = vpop.f32.mrb[198].mxu1 }
 0x47b   :  { %v9694_v7 = vpop.f32.mrb[199].mxu1 }
 0x47c   :  { %v13992_v19 = vadd.f32 %v9694_v7, %v9693_v16 }
 0x47d   :  { %7199 = vmatmul.mubr.bf16.gmra.mrb[240].mxu0 %v15278_v37  ;;  %8301 = vmatmul.mubr.bf16.gmra.mrb[48].mxu1 %v15278_v37  ;;  %v15282_v37 = vld [vmem:[#allocation88_spill] sm:$0xff] }
 0x47e   :  { %7208 = vmatprep.mubr.bf16.mxu0 %v15279_v25  ;;  %8308 = vmatprep.mubr.bf16.mxu1 %v15279_v25 }
 0x480   :  { %v9696_v51 = vpop.f32.mrb[200].mxu1 }
 0x481   :  { %v9697_v11 = vpop.f32.mrb[201].mxu1 }
 0x482   :  { %v13998_v36 = vadd.f32 %v9697_v11, %v9696_v51  ;;  %v9699_v39 = vpop.f32.mrb[202].mxu1 }
 0x483   :  { %v9700_v10 = vpop.f32.mrb[203].mxu1 }
 0x484   :  { %v14000_v43 = vadd.f32 %v9700_v10, %v9699_v39 }
 0x485   :  { %7209 = vmatmul.mubr.bf16.gmra.mrb[244].mxu0 %v15280_v63  ;;  %8309 = vmatmul.mubr.bf16.gmra.mrb[52].mxu1 %v15280_v63 }
 0x486   :  { %7218 = vmatprep.mubr.bf16.mxu0 %v15281_v18  ;;  %8316 = vmatprep.mubr.bf16.mxu1 %v15281_v18 }
 0x488   :  { %v9702_v34 = vpop.f32.mrb[204].mxu1 }
 0x489   :  { %v9703_v30 = vpop.f32.mrb[205].mxu1 }
 0x48a   :  { %v14006_v32 = vadd.f32 %v9703_v30, %v9702_v34  ;;  %v9705_v55 = vpop.f32.mrb[206].mxu1 }
 0x48b   :  { %v9706_v16 = vpop.f32.mrb[207].mxu1 }
 0x48c   :  { %v14008_v7 = vadd.f32 %v9706_v16, %v9705_v55  ;;  %v12130_v16 = vld [vmem:[#allocation10 + $0x488] ss:$12 sps:$4 sm:$0xff]  }
 0x48d   :  { %7219 = vmatmul.mubr.bf16.gmra.mrb[248].mxu0 %v15282_v37  ;;  %8317 = vmatmul.mubr.bf16.gmra.mrb[56].mxu1 %v15282_v37  ;;  %v12131_v37 = vld [vmem:[#allocation10 + $0x480] ss:$12 sps:$4 sm:$0xff]  }
 0x48e   :  { %7228 = vmatprep.mubr.bf16.mxu0 %v13185_v20  ;;  %8324 = vmatprep.mubr.bf16.mxu1 %v13185_v20 }
 0x490   :  { %v9708_v25 = vpop.f32.mrb[208].mxu1 }
 0x491   :  { %v9709_v51 = vpop.f32.mrb[209].mxu1 }
 0x492   :  { %v14014_v11 = vadd.f32 %v9709_v51, %v9708_v25  ;;  %v9711_v39 = vpop.f32.mrb[210].mxu1  ;;  %v12136_v51 = vld [vmem:[#allocation10 + $0x49c] ss:$12 sps:$4 sm:$0xff]  }
 0x493   :  { %v9712_v10 = vpop.f32.mrb[211].mxu1 }
 0x494   :  { %v14016_v63 = vadd.f32 %v9712_v10, %v9711_v39  ;;  %v12137_v39 = vld [vmem:[#allocation10 + $0x560] ss:$12 sps:$4 sm:$0xff]  }
 0x495   :  { %7229 = vmatmul.mubr.bf16.gmra.mrb[252].mxu0 %v13187_v48  ;;  %8325 = vmatmul.mubr.bf16.gmra.mrb[60].mxu1 %v13187_v48  ;;  %v12134_v48 = vld [vmem:[#allocation10 + $0x498] ss:$12 sps:$4 sm:$0xff]  }
 0x496   :  { %7271 = vmatprep.mubr.bf16.mxu0 %v13281_v13  ;;  %8365 = vmatprep.mubr.bf16.mxu1 %v13281_v13  ;;  %v12138_v13 = vld [vmem:[#allocation10 + $0x4a0] ss:$12 sps:$4 sm:$0xff]  }
 0x498   :  { %v9714_v18 = vpop.f32.mrb[212].mxu1 }
 0x499   :  { %v9715_v34 = vpop.f32.mrb[213].mxu1 }
 0x49a   :  { %v14022_v30 = vadd.f32 %v9715_v34, %v9714_v18  ;;  %v9717_v20 = vpop.f32.mrb[214].mxu1  ;;  %v12141_v18 = vld [vmem:[#allocation10 + $0x4b4] ss:$12 sps:$4 sm:$0xff]   ;;  %v12145_v34 = vld [vmem:[#allocation10 + $0x578] ss:$12 sps:$4 sm:$0xff]  }
 0x49b   :  { %v9718_v55 = vpop.f32.mrb[215].mxu1 }
 0x49c   :  { %v14024_v25 = vadd.f32 %v9718_v55, %v9717_v20 }
 0x49d   :  { %7272 = vmatmul.mubr.bf16.vlgmr.msra.gmra.mrb[192].mxu0 %v13277_v22  ;;  %8366 = vmatmul.mubr.bf16.vlgmr.msra.gmra.mrb[64].mxu1 %v13277_v22  ;;  %v12139_v22 = vld [vmem:[#allocation10 + $0x4b0] ss:$12 sps:$4 sm:$0xff]  }
 0x49e   :  { %7281 = vmatprep.mubr.bf16.mxu0 %v13301_v17  ;;  %8373 = vmatprep.mubr.bf16.mxu1 %v13301_v17  ;;  %v12144_v17 = vld [vmem:[#allocation10 + $0x4cc] ss:$12 sps:$4 sm:$0xff]  }
 0x49f   :  { %10005 = vmatpush3.bf16.msra.mxu1 %v12130_v16  ;;  %7433 = vmatpush1.bf16.msra.mxu0 %v12131_v37  ;;  %v12153_v16 = vld [vmem:[#allocation10 + $0x590] ss:$12 sps:$4 sm:$0xff]   ;;  %v12142_v37 = vld [vmem:[#allocation10 + $0x4c8] ss:$12 sps:$4 sm:$0xff]  }
 0x4a0   :  { %v9720_v10 = vpop.f32.mrb[216].mxu1  ;;  %7434 = vmatprep.subr.bf16.mxu0 %v12136_v51  ;;  %10006 = vmatprep.subr.bf16.mxu1 %v12137_v39  ;;  %v12154_v51 = vld [vmem:[#allocation10 + $0x4d0] ss:$12 sps:$4 sm:$0xff]  }
 0x4a1   :  { %v9721_v20 = vpop.f32.mrb[217].mxu1 }
 0x4a2   :  { %v14030_v55 = vadd.f32 %v9721_v20, %v9720_v10  ;;  %v9723_v31 = vpop.f32.mrb[218].mxu1 }
 0x4a3   :  { %v9724_v47 = vpop.f32.mrb[219].mxu1  ;;  %7435 = vmatpush1.bf16.msra.mxu0 %v12134_v48  ;;  %10007 = vmatpush3.bf16.msra.mxu1 %v12138_v13 }
 0x4a4   :  { %v14032_v58 = vadd.f32 %v9724_v47, %v9723_v31  ;;  %7436 = vmatprep.subr.bf16.mxu0 %v12141_v18  ;;  %10008 = vmatprep.subr.bf16.mxu1 %v12145_v34  ;;  %v12149_v31 = vld [vmem:[#allocation10 + $0x4e4] ss:$12 sps:$4 sm:$0xff]   ;;  %v12161_v47 = vld [vmem:[#allocation10 + $0x5a8] ss:$12 sps:$4 sm:$0xff]  }
 0x4a5   :  { %7282 = vmatmul.mubr.bf16.gmra.mrb[196].mxu0 %v13297_v8  ;;  %8374 = vmatmul.mubr.bf16.gmra.mrb[68].mxu1 %v13297_v8  ;;  %v12147_v8 = vld [vmem:[#allocation10 + $0x4e0] ss:$12 sps:$4 sm:$0xff]   ;;  %v12162_v34 = vld [vmem:[#allocation10 + $0x4e8] ss:$12 sps:$4 sm:$0xff]  }
 0x4a6   :  { %7291 = vmatprep.mubr.bf16.mxu0 %v13321_v59  ;;  %8381 = vmatprep.mubr.bf16.mxu1 %v13321_v59  ;;  %v12152_v59 = vld [vmem:[#allocation10 + $0x4fc] ss:$12 sps:$4 sm:$0xff]  }
 0x4a7   :  { %7437 = vmatpush1.bf16.msra.mxu0 %v12139_v22  ;;  %10009 = vmatpush3.bf16.msra.mxu1 %v12146_v46  ;;  %v12169_v46 = vld [vmem:[#allocation10 + $0x5c0] ss:$12 sps:$4 sm:$0xff]   ;;  %v12150_v22 = vld [vmem:[#allocation10 + $0x4f8] ss:$12 sps:$4 sm:$0xff]  }
 0x4a8   :  { %v9726_v39 = vpop.f32.mrb[220].mxu1  ;;  %7438 = vmatprep.subr.bf16.mxu0 %v12144_v17  ;;  %10010 = vmatprep.subr.bf16.mxu1 %v12153_v16  ;;  %v12170_v17 = vld [vmem:[#allocation10 + $0x500] ss:$12 sps:$4 sm:$0xff]  }
 0x4a9   :  { %v9727_v48 = vpop.f32.mrb[221].mxu1 }
 0x4aa   :  { %v14038_v13 = vadd.f32 %v9727_v48, %v9726_v39  ;;  %v9729_v10 = vpop.f32.mrb[222].mxu1 }
 0x4ab   :  { %v9730_v18 = vpop.f32.mrb[223].mxu1  ;;  %7439 = vmatpush1.bf16.msra.mxu0 %v12142_v37  ;;  %10011 = vmatpush3.bf16.msra.mxu1 %v12154_v51  ;;  %v12157_v37 = vld [vmem:[#allocation10 + $0x514] ss:$12 sps:$4 sm:$0xff]   ;;  %v12177_v51 = vld [vmem:[#allocation10 + $0x5d8] ss:$12 sps:$4 sm:$0xff]  }
 0x4ac   :  { %v14040_v20 = vadd.f32 %v9730_v18, %v9729_v10  ;;  %7440 = vmatprep.subr.bf16.mxu0 %v12149_v31  ;;  %10012 = vmatprep.subr.bf16.mxu1 %v12161_v47  ;;  %v12178_v10 = vld [vmem:[#allocation10 + $0x518] ss:$12 sps:$4 sm:$0xff]  }
 0x4ad   :  { %7292 = vmatmul.mubr.bf16.gmra.mrb[200].mxu0 %v13317_v40  ;;  %8382 = vmatmul.mubr.bf16.gmra.mrb[72].mxu1 %v13317_v40  ;;  %v12155_v40 = vld [vmem:[#allocation10 + $0x510] ss:$12 sps:$4 sm:$0xff]  }
 0x4ae   :  { %7301 = vmatprep.mubr.bf16.mxu0 %v13341_v24  ;;  %8389 = vmatprep.mubr.bf16.mxu1 %v13341_v24  ;;  %v12160_v24 = vld [vmem:[#allocation10 + $0x52c] ss:$12 sps:$4 sm:$0xff]  }
 0x4af   :  { %7441 = vmatpush1.bf16.msra.mxu0 %v12147_v8  ;;  %10013 = vmatpush3.bf16.msra.mxu1 %v12162_v34  ;;  %v12185_v8 = vld [vmem:[#allocation10 + $0x5f0] ss:$12 sps:$4 sm:$0xff]   ;;  %v12158_v34 = vld [vmem:[#allocation10 + $0x528] ss:$12 sps:$4 sm:$0xff]  }
 0x4b0   :  { %v9732_v16 = vpop.f32.mrb[224].mxu1  ;;  %7442 = vmatprep.subr.bf16.mxu0 %v12152_v59  ;;  %10014 = vmatprep.subr.bf16.mxu1 %v12169_v46  ;;  %v12186_v59 = vld [vmem:[#allocation10 + $0x530] ss:$12 sps:$4 sm:$0xff]  }
 0x4b1   :  { %v9733_v39 = vpop.f32.mrb[225].mxu1 }
 0x4b2   :  { %v14046_v31 = vadd.f32 %v9733_v39, %v9732_v16  ;;  %v9735_v47 = vpop.f32.mrb[226].mxu1 }
 0x4b3   :  { %v9736_v48 = vpop.f32.mrb[227].mxu1  ;;  %7443 = vmatpush1.bf16.msra.mxu0 %v12150_v22  ;;  %10015 = vmatpush3.bf16.msra.mxu1 %v12170_v17  ;;  %v12165_v22 = vld [vmem:[#allocation10 + $0x544] ss:$12 sps:$4 sm:$0xff]   ;;  %v12193_v17 = vld [vmem:[#allocation10 + $0x6c8] ss:$12 sps:$4 sm:$0xff]  }
 0x4b4   :  { %v14048_v18 = vadd.f32 %v9736_v48, %v9735_v47  ;;  %7444 = vmatprep.subr.bf16.mxu0 %v12157_v37  ;;  %10016 = vmatprep.subr.bf16.mxu1 %v12177_v51  ;;  %v15283_v48 = vld [vmem:[#allocation25_spill] sm:$0xff] }
 0x4b5   :  { %7302 = vmatmul.mubr.bf16.gmra.mrb[204].mxu0 %v13337_v62  ;;  %8390 = vmatmul.mubr.bf16.gmra.mrb[76].mxu1 %v13337_v62  ;;  %v12163_v62 = vld [vmem:[#allocation10 + $0x540] ss:$12 sps:$4 sm:$0xff]  }
 0x4b6   :  { %7311 = vmatprep.mubr.bf16.mxu0 %v13361_v54  ;;  %8397 = vmatprep.mubr.bf16.mxu1 %v13361_v54  ;;  %v12168_v54 = vld [vmem:[#allocation10 + $0x55c] ss:$12 sps:$4 sm:$0xff]  }
 0x4b7   :  { %7445 = vmatpush1.bf16.msra.mxu0 %v12155_v40  ;;  %10017 = vmatpush3.bf16.msra.mxu1 %v12178_v10  ;;  %v12166_v40 = vld [vmem:[#allocation10 + $0x558] ss:$12 sps:$4 sm:$0xff]  }
 0x4b8   :  { %v9738_v46 = vpop.f32.mrb[228].mxu1  ;;  %7446 = vmatprep.subr.bf16.mxu0 %v12160_v24  ;;  %10018 = vmatprep.subr.bf16.mxu1 %v12185_v8  ;;  %v12173_v24 = vld [vmem:[#allocation10 + $0x574] ss:$12 sps:$4 sm:$0xff]  }
 0x4b9   :  { %v9739_v16 = vpop.f32.mrb[229].mxu1 }
 0x4ba   :  { %v14054_v37 = vadd.f32 %v9739_v16, %v9738_v46  ;;  %v9741_v51 = vpop.f32.mrb[230].mxu1  ;;  %v12176_v16 = vld [vmem:[#allocation10 + $0x58c] ss:$12 sps:$4 sm:$0xff]  }
 0x4bb   :  { %v9742_v39 = vpop.f32.mrb[231].mxu1  ;;  %7447 = vmatpush1.bf16.msra.mxu0 %v12158_v34  ;;  %10019 = vmatpush3.bf16.msra.mxu1 %v12186_v59 }
 0x4bc   :  { %v14056_v47 = vadd.f32 %v9742_v39, %v9741_v51  ;;  %7448 = vmatprep.subr.bf16.mxu0 %v12165_v22  ;;  %10116 = vmatprep.subr.bf16.mxu1 %v12193_v17  ;;  %v12171_v22 = vld [vmem:[#allocation10 + $0x570] ss:$12 sps:$4 sm:$0xff]   ;;  %v12174_v51 = vld [vmem:[#allocation10 + $0x588] ss:$12 sps:$4 sm:$0xff]  }
 0x4bd   :  { %7312 = vmatmul.mubr.bf16.gmra.mrb[208].mxu0 %v15283_v48  ;;  %8398 = vmatmul.mubr.bf16.gmra.mrb[80].mxu1 %v15283_v48 }
 0x4be   :  { %7321 = vmatprep.mubr.bf16.mxu0 %v13381_v6  ;;  %8405 = vmatprep.mubr.bf16.mxu1 %v13381_v6  ;;  %v15284_v6 = vld [vmem:[#allocation91_spill] sm:$0xff] }
 0x4bf   :  { %7449 = vmatpush1.bf16.msra.mxu0 %v12163_v62  ;;  %v12181_v62 = vld [vmem:[#allocation10 + $0x5a4] ss:$12 sps:$4 sm:$0xff]  }
 0x4c0   :  { %v9744_v10 = vpop.f32.mrb[232].mxu1  ;;  %7450 = vmatprep.subr.bf16.mxu0 %v12168_v54 }
 0x4c1   :  { %v9745_v8 = vpop.f32.mrb[233].mxu1 }
 0x4c2   :  { %v14062_v34 = vadd.f32 %v9745_v8, %v9744_v10  ;;  %v9747_v59 = vpop.f32.mrb[234].mxu1 }
 0x4c3   :  { %v9748_v46 = vpop.f32.mrb[235].mxu1  ;;  %7451 = vmatpush1.bf16.msra.mxu0 %v12166_v40 }
 0x4c4   :  { %v14064_v17 = vadd.f32 %v9748_v46, %v9747_v59  ;;  %7452 = vmatprep.subr.bf16.mxu0 %v12173_v24  ;;  %v12179_v24 = vld [vmem:[#allocation10 + $0x5a0] ss:$12 sps:$4 sm:$0xff]   ;;  %v15285_v59 = vld [vmem:[#allocation30_spill] sm:$0xff] }
 0x4c5   :  { %7322 = vmatmul.mubr.bf16.gmra.mrb[212].mxu0 %v13375_v2  ;;  %8406 = vmatmul.mubr.bf16.gmra.mrb[84].mxu1 %v13375_v2  ;;  %v12184_v2 = vld [vmem:[#allocation10 + $0x5bc] ss:$12 sps:$4 sm:$0xff]   ;;  %v12182_v46 = vld [vmem:[#allocation10 + $0x5b8] ss:$12 sps:$4 sm:$0xff]  }
 0x4c6   :  { %7331 = vmatprep.mubr.bf16.mxu0 %v15284_v6  ;;  %8413 = vmatprep.mubr.bf16.mxu1 %v15284_v6 }
 0x4c7   :  { %7453 = vmatpush1.bf16.msra.mxu0 %v12171_v22 }
 0x4c8   :  { %v9750_v39 = vpop.f32.mrb[236].mxu1  ;;  %7454 = vmatprep.subr.bf16.mxu0 %v12176_v16  ;;  %v12189_v16 = vld [vmem:[#allocation10 + $0x5d4] ss:$12 sps:$4 sm:$0xff]  }
 0x4c9   :  { %v9751_v54 = vpop.f32.mrb[237].mxu1 }
 0x4ca   :  { %v14070_v48 = vadd.f32 %v9751_v54, %v9750_v39  ;;  %v9753_v40 = vpop.f32.mrb[238].mxu1 }
 0x4cb   :  { %v9754_v10 = vpop.f32.mrb[239].mxu1  ;;  %7455 = vmatpush1.bf16.msra.mxu0 %v12174_v51 }
 0x4cc   :  { %v14072_v8 = vadd.f32 %v9754_v10, %v9753_v40  ;;  %7456 = vmatprep.subr.bf16.mxu0 %v12181_v62  ;;  %v12187_v62 = vld [vmem:[#allocation10 + $0x5d0] ss:$12 sps:$4 sm:$0xff]   ;;  %v12192_v10 = vld [vmem:[#allocation10 + $0x5ec] ss:$12 sps:$4 sm:$0xff]  }
 0x4cd   :  { %7332 = vmatmul.mubr.bf16.gmra.mrb[216].mxu0 %v15285_v59  ;;  %8414 = vmatmul.mubr.bf16.gmra.mrb[88].mxu1 %v15285_v59  ;;  %v15286_v59 = vld [vmem:[#allocation93_spill] sm:$0xff] }
 0x4ce   :  { %7341 = vmatprep.mubr.bf16.mxu0 %v13421_v57  ;;  %8421 = vmatprep.mubr.bf16.mxu1 %v13421_v57  ;;  %v12190_v57 = vld [vmem:[#allocation10 + $0x5e8] ss:$12 sps:$4 sm:$0xff]  }
 0x4cf   :  { %7457 = vmatpush1.bf16.msra.mxu0 %v12179_v24 }
 0x4d0   :  { %v9756_v22 = vpop.f32.mrb[240].mxu1  ;;  %7458 = vmatprep.subr.bf16.mxu0 %v12184_v2  ;;  %v12197_v2 = vld [vmem:[#allocation10 + $0x604] ss:$12 sps:$4 sm:$0xff]  }
 0x4d1   :  { %v9757_v6 = vpop.f32.mrb[241].mxu1 }
 0x4d2   :  { %v14078_v51 = vadd.f32 %v9757_v6, %v9756_v22  ;;  %v9759_v39 = vpop.f32.mrb[242].mxu1 }
 0x4d3   :  { %v9760_v54 = vpop.f32.mrb[243].mxu1  ;;  %7459 = vmatpush1.bf16.msra.mxu0 %v12182_v46 }
 0x4d4   :  { %v14080_v40 = vadd.f32 %v9760_v54, %v9759_v39  ;;  %7460 = vmatprep.subr.bf16.mxu0 %v12189_v16 }
 0x4d5   :  { %7342 = vmatmul.mubr.bf16.gmra.mrb[220].mxu0 %v15286_v59  ;;  %8422 = vmatmul.mubr.bf16.gmra.mrb[92].mxu1 %v15286_v59 }
 0x4d6   :  { %7351 = vmatprep.mubr.bf16.mxu0 %v13441_v61  ;;  %8429 = vmatprep.mubr.bf16.mxu1 %v13441_v61 }
 0x4d7   :  { %7461 = vmatpush1.bf16.msra.mxu0 %v12187_v62 }
 0x4d8   :  { %v9762_v24 = vpop.f32.mrb[244].mxu1  ;;  %7462 = vmatprep.subr.bf16.mxu0 %v12192_v10 }
 0x4d9   :  { %v9763_v22 = vpop.f32.mrb[245].mxu1 }
 0x4da   :  { %v14086_v46 = vadd.f32 %v9763_v22, %v9762_v24  ;;  %v9765_v6 = vpop.f32.mrb[246].mxu1  ;;  %v5300_v22 = vld [vmem:[#allocation12] sm:$0x7] }
 0x4db   :  { %v9766_v39 = vpop.f32.mrb[247].mxu1  ;;  %7463 = vmatpush1.bf16.msra.mxu0 %v12190_v57 }
 0x4dc   :  { %v14088_v16 = vadd.f32 %v9766_v39, %v9765_v6  ;;  %7625 = vmatprep.subr.bf16.mxu0 %v12197_v2 }
 0x4dd   :  { %7352 = vmatmul.mubr.bf16.gmra.mrb[224].mxu0 %v13437_v44  ;;  %8430 = vmatmul.mubr.bf16.gmra.mrb[96].mxu1 %v13437_v44 }
 0x4de   :  { %7361 = vmatprep.mubr.bf16.mxu0 %v13461_v56  ;;  %8437 = vmatprep.mubr.bf16.mxu1 %v13461_v56 }
 0x4e0   :  { %v9768_v61 = vpop.f32.mrb[248].mxu1 }
 0x4e1   :  { %v9769_v54 = vpop.f32.mrb[249].mxu1 }
 0x4e2   :  { %v14094_v62 = vadd.f32 %v9769_v54, %v9768_v61  ;;  %v9771_v10 = vpop.f32.mrb[250].mxu1  ;;  %v15287_v61 = vld [vmem:[#allocation100_spill] sm:$0xff]  ;;  %v14109_v54 = vrot.slane %v5300_v22, %v15192_v52  ;;  %v15288_v52 = vld [vmem:[#allocation103_spill] sm:$0xff] }
 0x4e3   :  { %v9772_v59 = vpop.f32.mrb[251].mxu1 }
 0x4e4   :  { %v14096_v24 = vadd.f32 %v9772_v59, %v9771_v10  ;;  %v8046_v10 = vadd.f32 %v13982_v41, %v14109_v54 }
 0x4e5   :  { %7362 = vmatmul.mubr.bf16.gmra.mrb[228].mxu0 %v13457_v53  ;;  %8438 = vmatmul.mubr.bf16.gmra.mrb[100].mxu1 %v13457_v53 }
 0x4e6   :  { %7371 = vmatprep.mubr.bf16.mxu0 %v13481_v0  ;;  %8445 = vmatprep.mubr.bf16.mxu1 %v13481_v0 }
 0x4e8   :  { %v9774_v44 = vpop.f32.mrb[252].mxu1 }
 0x4e9   :  { %v9775_v57 = vpop.f32.mrb[253].mxu1 }
 0x4ea   :  { %v14102_v2 = vadd.f32 %v9775_v57, %v9774_v44  ;;  %v9777_v56 = vpop.f32.mrb[254].mxu1 }
 0x4eb   :  { %v9778_v6 = vpop.f32.mrb[255].mxu1 }
 0x4ec   :  { %v14104_v39 = vadd.f32 %v9778_v6, %v9777_v56  ;;  %v8049_v56 = vadd.f32 %v13984_v33, %v14109_v54 }
 0x4ed   :  { %7372 = vmatmul.mubr.bf16.gmra.mrb[232].mxu0 %v15287_v61  ;;  %8446 = vmatmul.mubr.bf16.gmra.mrb[104].mxu1 %v15287_v61 }
 0x4ee   :  { %7381 = vmatprep.mubr.bf16.mxu0 %v13501_v3  ;;  %8453 = vmatprep.mubr.bf16.mxu1 %v13501_v3 }
 0x4f0   :  { %v9796_v53 = vpop.f32.mrb[0].mxu1 }
 0x4f1   :  { %v9797_v0 = vpop.f32.mrb[1].mxu1 }
 0x4f2   :  { %v9798_v59 = vadd.f32 %v9797_v0, %v9796_v53  ;;  %v9799_v44 = vpop.f32.mrb[2].mxu1  ;;  %v8054_v53 = vadd.f32 %v13990_v4, %v14109_v54 }
 0x4f3   :  { %v9800_v57 = vpop.f32.mrb[3].mxu1 }
 0x4f4   :  { %v9801_v6 = vadd.f32 %v9800_v57, %v9799_v44  ;;  %v14117_v61 = vadd.f32 %v9798_v59, %v8046_v10  ;;  %v8057_v10 = vadd.f32 %v13992_v19, %v14109_v54 }
 0x4f5   :  { %7382 = vmatmul.mubr.bf16.gmra.mrb[236].mxu0 %v15288_v52  ;;  %8454 = vmatmul.mubr.bf16.gmra.mrb[108].mxu1 %v15288_v52 }
 0x4f6   :  { %7391 = vmatprep.mubr.bf16.mxu0 %v13521_v21  ;;  %8461 = vmatprep.mubr.bf16.mxu1 %v13521_v21  ;;  %v14123_v3 = vadd.f32 %v9801_v6, %v8049_v56  ;;  %v8062_v6 = vadd.f32 %v13998_v36, %v14109_v54 }
 0x4f8   :  { %v9802_v41 = vpop.f32.mrb[4].mxu1 }
 0x4f9   :  { %v9803_v22 = vpop.f32.mrb[5].mxu1 }
 0x4fa   :  { %v9804_v0 = vadd.f32 %v9803_v22, %v9802_v41  ;;  %v9805_v33 = vpop.f32.mrb[6].mxu1  ;;  %v8065_v22 = vadd.f32 %v14000_v43, %v14109_v54 }
 0x4fb   :  { %v9806_v44 = vpop.f32.mrb[7].mxu1 }
 0x4fc   :  { %v9807_v59 = vadd.f32 %v9806_v44, %v9805_v33  ;;  %v14129_v57 = vadd.f32 %v9804_v0, %v8054_v53  ;;  %v8070_v33 = vadd.f32 %v14006_v32, %v14109_v54 }
 0x4fd   :  { %7392 = vmatmul.mubr.bf16.gmra.mrb[240].mxu0 %v13517_v15  ;;  %8462 = vmatmul.mubr.bf16.gmra.mrb[112].mxu1 %v13517_v15 }
 0x4fe   :  { %7401 = vmatprep.mubr.bf16.mxu0 %v13541_v5  ;;  %8469 = vmatprep.mubr.bf16.mxu1 %v13541_v5  ;;  %v14135_v21 = vadd.f32 %v9807_v59, %v8057_v10  ;;  %v8073_v59 = vadd.f32 %v14008_v7, %v14109_v54 }
 0x500   :  { %v9808_v4 = vpop.f32.mrb[8].mxu1 }
 0x501   :  { %v9809_v56 = vpop.f32.mrb[9].mxu1 }
 0x502   :  { %v9810_v52 = vadd.f32 %v9809_v56, %v9808_v4  ;;  %v9811_v19 = vpop.f32.mrb[10].mxu1 }
 0x503   :  { %v9812_v41 = vpop.f32.mrb[11].mxu1 }
 0x504   :  { %v9813_v53 = vadd.f32 %v9812_v41, %v9811_v19  ;;  %v14141_v0 = vadd.f32 %v9810_v52, %v8062_v6  ;;  %v8078_v6 = vadd.f32 %v14014_v11, %v14109_v54  ;;  %v8081_v41 = vadd.f32 %v14016_v63, %v14109_v54 }
 0x505   :  { %7402 = vmatmul.mubr.bf16.gmra.mrb[244].mxu0 %v13537_v42  ;;  %8470 = vmatmul.mubr.bf16.gmra.mrb[116].mxu1 %v13537_v42 }
 0x506   :  { %7411 = vmatprep.mubr.bf16.mxu0 %v13561_v35  ;;  %8477 = vmatprep.mubr.bf16.mxu1 %v13561_v35  ;;  %v14147_v15 = vadd.f32 %v9813_v53, %v8065_v22 }
 0x508   :  { %v9814_v5 = vpop.f32.mrb[12].mxu1 }
 0x509   :  { %v9815_v36 = vpop.f32.mrb[13].mxu1 }
 0x50a   :  { %v9816_v44 = vadd.f32 %v9815_v36, %v9814_v5  ;;  %v9817_v43 = vpop.f32.mrb[14].mxu1  ;;  %v8086_v36 = vadd.f32 %v14022_v30, %v14109_v54 }
 0x50b   :  { %v9818_v10 = vpop.f32.mrb[15].mxu1 }
 0x50c   :  { %v9819_v4 = vadd.f32 %v9818_v10, %v9817_v43  ;;  %v14153_v56 = vadd.f32 %v9816_v44, %v8070_v33  ;;  %v12194_v43 = vld [vmem:[#allocation10 + $0x608] ss:$12 sps:$4 sm:$0xff]   ;;  %v12195_v10 = vld [vmem:[#allocation10 + $0x600] ss:$12 sps:$4 sm:$0xff]  }
 0x50d   :  { %7412 = vmatmul.mubr.bf16.gmra.mrb[248].mxu0 %v13557_v60  ;;  %8478 = vmatmul.mubr.bf16.gmra.mrb[120].mxu1 %v13557_v60  ;;  %v15289_v60 = vld [vmem:[#allocation19_spill] sm:$0xff] }
 0x50e   :  { %7421 = vmatprep.mubr.bf16.mxu0 %v13581_v12  ;;  %8485 = vmatprep.mubr.bf16.mxu1 %v13581_v12  ;;  %v14159_v42 = vadd.f32 %v9819_v4, %v8073_v59  ;;  %v8089_v59 = vadd.f32 %v14024_v25, %v14109_v54  ;;  %v12200_v4 = vld [vmem:[#allocation10 + $0x61c] ss:$12 sps:$4 sm:$0xff]  }
 0x510   :  { %v9820_v35 = vpop.f32.mrb[16].mxu1 }
 0x511   :  { %v9821_v32 = vpop.f32.mrb[17].mxu1 }
 0x512   :  { %v9822_v52 = vadd.f32 %v9821_v32, %v9820_v35  ;;  %v9823_v7 = vpop.f32.mrb[18].mxu1  ;;  %v12201_v35 = vld [vmem:[#allocation10 + $0x6e0] ss:$12 sps:$4 sm:$0xff]  }
 0x513   :  { %v9824_v19 = vpop.f32.mrb[19].mxu1 }
 0x514   :  { %v9825_v22 = vadd.f32 %v9824_v19, %v9823_v7  ;;  %v14165_v53 = vadd.f32 %v9822_v52, %v8078_v6  ;;  %v15290_v6 = vld [vmem:[#allocation18_spill] sm:$0xff]  ;;  %v15291_v52 = vld [vmem:[#allocation21_spill] sm:$0xff] }
 0x515   :  { %7422 = vmatmul.mubr.bf16.gmra.mrb[252].mxu0 %v13577_v28  ;;  %8486 = vmatmul.mubr.bf16.gmra.mrb[124].mxu1 %v13577_v28  ;;  %v12198_v7 = vld [vmem:[#allocation10 + $0x618] ss:$12 sps:$4 sm:$0xff]   ;;  %v12202_v19 = vld [vmem:[#allocation10 + $0x620] ss:$12 sps:$4 sm:$0xff]  }
 0x516   :  { %7464 = vmatprep.mubr.bf16.mxu0 %v15289_v60  ;;  %8526 = vmatprep.mubr.bf16.mxu1 %v15289_v60  ;;  %v14171_v12 = vadd.f32 %v9825_v22, %v8081_v41  ;;  %v12205_v41 = vld [vmem:[#allocation10 + $0x634] ss:$12 sps:$4 sm:$0xff]   ;;  %v12209_v22 = vld [vmem:[#allocation10 + $0x6f8] ss:$12 sps:$4 sm:$0xff]  }
 0x518   :  { %v9826_v11 = vpop.f32.mrb[20].mxu1 }
 0x519   :  { %v9827_v5 = vpop.f32.mrb[21].mxu1 }
 0x51a   :  { %v9828_v33 = vadd.f32 %v9827_v5, %v9826_v11  ;;  %v9829_v63 = vpop.f32.mrb[22].mxu1  ;;  %v8094_v11 = vadd.f32 %v14030_v55, %v14109_v54  ;;  %v15293_v55 = vld [vmem:[#allocation31_spill] sm:$0xff] }
 0x51b   :  { %v9830_v44 = vpop.f32.mrb[23].mxu1 }
 0x51c   :  { %v9831_v28 = vadd.f32 %v9830_v44, %v9829_v63  ;;  %v14177_v32 = vadd.f32 %v9828_v33, %v8086_v36  ;;  %v12203_v63 = vld [vmem:[#allocation10 + $0x630] ss:$12 sps:$4 sm:$0xff]   ;;  %v12210_v44 = vld [vmem:[#allocation10 + $0x638] ss:$12 sps:$4 sm:$0xff]  }
 0x51d   :  { %7465 = vmatmul.mubr.bf16.vlgmr.msra.gmra.mrb[192].mxu0 %v15290_v6  ;;  %8527 = vmatmul.mubr.bf16.vlgmr.msra.gmra.mrb[128].mxu1 %v15290_v6 }
 0x51e   :  { %7474 = vmatprep.mubr.bf16.mxu0 %v15291_v52  ;;  %8534 = vmatprep.mubr.bf16.mxu1 %v15291_v52  ;;  %v14183_v30 = vadd.f32 %v9831_v28, %v8089_v59  ;;  %v12208_v59 = vld [vmem:[#allocation10 + $0x64c] ss:$12 sps:$4 sm:$0xff]   ;;  %v12217_v28 = vld [vmem:[#allocation10 + $0x710] ss:$12 sps:$4 sm:$0xff]   ;;  %v12206_v52 = vld [vmem:[#allocation10 + $0x648] ss:$12 sps:$4 sm:$0xff]  }
 0x51f   :  { %10117 = vmatpush3.bf16.msra.mxu1 %v12194_v43  ;;  %7626 = vmatpush1.bf16.msra.mxu0 %v12195_v10  ;;  %v8097_v43 = vadd.f32 %v14032_v58, %v14109_v54  ;;  %v12218_v58 = vld [vmem:[#allocation10 + $0x650] ss:$12 sps:$4 sm:$0xff]  }
 0x520   :  { %v9832_v25 = vpop.f32.mrb[24].mxu1  ;;  %7627 = vmatprep.subr.bf16.mxu0 %v12200_v4  ;;  %10118 = vmatprep.subr.bf16.mxu1 %v12201_v35  ;;  %v15292_v35 = vld [vmem:[#allocation20_spill] sm:$0xff] }
 0x521   :  { %v9833_v60 = vpop.f32.mrb[25].mxu1 }
 0x522   :  { %v9834_v5 = vadd.f32 %v9833_v60, %v9832_v25  ;;  %v9835_v36 = vpop.f32.mrb[26].mxu1  ;;  %v12225_v25 = vld [vmem:[#allocation10 + $0x728] ss:$12 sps:$4 sm:$0xff]  }
 0x523   :  { %v9836_v33 = vpop.f32.mrb[27].mxu1  ;;  %7628 = vmatpush1.bf16.msra.mxu0 %v12198_v7  ;;  %10119 = vmatpush3.bf16.msra.mxu1 %v12202_v19  ;;  %v12213_v19 = vld [vmem:[#allocation10 + $0x664] ss:$12 sps:$4 sm:$0xff]  }
 0x524   :  { %v9837_v10 = vadd.f32 %v9836_v33, %v9835_v36  ;;  %7629 = vmatprep.subr.bf16.mxu0 %v12205_v41  ;;  %10120 = vmatprep.subr.bf16.mxu1 %v12209_v22  ;;  %v14189_v4 = vadd.f32 %v9834_v5, %v8094_v11  ;;  %v8102_v22 = vadd.f32 %v14038_v13, %v14109_v54  ;;  %v12211_v36 = vld [vmem:[#allocation10 + $0x660] ss:$12 sps:$4 sm:$0xff]   ;;  %v12226_v33 = vld [vmem:[#allocation10 + $0x668] ss:$12 sps:$4 sm:$0xff]  }
 0x525   :  { %7475 = vmatmul.mubr.bf16.gmra.mrb[196].mxu0 %v15292_v35  ;;  %8535 = vmatmul.mubr.bf16.gmra.mrb[132].mxu1 %v15292_v35  ;;  %v15295_v13 = vld [vmem:[#allocation24_spill] sm:$0xff] }
 0x526   :  { %7484 = vmatprep.mubr.bf16.mxu0 %v15293_v55  ;;  %8542 = vmatprep.mubr.bf16.mxu1 %v15293_v55  ;;  %v14195_v6 = vadd.f32 %v9837_v10, %v8097_v43  ;;  %v12216_v43 = vld [vmem:[#allocation10 + $0x67c] ss:$12 sps:$4 sm:$0xff]   ;;  %v12233_v10 = vld [vmem:[#allocation10 + $0x740] ss:$12 sps:$4 sm:$0xff]   ;;  %v12214_v55 = vld [vmem:[#allocation10 + $0x678] ss:$12 sps:$4 sm:$0xff]  }
 0x527   :  { %7630 = vmatpush1.bf16.msra.mxu0 %v12203_v63  ;;  %10121 = vmatpush3.bf16.msra.mxu1 %v12210_v44  ;;  %v8105_v63 = vadd.f32 %v14040_v20, %v14109_v54  ;;  %v12234_v20 = vld [vmem:[#allocation10 + $0x680] ss:$12 sps:$4 sm:$0xff]  }
 0x528   :  { %v9838_v7 = vpop.f32.mrb[28].mxu1  ;;  %7631 = vmatprep.subr.bf16.mxu0 %v12208_v59  ;;  %10122 = vmatprep.subr.bf16.mxu1 %v12217_v28  ;;  %v15294_v28 = vld [vmem:[#allocation22_spill] sm:$0xff] }
 0x529   :  { %v9839_v41 = vpop.f32.mrb[29].mxu1 }
 0x52a   :  { %v9840_v60 = vadd.f32 %v9839_v41, %v9838_v7  ;;  %v9841_v11 = vpop.f32.mrb[30].mxu1  ;;  %v12241_v7 = vld [vmem:[#allocation10 + $0x758] ss:$12 sps:$4 sm:$0xff]  }
 0x52b   :  { %v9842_v5 = vpop.f32.mrb[31].mxu1  ;;  %7632 = vmatpush1.bf16.msra.mxu0 %v12206_v52  ;;  %10123 = vmatpush3.bf16.msra.mxu1 %v12218_v58  ;;  %v12221_v58 = vld [vmem:[#allocation10 + $0x694] ss:$12 sps:$4 sm:$0xff]  }
 0x52c   :  { %v9843_v44 = vadd.f32 %v9842_v5, %v9841_v11  ;;  %7633 = vmatprep.subr.bf16.mxu0 %v12213_v19  ;;  %10124 = vmatprep.subr.bf16.mxu1 %v12225_v25  ;;  %v14201_v59 = vadd.f32 %v9840_v60, %v8102_v22  ;;  %v8110_v25 = vadd.f32 %v14046_v31, %v14109_v54  ;;  %v12219_v11 = vld [vmem:[#allocation10 + $0x690] ss:$12 sps:$4 sm:$0xff]   ;;  %v12242_v5 = vld [vmem:[#allocation10 + $0x698] ss:$12 sps:$4 sm:$0xff]  }
 0x52d   :  { %7485 = vmatmul.mubr.bf16.gmra.mrb[200].mxu0 %v15294_v28  ;;  %8543 = vmatmul.mubr.bf16.gmra.mrb[136].mxu1 %v15294_v28  ;;  %v15297_v31 = vld [vmem:[#allocation27_spill] sm:$0xff] }
 0x52e   :  { %7494 = vmatprep.mubr.bf16.mxu0 %v15295_v13  ;;  %8550 = vmatprep.mubr.bf16.mxu1 %v15295_v13  ;;  %v14207_v35 = vadd.f32 %v9843_v44, %v8105_v63  ;;  %v12224_v63 = vld [vmem:[#allocation10 + $0x6ac] ss:$12 sps:$4 sm:$0xff]   ;;  %v12249_v44 = vld [vmem:[#allocation10 + $0x770] ss:$12 sps:$4 sm:$0xff]   ;;  %v12222_v13 = vld [vmem:[#allocation10 + $0x6a8] ss:$12 sps:$4 sm:$0xff]  }
 0x52f   :  { %7634 = vmatpush1.bf16.msra.mxu0 %v12211_v36  ;;  %10125 = vmatpush3.bf16.msra.mxu1 %v12226_v33  ;;  %v8113_v36 = vadd.f32 %v14048_v18, %v14109_v54  ;;  %v12250_v18 = vld [vmem:[#allocation10 + $0x6b0] ss:$12 sps:$4 sm:$0xff]  }
 0x530   :  { %v9844_v52 = vpop.f32.mrb[32].mxu1  ;;  %7635 = vmatprep.subr.bf16.mxu0 %v12216_v43  ;;  %10126 = vmatprep.subr.bf16.mxu1 %v12233_v10  ;;  %v15296_v10 = vld [vmem:[#allocation23_spill] sm:$0xff] }
 0x531   :  { %v9845_v19 = vpop.f32.mrb[33].mxu1 }
 0x532   :  { %v9846_v41 = vadd.f32 %v9845_v19, %v9844_v52  ;;  %v9847_v22 = vpop.f32.mrb[34].mxu1  ;;  %v12257_v52 = vld [vmem:[#allocation10 + $0x848] ss:$12 sps:$4 sm:$0xff]  }
 0x533   :  { %v9848_v60 = vpop.f32.mrb[35].mxu1  ;;  %7636 = vmatpush1.bf16.msra.mxu0 %v12214_v55  ;;  %10127 = vmatpush3.bf16.msra.mxu1 %v12234_v20  ;;  %v12229_v20 = vld [vmem:[#allocation10 + $0x6c4] ss:$12 sps:$4 sm:$0xff]  }
 0x534   :  { %v9849_v33 = vadd.f32 %v9848_v60, %v9847_v22  ;;  %7637 = vmatprep.subr.bf16.mxu0 %v12221_v58  ;;  %10128 = vmatprep.subr.bf16.mxu1 %v12241_v7  ;;  %v14213_v43 = vadd.f32 %v9846_v41, %v8110_v25  ;;  %v8118_v7 = vadd.f32 %v14054_v37, %v14109_v54  ;;  %v12227_v22 = vld [vmem:[#allocation10 + $0x6c0] ss:$12 sps:$4 sm:$0xff]  }
 0x535   :  { %7495 = vmatmul.mubr.bf16.gmra.mrb[204].mxu0 %v15296_v10  ;;  %8551 = vmatmul.mubr.bf16.gmra.mrb[140].mxu1 %v15296_v10  ;;  %v8121_v60 = vadd.f32 %v14056_v47, %v14109_v54  ;;  %v15299_v37 = vld [vmem:[#allocation29_spill] sm:$0xff] }
 0x536   :  { %7504 = vmatprep.mubr.bf16.mxu0 %v15297_v31  ;;  %8558 = vmatprep.mubr.bf16.mxu1 %v15297_v31  ;;  %v14219_v28 = vadd.f32 %v9849_v33, %v8113_v36  ;;  %v15298_v33 = vld [vmem:[#allocation26_spill] sm:$0xff]  ;;  %v12237_v47 = vld [vmem:[#allocation10 + $0x6f4] ss:$12 sps:$4 sm:$0xff]  }
 0x537   :  { %7638 = vmatpush1.bf16.msra.mxu0 %v12219_v11  ;;  %10129 = vmatpush3.bf16.msra.mxu1 %v12242_v5  ;;  %v12232_v5 = vld [vmem:[#allocation10 + $0x6dc] ss:$12 sps:$4 sm:$0xff]  }
 0x538   :  { %v9850_v55 = vpop.f32.mrb[36].mxu1  ;;  %7639 = vmatprep.subr.bf16.mxu0 %v12224_v63  ;;  %10130 = vmatprep.subr.bf16.mxu1 %v12249_v44  ;;  %v12230_v44 = vld [vmem:[#allocation10 + $0x6d8] ss:$12 sps:$4 sm:$0xff]  }
 0x539   :  { %v9851_v58 = vpop.f32.mrb[37].mxu1 }
 0x53a   :  { %v9852_v19 = vadd.f32 %v9851_v58, %v9850_v55  ;;  %v9853_v25 = vpop.f32.mrb[38].mxu1  ;;  %v8129_v58 = vadd.f32 %v14064_v17, %v14109_v54  ;;  %v12245_v17 = vld [vmem:[#allocation10 + $0x724] ss:$12 sps:$4 sm:$0xff]  }
 0x53b   :  { %v9854_v41 = vpop.f32.mrb[39].mxu1  ;;  %7640 = vmatpush1.bf16.msra.mxu0 %v12222_v13  ;;  %10131 = vmatpush3.bf16.msra.mxu1 %v12250_v18  ;;  %v8126_v13 = vadd.f32 %v14062_v34, %v14109_v54 }
 0x53c   :  { %v9855_v11 = vadd.f32 %v9854_v41, %v9853_v25  ;;  %7641 = vmatprep.subr.bf16.mxu0 %v12229_v20  ;;  %10228 = vmatprep.subr.bf16.mxu1 %v12257_v52  ;;  %v14225_v36 = vadd.f32 %v9852_v19, %v8118_v7  ;;  %v12235_v52 = vld [vmem:[#allocation10 + $0x6f0] ss:$12 sps:$4 sm:$0xff]   ;;  %v12240_v19 = vld [vmem:[#allocation10 + $0x70c] ss:$12 sps:$4 sm:$0xff]  }
 0x53d   :  { %7505 = vmatmul.mubr.bf16.gmra.mrb[208].mxu0 %v15298_v33  ;;  %8559 = vmatmul.mubr.bf16.gmra.mrb[144].mxu1 %v15298_v33  ;;  %v15300_v41 = vld [vmem:[#allocation28_spill] sm:$0xff]  ;;  %v8134_v33 = vadd.f32 %v14070_v48, %v14109_v54 }
 0x53e   :  { %7514 = vmatprep.mubr.bf16.mxu0 %v15299_v37  ;;  %8566 = vmatprep.mubr.bf16.mxu1 %v15299_v37  ;;  %v14231_v63 = vadd.f32 %v9855_v11, %v8121_v60  ;;  %v12238_v60 = vld [vmem:[#allocation10 + $0x708] ss:$12 sps:$4 sm:$0xff]  }
 0x53f   :  { %7642 = vmatpush1.bf16.msra.mxu0 %v12227_v22  ;;  %v15301_v22 = vld [vmem:[#allocation92_spill] sm:$0xff] }
 0x540   :  { %v9856_v10 = vpop.f32.mrb[40].mxu1  ;;  %7643 = vmatprep.subr.bf16.mxu0 %v12232_v5 }
 0x541   :  { %v9857_v31 = vpop.f32.mrb[41].mxu1 }
 0x542   :  { %v9858_v18 = vadd.f32 %v9857_v31, %v9856_v10  ;;  %v9859_v55 = vpop.f32.mrb[42].mxu1  ;;  %v8137_v31 = vadd.f32 %v14072_v8, %v14109_v54  ;;  %v12253_v8 = vld [vmem:[#allocation10 + $0x754] ss:$12 sps:$4 sm:$0xff]  }
 0x543   :  { %v9860_v20 = vpop.f32.mrb[43].mxu1  ;;  %7644 = vmatpush1.bf16.msra.mxu0 %v12230_v44 }
 0x544   :  { %v9861_v7 = vadd.f32 %v9860_v20, %v9859_v55  ;;  %7645 = vmatprep.subr.bf16.mxu0 %v12237_v47  ;;  %v14237_v25 = vadd.f32 %v9858_v18, %v8126_v13  ;;  %v12243_v47 = vld [vmem:[#allocation10 + $0x720] ss:$12 sps:$4 sm:$0xff]   ;;  %v12248_v18 = vld [vmem:[#allocation10 + $0x73c] ss:$12 sps:$4 sm:$0xff]  }
 0x545   :  { %7515 = vmatmul.mubr.bf16.gmra.mrb[212].mxu0 %v15300_v41  ;;  %8567 = vmatmul.mubr.bf16.gmra.mrb[148].mxu1 %v15300_v41  ;;  %v15302_v20 = vld [vmem:[#allocation90_spill] sm:$0xff]  ;;  %v8142_v41 = vadd.f32 %v14078_v51, %v14109_v54 }
 0x546   :  { %7524 = vmatprep.mubr.bf16.mxu0 %v15301_v22  ;;  %8574 = vmatprep.mubr.bf16.mxu1 %v15301_v22  ;;  %v14243_v34 = vadd.f32 %v9861_v7, %v8129_v58  ;;  %v12246_v58 = vld [vmem:[#allocation10 + $0x738] ss:$12 sps:$4 sm:$0xff]  }
 0x547   :  { %7646 = vmatpush1.bf16.msra.mxu0 %v12235_v52  ;;  %v15303_v52 = vld [vmem:[#allocation95_spill] sm:$0xff] }
 0x548   :  { %v9862_v11 = vpop.f32.mrb[44].mxu1  ;;  %7647 = vmatprep.subr.bf16.mxu0 %v12240_v19 }
 0x549   :  { %v9863_v5 = vpop.f32.mrb[45].mxu1 }
 0x54a   :  { %v9864_v37 = vadd.f32 %v9863_v5, %v9862_v11  ;;  %v9865_v44 = vpop.f32.mrb[46].mxu1  ;;  %v8145_v5 = vadd.f32 %v14080_v40, %v14109_v54  ;;  %v12261_v40 = vld [vmem:[#allocation10 + $0x784] ss:$12 sps:$4 sm:$0xff]  }
 0x54b   :  { %v9866_v10 = vpop.f32.mrb[47].mxu1  ;;  %7648 = vmatpush1.bf16.msra.mxu0 %v12238_v60 }
 0x54c   :  { %v9867_v13 = vadd.f32 %v9866_v10, %v9865_v44  ;;  %7649 = vmatprep.subr.bf16.mxu0 %v12245_v17  ;;  %v14249_v55 = vadd.f32 %v9864_v37, %v8134_v33  ;;  %v12251_v17 = vld [vmem:[#allocation10 + $0x750] ss:$12 sps:$4 sm:$0xff]   ;;  %v12256_v37 = vld [vmem:[#allocation10 + $0x76c] ss:$12 sps:$4 sm:$0xff]   ;;  %v15304_v10 = vld [vmem:[#allocation94_spill] sm:$0xff] }
 0x54d   :  { %7525 = vmatmul.mubr.bf16.gmra.mrb[216].mxu0 %v15302_v20  ;;  %8575 = vmatmul.mubr.bf16.gmra.mrb[152].mxu1 %v15302_v20  ;;  %v8150_v20 = vadd.f32 %v14086_v46, %v14109_v54 }
 0x54e   :  { %7534 = vmatprep.mubr.bf16.mxu0 %v15303_v52  ;;  %8582 = vmatprep.mubr.bf16.mxu1 %v15303_v52  ;;  %v14255_v48 = vadd.f32 %v9867_v13, %v8137_v31  ;;  %v12254_v31 = vld [vmem:[#allocation10 + $0x768] ss:$12 sps:$4 sm:$0xff]  }
 0x54f   :  { %7650 = vmatpush1.bf16.msra.mxu0 %v12243_v47  ;;  %v15305_v47 = vld [vmem:[#allocation97_spill] sm:$0xff] }
 0x550   :  { %v9868_v7 = vpop.f32.mrb[48].mxu1  ;;  %7651 = vmatprep.subr.bf16.mxu0 %v12248_v18 }
 0x551   :  { %v9869_v19 = vpop.f32.mrb[49].mxu1 }
 0x552   :  { %v9870_v22 = vadd.f32 %v9869_v19, %v9868_v7  ;;  %v9871_v60 = vpop.f32.mrb[50].mxu1 }
 0x553   :  { %v9872_v11 = vpop.f32.mrb[51].mxu1  ;;  %7652 = vmatpush1.bf16.msra.mxu0 %v12246_v58 }
 0x554   :  { %v9873_v33 = vadd.f32 %v9872_v11, %v9871_v60  ;;  %7653 = vmatprep.subr.bf16.mxu0 %v12253_v8  ;;  %v14261_v44 = vadd.f32 %v9870_v22, %v8142_v41  ;;  %v8153_v8 = vadd.f32 %v14088_v16, %v14109_v54  ;;  %v15306_v22 = vld [vmem:[#allocation96_spill] sm:$0xff]  ;;  %v15307_v60 = vld [vmem:[#allocation99_spill] sm:$0xff] }
 0x555   :  { %7535 = vmatmul.mubr.bf16.gmra.mrb[220].mxu0 %v15304_v10  ;;  %8583 = vmatmul.mubr.bf16.gmra.mrb[156].mxu1 %v15304_v10  ;;  %v8161_v10 = vadd.f32 %v14096_v24, %v14109_v54 }
 0x556   :  { %7544 = vmatprep.mubr.bf16.mxu0 %v15305_v47  ;;  %8590 = vmatprep.mubr.bf16.mxu1 %v15305_v47  ;;  %v14267_v51 = vadd.f32 %v9873_v33, %v8145_v5  ;;  %v8158_v5 = vadd.f32 %v14094_v62, %v14109_v54 }
 0x557   :  { %7654 = vmatpush1.bf16.msra.mxu0 %v12251_v17 }
 0x558   :  { %v9874_v13 = vpop.f32.mrb[52].mxu1  ;;  %7655 = vmatprep.subr.bf16.mxu0 %v12256_v37 }
 0x559   :  { %v9875_v18 = vpop.f32.mrb[53].mxu1 }
 0x55a   :  { %v9876_v52 = vadd.f32 %v9875_v18, %v9874_v13  ;;  %v9877_v58 = vpop.f32.mrb[54].mxu1  ;;  %v15308_v13 = vld [vmem:[#allocation98_spill] sm:$0xff] }
 0x55b   :  { %v9878_v7 = vpop.f32.mrb[55].mxu1  ;;  %7656 = vmatpush1.bf16.msra.mxu0 %v12254_v31 }
 0x55c   :  { %v9879_v19 = vadd.f32 %v9878_v7, %v9877_v58  ;;  %7818 = vmatprep.subr.bf16.mxu0 %v12261_v40  ;;  %v14273_v41 = vadd.f32 %v9876_v52, %v8150_v20  ;;  %v15309_v40 = vld [vmem:[#allocation102_spill] sm:$0xff]  ;;  %v8166_v52 = vadd.f32 %v14102_v2, %v14109_v54 }
 0x55d   :  { %7545 = vmatmul.mubr.bf16.gmra.mrb[224].mxu0 %v15306_v22  ;;  %8591 = vmatmul.mubr.bf16.gmra.mrb[160].mxu1 %v15306_v22 }
 0x55e   :  { %7554 = vmatprep.mubr.bf16.mxu0 %v15307_v60  ;;  %8598 = vmatprep.mubr.bf16.mxu1 %v15307_v60  ;;  %v14279_v46 = vadd.f32 %v9879_v19, %v8153_v8  ;;  %v8169_v8 = vadd.f32 %v14104_v39, %v14109_v54  ;;  %v15310_v60 = vld [vmem:[#allocation101_spill] sm:$0xff] }
 0x560   :  { %v9880_v11 = vpop.f32.mrb[56].mxu1 }
 0x561   :  { %v9881_v17 = vpop.f32.mrb[57].mxu1 }
 0x562   :  { %v9882_v16 = vadd.f32 %v9881_v17, %v9880_v11  ;;  %v9883_v33 = vpop.f32.mrb[58].mxu1  ;;  %v15311_v11 = vld [vmem:[#allocation105_spill] sm:$0xff] }
 0x563   :  { %v9884_v37 = vpop.f32.mrb[59].mxu1 }
 0x564   :  { %v9885_v47 = vadd.f32 %v9884_v37, %v9883_v33  ;;  %v14285_v31 = vadd.f32 %v9882_v16, %v8158_v5 }
 0x565   :  { %7555 = vmatmul.mubr.bf16.gmra.mrb[228].mxu0 %v15308_v13  ;;  %8599 = vmatmul.mubr.bf16.gmra.mrb[164].mxu1 %v15308_v13  ;;  %v15313_v13 = vld [vmem:[#allocation107_spill] sm:$0xff] }
 0x566   :  { %7564 = vmatprep.mubr.bf16.mxu0 %v15309_v40  ;;  %8606 = vmatprep.mubr.bf16.mxu1 %v15309_v40  ;;  %v14291_v18 = vadd.f32 %v9885_v47, %v8161_v10  ;;  %v15312_v10 = vld [vmem:[#allocation104_spill] sm:$0xff] }
 0x568   :  { %v9886_v62 = vpop.f32.mrb[60].mxu1 }
 0x569   :  { %v9887_v20 = vpop.f32.mrb[61].mxu1 }
 0x56a   :  { %v9888_v58 = vadd.f32 %v9887_v20, %v9886_v62  ;;  %v9889_v24 = vpop.f32.mrb[62].mxu1 }
 0x56b   :  { %v9890_v7 = vpop.f32.mrb[63].mxu1 }
 0x56c   :  { %v9891_v19 = vadd.f32 %v9890_v7, %v9889_v24  ;;  %v14297_v22 = vadd.f32 %v9888_v58, %v8166_v52  ;;  %v15314_v7 = vld [vmem:[#allocation106_spill] sm:$0xff] }
 0x56d   :  { %7565 = vmatmul.mubr.bf16.gmra.mrb[232].mxu0 %v15310_v60  ;;  %8607 = vmatmul.mubr.bf16.gmra.mrb[168].mxu1 %v15310_v60 }
 0x56e   :  { %7574 = vmatprep.mubr.bf16.mxu0 %v15311_v11  ;;  %8614 = vmatprep.mubr.bf16.mxu1 %v15311_v11  ;;  %v14303_v17 = vadd.f32 %v9891_v19, %v8169_v8  ;;  %v15315_v8 = vld [vmem:[#allocation109_spill] sm:$0xff] }
 0x570   :  { %v9908_v2 = vpop.f32.mrb[64].mxu1 }
 0x571   :  { %v9909_v5 = vpop.f32.mrb[65].mxu1 }
 0x572   :  { %v9910_v16 = vadd.f32 %v9909_v5, %v9908_v2  ;;  %v9911_v33 = vpop.f32.mrb[66].mxu1 }
 0x573   :  { %v9912_v37 = vpop.f32.mrb[67].mxu1 }
 0x574   :  { %v14306_v39 = vadd.f32 %v9910_v16, %v14117_v61  ;;  %v9913_v54 = vadd.f32 %v9912_v37, %v9911_v33  ;;  %v15316_v33 = vld [vmem:[#allocation108_spill] sm:$0xff]  ;;  %v15317_v37 = vld [vmem:[#allocation111_spill] sm:$0xff] }
 0x575   :  { %7575 = vmatmul.mubr.bf16.gmra.mrb[236].mxu0 %v15312_v10  ;;  %8615 = vmatmul.mubr.bf16.gmra.mrb[172].mxu1 %v15312_v10 }
 0x576   :  { %v14311_v47 = vadd.f32 %v9913_v54, %v14123_v3  ;;  %7584 = vmatprep.mubr.bf16.mxu0 %v15313_v13  ;;  %8622 = vmatprep.mubr.bf16.mxu1 %v15313_v13 }
 0x578   :  { %v9914_v40 = vpop.f32.mrb[68].mxu1 }
 0x579   :  { %v9915_v62 = vpop.f32.mrb[69].mxu1 }
 0x57a   :  { %v9916_v20 = vadd.f32 %v9915_v62, %v9914_v40  ;;  %v9917_v52 = vpop.f32.mrb[70].mxu1 }
 0x57b   :  { %v9918_v58 = vpop.f32.mrb[71].mxu1 }
 0x57c   :  { %v14316_v61 = vadd.f32 %v9916_v20, %v14129_v57  ;;  %v9919_v24 = vadd.f32 %v9918_v58, %v9917_v52  ;;  %v15318_v52 = vld [vmem:[#allocation110_spill] sm:$0xff] }
 0x57d   :  { %7585 = vmatmul.mubr.bf16.gmra.mrb[240].mxu0 %v15314_v7  ;;  %8623 = vmatmul.mubr.bf16.gmra.mrb[176].mxu1 %v15314_v7 }
 0x57e   :  { %v14321_v3 = vadd.f32 %v9919_v24, %v14135_v21  ;;  %7594 = vmatprep.mubr.bf16.mxu0 %v15315_v8  ;;  %8630 = vmatprep.mubr.bf16.mxu1 %v15315_v8 }
 0x580   :  { %v9920_v19 = vpop.f32.mrb[72].mxu1 }
 0x581   :  { %v9921_v60 = vpop.f32.mrb[73].mxu1 }
 0x582   :  { %v9922_v11 = vadd.f32 %v9921_v60, %v9920_v19  ;;  %v9923_v2 = vpop.f32.mrb[74].mxu1 }
 0x583   :  { %v9924_v5 = vpop.f32.mrb[75].mxu1 }
 0x584   :  { %v14326_v57 = vadd.f32 %v9922_v11, %v14141_v0  ;;  %v9925_v16 = vadd.f32 %v9924_v5, %v9923_v2 }
 0x585   :  { %7595 = vmatmul.mubr.bf16.gmra.mrb[244].mxu0 %v15316_v33  ;;  %8631 = vmatmul.mubr.bf16.gmra.mrb[180].mxu1 %v15316_v33  ;;  %v12258_v33 = vld [vmem:[#allocation10 + $0x788] ss:$12 sps:$4 sm:$0xff]  }
 0x586   :  { %v14331_v21 = vadd.f32 %v9925_v16, %v14147_v15  ;;  %7604 = vmatprep.mubr.bf16.mxu0 %v15317_v37  ;;  %8638 = vmatprep.mubr.bf16.mxu1 %v15317_v37 }
 0x588   :  { %v9926_v54 = vpop.f32.mrb[76].mxu1 }
 0x589   :  { %v9927_v10 = vpop.f32.mrb[77].mxu1 }
 0x58a   :  { %v9928_v13 = vadd.f32 %v9927_v10, %v9926_v54  ;;  %v9929_v40 = vpop.f32.mrb[78].mxu1  ;;  %v12264_v10 = vld [vmem:[#allocation10 + $0x79c] ss:$12 sps:$4 sm:$0xff]  }
 0x58b   :  { %v9930_v62 = vpop.f32.mrb[79].mxu1 }
 0x58c   :  { %v14336_v0 = vadd.f32 %v9928_v13, %v14153_v56  ;;  %v9931_v20 = vadd.f32 %v9930_v62, %v9929_v40  ;;  %v12266_v13 = vld [vmem:[#allocation10 + $0x7a0] ss:$12 sps:$4 sm:$0xff]   ;;  %v12273_v62 = vld [vmem:[#allocation10 + $0x878] ss:$12 sps:$4 sm:$0xff]  }
 0x58d   :  { %7605 = vmatmul.mubr.bf16.gmra.mrb[248].mxu0 %v15318_v52  ;;  %8639 = vmatmul.mubr.bf16.gmra.mrb[184].mxu1 %v15318_v52  ;;  %v12269_v40 = vld [vmem:[#allocation10 + $0x7b4] ss:$12 sps:$4 sm:$0xff]  }
 0x58e   :  { %v14341_v15 = vadd.f32 %v9931_v20, %v14159_v42  ;;  %7614 = vmatprep.mubr.bf16.mxu0 %v13583_v29  ;;  %8646 = vmatprep.mubr.bf16.mxu1 %v13583_v29 }
 0x590   :  { %v9932_v58 = vpop.f32.mrb[80].mxu1 }
 0x591   :  { %v9933_v24 = vpop.f32.mrb[81].mxu1 }
 0x592   :  { %v9934_v7 = vadd.f32 %v9933_v24, %v9932_v58  ;;  %v9935_v8 = vpop.f32.mrb[82].mxu1  ;;  %v12274_v24 = vld [vmem:[#allocation10 + $0x7b8] ss:$12 sps:$4 sm:$0xff]  }
 0x593   :  { %v9936_v19 = vpop.f32.mrb[83].mxu1 }
 0x594   :  { %v14346_v56 = vadd.f32 %v9934_v7, %v14165_v53  ;;  %v9937_v60 = vadd.f32 %v9936_v19, %v9935_v8  ;;  %v12259_v53 = vld [vmem:[#allocation10 + $0x780] ss:$12 sps:$4 sm:$0xff]   ;;  %v12281_v19 = vld [vmem:[#allocation10 + $0x890] ss:$12 sps:$4 sm:$0xff]  }
 0x595   :  { %7615 = vmatmul.mubr.bf16.gmra.mrb[252].mxu0 %v13579_v9  ;;  %8647 = vmatmul.mubr.bf16.gmra.mrb[188].mxu1 %v13579_v9  ;;  %v12265_v9 = vld [vmem:[#allocation10 + $0x860] ss:$12 sps:$4 sm:$0xff]  }
 0x596   :  { %v14351_v42 = vadd.f32 %v9937_v60, %v14171_v12  ;;  %7657 = vmatprep.mubr.bf16.mxu0 %v13678_v38  ;;  %8687 = vmatprep.mubr.bf16.mxu1 %v13678_v38  ;;  %v12262_v38 = vld [vmem:[#allocation10 + $0x798] ss:$12 sps:$4 sm:$0xff]   ;;  %v15319_v60 = vld [vmem:[#allocation41_spill] sm:$0xff] }
 0x597   :  { %v12272_v8 = vld [vmem:[#allocation10 + $0x7cc] ss:$12 sps:$4 sm:$0xff]  }
 0x598   :  { %v9938_v29 = vpop.f32.mrb[84].mxu1 }
 0x599   :  { %v9939_v11 = vpop.f32.mrb[85].mxu1 }
 0x59a   :  { %v9940_v2 = vadd.f32 %v9939_v11, %v9938_v29  ;;  %v9941_v5 = vpop.f32.mrb[86].mxu1  ;;  %v15320_v11 = vld [vmem:[#allocation47_spill] sm:$0xff] }
 0x59b   :  { %v9942_v16 = vpop.f32.mrb[87].mxu1 }
 0x59c   :  { %v14356_v37 = vadd.f32 %v9940_v2, %v14177_v32  ;;  %v9943_v54 = vadd.f32 %v9942_v16, %v9941_v5  ;;  %v12270_v2 = vld [vmem:[#allocation10 + $0x7c8] ss:$12 sps:$4 sm:$0xff]   ;;  %v12277_v16 = vld [vmem:[#allocation10 + $0x7e4] ss:$12 sps:$4 sm:$0xff]  }
 0x59d   :  { %7658 = vmatmul.mubr.bf16.vlgmr.msra.gmra.mrb[192].mxu0 %v13674_v23  ;;  %8688 = vmatmul.mubr.bf16.vlgmr.msra.gmra.mrb[192].mxu1 %v13674_v23 }
 0x59e   :  { %v14361_v12 = vadd.f32 %v9943_v54, %v14183_v30  ;;  %7667 = vmatprep.mubr.bf16.mxu0 %v13698_v27  ;;  %8695 = vmatprep.mubr.bf16.mxu1 %v13698_v27  ;;  %v12267_v30 = vld [vmem:[#allocation10 + $0x7b0] ss:$12 sps:$4 sm:$0xff]  }
 0x59f   :  { %10229 = vmatpush3.bf16.msra.mxu1 %v12258_v33  ;;  %7819 = vmatpush1.bf16.msra.mxu0 %v12259_v53  ;;  %v12289_v33 = vld [vmem:[#allocation10 + $0x8a8] ss:$12 sps:$4 sm:$0xff]  }
 0x5a0   :  { %v9944_v32 = vpop.f32.mrb[88].mxu1  ;;  %7820 = vmatprep.subr.bf16.mxu0 %v12264_v10  ;;  %10230 = vmatprep.subr.bf16.mxu1 %v12265_v9 }
 0x5a1   :  { %v9945_v20 = vpop.f32.mrb[89].mxu1 }
 0x5a2   :  { %v9946_v52 = vadd.f32 %v9945_v20, %v9944_v32  ;;  %v9947_v58 = vpop.f32.mrb[90].mxu1  ;;  %v15321_v20 = vld [vmem:[#allocation43_spill] sm:$0xff] }
 0x5a3   :  { %v9948_v23 = vpop.f32.mrb[91].mxu1  ;;  %7821 = vmatpush1.bf16.msra.mxu0 %v12262_v38  ;;  %10231 = vmatpush3.bf16.msra.mxu1 %v12266_v13  ;;  %v12290_v38 = vld [vmem:[#allocation10 + $0x7e8] ss:$12 sps:$4 sm:$0xff]  }
 0x5a4   :  { %v14366_v7 = vadd.f32 %v9946_v52, %v14189_v4  ;;  %v9949_v27 = vadd.f32 %v9948_v23, %v9947_v58  ;;  %7822 = vmatprep.subr.bf16.mxu0 %v12269_v40  ;;  %10232 = vmatprep.subr.bf16.mxu1 %v12273_v62  ;;  %v12282_v4 = vld [vmem:[#allocation10 + $0x7d0] ss:$12 sps:$4 sm:$0xff]   ;;  %v12297_v62 = vld [vmem:[#allocation10 + $0x8c0] ss:$12 sps:$4 sm:$0xff]   ;;  %v12278_v23 = vld [vmem:[#allocation10 + $0x7f8] ss:$12 sps:$4 sm:$0xff]  }
 0x5a5   :  { %7668 = vmatmul.mubr.bf16.gmra.mrb[196].mxu0 %v15319_v60  ;;  %8696 = vmatmul.mubr.bf16.gmra.mrb[196].mxu1 %v15319_v60  ;;  %v12280_v40 = vld [vmem:[#allocation10 + $0x7fc] ss:$12 sps:$4 sm:$0xff]   ;;  %v15322_v58 = vld [vmem:[#allocation55_spill] sm:$0xff] }
 0x5a6   :  { %v14371_v29 = vadd.f32 %v9949_v27, %v14195_v6  ;;  %7677 = vmatprep.mubr.bf16.mxu0 %v15320_v11  ;;  %8703 = vmatprep.mubr.bf16.mxu1 %v15320_v11  ;;  %v12275_v6 = vld [vmem:[#allocation10 + $0x7e0] ss:$12 sps:$4 sm:$0xff]   ;;  %v12305_v27 = vld [vmem:[#allocation10 + $0x8d8] ss:$12 sps:$4 sm:$0xff]  }
 0x5a7   :  { %7823 = vmatpush1.bf16.msra.mxu0 %v12267_v30  ;;  %10233 = vmatpush3.bf16.msra.mxu1 %v12274_v24  ;;  %v12285_v24 = vld [vmem:[#allocation10 + $0x814] ss:$12 sps:$4 sm:$0xff]  }
 0x5a8   :  { %v9950_v5 = vpop.f32.mrb[92].mxu1  ;;  %7824 = vmatprep.subr.bf16.mxu0 %v12272_v8  ;;  %10234 = vmatprep.subr.bf16.mxu1 %v12281_v19 }
 0x5a9   :  { %v9951_v53 = vpop.f32.mrb[93].mxu1 }
 0x5aa   :  { %v9952_v54 = vadd.f32 %v9951_v53, %v9950_v5  ;;  %v9953_v10 = vpop.f32.mrb[94].mxu1  ;;  %v15323_v53 = vld [vmem:[#allocation51_spill] sm:$0xff] }
 0x5ab   :  { %v9954_v9 = vpop.f32.mrb[95].mxu1  ;;  %7825 = vmatpush1.bf16.msra.mxu0 %v12270_v2  ;;  %10235 = vmatpush3.bf16.msra.mxu1 %v12282_v4  ;;  %v12306_v2 = vld [vmem:[#allocation10 + $0x818] ss:$12 sps:$4 sm:$0xff]  }
 0x5ac   :  { %v14376_v13 = vadd.f32 %v9952_v54, %v14201_v59  ;;  %v9955_v32 = vadd.f32 %v9954_v9, %v9953_v10  ;;  %7826 = vmatprep.subr.bf16.mxu0 %v12277_v16  ;;  %10236 = vmatprep.subr.bf16.mxu1 %v12289_v33  ;;  %v12298_v59 = vld [vmem:[#allocation10 + $0x800] ss:$12 sps:$4 sm:$0xff]   ;;  %v12313_v33 = vld [vmem:[#allocation10 + $0x8f0] ss:$12 sps:$4 sm:$0xff]   ;;  %v12286_v9 = vld [vmem:[#allocation10 + $0x828] ss:$12 sps:$4 sm:$0xff]  }
 0x5ad   :  { %7678 = vmatmul.mubr.bf16.gmra.mrb[200].mxu0 %v15321_v20  ;;  %8704 = vmatmul.mubr.bf16.gmra.mrb[200].mxu1 %v15321_v20  ;;  %v12288_v16 = vld [vmem:[#allocation10 + $0x82c] ss:$12 sps:$4 sm:$0xff]  }
 0x5ae   :  { %v14381_v52 = vadd.f32 %v9955_v32, %v14207_v35  ;;  %7687 = vmatprep.mubr.bf16.mxu0 %v15322_v58  ;;  %8711 = vmatprep.mubr.bf16.mxu1 %v15322_v58  ;;  %v12283_v35 = vld [vmem:[#allocation10 + $0x810] ss:$12 sps:$4 sm:$0xff]   ;;  %v12291_v58 = vld [vmem:[#allocation10 + $0x840] ss:$12 sps:$4 sm:$0xff]  }
 0x5af   :  { %7827 = vmatpush1.bf16.msra.mxu0 %v12275_v6  ;;  %10237 = vmatpush3.bf16.msra.mxu1 %v12290_v38  ;;  %v15324_v10 = vld [vmem:[#allocation63_spill] sm:$0xff] }
 0x5b0   :  { %v9956_v30 = vpop.f32.mrb[96].mxu1  ;;  %7828 = vmatprep.subr.bf16.mxu0 %v12280_v40  ;;  %10238 = vmatprep.subr.bf16.mxu1 %v12297_v62  ;;  %v12293_v38 = vld [vmem:[#allocation10 + $0x844] ss:$12 sps:$4 sm:$0xff]  }
 0x5b1   :  { %v9957_v8 = vpop.f32.mrb[97].mxu1 }
 0x5b2   :  { %v9958_v19 = vadd.f32 %v9957_v8, %v9956_v30  ;;  %v9959_v60 = vpop.f32.mrb[98].mxu1  ;;  %v15325_v30 = vld [vmem:[#allocation59_spill] sm:$0xff]  ;;  %v12294_v8 = vld [vmem:[#allocation10 + $0x858] ss:$12 sps:$4 sm:$0xff]  }
 0x5b3   :  { %v9960_v11 = vpop.f32.mrb[99].mxu1  ;;  %7829 = vmatpush1.bf16.msra.mxu0 %v12278_v23  ;;  %10239 = vmatpush3.bf16.msra.mxu1 %v12298_v59  ;;  %v12296_v59 = vld [vmem:[#allocation10 + $0x85c] ss:$12 sps:$4 sm:$0xff]  }
 0x5b4   :  { %v14386_v4 = vadd.f32 %v9958_v19, %v14213_v43  ;;  %v9961_v5 = vadd.f32 %v9960_v11, %v9959_v60  ;;  %7830 = vmatprep.subr.bf16.mxu0 %v12285_v24  ;;  %10240 = vmatprep.subr.bf16.mxu1 %v12305_v27  ;;  %v12314_v43 = vld [vmem:[#allocation10 + $0x830] ss:$12 sps:$4 sm:$0xff]  }
 0x5b5   :  { %7688 = vmatmul.mubr.bf16.gmra.mrb[204].mxu0 %v15323_v53  ;;  %8712 = vmatmul.mubr.bf16.gmra.mrb[204].mxu1 %v15323_v53  ;;  %v15326_v27 = vld [vmem:[#allocation71_spill] sm:$0xff] }
 0x5b6   :  { %v14391_v54 = vadd.f32 %v9961_v5, %v14219_v28  ;;  %7697 = vmatprep.mubr.bf16.mxu0 %v15324_v10  ;;  %8719 = vmatprep.mubr.bf16.mxu1 %v15324_v10  ;;  %v12299_v5 = vld [vmem:[#allocation10 + $0x870] ss:$12 sps:$4 sm:$0xff]  }
 0x5b7   :  { %7831 = vmatpush1.bf16.msra.mxu0 %v12283_v35  ;;  %10241 = vmatpush3.bf16.msra.mxu1 %v12306_v2  ;;  %v15327_v53 = vld [vmem:[#allocation67_spill] sm:$0xff] }
 0x5b8   :  { %v9962_v6 = vpop.f32.mrb[100].mxu1  ;;  %7832 = vmatprep.subr.bf16.mxu0 %v12288_v16  ;;  %10242 = vmatprep.subr.bf16.mxu1 %v12313_v33  ;;  %v12304_v33 = vld [vmem:[#allocation10 + $0x88c] ss:$12 sps:$4 sm:$0xff]  }
 0x5b9   :  { %v9963_v32 = vpop.f32.mrb[101].mxu1 }
 0x5ba   :  { %v9964_v40 = vadd.f32 %v9963_v32, %v9962_v6  ;;  %v9965_v62 = vpop.f32.mrb[102].mxu1 }
 0x5bb   :  { %v9966_v20 = vpop.f32.mrb[103].mxu1  ;;  %7833 = vmatpush1.bf16.msra.mxu0 %v12286_v9  ;;  %10243 = vmatpush3.bf16.msra.mxu1 %v12314_v43  ;;  %v15328_v9 = vld [vmem:[#allocation81_spill] sm:$0xff]  ;;  %v12302_v43 = vld [vmem:[#allocation10 + $0x888] ss:$12 sps:$4 sm:$0xff]  }
 0x5bc   :  { %v14396_v28 = vadd.f32 %v9964_v40, %v14225_v36  ;;  %v9967_v23 = vadd.f32 %v9966_v20, %v9965_v62  ;;  %7834 = vmatprep.subr.bf16.mxu0 %v12293_v38  ;;  %v12301_v36 = vld [vmem:[#allocation10 + $0x874] ss:$12 sps:$4 sm:$0xff]  }
 0x5bd   :  { %7698 = vmatmul.mubr.bf16.gmra.mrb[208].mxu0 %v15325_v30  ;;  %8720 = vmatmul.mubr.bf16.gmra.mrb[208].mxu1 %v15325_v30  ;;  %v12307_v20 = vld [vmem:[#allocation10 + $0x8a0] ss:$12 sps:$4 sm:$0xff]  }
 0x5be   :  { %v14401_v24 = vadd.f32 %v9967_v23, %v14231_v63  ;;  %7707 = vmatprep.mubr.bf16.mxu0 %v15326_v27  ;;  %8727 = vmatprep.mubr.bf16.mxu1 %v15326_v27  ;;  %v12312_v23 = vld [vmem:[#allocation10 + $0x8bc] ss:$12 sps:$4 sm:$0xff]   ;;  %v15330_v27 = vld [vmem:[#allocation36_spill] sm:$0xff] }
 0x5bf   :  { %7835 = vmatpush1.bf16.msra.mxu0 %v12291_v58 }
 0x5c0   :  { %v9968_v19 = vpop.f32.mrb[104].mxu1  ;;  %7836 = vmatprep.subr.bf16.mxu0 %v12296_v59  ;;  %v15329_v59 = vld [vmem:[#allocation75_spill] sm:$0xff] }
 0x5c1   :  { %v9969_v60 = vpop.f32.mrb[105].mxu1 }
 0x5c2   :  { %v9970_v11 = vadd.f32 %v9969_v60, %v9968_v19  ;;  %v9971_v35 = vpop.f32.mrb[106].mxu1 }
 0x5c3   :  { %v9972_v2 = vpop.f32.mrb[107].mxu1  ;;  %7837 = vmatpush1.bf16.msra.mxu0 %v12294_v8  ;;  %v12310_v8 = vld [vmem:[#allocation10 + $0x8b8] ss:$12 sps:$4 sm:$0xff]  }
 0x5c4   :  { %v14406_v16 = vadd.f32 %v9970_v11, %v14237_v25  ;;  %v9973_v63 = vadd.f32 %v9972_v2, %v9971_v35  ;;  %7838 = vmatprep.subr.bf16.mxu0 %v12301_v36  ;;  %v12309_v25 = vld [vmem:[#allocation10 + $0x8a4] ss:$12 sps:$4 sm:$0xff]  }
 0x5c5   :  { %7708 = vmatmul.mubr.bf16.gmra.mrb[212].mxu0 %v15327_v53  ;;  %8728 = vmatmul.mubr.bf16.gmra.mrb[212].mxu1 %v15327_v53  ;;  %v12315_v2 = vld [vmem:[#allocation10 + $0x8d0] ss:$12 sps:$4 sm:$0xff]  }
 0x5c6   :  { %v14411_v10 = vadd.f32 %v9973_v63, %v14243_v34  ;;  %7717 = vmatprep.mubr.bf16.mxu0 %v15328_v9  ;;  %8735 = vmatprep.mubr.bf16.mxu1 %v15328_v9  ;;  %v12320_v63 = vld [vmem:[#allocation10 + $0x8ec] ss:$12 sps:$4 sm:$0xff]   ;;  %v12318_v9 = vld [vmem:[#allocation10 + $0x8e8] ss:$12 sps:$4 sm:$0xff]  }
 0x5c7   :  { %7839 = vmatpush1.bf16.msra.mxu0 %v12299_v5 }
 0x5c8   :  { %v9974_v6 = vpop.f32.mrb[108].mxu1  ;;  %7840 = vmatprep.subr.bf16.mxu0 %v12304_v33  ;;  %v15331_v33 = vld [vmem:[#allocation87_spill] sm:$0xff] }
 0x5c9   :  { %v9975_v38 = vpop.f32.mrb[109].mxu1 }
 0x5ca   :  { %v9976_v32 = vadd.f32 %v9975_v38, %v9974_v6  ;;  %v9977_v40 = vpop.f32.mrb[110].mxu1 }
 0x5cb   :  { %v9978_v62 = vpop.f32.mrb[111].mxu1  ;;  %7841 = vmatpush1.bf16.msra.mxu0 %v12302_v43 }
 0x5cc   :  { %v14416_v58 = vadd.f32 %v9976_v32, %v14249_v55  ;;  %v9979_v34 = vadd.f32 %v9978_v62, %v9977_v40  ;;  %7842 = vmatprep.subr.bf16.mxu0 %v12309_v25  ;;  %v12317_v55 = vld [vmem:[#allocation10 + $0x8d4] ss:$12 sps:$4 sm:$0xff]  }
 0x5cd   :  { %7718 = vmatmul.mubr.bf16.gmra.mrb[216].mxu0 %v15329_v59  ;;  %8736 = vmatmul.mubr.bf16.gmra.mrb[216].mxu1 %v15329_v59 }
 0x5ce   :  { %v14421_v30 = vadd.f32 %v9979_v34, %v14255_v48  ;;  %7727 = vmatprep.mubr.bf16.mxu0 %v15330_v27  ;;  %8743 = vmatprep.mubr.bf16.mxu1 %v15330_v27  ;;  %v15332_v27 = vld [vmem:[#allocation44_spill] sm:$0xff] }
 0x5cf   :  { %7843 = vmatpush1.bf16.msra.mxu0 %v12307_v20 }
 0x5d0   :  { %v9980_v19 = vpop.f32.mrb[112].mxu1  ;;  %7844 = vmatprep.subr.bf16.mxu0 %v12312_v23 }
 0x5d1   :  { %v9981_v36 = vpop.f32.mrb[113].mxu1 }
 0x5d2   :  { %v9982_v60 = vadd.f32 %v9981_v36, %v9980_v19  ;;  %v9983_v11 = vpop.f32.mrb[114].mxu1 }
 0x5d3   :  { %v9984_v35 = vpop.f32.mrb[115].mxu1  ;;  %7845 = vmatpush1.bf16.msra.mxu0 %v12310_v8 }
 0x5d4   :  { %v14426_v5 = vadd.f32 %v9982_v60, %v14261_v44  ;;  %v9985_v48 = vadd.f32 %v9984_v35, %v9983_v11  ;;  %7846 = vmatprep.subr.bf16.mxu0 %v12317_v55  ;;  %v15334_v11 = vld [vmem:[#allocation54_spill] sm:$0xff] }
 0x5d5   :  { %7728 = vmatmul.mubr.bf16.gmra.mrb[220].mxu0 %v15331_v33  ;;  %8744 = vmatmul.mubr.bf16.gmra.mrb[220].mxu1 %v15331_v33  ;;  %v15335_v35 = vld [vmem:[#allocation66_spill] sm:$0xff] }
 0x5d6   :  { %v14431_v53 = vadd.f32 %v9985_v48, %v14267_v51  ;;  %7737 = vmatprep.mubr.bf16.mxu0 %v13838_v14  ;;  %8751 = vmatprep.mubr.bf16.mxu1 %v13838_v14 }
 0x5d7   :  { %7847 = vmatpush1.bf16.msra.mxu0 %v12315_v2 }
 0x5d8   :  { %v9986_v43 = vpop.f32.mrb[116].mxu1  ;;  %7848 = vmatprep.subr.bf16.mxu0 %v12320_v63 }
 0x5d9   :  { %v9987_v44 = vpop.f32.mrb[117].mxu1 }
 0x5da   :  { %v9988_v6 = vadd.f32 %v9987_v44, %v9986_v43  ;;  %v9989_v25 = vpop.f32.mrb[118].mxu1  ;;  %v15336_v44 = vld [vmem:[#allocation62_spill] sm:$0xff] }
 0x5db   :  { %v9990_v38 = vpop.f32.mrb[119].mxu1  ;;  %7849 = vmatpush1.bf16.msra.mxu0 %v12318_v9 }
 0x5dc   :  { %v14436_v32 = vadd.f32 %v9988_v6, %v14273_v41  ;;  %v9991_v40 = vadd.f32 %v9990_v38, %v9989_v25 }
 0x5dd   :  { %7738 = vmatmul.mubr.bf16.gmra.mrb[224].mxu0 %v13834_v1  ;;  %8752 = vmatmul.mubr.bf16.gmra.mrb[224].mxu1 %v13834_v1 }
 0x5de   :  { %v14441_v51 = vadd.f32 %v9991_v40, %v14279_v46  ;;  %7747 = vmatprep.mubr.bf16.mxu0 %v13858_v45  ;;  %8759 = vmatprep.mubr.bf16.mxu1 %v13858_v45  ;;  %v15333_v46 = vld [vmem:[#allocation58_spill] sm:$0xff] }
 0x5e0   :  { %v9992_v14 = vpop.f32.mrb[120].mxu1 }
 0x5e1   :  { %v9993_v62 = vpop.f32.mrb[121].mxu1 }
 0x5e2   :  { %v9994_v20 = vadd.f32 %v9993_v62, %v9992_v14  ;;  %v9995_v34 = vpop.f32.mrb[122].mxu1 }
 0x5e3   :  { %v9996_v23 = vpop.f32.mrb[123].mxu1 }
 0x5e4   :  { %v14446_v41 = vadd.f32 %v9994_v20, %v14285_v31  ;;  %v9997_v59 = vadd.f32 %v9996_v23, %v9995_v34  ;;  %v15337_v20 = vld [vmem:[#allocation64_spill] sm:$0xff] }
 0x5e5   :  { %7748 = vmatmul.mubr.bf16.gmra.mrb[228].mxu0 %v15332_v27  ;;  %8760 = vmatmul.mubr.bf16.gmra.mrb[228].mxu1 %v15332_v27 }
 0x5e6   :  { %v14451_v1 = vadd.f32 %v9997_v59, %v14291_v18  ;;  %7757 = vmatprep.mubr.bf16.mxu0 %v15333_v46  ;;  %8767 = vmatprep.mubr.bf16.mxu1 %v15333_v46 }
 0x5e8   :  { %v9998_v45 = vpop.f32.mrb[124].mxu1 }
 0x5e9   :  { %v9999_v8 = vpop.f32.mrb[125].mxu1 }
 0x5ea   :  { %v10000_v19 = vadd.f32 %v9999_v8, %v9998_v45  ;;  %v10001_v55 = vpop.f32.mrb[126].mxu1  ;;  %v15338_v45 = vld [vmem:[#allocation68_spill] sm:$0xff] }
 0x5eb   :  { %v10002_v36 = vpop.f32.mrb[127].mxu1 }
 0x5ec   :  { %v14456_v31 = vadd.f32 %v10000_v19, %v14297_v22  ;;  %v10003_v60 = vadd.f32 %v10002_v36, %v10001_v55 }
 0x5ed   :  { %7758 = vmatmul.mubr.bf16.gmra.mrb[232].mxu0 %v15334_v11  ;;  %8768 = vmatmul.mubr.bf16.gmra.mrb[232].mxu1 %v15334_v11  ;;  %v15339_v11 = vld [vmem:[#allocation72_spill] sm:$0xff] }
 0x5ee   :  { %v14461_v18 = vadd.f32 %v10003_v60, %v14303_v17  ;;  %7767 = vmatprep.mubr.bf16.mxu0 %v15335_v35  ;;  %8775 = vmatprep.mubr.bf16.mxu1 %v15335_v35  ;;  %v15340_v35 = vld [vmem:[#allocation116_spill] sm:$0xff] }
 0x5f0   :  { %v10020_v2 = vpop.f32.mrb[128].mxu1 }
 0x5f1   :  { %v10021_v48 = vpop.f32.mrb[129].mxu1 }
 0x5f2   :  { %v10022_v63 = vadd.f32 %v10021_v48, %v10020_v2  ;;  %v10023_v33 = vpop.f32.mrb[130].mxu1 }
 0x5f3   :  { %v10024_v9 = vpop.f32.mrb[131].mxu1 }
 0x5f4   :  { %v14466_v22 = vadd.f32 %v10022_v63, %v14306_v39  ;;  %v10025_v43 = vadd.f32 %v10024_v9, %v10023_v33 }
 0x5f5   :  { %7768 = vmatmul.mubr.bf16.gmra.mrb[236].mxu0 %v15336_v44  ;;  %8776 = vmatmul.mubr.bf16.gmra.mrb[236].mxu1 %v15336_v44  ;;  %v15342_v44 = vld [vmem:[#allocation35_spill] sm:$0xff] }
 0x5f6   :  { %v14471_v17 = vadd.f32 %v10025_v43, %v14311_v47  ;;  %7777 = vmatprep.mubr.bf16.mxu0 %v13918_v50  ;;  %8783 = vmatprep.mubr.bf16.mxu1 %v13918_v50  ;;  %v15341_v43 = vld [vmem:[#allocation76_spill] sm:$0xff] }
 0x5f8   :  { %v10026_v6 = vpop.f32.mrb[132].mxu1 }
 0x5f9   :  { %v10027_v25 = vpop.f32.mrb[133].mxu1 }
 0x5fa   :  { %v10028_v38 = vadd.f32 %v10027_v25, %v10026_v6  ;;  %v10029_v40 = vpop.f32.mrb[134].mxu1 }
 0x5fb   :  { %v10030_v14 = vpop.f32.mrb[135].mxu1 }
 0x5fc   :  { %v14476_v39 = vadd.f32 %v10028_v38, %v14316_v61  ;;  %v10031_v62 = vadd.f32 %v10030_v14, %v10029_v40 }
 0x5fd   :  { %7778 = vmatmul.mubr.bf16.gmra.mrb[240].mxu0 %v15337_v20  ;;  %8784 = vmatmul.mubr.bf16.gmra.mrb[240].mxu1 %v15337_v20  ;;  %v15343_v20 = vld [vmem:[#allocation37_spill] sm:$0xff] }
 0x5fe   :  { %v14481_v47 = vadd.f32 %v10031_v62, %v14321_v3  ;;  %7787 = vmatprep.mubr.bf16.mxu0 %v13938_v26  ;;  %8791 = vmatprep.mubr.bf16.mxu1 %v13938_v26 }
 0x600   :  { %v10032_v50 = vpop.f32.mrb[136].mxu1 }
 0x601   :  { %v10033_v34 = vpop.f32.mrb[137].mxu1 }
 0x602   :  { %v10034_v23 = vadd.f32 %v10033_v34, %v10032_v50  ;;  %v10035_v59 = vpop.f32.mrb[138].mxu1  ;;  %v15344_v50 = vld [vmem:[#allocation45_spill] sm:$0xff] }
 0x603   :  { %v10036_v27 = vpop.f32.mrb[139].mxu1 }
 0x604   :  { %v14486_v61 = vadd.f32 %v10034_v23, %v14326_v57  ;;  %v10037_v46 = vadd.f32 %v10036_v27, %v10035_v59 }
 0x605   :  { %7788 = vmatmul.mubr.bf16.gmra.mrb[244].mxu0 %v15338_v45  ;;  %8792 = vmatmul.mubr.bf16.gmra.mrb[244].mxu1 %v15338_v45 }
 0x606   :  { %v14491_v3 = vadd.f32 %v10037_v46, %v14331_v21  ;;  %7797 = vmatprep.mubr.bf16.mxu0 %v13958_v49  ;;  %8799 = vmatprep.mubr.bf16.mxu1 %v13958_v49 }
 0x608   :  { %v10038_v26 = vpop.f32.mrb[140].mxu1 }
 0x609   :  { %v10039_v8 = vpop.f32.mrb[141].mxu1 }
 0x60a   :  { %v10040_v19 = vadd.f32 %v10039_v8, %v10038_v26  ;;  %v10041_v55 = vpop.f32.mrb[142].mxu1  ;;  %v15345_v26 = vld [vmem:[#allocation39_spill] sm:$0xff]  ;;  %v15346_v8 = vld [vmem:[#allocation53_spill] sm:$0xff] }
 0x60b   :  { %v10042_v36 = vpop.f32.mrb[143].mxu1 }
 0x60c   :  { %v14496_v57 = vadd.f32 %v10040_v19, %v14336_v0  ;;  %v10043_v60 = vadd.f32 %v10042_v36, %v10041_v55 }
 0x60d   :  { %7798 = vmatmul.mubr.bf16.gmra.mrb[248].mxu0 %v15339_v11  ;;  %8800 = vmatmul.mubr.bf16.gmra.mrb[248].mxu1 %v15339_v11 }
 0x60e   :  { %v14501_v21 = vadd.f32 %v10043_v60, %v14341_v15  ;;  %7807 = vmatprep.mubr.bf16.mxu0 %v15340_v35  ;;  %8807 = vmatprep.mubr.bf16.mxu1 %v15340_v35 }
 0x610   :  { %v10044_v49 = vpop.f32.mrb[144].mxu1 }
 0x611   :  { %v10045_v2 = vpop.f32.mrb[145].mxu1 }
 0x612   :  { %v10046_v48 = vadd.f32 %v10045_v2, %v10044_v49  ;;  %v10047_v63 = vpop.f32.mrb[146].mxu1  ;;  %v15347_v49 = vld [vmem:[#allocation49_spill] sm:$0xff] }
 0x613   :  { %v10048_v33 = vpop.f32.mrb[147].mxu1  ;;  %v15348_v2 = vld [vmem:[#allocation61_spill] sm:$0xff] }
 0x614   :  { %v14506_v0 = vadd.f32 %v10046_v48, %v14346_v56  ;;  %v10049_v9 = vadd.f32 %v10048_v33, %v10047_v63 }
 0x615   :  { %7808 = vmatmul.mubr.bf16.gmra.mrb[252].mxu0 %v15341_v43  ;;  %8808 = vmatmul.mubr.bf16.gmra.mrb[252].mxu1 %v15341_v43 }
 0x616   :  { %v14511_v15 = vadd.f32 %v10049_v9, %v14351_v42  ;;  %7850 = vmatprep.mubr.bf16.mxu0 %v15342_v44  ;;  %8848 = vmatprep.mubr.bf16.mxu1 %v15342_v44 }
 0x618   :  { %v10050_v6 = vpop.f32.mrb[148].mxu1 }
 0x619   :  { %v10051_v25 = vpop.f32.mrb[149].mxu1 }
 0x61a   :  { %v10052_v38 = vadd.f32 %v10051_v25, %v10050_v6  ;;  %v10053_v40 = vpop.f32.mrb[150].mxu1  ;;  %v15349_v6 = vld [vmem:[#allocation57_spill] sm:$0xff] }
 0x61b   :  { %v10054_v14 = vpop.f32.mrb[151].mxu1  ;;  %v15350_v25 = vld [vmem:[#allocation69_spill] sm:$0xff] }
 0x61c   :  { %v14516_v56 = vadd.f32 %v10052_v38, %v14356_v37  ;;  %v10055_v62 = vadd.f32 %v10054_v14, %v10053_v40 }
 0x61d   :  { %7851 = vmatmul.mubr.bf16.vlgmr.msra.gmra.mrb[192].mxu0 %v15343_v20  ;;  %8849 = vmatmul.mubr.bf16.vlgmr.msra.gmra.mrb[0].mxu1 %v15343_v20 }
 0x61e   :  { %v14521_v42 = vadd.f32 %v10055_v62, %v14361_v12  ;;  %7860 = vmatprep.mubr.bf16.mxu0 %v15344_v50  ;;  %8856 = vmatprep.mubr.bf16.mxu1 %v15344_v50 }
 0x620   :  { %v10056_v34 = vpop.f32.mrb[152].mxu1 }
 0x621   :  { %v10057_v23 = vpop.f32.mrb[153].mxu1 }
 0x622   :  { %v10058_v59 = vadd.f32 %v10057_v23, %v10056_v34  ;;  %v10059_v27 = vpop.f32.mrb[154].mxu1  ;;  %v15351_v34 = vld [vmem:[#allocation65_spill] sm:$0xff] }
 0x623   :  { %v10060_v46 = vpop.f32.mrb[155].mxu1  ;;  %v15352_v23 = vld [vmem:[#allocation77_spill] sm:$0xff] }
 0x624   :  { %v14526_v37 = vadd.f32 %v10058_v59, %v14366_v7  ;;  %v10061_v45 = vadd.f32 %v10060_v46, %v10059_v27 }
 0x625   :  { %7861 = vmatmul.mubr.bf16.gmra.mrb[196].mxu0 %v15345_v26  ;;  %8857 = vmatmul.mubr.bf16.gmra.mrb[4].mxu1 %v15345_v26 }
 0x626   :  { %v14531_v12 = vadd.f32 %v10061_v45, %v14371_v29  ;;  %7870 = vmatprep.mubr.bf16.mxu0 %v15346_v8  ;;  %8864 = vmatprep.mubr.bf16.mxu1 %v15346_v8 }
 0x628   :  { %v10062_v19 = vpop.f32.mrb[156].mxu1 }
 0x629   :  { %v10063_v55 = vpop.f32.mrb[157].mxu1 }
 0x62a   :  { %v10064_v36 = vadd.f32 %v10063_v55, %v10062_v19  ;;  %v10065_v60 = vpop.f32.mrb[158].mxu1  ;;  %v15353_v19 = vld [vmem:[#allocation73_spill] sm:$0xff]  ;;  %v15354_v55 = vld [vmem:[#allocation79_spill] sm:$0xff] }
 0x62b   :  { %v10066_v11 = vpop.f32.mrb[159].mxu1 }
 0x62c   :  { %v14536_v7 = vadd.f32 %v10064_v36, %v14376_v13  ;;  %v10067_v35 = vadd.f32 %v10066_v11, %v10065_v60 }
 0x62d   :  { %7871 = vmatmul.mubr.bf16.gmra.mrb[200].mxu0 %v15347_v49  ;;  %8865 = vmatmul.mubr.bf16.gmra.mrb[8].mxu1 %v15347_v49 }
 0x62e   :  { %v14541_v29 = vadd.f32 %v10067_v35, %v14381_v52  ;;  %7880 = vmatprep.mubr.bf16.mxu0 %v15348_v2  ;;  %8872 = vmatprep.mubr.bf16.mxu1 %v15348_v2 }
 0x630   :  { %v10068_v48 = vpop.f32.mrb[160].mxu1 }
 0x631   :  { %v10069_v63 = vpop.f32.mrb[161].mxu1 }
 0x632   :  { %v10070_v33 = vadd.f32 %v10069_v63, %v10068_v48  ;;  %v10071_v9 = vpop.f32.mrb[162].mxu1  ;;  %v15355_v48 = vld [vmem:[#allocation33_spill] sm:$0xff]  ;;  %v15356_v63 = vld [vmem:[#allocation42_spill] sm:$0xff] }
 0x633   :  { %v10072_v43 = vpop.f32.mrb[163].mxu1 }
 0x634   :  { %v14546_v13 = vadd.f32 %v10070_v33, %v14386_v4  ;;  %v10073_v44 = vadd.f32 %v10072_v43, %v10071_v9 }
 0x635   :  { %7881 = vmatmul.mubr.bf16.gmra.mrb[204].mxu0 %v15349_v6  ;;  %8873 = vmatmul.mubr.bf16.gmra.mrb[12].mxu1 %v15349_v6 }
 0x636   :  { %v14551_v52 = vadd.f32 %v10073_v44, %v14391_v54  ;;  %7890 = vmatprep.mubr.bf16.mxu0 %v15350_v25  ;;  %8880 = vmatprep.mubr.bf16.mxu1 %v15350_v25 }
 0x638   :  { %v10074_v38 = vpop.f32.mrb[164].mxu1 }
 0x639   :  { %v10075_v40 = vpop.f32.mrb[165].mxu1 }
 0x63a   :  { %v10076_v14 = vadd.f32 %v10075_v40, %v10074_v38  ;;  %v10077_v62 = vpop.f32.mrb[166].mxu1  ;;  %v15357_v38 = vld [vmem:[#allocation38_spill] sm:$0xff] }
 0x63b   :  { %v10078_v20 = vpop.f32.mrb[167].mxu1  ;;  %v15358_v40 = vld [vmem:[#allocation46_spill] sm:$0xff] }
 0x63c   :  { %v14556_v4 = vadd.f32 %v10076_v14, %v14396_v28  ;;  %v10079_v50 = vadd.f32 %v10078_v20, %v10077_v62 }
 0x63d   :  { %7891 = vmatmul.mubr.bf16.gmra.mrb[208].mxu0 %v15351_v34  ;;  %8881 = vmatmul.mubr.bf16.gmra.mrb[16].mxu1 %v15351_v34 }
 0x63e   :  { %v14561_v54 = vadd.f32 %v10079_v50, %v14401_v24  ;;  %7900 = vmatprep.mubr.bf16.mxu0 %v15352_v23  ;;  %8888 = vmatprep.mubr.bf16.mxu1 %v15352_v23 }
 0x640   :  { %v10080_v59 = vpop.f32.mrb[168].mxu1 }
 0x641   :  { %v10081_v27 = vpop.f32.mrb[169].mxu1 }
 0x642   :  { %v10082_v46 = vadd.f32 %v10081_v27, %v10080_v59  ;;  %v10083_v45 = vpop.f32.mrb[170].mxu1  ;;  %v15359_v59 = vld [vmem:[#allocation40_spill] sm:$0xff] }
 0x643   :  { %v10084_v26 = vpop.f32.mrb[171].mxu1  ;;  %v15360_v27 = vld [vmem:[#allocation48_spill] sm:$0xff] }
 0x644   :  { %v14566_v28 = vadd.f32 %v10082_v46, %v14406_v16  ;;  %v10085_v8 = vadd.f32 %v10084_v26, %v10083_v45 }
 0x645   :  { %7901 = vmatmul.mubr.bf16.gmra.mrb[212].mxu0 %v15353_v19  ;;  %8889 = vmatmul.mubr.bf16.gmra.mrb[20].mxu1 %v15353_v19 }
 0x646   :  { %v14571_v24 = vadd.f32 %v10085_v8, %v14411_v10  ;;  %7910 = vmatprep.mubr.bf16.mxu0 %v15354_v55  ;;  %8896 = vmatprep.mubr.bf16.mxu1 %v15354_v55 }
 0x648   :  { %v10086_v36 = vpop.f32.mrb[172].mxu1 }
 0x649   :  { %v10087_v60 = vpop.f32.mrb[173].mxu1 }
 0x64a   :  { %v10088_v11 = vadd.f32 %v10087_v60, %v10086_v36  ;;  %v10089_v35 = vpop.f32.mrb[174].mxu1  ;;  %v15361_v36 = vld [vmem:[#allocation50_spill] sm:$0xff]  ;;  %v15362_v60 = vld [vmem:[#allocation56_spill] sm:$0xff] }
 0x64b   :  { %v10090_v49 = vpop.f32.mrb[175].mxu1 }
 0x64c   :  { %v14576_v16 = vadd.f32 %v10088_v11, %v14416_v58  ;;  %v10091_v2 = vadd.f32 %v10090_v49, %v10089_v35 }
 0x64d   :  { %7911 = vmatmul.mubr.bf16.gmra.mrb[216].mxu0 %v15355_v48  ;;  %8897 = vmatmul.mubr.bf16.gmra.mrb[24].mxu1 %v15355_v48 }
 0x64e   :  { %v14581_v10 = vadd.f32 %v10091_v2, %v14421_v30  ;;  %7920 = vmatprep.mubr.bf16.mxu0 %v15356_v63  ;;  %8904 = vmatprep.mubr.bf16.mxu1 %v15356_v63 }
 0x650   :  { %v10092_v33 = vpop.f32.mrb[176].mxu1 }
 0x651   :  { %v10093_v9 = vpop.f32.mrb[177].mxu1 }
 0x652   :  { %v10094_v43 = vadd.f32 %v10093_v9, %v10092_v33  ;;  %v10095_v44 = vpop.f32.mrb[178].mxu1  ;;  %v15363_v33 = vld [vmem:[#allocation52_spill] sm:$0xff] }
 0x653   :  { %v10096_v6 = vpop.f32.mrb[179].mxu1  ;;  %v15364_v9 = vld [vmem:[#allocation112_spill] sm:$0xff] }
 0x654   :  { %v14586_v58 = vadd.f32 %v10094_v43, %v14426_v5  ;;  %v10097_v25 = vadd.f32 %v10096_v6, %v10095_v44 }
 0x655   :  { %7921 = vmatmul.mubr.bf16.gmra.mrb[220].mxu0 %v15357_v38  ;;  %8905 = vmatmul.mubr.bf16.gmra.mrb[28].mxu1 %v15357_v38 }
 0x656   :  { %v14591_v30 = vadd.f32 %v10097_v25, %v14431_v53  ;;  %7930 = vmatprep.mubr.bf16.mxu0 %v15358_v40  ;;  %8912 = vmatprep.mubr.bf16.mxu1 %v15358_v40 }
 0x658   :  { %v10098_v14 = vpop.f32.mrb[180].mxu1 }
 0x659   :  { %v10099_v62 = vpop.f32.mrb[181].mxu1 }
 0x65a   :  { %v10100_v20 = vadd.f32 %v10099_v62, %v10098_v14  ;;  %v10101_v50 = vpop.f32.mrb[182].mxu1  ;;  %v15365_v14 = vld [vmem:[#allocation60_spill] sm:$0xff]  ;;  %v15366_v62 = vld [vmem:[#allocation113_spill] sm:$0xff] }
 0x65b   :  { %v10102_v34 = vpop.f32.mrb[183].mxu1 }
 0x65c   :  { %v14596_v5 = vadd.f32 %v10100_v20, %v14436_v32  ;;  %v10103_v23 = vadd.f32 %v10102_v34, %v10101_v50 }
 0x65d   :  { %7931 = vmatmul.mubr.bf16.gmra.mrb[224].mxu0 %v15359_v59  ;;  %8913 = vmatmul.mubr.bf16.gmra.mrb[32].mxu1 %v15359_v59 }
 0x65e   :  { %v14601_v53 = vadd.f32 %v10103_v23, %v14441_v51  ;;  %7940 = vmatprep.mubr.bf16.mxu0 %v15360_v27  ;;  %8920 = vmatprep.mubr.bf16.mxu1 %v15360_v27 }
 0x660   :  { %v10104_v46 = vpop.f32.mrb[184].mxu1 }
 0x661   :  { %v10105_v45 = vpop.f32.mrb[185].mxu1 }
 0x662   :  { %v10106_v26 = vadd.f32 %v10105_v45, %v10104_v46  ;;  %v10107_v8 = vpop.f32.mrb[186].mxu1  ;;  %v15367_v46 = vld [vmem:[#allocation70_spill] sm:$0xff] }
 0x663   :  { %v10108_v19 = vpop.f32.mrb[187].mxu1  ;;  %v15368_v45 = vld [vmem:[#allocation114_spill] sm:$0xff] }
 0x664   :  { %v14606_v32 = vadd.f32 %v10106_v26, %v14446_v41  ;;  %v10109_v55 = vadd.f32 %v10108_v19, %v10107_v8 }
 0x665   :  { %7941 = vmatmul.mubr.bf16.gmra.mrb[228].mxu0 %v15361_v36  ;;  %8921 = vmatmul.mubr.bf16.gmra.mrb[36].mxu1 %v15361_v36 }
 0x666   :  { %v14611_v51 = vadd.f32 %v10109_v55, %v14451_v1  ;;  %7950 = vmatprep.mubr.bf16.mxu0 %v15362_v60  ;;  %8928 = vmatprep.mubr.bf16.mxu1 %v15362_v60 }
 0x668   :  { %v10110_v11 = vpop.f32.mrb[188].mxu1 }
 0x669   :  { %v10111_v35 = vpop.f32.mrb[189].mxu1 }
 0x66a   :  { %v10112_v49 = vadd.f32 %v10111_v35, %v10110_v11  ;;  %v10113_v2 = vpop.f32.mrb[190].mxu1  ;;  %v15369_v11 = vld [vmem:[#allocation74_spill] sm:$0xff]  ;;  %v15370_v35 = vld [vmem:[#allocation115_spill] sm:$0xff] }
 0x66b   :  { %v10114_v48 = vpop.f32.mrb[191].mxu1 }
 0x66c   :  { %v14616_v41 = vadd.f32 %v10112_v49, %v14456_v31  ;;  %v10115_v63 = vadd.f32 %v10114_v48, %v10113_v2 }
 0x66d   :  { %7951 = vmatmul.mubr.bf16.gmra.mrb[232].mxu0 %v15363_v33  ;;  %8929 = vmatmul.mubr.bf16.gmra.mrb[40].mxu1 %v15363_v33 }
 0x66e   :  { %v14621_v1 = vadd.f32 %v10115_v63, %v14461_v18  ;;  %7960 = vmatprep.mubr.bf16.mxu0 %v15364_v9  ;;  %8936 = vmatprep.mubr.bf16.mxu1 %v15364_v9 }
 0x670   :  { %v10132_v43 = vpop.f32.mrb[192].mxu1 }
 0x671   :  { %v10133_v44 = vpop.f32.mrb[193].mxu1 }
 0x672   :  { %v10134_v6 = vadd.f32 %v10133_v44, %v10132_v43  ;;  %v10135_v25 = vpop.f32.mrb[194].mxu1  ;;  %v15371_v43 = vld [vmem:[#allocation78_spill] sm:$0xff]  ;;  %v15372_v44 = vld [vmem:[#allocation117_spill] sm:$0xff] }
 0x673   :  { %v10136_v38 = vpop.f32.mrb[195].mxu1 }
 0x674   :  { %v14626_v31 = vadd.f32 %v10134_v6, %v14466_v22  ;;  %v10137_v40 = vadd.f32 %v10136_v38, %v10135_v25 }
 0x675   :  { %7961 = vmatmul.mubr.bf16.gmra.mrb[236].mxu0 %v15365_v14  ;;  %8937 = vmatmul.mubr.bf16.gmra.mrb[44].mxu1 %v15365_v14 }
 0x676   :  { %v14631_v18 = vadd.f32 %v10137_v40, %v14471_v17  ;;  %7970 = vmatprep.mubr.bf16.mxu0 %v15366_v62  ;;  %8944 = vmatprep.mubr.bf16.mxu1 %v15366_v62 }
 0x678   :  { %v10138_v20 = vpop.f32.mrb[196].mxu1 }
 0x679   :  { %v10139_v50 = vpop.f32.mrb[197].mxu1 }
 0x67a   :  { %v10140_v34 = vadd.f32 %v10139_v50, %v10138_v20  ;;  %v10141_v23 = vpop.f32.mrb[198].mxu1  ;;  %v15373_v20 = vld [vmem:[#allocation82_spill] sm:$0xff] }
 0x67b   :  { %v10142_v59 = vpop.f32.mrb[199].mxu1 }
 0x67c   :  { %v14636_v22 = vadd.f32 %v10140_v34, %v14476_v39  ;;  %v10143_v27 = vadd.f32 %v10142_v59, %v10141_v23 }
 0x67d   :  { %7971 = vmatmul.mubr.bf16.gmra.mrb[240].mxu0 %v15367_v46  ;;  %8945 = vmatmul.mubr.bf16.gmra.mrb[48].mxu1 %v15367_v46 }
 0x67e   :  { %v14641_v17 = vadd.f32 %v10143_v27, %v14481_v47  ;;  %7980 = vmatprep.mubr.bf16.mxu0 %v15368_v45  ;;  %8952 = vmatprep.mubr.bf16.mxu1 %v15368_v45 }
 0x680   :  { %v10144_v26 = vpop.f32.mrb[200].mxu1 }
 0x681   :  { %v10145_v8 = vpop.f32.mrb[201].mxu1 }
 0x682   :  { %v10146_v19 = vadd.f32 %v10145_v8, %v10144_v26  ;;  %v10147_v55 = vpop.f32.mrb[202].mxu1 }
 0x683   :  { %v10148_v36 = vpop.f32.mrb[203].mxu1 }
 0x684   :  { %v14646_v39 = vadd.f32 %v10146_v19, %v14486_v61  ;;  %v10149_v60 = vadd.f32 %v10148_v36, %v10147_v55 }
 0x685   :  { %7981 = vmatmul.mubr.bf16.gmra.mrb[244].mxu0 %v15369_v11  ;;  %8953 = vmatmul.mubr.bf16.gmra.mrb[52].mxu1 %v15369_v11 }
 0x686   :  { %v14651_v47 = vadd.f32 %v10149_v60, %v14491_v3  ;;  %7990 = vmatprep.mubr.bf16.mxu0 %v15370_v35  ;;  %8960 = vmatprep.mubr.bf16.mxu1 %v15370_v35 }
 0x688   :  { %v10150_v49 = vpop.f32.mrb[204].mxu1 }
 0x689   :  { %v10151_v2 = vpop.f32.mrb[205].mxu1 }
 0x68a   :  { %v10152_v48 = vadd.f32 %v10151_v2, %v10150_v49  ;;  %v10153_v63 = vpop.f32.mrb[206].mxu1 }
 0x68b   :  { %v10154_v33 = vpop.f32.mrb[207].mxu1 }
 0x68c   :  { %v14656_v61 = vadd.f32 %v10152_v48, %v14496_v57  ;;  %v10155_v9 = vadd.f32 %v10154_v33, %v10153_v63 }
 0x68d   :  { %7991 = vmatmul.mubr.bf16.gmra.mrb[248].mxu0 %v15371_v43  ;;  %8961 = vmatmul.mubr.bf16.gmra.mrb[56].mxu1 %v15371_v43 }
 0x68e   :  { %v14661_v3 = vadd.f32 %v10155_v9, %v14501_v21  ;;  %8000 = vmatprep.mubr.bf16.mxu0 %v15372_v44  ;;  %8968 = vmatprep.mubr.bf16.mxu1 %v15372_v44 }
 0x690   :  { %v10156_v6 = vpop.f32.mrb[208].mxu1 }
 0x691   :  { %v10157_v25 = vpop.f32.mrb[209].mxu1 }
 0x692   :  { %v10158_v38 = vadd.f32 %v10157_v25, %v10156_v6  ;;  %v10159_v40 = vpop.f32.mrb[210].mxu1 }
 0x693   :  { %v10160_v14 = vpop.f32.mrb[211].mxu1 }
 0x694   :  { %v14666_v57 = vadd.f32 %v10158_v38, %v14506_v0  ;;  %v10161_v62 = vadd.f32 %v10160_v14, %v10159_v40 }
 0x695   :  { %8001 = vmatmul.mubr.bf16.gmra.mrb[252].mxu0 %v15373_v20  ;;  %8969 = vmatmul.mubr.bf16.gmra.mrb[60].mxu1 %v15373_v20 }
 0x696   :  { %v14671_v21 = vadd.f32 %v10161_v62, %v14511_v15 }
 0x698   :  { %v10162_v50 = vpop.f32.mrb[212].mxu1 }
 0x699   :  { %v10163_v34 = vpop.f32.mrb[213].mxu1 }
 0x69a   :  { %v10164_v23 = vadd.f32 %v10163_v34, %v10162_v50  ;;  %v10165_v59 = vpop.f32.mrb[214].mxu1 }
 0x69b   :  { %v10166_v27 = vpop.f32.mrb[215].mxu1 }
 0x69c   :  { %v14674_v46 = vadd.f32 %v10164_v23, %v14516_v56  ;;  %v10167_v45 = vadd.f32 %v10166_v27, %v10165_v59 }
 0x69e   :  { %v14677_v0 = vadd.f32 %v10167_v45, %v14521_v42 }
 0x6a0   :  { %v10168_v26 = vpop.f32.mrb[216].mxu1 }
 0x6a1   :  { %v10169_v8 = vpop.f32.mrb[217].mxu1 }
 0x6a2   :  { %v10170_v19 = vadd.f32 %v10169_v8, %v10168_v26  ;;  %v10171_v55 = vpop.f32.mrb[218].mxu1 }
 0x6a3   :  { %v10172_v36 = vpop.f32.mrb[219].mxu1 }
 0x6a4   :  { %v14680_v15 = vadd.f32 %v10170_v19, %v14526_v37  ;;  %v10173_v60 = vadd.f32 %v10172_v36, %v10171_v55 }
 0x6a6   :  { %v14683_v11 = vadd.f32 %v10173_v60, %v14531_v12 }
 0x6a8   :  { %v10174_v35 = vpop.f32.mrb[220].mxu1 }
 0x6a9   :  { %v10175_v49 = vpop.f32.mrb[221].mxu1 }
 0x6aa   :  { %v10176_v56 = vadd.f32 %v10175_v49, %v10174_v35  ;;  %v10177_v2 = vpop.f32.mrb[222].mxu1 }
 0x6ab   :  { %v10178_v48 = vpop.f32.mrb[223].mxu1 }
 0x6ac   :  { %v14686_v42 = vadd.f32 %v10176_v56, %v14536_v7  ;;  %v10179_v63 = vadd.f32 %v10178_v48, %v10177_v2 }
 0x6ae   :  { %v14689_v33 = vadd.f32 %v10179_v63, %v14541_v29 }
 0x6b0   :  { %v10180_v9 = vpop.f32.mrb[224].mxu1 }
 0x6b1   :  { %v10181_v43 = vpop.f32.mrb[225].mxu1 }
 0x6b2   :  { %v10182_v37 = vadd.f32 %v10181_v43, %v10180_v9  ;;  %v10183_v44 = vpop.f32.mrb[226].mxu1 }
 0x6b3   :  { %v10184_v6 = vpop.f32.mrb[227].mxu1 }
 0x6b4   :  { %v14692_v12 = vadd.f32 %v10182_v37, %v14546_v13  ;;  %v10185_v25 = vadd.f32 %v10184_v6, %v10183_v44 }
 0x6b6   :  { %v14695_v38 = vadd.f32 %v10185_v25, %v14551_v52 }
 0x6b8   :  { %v10186_v40 = vpop.f32.mrb[228].mxu1 }
 0x6b9   :  { %v10187_v14 = vpop.f32.mrb[229].mxu1 }
 0x6ba   :  { %v10188_v7 = vadd.f32 %v10187_v14, %v10186_v40  ;;  %v10189_v62 = vpop.f32.mrb[230].mxu1 }
 0x6bb   :  { %v10190_v20 = vpop.f32.mrb[231].mxu1 }
 0x6bc   :  { %v14698_v29 = vadd.f32 %v10188_v7, %v14556_v4  ;;  %v10191_v50 = vadd.f32 %v10190_v20, %v10189_v62 }
 0x6be   :  { %v14701_v34 = vadd.f32 %v10191_v50, %v14561_v54 }
 0x6c0   :  { %v10192_v23 = vpop.f32.mrb[232].mxu1 }
 0x6c1   :  { %v10193_v59 = vpop.f32.mrb[233].mxu1 }
 0x6c2   :  { %v10194_v13 = vadd.f32 %v10193_v59, %v10192_v23  ;;  %v10195_v27 = vpop.f32.mrb[234].mxu1 }
 0x6c3   :  { %v10196_v45 = vpop.f32.mrb[235].mxu1 }
 0x6c4   :  { %v14704_v52 = vadd.f32 %v10194_v13, %v14566_v28  ;;  %v10197_v26 = vadd.f32 %v10196_v45, %v10195_v27 }
 0x6c6   :  { %v14707_v8 = vadd.f32 %v10197_v26, %v14571_v24 }
 0x6c8   :  { %v10198_v19 = vpop.f32.mrb[236].mxu1 }
 0x6c9   :  { %v10199_v55 = vpop.f32.mrb[237].mxu1 }
 0x6ca   :  { %v10200_v4 = vadd.f32 %v10199_v55, %v10198_v19  ;;  %v10201_v36 = vpop.f32.mrb[238].mxu1  ;;  %v12322_v55 = vld [vmem:[#allocation12] sm:$0x7] }
 0x6cb   :  { %v10202_v60 = vpop.f32.mrb[239].mxu1 }
 0x6cc   :  { %v14710_v54 = vadd.f32 %v10200_v4, %v14576_v16  ;;  %v10203_v35 = vadd.f32 %v10202_v60, %v10201_v36  ;;  %v15374_v4 = vld [vmem:[#allocation32_spill] sm:$0xff]  ;;  %v15375_v60 = vld [vmem:[#allocation34_spill] sm:$0xff] }
 0x6cd   :  { %v14737_v36 = vrot.slane %v12322_v55, %v15374_v4 }
 0x6ce   :  { %v14713_v49 = vadd.f32 %v10203_v35, %v14581_v10  ;;  %v14743_v35 = vrot.slane %v12322_v55, %v15375_v60 }
 0x6d0   :  { %v10204_v56 = vpop.f32.mrb[240].mxu1 }
 0x6d1   :  { %v10205_v2 = vpop.f32.mrb[241].mxu1 }
 0x6d2   :  { %v10206_v28 = vadd.f32 %v10205_v2, %v10204_v56  ;;  %v10207_v48 = vpop.f32.mrb[242].mxu1 }
 0x6d3   :  { %v10208_v63 = vpop.f32.mrb[243].mxu1 }
 0x6d4   :  { %v14716_v24 = vadd.f32 %v10206_v28, %v14586_v58  ;;  %v10209_v9 = vadd.f32 %v10208_v63, %v10207_v48 }
 0x6d6   :  { %v14719_v43 = vadd.f32 %v10209_v9, %v14591_v30 }
 0x6d8   :  { %v10210_v37 = vpop.f32.mrb[244].mxu1 }
 0x6d9   :  { %v10211_v44 = vpop.f32.mrb[245].mxu1 }
 0x6da   :  { %v10212_v16 = vadd.f32 %v10211_v44, %v10210_v37  ;;  %v10213_v6 = vpop.f32.mrb[246].mxu1 }
 0x6db   :  { %v10214_v25 = vpop.f32.mrb[247].mxu1 }
 0x6dc   :  { %v14722_v10 = vadd.f32 %v10212_v16, %v14596_v5  ;;  %v10215_v40 = vadd.f32 %v10214_v25, %v10213_v6 }
 0x6de   :  { %v14725_v14 = vadd.f32 %v10215_v40, %v14601_v53 }
 0x6e0   :  { %v10216_v7 = vpop.f32.mrb[248].mxu1 }
 0x6e1   :  { %v10217_v62 = vpop.f32.mrb[249].mxu1 }
 0x6e2   :  { %v10218_v58 = vadd.f32 %v10217_v62, %v10216_v7  ;;  %v10219_v20 = vpop.f32.mrb[250].mxu1 }
 0x6e3   :  { %v10220_v50 = vpop.f32.mrb[251].mxu1 }
 0x6e4   :  { %v14728_v30 = vadd.f32 %v10218_v58, %v14606_v32  ;;  %v10221_v23 = vadd.f32 %v10220_v50, %v10219_v20 }
 0x6e6   :  { %v14731_v59 = vadd.f32 %v10221_v23, %v14611_v51 }
 0x6e8   :  { %v10222_v13 = vpop.f32.mrb[252].mxu1 }
 0x6e9   :  { %v10223_v27 = vpop.f32.mrb[253].mxu1 }
 0x6ea   :  { %v10224_v5 = vadd.f32 %v10223_v27, %v10222_v13  ;;  %v10225_v45 = vpop.f32.mrb[254].mxu1 }
 0x6eb   :  { %v10226_v26 = vpop.f32.mrb[255].mxu1 }
 0x6ec   :  { %v14734_v53 = vadd.f32 %v10224_v5, %v14616_v41  ;;  %v10227_v19 = vadd.f32 %v10226_v26, %v10225_v45 }
 0x6ee   :  { %v14740_v32 = vadd.f32 %v10227_v19, %v14621_v1 }
 0x6f0   :  { %v7852_v51 = vpop.f32.mrb[192].mxu0  ;;  %v10244_v56 = vpop.f32.mrb[0].mxu1 }
 0x6f1   :  { %v10724_v2 = vadd.f32 %v7852_v51, %v14737_v36  ;;  %v7854_v28 = vpop.f32.mrb[193].mxu0  ;;  %v10245_v48 = vpop.f32.mrb[1].mxu1 }
 0x6f2   :  { %v10725_v41 = vadd.f32 %v7854_v28, %v14743_v35  ;;  %v10246_v63 = vadd.f32 %v10245_v48, %v10244_v56  ;;  %v7856_v9 = vpop.f32.mrb[194].mxu0  ;;  %v10247_v37 = vpop.f32.mrb[2].mxu1 }
 0x6f3   :  { %8977 = vst [vmem:[#allocation13] sm:$0xff] %v10724_v2  ;;  %v10726_v44 = vadd.f32 %v7856_v9, %v14737_v36  ;;  %v7858_v16 = vpop.f32.mrb[195].mxu0  ;;  %v10248_v1 = vpop.f32.mrb[3].mxu1 }
 0x6f4   :  { %8978 = vst [vmem:[#allocation13 + $0x8] sm:$0xff] %v10725_v41  ;;  %v8851_v6 = vadd.f32 %v10246_v63, %v14626_v31  ;;  %v10727_v25 = vadd.f32 %v7858_v16, %v14743_v35  ;;  %v10249_v40 = vadd.f32 %v10248_v1, %v10247_v37 }
 0x6f5   :  { %8980 = vst [vmem:[#allocation13 + $0x18] sm:$0xff] %v10726_v44 }
 0x6f6   :  { %8979 = vst [vmem:[#allocation13 + $0x10] sm:$0xff] %v8851_v6  ;;  %8981 = vst [vmem:[#allocation13 + $0x20] sm:$0xff] %v10727_v25  ;;  %v8854_v7 = vadd.f32 %v10249_v40, %v14631_v18 }
 0x6f8   :  { %8982 = vst [vmem:[#allocation13 + $0x28] sm:$0xff] %v8854_v7  ;;  %v7862_v62 = vpop.f32.mrb[196].mxu0  ;;  %v10250_v58 = vpop.f32.mrb[4].mxu1 }
 0x6f9   :  { %v10728_v20 = vadd.f32 %v7862_v62, %v14737_v36  ;;  %v7864_v50 = vpop.f32.mrb[197].mxu0  ;;  %v10251_v23 = vpop.f32.mrb[5].mxu1 }
 0x6fa   :  { %v10729_v13 = vadd.f32 %v7864_v50, %v14743_v35  ;;  %v10252_v27 = vadd.f32 %v10251_v23, %v10250_v58  ;;  %v7866_v5 = vpop.f32.mrb[198].mxu0  ;;  %v10253_v31 = vpop.f32.mrb[6].mxu1 }
 0x6fb   :  { %8983 = vst [vmem:[#allocation13 + $0x30] sm:$0xff] %v10728_v20  ;;  %v10730_v45 = vadd.f32 %v7866_v5, %v14737_v36  ;;  %v7868_v26 = vpop.f32.mrb[199].mxu0  ;;  %v10254_v19 = vpop.f32.mrb[7].mxu1 }
 0x6fc   :  { %8984 = vst [vmem:[#allocation13 + $0x38] sm:$0xff] %v10729_v13  ;;  %v8859_v18 = vadd.f32 %v10252_v27, %v14636_v22  ;;  %v10731_v55 = vadd.f32 %v7868_v26, %v14743_v35  ;;  %v10255_v4 = vadd.f32 %v10254_v19, %v10253_v31 }
 0x6fd   :  { %8986 = vst [vmem:[#allocation13 + $0x48] sm:$0xff] %v10730_v45 }
 0x6fe   :  { %8985 = vst [vmem:[#allocation13 + $0x40] sm:$0xff] %v8859_v18  ;;  %8987 = vst [vmem:[#allocation13 + $0x50] sm:$0xff] %v10731_v55  ;;  %v8862_v60 = vadd.f32 %v10255_v4, %v14641_v17 }
 0x700   :  { %8988 = vst [vmem:[#allocation13 + $0x58] sm:$0xff] %v8862_v60  ;;  %v7872_v51 = vpop.f32.mrb[200].mxu0  ;;  %v10256_v56 = vpop.f32.mrb[8].mxu1 }
 0x701   :  { %v10732_v2 = vadd.f32 %v7872_v51, %v14737_v36  ;;  %v7874_v28 = vpop.f32.mrb[201].mxu0  ;;  %v10257_v48 = vpop.f32.mrb[9].mxu1 }
 0x702   :  { %v10733_v41 = vadd.f32 %v7874_v28, %v14743_v35  ;;  %v10258_v63 = vadd.f32 %v10257_v48, %v10256_v56  ;;  %v7876_v9 = vpop.f32.mrb[202].mxu0  ;;  %v10259_v22 = vpop.f32.mrb[10].mxu1 }
 0x703   :  { %8989 = vst [vmem:[#allocation13 + $0x60] sm:$0xff] %v10732_v2  ;;  %v10734_v37 = vadd.f32 %v7876_v9, %v14737_v36  ;;  %v7878_v44 = vpop.f32.mrb[203].mxu0  ;;  %v10260_v16 = vpop.f32.mrb[11].mxu1 }
 0x704   :  { %8990 = vst [vmem:[#allocation13 + $0x68] sm:$0xff] %v10733_v41  ;;  %v8867_v17 = vadd.f32 %v10258_v63, %v14646_v39  ;;  %v10735_v1 = vadd.f32 %v7878_v44, %v14743_v35  ;;  %v10261_v6 = vadd.f32 %v10260_v16, %v10259_v22 }
 0x705   :  { %8992 = vst [vmem:[#allocation13 + $0x78] sm:$0xff] %v10734_v37 }
 0x706   :  { %8991 = vst [vmem:[#allocation13 + $0x70] sm:$0xff] %v8867_v17  ;;  %8993 = vst [vmem:[#allocation13 + $0x80] sm:$0xff] %v10735_v1  ;;  %v8870_v25 = vadd.f32 %v10261_v6, %v14651_v47 }
 0x708   :  { %8994 = vst [vmem:[#allocation13 + $0x88] sm:$0xff] %v8870_v25  ;;  %v7882_v40 = vpop.f32.mrb[204].mxu0  ;;  %v10262_v7 = vpop.f32.mrb[12].mxu1 }
 0x709   :  { %v10736_v62 = vadd.f32 %v7882_v40, %v14737_v36  ;;  %v7884_v58 = vpop.f32.mrb[205].mxu0  ;;  %v10263_v20 = vpop.f32.mrb[13].mxu1 }
 0x70a   :  { %v10737_v50 = vadd.f32 %v7884_v58, %v14743_v35  ;;  %v10264_v23 = vadd.f32 %v10263_v20, %v10262_v7  ;;  %v7886_v13 = vpop.f32.mrb[206].mxu0  ;;  %v10265_v39 = vpop.f32.mrb[14].mxu1 }
 0x70b   :  { %8995 = vst [vmem:[#allocation13 + $0x90] sm:$0xff] %v10736_v62  ;;  %v10738_v27 = vadd.f32 %v7886_v13, %v14737_v36  ;;  %v7888_v5 = vpop.f32.mrb[207].mxu0  ;;  %v10266_v31 = vpop.f32.mrb[15].mxu1 }
 0x70c   :  { %8996 = vst [vmem:[#allocation13 + $0x98] sm:$0xff] %v10737_v50  ;;  %v8875_v47 = vadd.f32 %v10264_v23, %v14656_v61  ;;  %v10739_v45 = vadd.f32 %v7888_v5, %v14743_v35  ;;  %v10267_v26 = vadd.f32 %v10266_v31, %v10265_v39 }
 0x70d   :  { %8998 = vst [vmem:[#allocation13 + $0xa8] sm:$0xff] %v10738_v27 }
 0x70e   :  { %8997 = vst [vmem:[#allocation13 + $0xa0] sm:$0xff] %v8875_v47  ;;  %8999 = vst [vmem:[#allocation13 + $0xb0] sm:$0xff] %v10739_v45  ;;  %v8878_v19 = vadd.f32 %v10267_v26, %v14661_v3 }
 0x710   :  { %9000 = vst [vmem:[#allocation13 + $0xb8] sm:$0xff] %v8878_v19  ;;  %v7892_v18 = vpop.f32.mrb[208].mxu0  ;;  %v10268_v55 = vpop.f32.mrb[16].mxu1 }
 0x711   :  { %v10740_v4 = vadd.f32 %v7892_v18, %v14737_v36  ;;  %v7894_v60 = vpop.f32.mrb[209].mxu0  ;;  %v10269_v51 = vpop.f32.mrb[17].mxu1 }
 0x712   :  { %v10741_v56 = vadd.f32 %v7894_v60, %v14743_v35  ;;  %v10270_v2 = vadd.f32 %v10269_v51, %v10268_v55  ;;  %v7896_v28 = vpop.f32.mrb[210].mxu0  ;;  %v10271_v61 = vpop.f32.mrb[18].mxu1 }
 0x713   :  { %9001 = vst [vmem:[#allocation13 + $0xc0] sm:$0xff] %v10740_v4  ;;  %v10742_v48 = vadd.f32 %v7896_v28, %v14737_v36  ;;  %v7898_v41 = vpop.f32.mrb[211].mxu0  ;;  %v10272_v63 = vpop.f32.mrb[19].mxu1 }
 0x714   :  { %9002 = vst [vmem:[#allocation13 + $0xc8] sm:$0xff] %v10741_v56  ;;  %v8883_v3 = vadd.f32 %v10270_v2, %v14666_v57  ;;  %v10743_v9 = vadd.f32 %v7898_v41, %v14743_v35  ;;  %v10273_v22 = vadd.f32 %v10272_v63, %v10271_v61 }
 0x715   :  { %9004 = vst [vmem:[#allocation13 + $0xd8] sm:$0xff] %v10742_v48 }
 0x716   :  { %9003 = vst [vmem:[#allocation13 + $0xd0] sm:$0xff] %v8883_v3  ;;  %9005 = vst [vmem:[#allocation13 + $0xe0] sm:$0xff] %v10743_v9  ;;  %v8886_v37 = vadd.f32 %v10273_v22, %v14671_v21 }
 0x718   :  { %9006 = vst [vmem:[#allocation13 + $0xe8] sm:$0xff] %v8886_v37  ;;  %v7902_v44 = vpop.f32.mrb[212].mxu0  ;;  %v10274_v16 = vpop.f32.mrb[20].mxu1 }
 0x719   :  { %v10744_v17 = vadd.f32 %v7902_v44, %v14737_v36  ;;  %v7904_v1 = vpop.f32.mrb[213].mxu0  ;;  %v10275_v6 = vpop.f32.mrb[21].mxu1 }
 0x71a   :  { %v10745_v25 = vadd.f32 %v7904_v1, %v14743_v35  ;;  %v10276_v40 = vadd.f32 %v10275_v6, %v10274_v16  ;;  %v7906_v7 = vpop.f32.mrb[214].mxu0  ;;  %v10277_v57 = vpop.f32.mrb[22].mxu1 }
 0x71b   :  { %9007 = vst [vmem:[#allocation13 + $0xf0] sm:$0xff] %v10744_v17  ;;  %v10746_v62 = vadd.f32 %v7906_v7, %v14737_v36  ;;  %v7908_v58 = vpop.f32.mrb[215].mxu0  ;;  %v10278_v20 = vpop.f32.mrb[23].mxu1 }
 0x71c   :  { %9008 = vst [vmem:[#allocation13 + $0xf8] sm:$0xff] %v10745_v25  ;;  %v8891_v21 = vadd.f32 %v10276_v40, %v14674_v46  ;;  %v10747_v50 = vadd.f32 %v7908_v58, %v14743_v35  ;;  %v10279_v23 = vadd.f32 %v10278_v20, %v10277_v57 }
 0x71d   :  { %9010 = vst [vmem:[#allocation13 + $0x108] sm:$0xff] %v10746_v62 }
 0x71e   :  { %9009 = vst [vmem:[#allocation13 + $0x100] sm:$0xff] %v8891_v21  ;;  %9011 = vst [vmem:[#allocation13 + $0x110] sm:$0xff] %v10747_v50  ;;  %v8894_v13 = vadd.f32 %v10279_v23, %v14677_v0 }
 0x720   :  { %9012 = vst [vmem:[#allocation13 + $0x118] sm:$0xff] %v8894_v13  ;;  %v7912_v39 = vpop.f32.mrb[216].mxu0  ;;  %v10280_v27 = vpop.f32.mrb[24].mxu1 }
 0x721   :  { %v10748_v5 = vadd.f32 %v7912_v39, %v14737_v36  ;;  %v7914_v31 = vpop.f32.mrb[217].mxu0  ;;  %v10281_v47 = vpop.f32.mrb[25].mxu1 }
 0x722   :  { %v10749_v45 = vadd.f32 %v7914_v31, %v14743_v35  ;;  %v10282_v26 = vadd.f32 %v10281_v47, %v10280_v27  ;;  %v7916_v19 = vpop.f32.mrb[218].mxu0  ;;  %v10283_v46 = vpop.f32.mrb[26].mxu1 }
 0x723   :  { %9013 = vst [vmem:[#allocation13 + $0x120] sm:$0xff] %v10748_v5  ;;  %v10750_v18 = vadd.f32 %v7916_v19, %v14737_v36  ;;  %v7918_v55 = vpop.f32.mrb[219].mxu0  ;;  %v10284_v4 = vpop.f32.mrb[27].mxu1 }
 0x724   :  { %9014 = vst [vmem:[#allocation13 + $0x128] sm:$0xff] %v10749_v45  ;;  %v8899_v0 = vadd.f32 %v10282_v26, %v14680_v15  ;;  %v10751_v60 = vadd.f32 %v7918_v55, %v14743_v35  ;;  %v10285_v51 = vadd.f32 %v10284_v4, %v10283_v46 }
 0x725   :  { %9016 = vst [vmem:[#allocation13 + $0x138] sm:$0xff] %v10750_v18 }
 0x726   :  { %9015 = vst [vmem:[#allocation13 + $0x130] sm:$0xff] %v8899_v0  ;;  %9017 = vst [vmem:[#allocation13 + $0x140] sm:$0xff] %v10751_v60  ;;  %v8902_v56 = vadd.f32 %v10285_v51, %v14683_v11 }
 0x728   :  { %9018 = vst [vmem:[#allocation13 + $0x148] sm:$0xff] %v8902_v56  ;;  %v7922_v2 = vpop.f32.mrb[220].mxu0  ;;  %v10286_v28 = vpop.f32.mrb[28].mxu1 }
 0x729   :  { %v10752_v61 = vadd.f32 %v7922_v2, %v14737_v36  ;;  %v7924_v48 = vpop.f32.mrb[221].mxu0  ;;  %v10287_v41 = vpop.f32.mrb[29].mxu1 }
 0x72a   :  { %v10753_v63 = vadd.f32 %v7924_v48, %v14743_v35  ;;  %v10288_v3 = vadd.f32 %v10287_v41, %v10286_v28  ;;  %v7926_v9 = vpop.f32.mrb[222].mxu0  ;;  %v10289_v15 = vpop.f32.mrb[30].mxu1 }
 0x72b   :  { %9019 = vst [vmem:[#allocation13 + $0x150] sm:$0xff] %v10752_v61  ;;  %v10754_v22 = vadd.f32 %v7926_v9, %v14737_v36  ;;  %v7928_v37 = vpop.f32.mrb[223].mxu0  ;;  %v10290_v44 = vpop.f32.mrb[31].mxu1 }
 0x72c   :  { %9020 = vst [vmem:[#allocation13 + $0x158] sm:$0xff] %v10753_v63  ;;  %v8907_v11 = vadd.f32 %v10288_v3, %v14686_v42  ;;  %v10755_v16 = vadd.f32 %v7928_v37, %v14743_v35  ;;  %v10291_v17 = vadd.f32 %v10290_v44, %v10289_v15 }
 0x72d   :  { %9022 = vst [vmem:[#allocation13 + $0x168] sm:$0xff] %v10754_v22 }
 0x72e   :  { %9021 = vst [vmem:[#allocation13 + $0x160] sm:$0xff] %v8907_v11  ;;  %9023 = vst [vmem:[#allocation13 + $0x170] sm:$0xff] %v10755_v16  ;;  %v8910_v1 = vadd.f32 %v10291_v17, %v14689_v33 }
 0x730   :  { %9024 = vst [vmem:[#allocation13 + $0x178] sm:$0xff] %v8910_v1  ;;  %v7932_v6 = vpop.f32.mrb[224].mxu0  ;;  %v10292_v25 = vpop.f32.mrb[32].mxu1 }
 0x731   :  { %v10756_v40 = vadd.f32 %v7932_v6, %v14737_v36  ;;  %v7934_v7 = vpop.f32.mrb[225].mxu0  ;;  %v10293_v57 = vpop.f32.mrb[33].mxu1 }
 0x732   :  { %v10757_v62 = vadd.f32 %v7934_v7, %v14743_v35  ;;  %v10294_v58 = vadd.f32 %v10293_v57, %v10292_v25  ;;  %v7936_v20 = vpop.f32.mrb[226].mxu0  ;;  %v10295_v42 = vpop.f32.mrb[34].mxu1 }
 0x733   :  { %9025 = vst [vmem:[#allocation13 + $0x180] sm:$0xff] %v10756_v40  ;;  %v10758_v21 = vadd.f32 %v7936_v20, %v14737_v36  ;;  %v7938_v50 = vpop.f32.mrb[227].mxu0  ;;  %v10296_v23 = vpop.f32.mrb[35].mxu1 }
 0x734   :  { %9026 = vst [vmem:[#allocation13 + $0x188] sm:$0xff] %v10757_v62  ;;  %v8915_v33 = vadd.f32 %v10294_v58, %v14692_v12  ;;  %v10759_v13 = vadd.f32 %v7938_v50, %v14743_v35  ;;  %v10297_v39 = vadd.f32 %v10296_v23, %v10295_v42 }
 0x735   :  { %9028 = vst [vmem:[#allocation13 + $0x198] sm:$0xff] %v10758_v21 }
 0x736   :  { %9027 = vst [vmem:[#allocation13 + $0x190] sm:$0xff] %v8915_v33  ;;  %9029 = vst [vmem:[#allocation13 + $0x1a0] sm:$0xff] %v10759_v13  ;;  %v8918_v27 = vadd.f32 %v10297_v39, %v14695_v38 }
 0x738   :  { %9030 = vst [vmem:[#allocation13 + $0x1a8] sm:$0xff] %v8918_v27  ;;  %v7942_v5 = vpop.f32.mrb[228].mxu0  ;;  %v10298_v31 = vpop.f32.mrb[36].mxu1 }
 0x739   :  { %v10760_v47 = vadd.f32 %v7942_v5, %v14737_v36  ;;  %v7944_v45 = vpop.f32.mrb[229].mxu0  ;;  %v10299_v26 = vpop.f32.mrb[37].mxu1 }
 0x73a   :  { %v10761_v19 = vadd.f32 %v7944_v45, %v14743_v35  ;;  %v10300_v46 = vadd.f32 %v10299_v26, %v10298_v31  ;;  %v7946_v18 = vpop.f32.mrb[230].mxu0  ;;  %v10301_v12 = vpop.f32.mrb[38].mxu1 }
 0x73b   :  { %9031 = vst [vmem:[#allocation13 + $0x1b0] sm:$0xff] %v10760_v47  ;;  %v10762_v55 = vadd.f32 %v7946_v18, %v14737_v36  ;;  %v7948_v4 = vpop.f32.mrb[231].mxu0  ;;  %v10302_v0 = vpop.f32.mrb[39].mxu1 }
 0x73c   :  { %9032 = vst [vmem:[#allocation13 + $0x1b8] sm:$0xff] %v10761_v19  ;;  %v8923_v38 = vadd.f32 %v10300_v46, %v14698_v29  ;;  %v10763_v60 = vadd.f32 %v7948_v4, %v14743_v35  ;;  %v10303_v51 = vadd.f32 %v10302_v0, %v10301_v12 }
 0x73d   :  { %9034 = vst [vmem:[#allocation13 + $0x1c8] sm:$0xff] %v10762_v55 }
 0x73e   :  { %9033 = vst [vmem:[#allocation13 + $0x1c0] sm:$0xff] %v8923_v38  ;;  %9035 = vst [vmem:[#allocation13 + $0x1d0] sm:$0xff] %v10763_v60  ;;  %v8926_v56 = vadd.f32 %v10303_v51, %v14701_v34 }
 0x740   :  { %9036 = vst [vmem:[#allocation13 + $0x1d8] sm:$0xff] %v8926_v56  ;;  %v7952_v2 = vpop.f32.mrb[232].mxu0  ;;  %v10304_v28 = vpop.f32.mrb[40].mxu1 }
 0x741   :  { %v10764_v61 = vadd.f32 %v7952_v2, %v14737_v36  ;;  %v7954_v48 = vpop.f32.mrb[233].mxu0  ;;  %v10305_v41 = vpop.f32.mrb[41].mxu1 }
 0x742   :  { %v10765_v63 = vadd.f32 %v7954_v48, %v14743_v35  ;;  %v10306_v3 = vadd.f32 %v10305_v41, %v10304_v28  ;;  %v7956_v9 = vpop.f32.mrb[234].mxu0  ;;  %v10307_v29 = vpop.f32.mrb[42].mxu1 }
 0x743   :  { %9037 = vst [vmem:[#allocation13 + $0x1e0] sm:$0xff] %v10764_v61  ;;  %v10766_v15 = vadd.f32 %v7956_v9, %v14737_v36  ;;  %v7958_v22 = vpop.f32.mrb[235].mxu0  ;;  %v10308_v37 = vpop.f32.mrb[43].mxu1 }
 0x744   :  { %9038 = vst [vmem:[#allocation13 + $0x1e8] sm:$0xff] %v10765_v63  ;;  %v8931_v34 = vadd.f32 %v10306_v3, %v14704_v52  ;;  %v10767_v44 = vadd.f32 %v7958_v22, %v14743_v35  ;;  %v10309_v11 = vadd.f32 %v10308_v37, %v10307_v29 }
 0x745   :  { %9040 = vst [vmem:[#allocation13 + $0x1f8] sm:$0xff] %v10766_v15 }
 0x746   :  { %9039 = vst [vmem:[#allocation13 + $0x1f0] sm:$0xff] %v8931_v34  ;;  %9041 = vst [vmem:[#allocation13 + $0x200] sm:$0xff] %v10767_v44  ;;  %v8934_v16 = vadd.f32 %v10309_v11, %v14707_v8 }
 0x748   :  { %9042 = vst [vmem:[#allocation13 + $0x208] sm:$0xff] %v8934_v16  ;;  %v7962_v17 = vpop.f32.mrb[236].mxu0  ;;  %v10310_v1 = vpop.f32.mrb[44].mxu1 }
 0x749   :  { %v10768_v6 = vadd.f32 %v7962_v17, %v14737_v36  ;;  %v7964_v25 = vpop.f32.mrb[237].mxu0  ;;  %v10311_v40 = vpop.f32.mrb[45].mxu1 }
 0x74a   :  { %v10769_v7 = vadd.f32 %v7964_v25, %v14743_v35  ;;  %v10312_v57 = vadd.f32 %v10311_v40, %v10310_v1  ;;  %v7966_v62 = vpop.f32.mrb[238].mxu0  ;;  %v10313_v52 = vpop.f32.mrb[46].mxu1 }
 0x74b   :  { %9043 = vst [vmem:[#allocation13 + $0x210] sm:$0xff] %v10768_v6  ;;  %v10770_v58 = vadd.f32 %v7966_v62, %v14737_v36  ;;  %v7968_v20 = vpop.f32.mrb[239].mxu0  ;;  %v10314_v42 = vpop.f32.mrb[47].mxu1 }
 0x74c   :  { %9044 = vst [vmem:[#allocation13 + $0x218] sm:$0xff] %v10769_v7  ;;  %v8939_v8 = vadd.f32 %v10312_v57, %v14710_v54  ;;  %v10771_v21 = vadd.f32 %v7968_v20, %v14743_v35  ;;  %v10315_v50 = vadd.f32 %v10314_v42, %v10313_v52 }
 0x74d   :  { %9046 = vst [vmem:[#allocation13 + $0x228] sm:$0xff] %v10770_v58 }
 0x74e   :  { %9045 = vst [vmem:[#allocation13 + $0x220] sm:$0xff] %v8939_v8  ;;  %9047 = vst [vmem:[#allocation13 + $0x230] sm:$0xff] %v10771_v21  ;;  %v8942_v23 = vadd.f32 %v10315_v50, %v14713_v49 }
 0x750   :  { %9048 = vst [vmem:[#allocation13 + $0x238] sm:$0xff] %v8942_v23  ;;  %v7972_v33 = vpop.f32.mrb[240].mxu0  ;;  %v10316_v13 = vpop.f32.mrb[48].mxu1 }
 0x751   :  { %v10772_v39 = vadd.f32 %v7972_v33, %v14737_v36  ;;  %v7974_v27 = vpop.f32.mrb[241].mxu0  ;;  %v10317_v5 = vpop.f32.mrb[49].mxu1 }
 0x752   :  { %v10773_v31 = vadd.f32 %v7974_v27, %v14743_v35  ;;  %v10318_v47 = vadd.f32 %v10317_v5, %v10316_v13  ;;  %v7976_v45 = vpop.f32.mrb[242].mxu0  ;;  %v10319_v54 = vpop.f32.mrb[50].mxu1 }
 0x753   :  { %9049 = vst [vmem:[#allocation13 + $0x240] sm:$0xff] %v10772_v39  ;;  %v10774_v26 = vadd.f32 %v7976_v45, %v14737_v36  ;;  %v7978_v19 = vpop.f32.mrb[243].mxu0  ;;  %v10320_v46 = vpop.f32.mrb[51].mxu1 }
 0x754   :  { %9050 = vst [vmem:[#allocation13 + $0x248] sm:$0xff] %v10773_v31  ;;  %v8947_v49 = vadd.f32 %v10318_v47, %v14716_v24  ;;  %v10775_v18 = vadd.f32 %v7978_v19, %v14743_v35  ;;  %v10321_v12 = vadd.f32 %v10320_v46, %v10319_v54 }
 0x755   :  { %9052 = vst [vmem:[#allocation13 + $0x258] sm:$0xff] %v10774_v26 }
 0x756   :  { %9051 = vst [vmem:[#allocation13 + $0x250] sm:$0xff] %v8947_v49  ;;  %9053 = vst [vmem:[#allocation13 + $0x260] sm:$0xff] %v10775_v18  ;;  %v8950_v55 = vadd.f32 %v10321_v12, %v14719_v43 }
 0x758   :  { %9054 = vst [vmem:[#allocation13 + $0x268] sm:$0xff] %v8950_v55  ;;  %v7982_v4 = vpop.f32.mrb[244].mxu0  ;;  %v10322_v0 = vpop.f32.mrb[52].mxu1 }
 0x759   :  { %v10776_v38 = vadd.f32 %v7982_v4, %v14737_v36  ;;  %v7984_v60 = vpop.f32.mrb[245].mxu0  ;;  %v10323_v51 = vpop.f32.mrb[53].mxu1 }
 0x75a   :  { %v10777_v56 = vadd.f32 %v7984_v60, %v14743_v35  ;;  %v10324_v2 = vadd.f32 %v10323_v51, %v10322_v0  ;;  %v7986_v28 = vpop.f32.mrb[246].mxu0  ;;  %v10325_v24 = vpop.f32.mrb[54].mxu1 }
 0x75b   :  { %9055 = vst [vmem:[#allocation13 + $0x270] sm:$0xff] %v10776_v38  ;;  %v10778_v61 = vadd.f32 %v7986_v28, %v14737_v36  ;;  %v7988_v48 = vpop.f32.mrb[247].mxu0  ;;  %v10326_v41 = vpop.f32.mrb[55].mxu1 }
 0x75c   :  { %9056 = vst [vmem:[#allocation13 + $0x278] sm:$0xff] %v10777_v56  ;;  %v8955_v43 = vadd.f32 %v10324_v2, %v14722_v10  ;;  %v10779_v63 = vadd.f32 %v7988_v48, %v14743_v35  ;;  %v10327_v3 = vadd.f32 %v10326_v41, %v10325_v24 }
 0x75d   :  { %9058 = vst [vmem:[#allocation13 + $0x288] sm:$0xff] %v10778_v61 }
 0x75e   :  { %9057 = vst [vmem:[#allocation13 + $0x280] sm:$0xff] %v8955_v43  ;;  %9059 = vst [vmem:[#allocation13 + $0x290] sm:$0xff] %v10779_v63  ;;  %v8958_v9 = vadd.f32 %v10327_v3, %v14725_v14 }
 0x760   :  { %9060 = vst [vmem:[#allocation13 + $0x298] sm:$0xff] %v8958_v9  ;;  %v7992_v29 = vpop.f32.mrb[248].mxu0  ;;  %v10328_v15 = vpop.f32.mrb[56].mxu1 }
 0x761   :  { %v10780_v22 = vadd.f32 %v7992_v29, %v14737_v36  ;;  %v7994_v37 = vpop.f32.mrb[249].mxu0  ;;  %v10329_v34 = vpop.f32.mrb[57].mxu1 }
 0x762   :  { %v10781_v44 = vadd.f32 %v7994_v37, %v14743_v35  ;;  %v10330_v11 = vadd.f32 %v10329_v34, %v10328_v15  ;;  %v7996_v16 = vpop.f32.mrb[250].mxu0  ;;  %v10331_v10 = vpop.f32.mrb[58].mxu1 }
 0x763   :  { %9061 = vst [vmem:[#allocation13 + $0x2a0] sm:$0xff] %v10780_v22  ;;  %v10782_v17 = vadd.f32 %v7996_v16, %v14737_v36  ;;  %v7998_v1 = vpop.f32.mrb[251].mxu0  ;;  %v10332_v6 = vpop.f32.mrb[59].mxu1 }
 0x764   :  { %9062 = vst [vmem:[#allocation13 + $0x2a8] sm:$0xff] %v10781_v44  ;;  %v8963_v14 = vadd.f32 %v10330_v11, %v14728_v30  ;;  %v10783_v25 = vadd.f32 %v7998_v1, %v14743_v35  ;;  %v10333_v40 = vadd.f32 %v10332_v6, %v10331_v10 }
 0x765   :  { %9064 = vst [vmem:[#allocation13 + $0x2b8] sm:$0xff] %v10782_v17 }
 0x766   :  { %9063 = vst [vmem:[#allocation13 + $0x2b0] sm:$0xff] %v8963_v14  ;;  %9065 = vst [vmem:[#allocation13 + $0x2c0] sm:$0xff] %v10783_v25  ;;  %v8966_v7 = vadd.f32 %v10333_v40, %v14731_v59 }
 0x768   :  { %9066 = vst [vmem:[#allocation13 + $0x2c8] sm:$0xff] %v8966_v7  ;;  %v8002_v57 = vpop.f32.mrb[252].mxu0  ;;  %v10334_v62 = vpop.f32.mrb[60].mxu1 }
 0x769   :  { %v10784_v52 = vadd.f32 %v8002_v57, %v14737_v36  ;;  %v8004_v58 = vpop.f32.mrb[253].mxu0  ;;  %v10335_v20 = vpop.f32.mrb[61].mxu1 }
 0x76a   :  { %v10785_v42 = vadd.f32 %v8004_v58, %v14743_v35  ;;  %v10336_v8 = vadd.f32 %v10335_v20, %v10334_v62  ;;  %v8006_v21 = vpop.f32.mrb[254].mxu0  ;;  %v10337_v30 = vpop.f32.mrb[62].mxu1 }
 0x76b   :  { %9067 = vst [vmem:[#allocation13 + $0x2d0] sm:$0xff] %v10784_v52  ;;  %v10786_v50 = vadd.f32 %v8006_v21, %v14737_v36  ;;  %v8008_v23 = vpop.f32.mrb[255].mxu0  ;;  %v10338_v33 = vpop.f32.mrb[63].mxu1 }
 0x76c   :  { %9068 = vst [vmem:[#allocation13 + $0x2d8] sm:$0xff] %v10785_v42  ;;  %v8971_v59 = vadd.f32 %v10336_v8, %v14734_v53  ;;  %v10787_v13 = vadd.f32 %v8008_v23, %v14743_v35  ;;  %v10339_v39 = vadd.f32 %v10338_v33, %v10337_v30 }
 0x76d   :  { %9070 = vst [vmem:[#allocation13 + $0x2e8] sm:$0xff] %v10786_v50 }
 0x76e   :  { %9069 = vst [vmem:[#allocation13 + $0x2e0] sm:$0xff] %v8971_v59  ;;  %9071 = vst [vmem:[#allocation13 + $0x2f0] sm:$0xff] %v10787_v13  ;;  %v8974_v27 = vadd.f32 %v10339_v39, %v14740_v32 }
 0x770   :  { %9072 = vst [vmem:[#allocation13 + $0x2f8] sm:$0xff] %v8974_v27 }
 0x771   :  { %12444 = shalt.err (!%p12441_p2)
}
 0x772   :  { %s12445_s13 = scalar_lea.hbm %s14862_s6, 12288 }
 0x773   :  { %p12446_p3 = scmp.ne.s32.totalorder %s14862_s6, %s12445_s13  ;;  %p12449_p4 = scmp.lt.u32.totalorder %s12445_s13, %s14862_s6 }
 0x775   :  { %p12451_p5 = pnand %p12449_p4, %p12446_p3 }
 0x777   :  { %12454 = shalt.err (!%p12451_p5)
}
 0x778   :  { %9084 = dma.vmem_to_hbm [thread:$0]  %s9079_s9, 12288, %s14862_s6, [#allocation6], %s12470_s4, %s12470_s4, %s12471_s8  }
 0x779   :  { %12461 = dma.done.wait [#allocation6], 12288  }
 0x77a   :  { %12462 = vsyncadd [#allocation6], 4294955008 }
 0x77b   :  { %9088 = vsyncpa [#allocation5], 1 }
 0x77c   :  { %9089 = vsyncpa [#allocation8], 1 }
 0x77d   :  { %9090 = vsyncpa [#allocation11], 1 }
 0x77e   :  { %9091 = vsyncpa [#allocation6], 1 }

</bundles_post_ra>
